<compile_context>
chip_gen: v7x
topology: tpu7x:2x2x1
jax: 0.10.0
libtpu: 0.0.40
codegen_flags: <defaults>
</compile_context>

<pallas_src>
import functools
import math

import jax
import jax.numpy as jnp
from jax.experimental import pallas as pl
from jax.experimental.pallas import tpu as pltpu


OUT_LANES = 128  # lane-dense packed output width


# ----------------------------------------------------------------------------
# Fused Pallas kernel: head convs + prediction convs + postprocess
# ----------------------------------------------------------------------------
def _yolof_head_kernel(x_ref, wh_ref, bh_ref, wp_ref, bp_ref,
                       anc_ref, awh_ref, cmask_ref, dec_ref,
                       out_ref, pad_scr, col_scr,
                       *, H, W, Ctot, A, C, Nh,
                       ctr_clamp, scale_clamp, exp_clamp):
    """One batch element per grid step.

    x_ref:    (1, H, W, Ctot)      input, channels zero-padded to Ctot, bf16
    wh_ref:   (Nh, 9*Ctot, Ctot)   fused (cls|reg) head-conv weights, bf16
    bh_ref:   (Nh, 1, Ctot)        fused head-conv biases (norm folded), f32
    wp_ref:   (9*Ctot, Np)         fused prediction weights
                                   [cls (A*C) | obj expanded (A*C) | reg (4A)]
    bp_ref:   (1, Np)              fused prediction bias
    anc_ref:  (H*W, 4A)            per-row anchors [x, y, w_a, h_a] * A
    awh_ref:  (1, 4A)              [w_a, h_a, w_a, h_a] * A
    cmask_ref:(1, 4A)              1.0 on center columns, 0.0 on size columns
    dec_ref:  (4A, 4A)             constant box-decode matrix
    out_ref:  (1, H*W, 128)        packed [ncls | reg | box | pad], f32
    pad_scr:  (H+2, W+2, Ctot)     f32 halo scratch
    col_scr:  (H*W, 9*Ctot)        bf16 im2col scratch
    """
    HW = H * W
    AC = A * C

    # Zero once per invocation: the 1-pixel halo border stays zero for all
    # three conv layers (only the interior is overwritten below).
    pad_scr[...] = jnp.zeros_like(pad_scr)

    def conv3x3(act_hwc, w, b, relu):
        """act_hwc: (H, W, Ctot) f32 value -> (H*W, Nout) f32 value."""
        pad_scr[1:H + 1, 1:W + 1, :] = act_hwc
        for dy in range(3):
            for dx in range(3):
                t = dy * 3 + dx
                patch = pad_scr[dy:dy + H, dx:dx + W, :].reshape(HW, Ctot)
                col_scr[:, t * Ctot:(t + 1) * Ctot] = patch.astype(col_scr.dtype)
        out = jnp.dot(col_scr[...], w, preferred_element_type=jnp.float32) + b
        if relu:
            out = jnp.maximum(out, 0.0)
        return out

    # ---- fused (cls | reg) BasicConv stacks ----
    feat = x_ref[0].astype(jnp.float32)                     # (H, W, Ctot)
    for i in range(Nh):
        f = conv3x3(feat, wh_ref[i], bh_ref[i], relu=True)  # (HW, Ctot)
        feat = f.reshape(H, W, Ctot)

    # ---- fused prediction conv: [cls_pred | obj_pred(expanded) | reg_pred] ----
    raw = conv3x3(feat, wp_ref[...], bp_ref[...], relu=False)  # (HW, Np)

    cls_p = raw[:, 0:AC]                  # (HW, A*C), col = a*C + c
    obj_b = raw[:, AC:2 * AC]             # objectness already broadcast to A*C
    reg_p = raw[:, 2 * AC:2 * AC + 4 * A]  # (HW, 4A), col = a*4 + i

    # objectness-normalized class logits (fused epilogue)
    ncls = cls_p + obj_b - jnp.log(
        1.0 + jnp.exp(jnp.minimum(cls_p, exp_clamp))
            + jnp.exp(jnp.minimum(obj_b, exp_clamp)))

    # box decode, kept in the lane-dense (HW, 4A) layout
    anc = anc_ref[...]                    # [x, y, w_a, h_a] per anchor
    awh = awh_ref[...]                    # [w_a, h_a, w_a, h_a] per anchor
    cm = cmask_ref[...]                   # 1 on ctr cols, 0 on size cols
    off = jnp.clip(reg_p * awh, -ctr_clamp, ctr_clamp)
    wh = awh * jnp.exp(jnp.minimum(reg_p, scale_clamp))
    dec_in = cm * (anc + off) + (1.0 - cm) * wh
    box = jnp.dot(dec_in, dec_ref[...], preferred_element_type=jnp.float32)

    # lane-dense packed output: [ncls (AC) | reg (4A) | box (4A) | zero pad]
    out_ref[...] = jnp.zeros_like(out_ref)
    out_ref[0, :, 0:AC] = ncls
    out_ref[0, :, AC:AC + 4 * A] = reg_p
    out_ref[0, :, AC + 4 * A:AC + 8 * A] = box


# ----------------------------------------------------------------------------
# Config / parameter construction (deterministic, synthetic)
# ----------------------------------------------------------------------------
class Cfg:
    center_clamp = 32.0
    out_stride = 16
    num_classes = 8
    num_cls_head = 2
    num_reg_head = 2
    head_act = 'relu'
    head_norm = 'BN'
    anchor_size = [[32.0, 32.0], [64.0, 64.0], [128.0, 128.0]]
    num_anchors = 3


def _conv_params(key, cin, cout, std):
    kw, _ = jax.random.split(key)
    w = jax.random.normal(kw, (9, cin, cout), jnp.float32) * std
    b = jnp.zeros((1, cout), jnp.float32)
    return w, b


def make_params(cfg, in_dim, out_dim, key):
    """Raw per-layer parameters (conv w/b + fused-norm scale/shift)."""
    keys = jax.random.split(key, 16)
    ki = iter(keys)
    params = {'cls_heads': [], 'reg_heads': []}
    for i in range(cfg.num_cls_head):
        cin = in_dim if i == 0 else out_dim
        w, b = _conv_params(next(ki), cin, out_dim, 0.05)
        scale = 1.0 + 0.1 * jax.random.normal(next(ki), (1, out_dim), jnp.float32)
        shift = jnp.zeros((1, out_dim), jnp.float32)
        params['cls_heads'].append(dict(w=w, b=b, scale=scale, shift=shift))
    for i in range(cfg.num_reg_head):
        cin = in_dim if i == 0 else out_dim
        w, b = _conv_params(next(ki), cin, out_dim, 0.05)
        scale = 1.0 + 0.1 * jax.random.normal(next(ki), (1, out_dim), jnp.float32)
        shift = jnp.zeros((1, out_dim), jnp.float32)
        params['reg_heads'].append(dict(w=w, b=b, scale=scale, shift=shift))
    A, C = cfg.num_anchors, cfg.num_classes
    init_prob = 0.01
    cls_bias = -math.log((1.0 - init_prob) / init_prob)
    w, _ = _conv_params(next(ki), out_dim, 1 * A, 0.01)
    params['obj_pred'] = dict(w=w, b=jnp.zeros((1, 1 * A), jnp.float32))
    w, _ = _conv_params(next(ki), out_dim, C * A, 0.01)
    params['cls_pred'] = dict(w=w, b=jnp.full((1, C * A), cls_bias, jnp.float32))
    w, _ = _conv_params(next(ki), out_dim, 4 * A, 0.01)
    params['reg_pred'] = dict(w=w, b=jnp.zeros((1, 4 * A), jnp.float32))
    return params


def pack_params(params, cfg, in_dim, out_dim):
    """Fold norms, fuse cls|reg branches into block-diagonal weights, bf16."""
    A, C = cfg.num_anchors, cfg.num_classes
    D = out_dim
    Ctot = 2 * D
    AC = A * C
    Np = 2 * AC + 4 * A
    Nh = cfg.num_cls_head
    assert cfg.num_reg_head == Nh, "fused kernel assumes equal head depths"
    assert in_dim <= Ctot

    def fold(p):
        w = p['w'] * p['scale'][None, :, :]          # (9, cin, cout)
        b = p['b'] * p['scale'] + p['shift']         # (1, cout)
        return w, b

    w_head, b_head = [], []
    for i in range(Nh):
        wc, bc = fold(params['cls_heads'][i])
        wr, br = fold(params['reg_heads'][i])
        w3 = jnp.zeros((9, Ctot, Ctot), jnp.float32)
        if i == 0:
            w3 = w3.at[:, :in_dim, :D].set(wc)       # reads padded x channels
            w3 = w3.at[:, :in_dim, D:].set(wr)
        else:
            w3 = w3.at[:, :D, :D].set(wc)            # cls -> cls
            w3 = w3.at[:, D:, D:].set(wr)            # reg -> reg
        w_head.append(w3.reshape(9 * Ctot, Ctot))
        b_head.append(jnp.concatenate([bc, br], axis=1))
    w_head = jnp.stack(w_head).astype(jnp.bfloat16)   # (Nh, 9*Ctot, Ctot)
    b_head = jnp.stack(b_head)                        # (Nh, 1, Ctot)

    wcls, bcls = params['cls_pred']['w'], params['cls_pred']['b']
    wobj, bobj = params['obj_pred']['w'], params['obj_pred']['b']
    wreg, breg = params['reg_pred']['w'], params['reg_pred']['b']
    wobj_e = jnp.repeat(wobj, C, axis=2)              # (9, D, A*C), col a*C+c -> a
    bobj_e = jnp.repeat(bobj, C, axis=1)              # (1, A*C)
    wp3 = jnp.zeros((9, Ctot, Np), jnp.float32)
    wp3 = wp3.at[:, :D, :AC].set(wcls)                # cls feats -> cls_pred
    wp3 = wp3.at[:, D:, AC:2 * AC].set(wobj_e)        # reg feats -> obj_pred
    wp3 = wp3.at[:, D:, 2 * AC:].set(wreg)            # reg feats -> reg_pred
    w_pred = wp3.reshape(9 * Ctot, Np).astype(jnp.bfloat16)
    b_pred = jnp.concatenate([bcls, bobj_e, breg], axis=1)

    # box-decode constants (anchor sizes are static config)
    anchor_size = jnp.asarray(cfg.anchor_size, jnp.float32)        # (A, 2)
    awh = jnp.tile(anchor_size, (1, 2)).reshape(1, 4 * A)          # [w,h,w,h]*A
    cmask = jnp.tile(jnp.asarray([1.0, 1.0, 0.0, 0.0], jnp.float32),
                     (A,)).reshape(1, 4 * A)
    blk = jnp.asarray([[1.0, 0.0, 1.0, 0.0],
                       [0.0, 1.0, 0.0, 1.0],
                       [-0.5, 0.0, 0.5, 0.0],
                       [0.0, -0.5, 0.0, 0.5]], jnp.float32)
    dec = jnp.kron(jnp.eye(A, dtype=jnp.float32), blk)             # (4A, 4A)

    return dict(w_head=w_head, b_head=b_head, w_pred=w_pred, b_pred=b_pred,
                awh=awh, cmask=cmask, dec=dec, ctot=Ctot, npred=Np)


def get_anchors(cfg, fmp_h, fmp_w):
    A = cfg.num_anchors
    ys, xs = jnp.meshgrid(jnp.arange(fmp_h), jnp.arange(fmp_w), indexing='ij')
    xy = jnp.stack([xs, ys], axis=-1).reshape(-1, 2).astype(jnp.float32) + 0.5
    xy = jnp.repeat(xy[:, None, :], A, axis=1) * float(cfg.out_stride)
    wh = jnp.broadcast_to(jnp.asarray(cfg.anchor_size, jnp.float32)[None],
                          (fmp_h * fmp_w, A, 2))
    return jnp.concatenate([xy, wh], axis=-1).reshape(-1, 4)  # (H*W*A, 4)


# ----------------------------------------------------------------------------
# YolofHead forward
# ----------------------------------------------------------------------------
def yolof_head_forward(packed, cfg, x_nchw, mask=None):
    B, Cin, H, W = x_nchw.shape
    A, C = cfg.num_anchors, cfg.num_classes
    HW, AC = H * W, cfg.num_anchors * cfg.num_classes
    Ctot, Np = packed['ctot'], packed['npred']
    Nh = packed['w_head'].shape[0]
    assert AC + 8 * A <= OUT_LANES

    # NCHW -> NHWC, pad channels to the fused (cls|reg) width, bf16 for the MXU
    x = jnp.transpose(x_nchw, (0, 2, 3, 1)).astype(jnp.float32)
    x = jnp.pad(x, ((0, 0), (0, 0), (0, 0), (0, Ctot - Cin)))
    x = x.astype(jnp.bfloat16)

    anchors = get_anchors(cfg, H, W)                 # (M, 4)
    anc12 = anchors.reshape(HW, 4 * A)               # [x, y, w_a, h_a] per anchor

    kern = functools.partial(
        _yolof_head_kernel, H=H, W=W, Ctot=Ctot, A=A, C=C, Nh=Nh,
        ctr_clamp=float(cfg.center_clamp),
        scale_clamp=float(math.log(1000.0 / 16)),
        exp_clamp=float(math.log(1e8)))

    packed_out = pl.pallas_call(
        kern,
        out_shape=jax.ShapeDtypeStruct((B, HW, OUT_LANES), jnp.float32),
        grid=(B,),
        in_specs=[
            pl.BlockSpec((1, H, W, Ctot), lambda b: (b, 0, 0, 0)),
            pl.BlockSpec((Nh, 9 * Ctot, Ctot), lambda b: (0, 0, 0)),
            pl.BlockSpec((Nh, 1, Ctot), lambda b: (0, 0, 0)),
            pl.BlockSpec((9 * Ctot, Np), lambda b: (0, 0)),
            pl.BlockSpec((1, Np), lambda b: (0, 0)),
            pl.BlockSpec((HW, 4 * A), lambda b: (0, 0)),
            pl.BlockSpec((1, 4 * A), lambda b: (0, 0)),
            pl.BlockSpec((1, 4 * A), lambda b: (0, 0)),
            pl.BlockSpec((4 * A, 4 * A), lambda b: (0, 0)),
        ],
        out_specs=pl.BlockSpec((1, HW, OUT_LANES), lambda b: (b, 0, 0)),
        scratch_shapes=[
            pltpu.VMEM((H + 2, W + 2, Ctot), jnp.float32),   # halo scratch
            pltpu.VMEM((HW, 9 * Ctot), jnp.bfloat16),        # im2col scratch
        ],
        compiler_params=pltpu.CompilerParams(
            dimension_semantics=("parallel",)),
    )(x, packed['w_head'], packed['b_head'], packed['w_pred'],
      packed['b_pred'], anc12, packed['awh'], packed['cmask'], packed['dec'])

    # cheap XLA-side unpack to the reference layouts (m = (h*W + w)*A + a)
    M = HW * A
    ncls = packed_out[:, :, 0:AC].reshape(B, HW, A, C).reshape(B, M, C)
    reg = packed_out[:, :, AC:AC + 4 * A].reshape(B, HW, A, 4).reshape(B, M, 4)
    box = packed_out[:, :, AC + 4 * A:AC + 8 * A].reshape(B, HW, A, 4).reshape(B, M, 4)

    # TODO(synk): mask path (F.interpolate + bool flatten) not implemented; the
    # reference only uses it when a mask is provided, and we pass mask=None.
    return {'pred_cls': ncls,
            'pred_reg': reg,
            'pred_box': box,
            'anchors': anchors,
            'mask': mask}


# ----------------------------------------------------------------------------
if __name__ == "__main__":
    cfg = Cfg()
    in_dim, out_dim = 4, 32
    B, H, W = 2, 16, 16

    key = jax.random.PRNGKey(0)
    kx, kp = jax.random.split(key)
    x = jax.random.normal(kx, (B, in_dim, H, W), jnp.float32)  # NCHW input
    params = make_params(cfg, in_dim, out_dim, kp)
    packed = pack_params(params, cfg, in_dim, out_dim)

    outputs = yolof_head_forward(packed, cfg, x)
    jax.block_until_ready(outputs['pred_cls'])
    jax.block_until_ready(outputs['pred_box'])
    jax.block_until_ready(outputs['pred_reg'])

    M = H * W * cfg.num_anchors
    assert outputs['pred_cls'].shape == (B, M, cfg.num_classes)
    assert outputs['pred_reg'].shape == (B, M, 4)
    assert outputs['pred_box'].shape == (B, M, 4)
    assert outputs['anchors'].shape == (M, 4)
    print("KERNEL_OK")
</pallas_src>

<mosaic_0001>
module attributes {stable_mosaic.version = 11 : i64} {
  func.func @_yolof_head_kernel(%arg0: i32, %arg1: memref<1x16x16x64xbf16, #tpu.memory_space<vmem>>, %arg2: memref<2x576x64xbf16, #tpu.memory_space<vmem>>, %arg3: memref<2x1x64xf32, #tpu.memory_space<vmem>>, %arg4: memref<576x60xbf16, #tpu.memory_space<vmem>>, %arg5: memref<1x60xf32, #tpu.memory_space<vmem>>, %arg6: memref<256x12xf32, #tpu.memory_space<vmem>>, %arg7: memref<1x12xf32, #tpu.memory_space<vmem>>, %arg8: memref<1x12xf32, #tpu.memory_space<vmem>>, %arg9: memref<12x12xf32, #tpu.memory_space<vmem>>, %arg10: memref<1x256x128xf32, #tpu.memory_space<vmem>>, %arg11: memref<18x18x64xf32, #tpu.memory_space<vmem>>, %arg12: memref<256x576xbf16, #tpu.memory_space<vmem>>) attributes {dimension_semantics = [#tpu.dimension_semantics<parallel>], iteration_bounds = array<i64: 2>, scalar_prefetch = 0 : i64, scratch_operands = 2 : i64, tpu.core_type = #tpu.core_type<tc>, window_params = [{transform_indices = @transform_0, window_bounds = array<i64: 1, 16, 16, 64>}, {pipeline_mode = #tpu.pipeline_mode<synchronous>, transform_indices = @transform_1, window_bounds = array<i64: 2, 576, 64>}, {pipeline_mode = #tpu.pipeline_mode<synchronous>, transform_indices = @transform_2, window_bounds = array<i64: 2, 1, 64>}, {pipeline_mode = #tpu.pipeline_mode<synchronous>, transform_indices = @transform_3, window_bounds = array<i64: 576, 60>}, {pipeline_mode = #tpu.pipeline_mode<synchronous>, transform_indices = @transform_4, window_bounds = array<i64: 1, 60>}, {pipeline_mode = #tpu.pipeline_mode<synchronous>, transform_indices = @transform_5, window_bounds = array<i64: 256, 12>}, {pipeline_mode = #tpu.pipeline_mode<synchronous>, transform_indices = @transform_6, window_bounds = array<i64: 1, 12>}, {pipeline_mode = #tpu.pipeline_mode<synchronous>, transform_indices = @transform_7, window_bounds = array<i64: 1, 12>}, {pipeline_mode = #tpu.pipeline_mode<synchronous>, transform_indices = @transform_8, window_bounds = array<i64: 12, 12>}, {transform_indices = @transform_9, window_bounds = array<i64: 1, 256, 128>}]} {
    %cst = arith.constant 0.000000e+00 : f32
    %0 = vector.broadcast %cst : f32 to vector<18x18x64xf32>
    %c0 = arith.constant 0 : index
    %c0_0 = arith.constant 0 : index
    %c0_1 = arith.constant 0 : index
    %1 = vector.load %arg11[%c0, %c0_0, %c0_1] : memref<18x18x64xf32, #tpu.memory_space<vmem>>, vector<18x18x64xf32>
    tpu.vector_store %arg11[%c0, %c0_0, %c0_1], %0 {strides = array<i32>} : memref<18x18x64xf32, #tpu.memory_space<vmem>>, vector<18x18x64xf32>,
    %c0_2 = arith.constant 0 : index
    %c0_3 = arith.constant 0 : index
    %c0_4 = arith.constant 0 : index
    %c0_5 = arith.constant 0 : index
    %2 = vector.load %arg1[%c0_2, %c0_3, %c0_4, %c0_5] : memref<1x16x16x64xbf16, #tpu.memory_space<vmem>>, vector<1x16x16x64xbf16>
    %3 = vector.shape_cast %2 : vector<1x16x16x64xbf16> to vector<16x16x64xbf16>
    %4 = arith.extf %3 : vector<16x16x64xbf16> to vector<16x16x64xf32>
    %c0_6 = arith.constant 0 : index
    %c0_7 = arith.constant 0 : index
    %c0_8 = arith.constant 0 : index
    %5 = vector.load %arg2[%c0_6, %c0_7, %c0_8] : memref<2x576x64xbf16, #tpu.memory_space<vmem>>, vector<1x576x64xbf16>
    %6 = vector.shape_cast %5 : vector<1x576x64xbf16> to vector<576x64xbf16>
    %c0_9 = arith.constant 0 : index
    %c0_10 = arith.constant 0 : index
    %c0_11 = arith.constant 0 : index
    %7 = vector.load %arg3[%c0_9, %c0_10, %c0_11] : memref<2x1x64xf32, #tpu.memory_space<vmem>>, vector<1x1x64xf32>
    %8 = vector.shape_cast %7 : vector<1x1x64xf32> to vector<1x64xf32>
    %c1 = arith.constant 1 : index
    %c1_12 = arith.constant 1 : index
    %c0_13 = arith.constant 0 : index
    %9 = vector.load %arg11[%c1, %c1_12, %c0_13] : memref<18x18x64xf32, #tpu.memory_space<vmem>>, vector<16x16x64xf32>
    tpu.vector_store %arg11[%c1, %c1_12, %c0_13], %4 {strides = array<i32>} : memref<18x18x64xf32, #tpu.memory_space<vmem>>, vector<16x16x64xf32>,
    %c0_14 = arith.constant 0 : index
    %c0_15 = arith.constant 0 : index
    %c0_16 = arith.constant 0 : index
    %10 = vector.load %arg11[%c0_14, %c0_15, %c0_16] : memref<18x18x64xf32, #tpu.memory_space<vmem>>, vector<16x16x64xf32>
    %11 = vector.shape_cast %10 : vector<16x16x64xf32> to vector<256x64xf32>
    %12 = arith.truncf %11 : vector<256x64xf32> to vector<256x64xbf16>
    %c0_17 = arith.constant 0 : index
    %c0_18 = arith.constant 0 : index
    %13 = vector.load %arg12[%c0_17, %c0_18] : memref<256x576xbf16, #tpu.memory_space<vmem>>, vector<256x64xbf16>
    tpu.vector_store %arg12[%c0_17, %c0_18], %12 {strides = array<i32>} : memref<256x576xbf16, #tpu.memory_space<vmem>>, vector<256x64xbf16>,
    %c0_19 = arith.constant 0 : index
    %c1_20 = arith.constant 1 : index
    %c0_21 = arith.constant 0 : index
    %14 = vector.load %arg11[%c0_19, %c1_20, %c0_21] : memref<18x18x64xf32, #tpu.memory_space<vmem>>, vector<16x16x64xf32>
    %15 = vector.shape_cast %14 : vector<16x16x64xf32> to vector<256x64xf32>
    %16 = arith.truncf %15 : vector<256x64xf32> to vector<256x64xbf16>
    %c0_22 = arith.constant 0 : index
    %c64 = arith.constant 64 : index
    %17 = vector.load %arg12[%c0_22, %c64] : memref<256x576xbf16, #tpu.memory_space<vmem>>, vector<256x64xbf16>
    tpu.vector_store %arg12[%c0_22, %c64], %16 {strides = array<i32>} : memref<256x576xbf16, #tpu.memory_space<vmem>>, vector<256x64xbf16>,
    %c0_23 = arith.constant 0 : index
    %c2 = arith.constant 2 : index
    %c0_24 = arith.constant 0 : index
    %18 = vector.load %arg11[%c0_23, %c2, %c0_24] : memref<18x18x64xf32, #tpu.memory_space<vmem>>, vector<16x16x64xf32>
    %19 = vector.shape_cast %18 : vector<16x16x64xf32> to vector<256x64xf32>
    %20 = arith.truncf %19 : vector<256x64xf32> to vector<256x64xbf16>
    %c0_25 = arith.constant 0 : index
    %c128 = arith.constant 128 : index
    %21 = vector.load %arg12[%c0_25, %c128] : memref<256x576xbf16, #tpu.memory_space<vmem>>, vector<256x64xbf16>
    tpu.vector_store %arg12[%c0_25, %c128], %20 {strides = array<i32>} : memref<256x576xbf16, #tpu.memory_space<vmem>>, vector<256x64xbf16>,
    %c1_26 = arith.constant 1 : index
    %c0_27 = arith.constant 0 : index
    %c0_28 = arith.constant 0 : index
    %22 = vector.load %arg11[%c1_26, %c0_27, %c0_28] : memref<18x18x64xf32, #tpu.memory_space<vmem>>, vector<16x16x64xf32>
    %23 = vector.shape_cast %22 : vector<16x16x64xf32> to vector<256x64xf32>
    %24 = arith.truncf %23 : vector<256x64xf32> to vector<256x64xbf16>
    %c0_29 = arith.constant 0 : index
    %c192 = arith.constant 192 : index
    %25 = vector.load %arg12[%c0_29, %c192] : memref<256x576xbf16, #tpu.memory_space<vmem>>, vector<256x64xbf16>
    tpu.vector_store %arg12[%c0_29, %c192], %24 {strides = array<i32>} : memref<256x576xbf16, #tpu.memory_space<vmem>>, vector<256x64xbf16>,
    %c1_30 = arith.constant 1 : index
    %c1_31 = arith.constant 1 : index
    %c0_32 = arith.constant 0 : index
    %26 = vector.load %arg11[%c1_30, %c1_31, %c0_32] : memref<18x18x64xf32, #tpu.memory_space<vmem>>, vector<16x16x64xf32>
    %27 = vector.shape_cast %26 : vector<16x16x64xf32> to vector<256x64xf32>
    %28 = arith.truncf %27 : vector<256x64xf32> to vector<256x64xbf16>
    %c0_33 = arith.constant 0 : index
    %c256 = arith.constant 256 : index
    %29 = vector.load %arg12[%c0_33, %c256] : memref<256x576xbf16, #tpu.memory_space<vmem>>, vector<256x64xbf16>
    tpu.vector_store %arg12[%c0_33, %c256], %28 {strides = array<i32>} : memref<256x576xbf16, #tpu.memory_space<vmem>>, vector<256x64xbf16>,
    %c1_34 = arith.constant 1 : index
    %c2_35 = arith.constant 2 : index
    %c0_36 = arith.constant 0 : index
    %30 = vector.load %arg11[%c1_34, %c2_35, %c0_36] : memref<18x18x64xf32, #tpu.memory_space<vmem>>, vector<16x16x64xf32>
    %31 = vector.shape_cast %30 : vector<16x16x64xf32> to vector<256x64xf32>
    %32 = arith.truncf %31 : vector<256x64xf32> to vector<256x64xbf16>
    %c0_37 = arith.constant 0 : index
    %c320 = arith.constant 320 : index
    %33 = vector.load %arg12[%c0_37, %c320] : memref<256x576xbf16, #tpu.memory_space<vmem>>, vector<256x64xbf16>
    tpu.vector_store %arg12[%c0_37, %c320], %32 {strides = array<i32>} : memref<256x576xbf16, #tpu.memory_space<vmem>>, vector<256x64xbf16>,
    %c2_38 = arith.constant 2 : index
    %c0_39 = arith.constant 0 : index
    %c0_40 = arith.constant 0 : index
    %34 = vector.load %arg11[%c2_38, %c0_39, %c0_40] : memref<18x18x64xf32, #tpu.memory_space<vmem>>, vector<16x16x64xf32>
    %35 = vector.shape_cast %34 : vector<16x16x64xf32> to vector<256x64xf32>
    %36 = arith.truncf %35 : vector<256x64xf32> to vector<256x64xbf16>
    %c0_41 = arith.constant 0 : index
    %c384 = arith.constant 384 : index
    %37 = vector.load %arg12[%c0_41, %c384] : memref<256x576xbf16, #tpu.memory_space<vmem>>, vector<256x64xbf16>
    tpu.vector_store %arg12[%c0_41, %c384], %36 {strides = array<i32>} : memref<256x576xbf16, #tpu.memory_space<vmem>>, vector<256x64xbf16>,
    %c2_42 = arith.constant 2 : index
    %c1_43 = arith.constant 1 : index
    %c0_44 = arith.constant 0 : index
    %38 = vector.load %arg11[%c2_42, %c1_43, %c0_44] : memref<18x18x64xf32, #tpu.memory_space<vmem>>, vector<16x16x64xf32>
    %39 = vector.shape_cast %38 : vector<16x16x64xf32> to vector<256x64xf32>
    %40 = arith.truncf %39 : vector<256x64xf32> to vector<256x64xbf16>
    %c0_45 = arith.constant 0 : index
    %c448 = arith.constant 448 : index
    %41 = vector.load %arg12[%c0_45, %c448] : memref<256x576xbf16, #tpu.memory_space<vmem>>, vector<256x64xbf16>
    tpu.vector_store %arg12[%c0_45, %c448], %40 {strides = array<i32>} : memref<256x576xbf16, #tpu.memory_space<vmem>>, vector<256x64xbf16>,
    %c2_46 = arith.constant 2 : index
    %c2_47 = arith.constant 2 : index
    %c0_48 = arith.constant 0 : index
    %42 = vector.load %arg11[%c2_46, %c2_47, %c0_48] : memref<18x18x64xf32, #tpu.memory_space<vmem>>, vector<16x16x64xf32>
    %43 = vector.shape_cast %42 : vector<16x16x64xf32> to vector<256x64xf32>
    %44 = arith.truncf %43 : vector<256x64xf32> to vector<256x64xbf16>
    %c0_49 = arith.constant 0 : index
    %c512 = arith.constant 512 : index
    %45 = vector.load %arg12[%c0_49, %c512] : memref<256x576xbf16, #tpu.memory_space<vmem>>, vector<256x64xbf16>
    tpu.vector_store %arg12[%c0_49, %c512], %44 {strides = array<i32>} : memref<256x576xbf16, #tpu.memory_space<vmem>>, vector<256x64xbf16>,
    %c0_50 = arith.constant 0 : index
    %c0_51 = arith.constant 0 : index
    %46 = vector.load %arg12[%c0_50, %c0_51] : memref<256x576xbf16, #tpu.memory_space<vmem>>, vector<256x576xbf16>
    %cst_52 = arith.constant dense<0.000000e+00> : vector<256x64xf32>
    %47 = tpu.matmul %46, %6, %cst_52 {dimension_numbers = #tpu.dot_dimension_numbers<[1], [0], [0], [1], [0, 0, 1, 1], [], []>} : vector<256x576xbf16>, vector<576x64xbf16>, vector<256x64xf32> -> vector<256x64xf32>
    %48 = vector.broadcast %8 : vector<1x64xf32> to vector<256x64xf32>
    %49 = arith.addf %47, %48 : vector<256x64xf32>
    %cst_53 = arith.constant 0.000000e+00 : f32
    %50 = vector.broadcast %cst_53 : f32 to vector<256x64xf32>
    %51 = arith.maximumf %49, %50 : vector<256x64xf32>
    %52 = vector.shape_cast %51 : vector<256x64xf32> to vector<16x16x64xf32>
    %c1_54 = arith.constant 1 : index
    %c0_55 = arith.constant 0 : index
    %c0_56 = arith.constant 0 : index
    %53 = vector.load %arg2[%c1_54, %c0_55, %c0_56] : memref<2x576x64xbf16, #tpu.memory_space<vmem>>, vector<1x576x64xbf16>
    %54 = vector.shape_cast %53 : vector<1x576x64xbf16> to vector<576x64xbf16>
    %c1_57 = arith.constant 1 : index
    %c0_58 = arith.constant 0 : index
    %c0_59 = arith.constant 0 : index
    %55 = vector.load %arg3[%c1_57, %c0_58, %c0_59] : memref<2x1x64xf32, #tpu.memory_space<vmem>>, vector<1x1x64xf32>
    %56 = vector.shape_cast %55 : vector<1x1x64xf32> to vector<1x64xf32>
    %c1_60 = arith.constant 1 : index
    %c1_61 = arith.constant 1 : index
    %c0_62 = arith.constant 0 : index
    %57 = vector.load %arg11[%c1_60, %c1_61, %c0_62] : memref<18x18x64xf32, #tpu.memory_space<vmem>>, vector<16x16x64xf32>
    tpu.vector_store %arg11[%c1_60, %c1_61, %c0_62], %52 {strides = array<i32>} : memref<18x18x64xf32, #tpu.memory_space<vmem>>, vector<16x16x64xf32>,
    %c0_63 = arith.constant 0 : index
    %c0_64 = arith.constant 0 : index
    %c0_65 = arith.constant 0 : index
    %58 = vector.load %arg11[%c0_63, %c0_64, %c0_65] : memref<18x18x64xf32, #tpu.memory_space<vmem>>, vector<16x16x64xf32>
    %59 = vector.shape_cast %58 : vector<16x16x64xf32> to vector<256x64xf32>
    %60 = arith.truncf %59 : vector<256x64xf32> to vector<256x64xbf16>
    %c0_66 = arith.constant 0 : index
    %c0_67 = arith.constant 0 : index
    %61 = vector.load %arg12[%c0_66, %c0_67] : memref<256x576xbf16, #tpu.memory_space<vmem>>, vector<256x64xbf16>
    tpu.vector_store %arg12[%c0_66, %c0_67], %60 {strides = array<i32>} : memref<256x576xbf16, #tpu.memory_space<vmem>>, vector<256x64xbf16>,
    %c0_68 = arith.constant 0 : index
    %c1_69 = arith.constant 1 : index
    %c0_70 = arith.constant 0 : index
    %62 = vector.load %arg11[%c0_68, %c1_69, %c0_70] : memref<18x18x64xf32, #tpu.memory_space<vmem>>, vector<16x16x64xf32>
    %63 = vector.shape_cast %62 : vector<16x16x64xf32> to vector<256x64xf32>
    %64 = arith.truncf %63 : vector<256x64xf32> to vector<256x64xbf16>
    %c0_71 = arith.constant 0 : index
    %c64_72 = arith.constant 64 : index
    %65 = vector.load %arg12[%c0_71, %c64_72] : memref<256x576xbf16, #tpu.memory_space<vmem>>, vector<256x64xbf16>
    tpu.vector_store %arg12[%c0_71, %c64_72], %64 {strides = array<i32>} : memref<256x576xbf16, #tpu.memory_space<vmem>>, vector<256x64xbf16>,
    %c0_73 = arith.constant 0 : index
    %c2_74 = arith.constant 2 : index
    %c0_75 = arith.constant 0 : index
    %66 = vector.load %arg11[%c0_73, %c2_74, %c0_75] : memref<18x18x64xf32, #tpu.memory_space<vmem>>, vector<16x16x64xf32>
    %67 = vector.shape_cast %66 : vector<16x16x64xf32> to vector<256x64xf32>
    %68 = arith.truncf %67 : vector<256x64xf32> to vector<256x64xbf16>
    %c0_76 = arith.constant 0 : index
    %c128_77 = arith.constant 128 : index
    %69 = vector.load %arg12[%c0_76, %c128_77] : memref<256x576xbf16, #tpu.memory_space<vmem>>, vector<256x64xbf16>
    tpu.vector_store %arg12[%c0_76, %c128_77], %68 {strides = array<i32>} : memref<256x576xbf16, #tpu.memory_space<vmem>>, vector<256x64xbf16>,
    %c1_78 = arith.constant 1 : index
    %c0_79 = arith.constant 0 : index
    %c0_80 = arith.constant 0 : index
    %70 = vector.load %arg11[%c1_78, %c0_79, %c0_80] : memref<18x18x64xf32, #tpu.memory_space<vmem>>, vector<16x16x64xf32>
    %71 = vector.shape_cast %70 : vector<16x16x64xf32> to vector<256x64xf32>
    %72 = arith.truncf %71 : vector<256x64xf32> to vector<256x64xbf16>
    %c0_81 = arith.constant 0 : index
    %c192_82 = arith.constant 192 : index
    %73 = vector.load %arg12[%c0_81, %c192_82] : memref<256x576xbf16, #tpu.memory_space<vmem>>, vector<256x64xbf16>
    tpu.vector_store %arg12[%c0_81, %c192_82], %72 {strides = array<i32>} : memref<256x576xbf16, #tpu.memory_space<vmem>>, vector<256x64xbf16>,
    %c1_83 = arith.constant 1 : index
    %c1_84 = arith.constant 1 : index
    %c0_85 = arith.constant 0 : index
    %74 = vector.load %arg11[%c1_83, %c1_84, %c0_85] : memref<18x18x64xf32, #tpu.memory_space<vmem>>, vector<16x16x64xf32>
    %75 = vector.shape_cast %74 : vector<16x16x64xf32> to vector<256x64xf32>
    %76 = arith.truncf %75 : vector<256x64xf32> to vector<256x64xbf16>
    %c0_86 = arith.constant 0 : index
    %c256_87 = arith.constant 256 : index
    %77 = vector.load %arg12[%c0_86, %c256_87] : memref<256x576xbf16, #tpu.memory_space<vmem>>, vector<256x64xbf16>
    tpu.vector_store %arg12[%c0_86, %c256_87], %76 {strides = array<i32>} : memref<256x576xbf16, #tpu.memory_space<vmem>>, vector<256x64xbf16>,
    %c1_88 = arith.constant 1 : index
    %c2_89 = arith.constant 2 : index
    %c0_90 = arith.constant 0 : index
    %78 = vector.load %arg11[%c1_88, %c2_89, %c0_90] : memref<18x18x64xf32, #tpu.memory_space<vmem>>, vector<16x16x64xf32>
    %79 = vector.shape_cast %78 : vector<16x16x64xf32> to vector<256x64xf32>
    %80 = arith.truncf %79 : vector<256x64xf32> to vector<256x64xbf16>
    %c0_91 = arith.constant 0 : index
    %c320_92 = arith.constant 320 : index
    %81 = vector.load %arg12[%c0_91, %c320_92] : memref<256x576xbf16, #tpu.memory_space<vmem>>, vector<256x64xbf16>
    tpu.vector_store %arg12[%c0_91, %c320_92], %80 {strides = array<i32>} : memref<256x576xbf16, #tpu.memory_space<vmem>>, vector<256x64xbf16>,
    %c2_93 = arith.constant 2 : index
    %c0_94 = arith.constant 0 : index
    %c0_95 = arith.constant 0 : index
    %82 = vector.load %arg11[%c2_93, %c0_94, %c0_95] : memref<18x18x64xf32, #tpu.memory_space<vmem>>, vector<16x16x64xf32>
    %83 = vector.shape_cast %82 : vector<16x16x64xf32> to vector<256x64xf32>
    %84 = arith.truncf %83 : vector<256x64xf32> to vector<256x64xbf16>
    %c0_96 = arith.constant 0 : index
    %c384_97 = arith.constant 384 : index
    %85 = vector.load %arg12[%c0_96, %c384_97] : memref<256x576xbf16, #tpu.memory_space<vmem>>, vector<256x64xbf16>
    tpu.vector_store %arg12[%c0_96, %c384_97], %84 {strides = array<i32>} : memref<256x576xbf16, #tpu.memory_space<vmem>>, vector<256x64xbf16>,
    %c2_98 = arith.constant 2 : index
    %c1_99 = arith.constant 1 : index
    %c0_100 = arith.constant 0 : index
    %86 = vector.load %arg11[%c2_98, %c1_99, %c0_100] : memref<18x18x64xf32, #tpu.memory_space<vmem>>, vector<16x16x64xf32>
    %87 = vector.shape_cast %86 : vector<16x16x64xf32> to vector<256x64xf32>
    %88 = arith.truncf %87 : vector<256x64xf32> to vector<256x64xbf16>
    %c0_101 = arith.constant 0 : index
    %c448_102 = arith.constant 448 : index
    %89 = vector.load %arg12[%c0_101, %c448_102] : memref<256x576xbf16, #tpu.memory_space<vmem>>, vector<256x64xbf16>
    tpu.vector_store %arg12[%c0_101, %c448_102], %88 {strides = array<i32>} : memref<256x576xbf16, #tpu.memory_space<vmem>>, vector<256x64xbf16>,
    %c2_103 = arith.constant 2 : index
    %c2_104 = arith.constant 2 : index
    %c0_105 = arith.constant 0 : index
    %90 = vector.load %arg11[%c2_103, %c2_104, %c0_105] : memref<18x18x64xf32, #tpu.memory_space<vmem>>, vector<16x16x64xf32>
    %91 = vector.shape_cast %90 : vector<16x16x64xf32> to vector<256x64xf32>
    %92 = arith.truncf %91 : vector<256x64xf32> to vector<256x64xbf16>
    %c0_106 = arith.constant 0 : index
    %c512_107 = arith.constant 512 : index
    %93 = vector.load %arg12[%c0_106, %c512_107] : memref<256x576xbf16, #tpu.memory_space<vmem>>, vector<256x64xbf16>
    tpu.vector_store %arg12[%c0_106, %c512_107], %92 {strides = array<i32>} : memref<256x576xbf16, #tpu.memory_space<vmem>>, vector<256x64xbf16>,
    %c0_108 = arith.constant 0 : index
    %c0_109 = arith.constant 0 : index
    %94 = vector.load %arg12[%c0_108, %c0_109] : memref<256x576xbf16, #tpu.memory_space<vmem>>, vector<256x576xbf16>
    %cst_110 = arith.constant dense<0.000000e+00> : vector<256x64xf32>
    %95 = tpu.matmul %94, %54, %cst_110 {dimension_numbers = #tpu.dot_dimension_numbers<[1], [0], [0], [1], [0, 0, 1, 1], [], []>} : vector<256x576xbf16>, vector<576x64xbf16>, vector<256x64xf32> -> vector<256x64xf32>
    %96 = vector.broadcast %56 : vector<1x64xf32> to vector<256x64xf32>
    %97 = arith.addf %95, %96 : vector<256x64xf32>
    %cst_111 = arith.constant 0.000000e+00 : f32
    %98 = vector.broadcast %cst_111 : f32 to vector<256x64xf32>
    %99 = arith.maximumf %97, %98 : vector<256x64xf32>
    %100 = vector.shape_cast %99 : vector<256x64xf32> to vector<16x16x64xf32>
    %c0_112 = arith.constant 0 : index
    %c0_113 = arith.constant 0 : index
    %101 = vector.load %arg4[%c0_112, %c0_113] : memref<576x60xbf16, #tpu.memory_space<vmem>>, vector<576x60xbf16>
    %c0_114 = arith.constant 0 : index
    %c0_115 = arith.constant 0 : index
    %102 = vector.load %arg5[%c0_114, %c0_115] : memref<1x60xf32, #tpu.memory_space<vmem>>, vector<1x60xf32>
    %c1_116 = arith.constant 1 : index
    %c1_117 = arith.constant 1 : index
    %c0_118 = arith.constant 0 : index
    %103 = vector.load %arg11[%c1_116, %c1_117, %c0_118] : memref<18x18x64xf32, #tpu.memory_space<vmem>>, vector<16x16x64xf32>
    tpu.vector_store %arg11[%c1_116, %c1_117, %c0_118], %100 {strides = array<i32>} : memref<18x18x64xf32, #tpu.memory_space<vmem>>, vector<16x16x64xf32>,
    %c0_119 = arith.constant 0 : index
    %c0_120 = arith.constant 0 : index
    %c0_121 = arith.constant 0 : index
    %104 = vector.load %arg11[%c0_119, %c0_120, %c0_121] : memref<18x18x64xf32, #tpu.memory_space<vmem>>, vector<16x16x64xf32>
    %105 = vector.shape_cast %104 : vector<16x16x64xf32> to vector<256x64xf32>
    %106 = arith.truncf %105 : vector<256x64xf32> to vector<256x64xbf16>
    %c0_122 = arith.constant 0 : index
    %c0_123 = arith.constant 0 : index
    %107 = vector.load %arg12[%c0_122, %c0_123] : memref<256x576xbf16, #tpu.memory_space<vmem>>, vector<256x64xbf16>
    tpu.vector_store %arg12[%c0_122, %c0_123], %106 {strides = array<i32>} : memref<256x576xbf16, #tpu.memory_space<vmem>>, vector<256x64xbf16>,
    %c0_124 = arith.constant 0 : index
    %c1_125 = arith.constant 1 : index
    %c0_126 = arith.constant 0 : index
    %108 = vector.load %arg11[%c0_124, %c1_125, %c0_126] : memref<18x18x64xf32, #tpu.memory_space<vmem>>, vector<16x16x64xf32>
    %109 = vector.shape_cast %108 : vector<16x16x64xf32> to vector<256x64xf32>
    %110 = arith.truncf %109 : vector<256x64xf32> to vector<256x64xbf16>
    %c0_127 = arith.constant 0 : index
    %c64_128 = arith.constant 64 : index
    %111 = vector.load %arg12[%c0_127, %c64_128] : memref<256x576xbf16, #tpu.memory_space<vmem>>, vector<256x64xbf16>
    tpu.vector_store %arg12[%c0_127, %c64_128], %110 {strides = array<i32>} : memref<256x576xbf16, #tpu.memory_space<vmem>>, vector<256x64xbf16>,
    %c0_129 = arith.constant 0 : index
    %c2_130 = arith.constant 2 : index
    %c0_131 = arith.constant 0 : index
    %112 = vector.load %arg11[%c0_129, %c2_130, %c0_131] : memref<18x18x64xf32, #tpu.memory_space<vmem>>, vector<16x16x64xf32>
    %113 = vector.shape_cast %112 : vector<16x16x64xf32> to vector<256x64xf32>
    %114 = arith.truncf %113 : vector<256x64xf32> to vector<256x64xbf16>
    %c0_132 = arith.constant 0 : index
    %c128_133 = arith.constant 128 : index
    %115 = vector.load %arg12[%c0_132, %c128_133] : memref<256x576xbf16, #tpu.memory_space<vmem>>, vector<256x64xbf16>
    tpu.vector_store %arg12[%c0_132, %c128_133], %114 {strides = array<i32>} : memref<256x576xbf16, #tpu.memory_space<vmem>>, vector<256x64xbf16>,
    %c1_134 = arith.constant 1 : index
    %c0_135 = arith.constant 0 : index
    %c0_136 = arith.constant 0 : index
    %116 = vector.load %arg11[%c1_134, %c0_135, %c0_136] : memref<18x18x64xf32, #tpu.memory_space<vmem>>, vector<16x16x64xf32>
    %117 = vector.shape_cast %116 : vector<16x16x64xf32> to vector<256x64xf32>
    %118 = arith.truncf %117 : vector<256x64xf32> to vector<256x64xbf16>
    %c0_137 = arith.constant 0 : index
    %c192_138 = arith.constant 192 : index
    %119 = vector.load %arg12[%c0_137, %c192_138] : memref<256x576xbf16, #tpu.memory_space<vmem>>, vector<256x64xbf16>
    tpu.vector_store %arg12[%c0_137, %c192_138], %118 {strides = array<i32>} : memref<256x576xbf16, #tpu.memory_space<vmem>>, vector<256x64xbf16>,
    %c1_139 = arith.constant 1 : index
    %c1_140 = arith.constant 1 : index
    %c0_141 = arith.constant 0 : index
    %120 = vector.load %arg11[%c1_139, %c1_140, %c0_141] : memref<18x18x64xf32, #tpu.memory_space<vmem>>, vector<16x16x64xf32>
    %121 = vector.shape_cast %120 : vector<16x16x64xf32> to vector<256x64xf32>
    %122 = arith.truncf %121 : vector<256x64xf32> to vector<256x64xbf16>
    %c0_142 = arith.constant 0 : index
    %c256_143 = arith.constant 256 : index
    %123 = vector.load %arg12[%c0_142, %c256_143] : memref<256x576xbf16, #tpu.memory_space<vmem>>, vector<256x64xbf16>
    tpu.vector_store %arg12[%c0_142, %c256_143], %122 {strides = array<i32>} : memref<256x576xbf16, #tpu.memory_space<vmem>>, vector<256x64xbf16>,
    %c1_144 = arith.constant 1 : index
    %c2_145 = arith.constant 2 : index
    %c0_146 = arith.constant 0 : index
    %124 = vector.load %arg11[%c1_144, %c2_145, %c0_146] : memref<18x18x64xf32, #tpu.memory_space<vmem>>, vector<16x16x64xf32>
    %125 = vector.shape_cast %124 : vector<16x16x64xf32> to vector<256x64xf32>
    %126 = arith.truncf %125 : vector<256x64xf32> to vector<256x64xbf16>
    %c0_147 = arith.constant 0 : index
    %c320_148 = arith.constant 320 : index
    %127 = vector.load %arg12[%c0_147, %c320_148] : memref<256x576xbf16, #tpu.memory_space<vmem>>, vector<256x64xbf16>
    tpu.vector_store %arg12[%c0_147, %c320_148], %126 {strides = array<i32>} : memref<256x576xbf16, #tpu.memory_space<vmem>>, vector<256x64xbf16>,
    %c2_149 = arith.constant 2 : index
    %c0_150 = arith.constant 0 : index
    %c0_151 = arith.constant 0 : index
    %128 = vector.load %arg11[%c2_149, %c0_150, %c0_151] : memref<18x18x64xf32, #tpu.memory_space<vmem>>, vector<16x16x64xf32>
    %129 = vector.shape_cast %128 : vector<16x16x64xf32> to vector<256x64xf32>
    %130 = arith.truncf %129 : vector<256x64xf32> to vector<256x64xbf16>
    %c0_152 = arith.constant 0 : index
    %c384_153 = arith.constant 384 : index
    %131 = vector.load %arg12[%c0_152, %c384_153] : memref<256x576xbf16, #tpu.memory_space<vmem>>, vector<256x64xbf16>
    tpu.vector_store %arg12[%c0_152, %c384_153], %130 {strides = array<i32>} : memref<256x576xbf16, #tpu.memory_space<vmem>>, vector<256x64xbf16>,
    %c2_154 = arith.constant 2 : index
    %c1_155 = arith.constant 1 : index
    %c0_156 = arith.constant 0 : index
    %132 = vector.load %arg11[%c2_154, %c1_155, %c0_156] : memref<18x18x64xf32, #tpu.memory_space<vmem>>, vector<16x16x64xf32>
    %133 = vector.shape_cast %132 : vector<16x16x64xf32> to vector<256x64xf32>
    %134 = arith.truncf %133 : vector<256x64xf32> to vector<256x64xbf16>
    %c0_157 = arith.constant 0 : index
    %c448_158 = arith.constant 448 : index
    %135 = vector.load %arg12[%c0_157, %c448_158] : memref<256x576xbf16, #tpu.memory_space<vmem>>, vector<256x64xbf16>
    tpu.vector_store %arg12[%c0_157, %c448_158], %134 {strides = array<i32>} : memref<256x576xbf16, #tpu.memory_space<vmem>>, vector<256x64xbf16>,
    %c2_159 = arith.constant 2 : index
    %c2_160 = arith.constant 2 : index
    %c0_161 = arith.constant 0 : index
    %136 = vector.load %arg11[%c2_159, %c2_160, %c0_161] : memref<18x18x64xf32, #tpu.memory_space<vmem>>, vector<16x16x64xf32>
    %137 = vector.shape_cast %136 : vector<16x16x64xf32> to vector<256x64xf32>
    %138 = arith.truncf %137 : vector<256x64xf32> to vector<256x64xbf16>
    %c0_162 = arith.constant 0 : index
    %c512_163 = arith.constant 512 : index
    %139 = vector.load %arg12[%c0_162, %c512_163] : memref<256x576xbf16, #tpu.memory_space<vmem>>, vector<256x64xbf16>
    tpu.vector_store %arg12[%c0_162, %c512_163], %138 {strides = array<i32>} : memref<256x576xbf16, #tpu.memory_space<vmem>>, vector<256x64xbf16>,
    %c0_164 = arith.constant 0 : index
    %c0_165 = arith.constant 0 : index
    %140 = vector.load %arg12[%c0_164, %c0_165] : memref<256x576xbf16, #tpu.memory_space<vmem>>, vector<256x576xbf16>
    %cst_166 = arith.constant dense<0.000000e+00> : vector<256x60xf32>
    %141 = tpu.matmul %140, %101, %cst_166 {dimension_numbers = #tpu.dot_dimension_numbers<[1], [0], [0], [1], [0, 0, 1, 1], [], []>} : vector<256x576xbf16>, vector<576x60xbf16>, vector<256x60xf32> -> vector<256x60xf32>
    %142 = vector.broadcast %102 : vector<1x60xf32> to vector<256x60xf32>
    %143 = arith.addf %141, %142 : vector<256x60xf32>
    %144 = vector.extract_strided_slice %143 {offsets = [0, 0], sizes = [256, 24], strides = [1, 1]} : vector<256x60xf32> to vector<256x24xf32>
    %145 = vector.extract_strided_slice %143 {offsets = [0, 24], sizes = [256, 24], strides = [1, 1]} : vector<256x60xf32> to vector<256x24xf32>
    %146 = vector.extract_strided_slice %143 {offsets = [0, 48], sizes = [256, 12], strides = [1, 1]} : vector<256x60xf32> to vector<256x12xf32>
    %147 = arith.addf %144, %145 : vector<256x24xf32>
    %cst_167 = arith.constant 18.420681 : f32
    %148 = vector.broadcast %cst_167 : f32 to vector<256x24xf32>
    %149 = arith.minimumf %144, %148 : vector<256x24xf32>
    %150 = math.exp %149 : vector<256x24xf32>
    %cst_168 = arith.constant 1.000000e+00 : f32
    %151 = vector.broadcast %cst_168 : f32 to vector<256x24xf32>
    %152 = arith.addf %151, %150 : vector<256x24xf32>
    %cst_169 = arith.constant 18.420681 : f32
    %153 = vector.broadcast %cst_169 : f32 to vector<256x24xf32>
    %154 = arith.minimumf %145, %153 : vector<256x24xf32>
    %155 = math.exp %154 : vector<256x24xf32>
    %156 = arith.addf %152, %155 : vector<256x24xf32>
    %157 = math.log %156 : vector<256x24xf32>
    %158 = arith.subf %147, %157 : vector<256x24xf32>
    %c0_170 = arith.constant 0 : index
    %c0_171 = arith.constant 0 : index
    %159 = vector.load %arg6[%c0_170, %c0_171] : memref<256x12xf32, #tpu.memory_space<vmem>>, vector<256x12xf32>
    %c0_172 = arith.constant 0 : index
    %c0_173 = arith.constant 0 : index
    %160 = vector.load %arg7[%c0_172, %c0_173] : memref<1x12xf32, #tpu.memory_space<vmem>>, vector<1x12xf32>
    %c0_174 = arith.constant 0 : index
    %c0_175 = arith.constant 0 : index
    %161 = vector.load %arg8[%c0_174, %c0_175] : memref<1x12xf32, #tpu.memory_space<vmem>>, vector<1x12xf32>
    %162 = vector.broadcast %160 : vector<1x12xf32> to vector<256x12xf32>
    %163 = arith.mulf %146, %162 : vector<256x12xf32>
    %cst_176 = arith.constant -3.200000e+01 : f32
    %cst_177 = arith.constant 3.200000e+01 : f32
    %164 = vector.broadcast %cst_176 : f32 to vector<256x12xf32>
    %165 = arith.maximumf %164, %163 : vector<256x12xf32>
    %166 = vector.broadcast %cst_177 : f32 to vector<256x12xf32>
    %167 = arith.minimumf %166, %165 : vector<256x12xf32>
    %cst_178 = arith.constant 4.13516665 : f32
    %168 = vector.broadcast %cst_178 : f32 to vector<256x12xf32>
    %169 = arith.minimumf %146, %168 : vector<256x12xf32>
    %170 = math.exp %169 : vector<256x12xf32>
    %171 = vector.broadcast %160 : vector<1x12xf32> to vector<256x12xf32>
    %172 = arith.mulf %171, %170 : vector<256x12xf32>
    %173 = arith.addf %159, %167 : vector<256x12xf32>
    %174 = vector.broadcast %161 : vector<1x12xf32> to vector<256x12xf32>
    %175 = arith.mulf %174, %173 : vector<256x12xf32>
    %cst_179 = arith.constant 1.000000e+00 : f32
    %176 = vector.broadcast %cst_179 : f32 to vector<1x12xf32>
    %177 = arith.subf %176, %161 : vector<1x12xf32>
    %178 = vector.broadcast %177 : vector<1x12xf32> to vector<256x12xf32>
    %179 = arith.mulf %178, %172 : vector<256x12xf32>
    %180 = arith.addf %175, %179 : vector<256x12xf32>
    %c0_180 = arith.constant 0 : index
    %c0_181 = arith.constant 0 : index
    %181 = vector.load %arg9[%c0_180, %c0_181] : memref<12x12xf32, #tpu.memory_space<vmem>>, vector<12x12xf32>
    %cst_182 = arith.constant dense<0.000000e+00> : vector<256x12xf32>
    %182 = tpu.matmul %180, %181, %cst_182 {dimension_numbers = #tpu.dot_dimension_numbers<[1], [0], [0], [1], [0, 0, 1, 1], [], []>} : vector<256x12xf32>, vector<12x12xf32>, vector<256x12xf32> -> vector<256x12xf32>
    %cst_183 = arith.constant 0.000000e+00 : f32
    %183 = vector.broadcast %cst_183 : f32 to vector<1x256x128xf32>
    %c0_184 = arith.constant 0 : index
    %c0_185 = arith.constant 0 : index
    %c0_186 = arith.constant 0 : index
    %184 = vector.load %arg10[%c0_184, %c0_185, %c0_186] : memref<1x256x128xf32, #tpu.memory_space<vmem>>, vector<1x256x128xf32>
    tpu.vector_store %arg10[%c0_184, %c0_185, %c0_186], %183 {strides = array<i32>} : memref<1x256x128xf32, #tpu.memory_space<vmem>>, vector<1x256x128xf32>,
    %c0_187 = arith.constant 0 : index
    %c0_188 = arith.constant 0 : index
    %c0_189 = arith.constant 0 : index
    %185 = vector.load %arg10[%c0_187, %c0_188, %c0_189] : memref<1x256x128xf32, #tpu.memory_space<vmem>>, vector<1x256x24xf32>
    %186 = vector.shape_cast %185 : vector<1x256x24xf32> to vector<256x24xf32>
    %187 = vector.shape_cast %158 : vector<256x24xf32> to vector<1x256x24xf32>
    tpu.vector_store %arg10[%c0_187, %c0_188, %c0_189], %187 {strides = array<i32>} : memref<1x256x128xf32, #tpu.memory_space<vmem>>, vector<1x256x24xf32>,
    %c0_190 = arith.constant 0 : index
    %c0_191 = arith.constant 0 : index
    %c24 = arith.constant 24 : index
    %188 = vector.load %arg10[%c0_190, %c0_191, %c24] : memref<1x256x128xf32, #tpu.memory_space<vmem>>, vector<1x256x12xf32>
    %189 = vector.shape_cast %188 : vector<1x256x12xf32> to vector<256x12xf32>
    %190 = vector.shape_cast %146 : vector<256x12xf32> to vector<1x256x12xf32>
    tpu.vector_store %arg10[%c0_190, %c0_191, %c24], %190 {strides = array<i32>} : memref<1x256x128xf32, #tpu.memory_space<vmem>>, vector<1x256x12xf32>,
    %c0_192 = arith.constant 0 : index
    %c0_193 = arith.constant 0 : index
    %c36 = arith.constant 36 : index
    %191 = vector.load %arg10[%c0_192, %c0_193, %c36] : memref<1x256x128xf32, #tpu.memory_space<vmem>>, vector<1x256x12xf32>
    %192 = vector.shape_cast %191 : vector<1x256x12xf32> to vector<256x12xf32>
    %193 = vector.shape_cast %182 : vector<256x12xf32> to vector<1x256x12xf32>
    tpu.vector_store %arg10[%c0_192, %c0_193, %c36], %193 {strides = array<i32>} : memref<1x256x128xf32, #tpu.memory_space<vmem>>, vector<1x256x12xf32>,
    return
  }
  func.func @transform_0(%arg0: i32) -> (i32, i32, i32, i32) {
    %c0_i32 = arith.constant 0 : i32
    %c0_i32_0 = arith.constant 0 : i32
    %c0_i32_1 = arith.constant 0 : i32
    %c0_i32_2 = arith.constant 0 : i32
    return %arg0, %c0_i32, %c0_i32_0, %c0_i32_1 : i32, i32, i32, i32
  }
  func.func @transform_1(%arg0: i32) -> (i32, i32, i32) {
    %c0_i32 = arith.constant 0 : i32
    %c0_i32_0 = arith.constant 0 : i32
    %c0_i32_1 = arith.constant 0 : i32
    %c0_i32_2 = arith.constant 0 : i32
    return %c0_i32, %c0_i32_0, %c0_i32_1 : i32, i32, i32
  }
  func.func @transform_2(%arg0: i32) -> (i32, i32, i32) {
    %c0_i32 = arith.constant 0 : i32
    %c0_i32_0 = arith.constant 0 : i32
    %c0_i32_1 = arith.constant 0 : i32
    %c0_i32_2 = arith.constant 0 : i32
    return %c0_i32, %c0_i32_0, %c0_i32_1 : i32, i32, i32
  }
  func.func @transform_3(%arg0: i32) -> (i32, i32) {
    %c0_i32 = arith.constant 0 : i32
    %c0_i32_0 = arith.constant 0 : i32
    %c0_i32_1 = arith.constant 0 : i32
    return %c0_i32, %c0_i32_0 : i32, i32
  }
  func.func @transform_4(%arg0: i32) -> (i32, i32) {
    %c0_i32 = arith.constant 0 : i32
    %c0_i32_0 = arith.constant 0 : i32
    %c0_i32_1 = arith.constant 0 : i32
    return %c0_i32, %c0_i32_0 : i32, i32
  }
  func.func @transform_5(%arg0: i32) -> (i32, i32) {
    %c0_i32 = arith.constant 0 : i32
    %c0_i32_0 = arith.constant 0 : i32
    %c0_i32_1 = arith.constant 0 : i32
    return %c0_i32, %c0_i32_0 : i32, i32
  }
  func.func @transform_6(%arg0: i32) -> (i32, i32) {
    %c0_i32 = arith.constant 0 : i32
    %c0_i32_0 = arith.constant 0 : i32
    %c0_i32_1 = arith.constant 0 : i32
    return %c0_i32, %c0_i32_0 : i32, i32
  }
  func.func @transform_7(%arg0: i32) -> (i32, i32) {
    %c0_i32 = arith.constant 0 : i32
    %c0_i32_0 = arith.constant 0 : i32
    %c0_i32_1 = arith.constant 0 : i32
    return %c0_i32, %c0_i32_0 : i32, i32
  }
  func.func @transform_8(%arg0: i32) -> (i32, i32) {
    %c0_i32 = arith.constant 0 : i32
    %c0_i32_0 = arith.constant 0 : i32
    %c0_i32_1 = arith.constant 0 : i32
    return %c0_i32, %c0_i32_0 : i32, i32
  }
  func.func @transform_9(%arg0: i32) -> (i32, i32, i32) {
    %c0_i32 = arith.constant 0 : i32
    %c0_i32_0 = arith.constant 0 : i32
    %c0_i32_1 = arith.constant 0 : i32
    return %arg0, %c0_i32, %c0_i32_0 : i32, i32, i32
  }
}

</mosaic_0001>

<bundles_post_ra>
// kernel: tpu_custom_call.1
= control target key start
LH: loop header
LB: loop body
LE: loop exit
PB: predicated region body
PF: predicated region fallthrough
CT: control target
= control target key end

     0   :  { %14 = vsyncpa [#allocation5], 0  ;;  %s13075_s0 = inlined_call_operand.vmem [shape: bf16[2,16,16,64], index: 0, kind: input, shape index: {}]   ;;  %s13076_s1 = inlined_call_operand.vmem [shape: bf16[2,576,64], index: 1, kind: input, shape index: {}]   ;;  %s13077_s2 = inlined_call_operand.vmem [shape: f32[2,1,64], index: 2, kind: input, shape index: {}]   ;;  %s13078_s3 = inlined_call_operand.vmem [shape: bf16[576,60], index: 3, kind: input, shape index: {}]   ;;  %s13079_s4 = inlined_call_operand.vmem [shape: f32[1,60], index: 4, kind: input, shape index: {}]   ;;  %s13080_s5 = inlined_call_operand.vmem [shape: f32[256,12], index: 5, kind: input, shape index: {}]   ;;  %s13081_s6 = inlined_call_operand.vmem [shape: f32[1,12], index: 6, kind: input, shape index: {}]   ;;  %s13082_s7 = inlined_call_operand.vmem [shape: f32[1,12], index: 7, kind: input, shape index: {}]   ;;  %s13083_s8 = inlined_call_operand.vmem [shape: f32[12,12], index: 8, kind: input, shape index: {}]   ;;  %s13084_s9 = inlined_call_operand.hbm [shape: f32[2,256,128], index: 9, kind: output, shape index: {}]  }
   0x1   :  { %16 = vsyncpa [#allocation5 + $0x1], 0  ;;  %s9514_s30 = smov 0   ;;  %s9516_s10 = smov 0  }
   0x2   :  { %s9518_s11 = smov 0   ;;  %s9520_s12 = smov 0  }
   0x3 LB: > { %s9535_s13 = sadd.s32 4294967295, %s9452_s12   ;;  %s7702_s14 = sadd.s32 4294967294, %s9452_s12   ;;  %s9452_s12 = sphi %s9520_s12, %s13231_s12   ;;  %s9448_s11 = sphi %s9518_s11, %s13230_s11   ;;  %s9444_s10 = sphi %s9516_s10, %s13229_s10   ;;  %s9440_s30 = sphi %s9514_s30, %s13228_s30  }
   0x4   : > { %s9539_s15 = sadd.s32 1, %s9452_s12   ;;  %s223_s16 = sadd.s32 1, %s9448_s11 }
   0x5   : > { %s220_s17 = ssub.s32 %s9452_s12, %s9539_s15  ;;  %p233_p0 = scmp.ne.s32.totalorder %s9448_s11, %s9444_s10 }
   0x6   : > { %p221_p1 = scmp.eq.s32.totalorder %s220_s17, 0  ;;  %p234_p2 = scmp.eq.s32.totalorder %s9535_s13, 1 }
   0x7   : > { %p239_p3 = scmp.ne.s32.totalorder %s9444_s10, %s9440_s30  ;;  %p240_p4 = scmp.eq.s32.totalorder %s7702_s14, 1 }
   0x8   : > { %s9550_s18 = scalar_select %p221_p1, %s9448_s11, %s223_s16  }
   0x9   : > { %p9552_p5 = por %p234_p2, %p233_p0  ;;  %p9556_p6 = por %p240_p4, %p239_p3 }
   0xa   : > { %p7705_p7 = scmp.ge.s32.totalorder %s9452_s12, 1  ;;  %p290_p8 = scmp.lt.s32.totalorder %s9452_s12, 3 }
   0xc   : > { %p291_p9 = pnand %p7705_p7, %p290_p8 }
   0xe   : > { %294 = sbr.rel (%p291_p9) target bundleno = 2095 (0x82f), region = 56 }
  0x15   : > { %p326_p10 = scmp.lt.s32.totalorder %s9535_s13, 1  ;;  %vm332_vm0 = vcmask 523264   ;;  %vm335_vm1 = vcmask 517120   ;;  %v9085_v0 = vld [vmem:[%s13076_s1 + $0x40] sm:$0xff]   ;;  %v13085_v1 = vmov 0.0   ;;  %v9087_v3 = vld [vmem:[%s13076_s1 + $0x48] sm:$0xff]  }
  0x16   : > { %337 = vst.msk [vmem:[#allocation2 + $0x18] sm:$0xff] %vm332_vm0, %v13085_v1  ;;  %338 = vst.msk [vmem:[#allocation2 + $0x20] sm:$0xff] %vm332_vm0, %v13085_v1  ;;  %8093 = vmatprep.subr.bf16.mxu0 %v9085_v0  ;;  %v9086_v2 = vld [vmem:[%s13076_s1] sm:$0xff]   ;;  %v9088_v4 = vld [vmem:[%s13076_s1 + $0x8] sm:$0xff]   ;;  %s9455_s17 = smov 64   ;;  %vm734_vm2 = vcmask 1048064  }
  0x17   : > { %339 = vst.msk [vmem:[#allocation2 + $0x28] sm:$0x3] %vm335_vm1, %v13085_v1  ;;  %336 = vst.msk [vmem:[#allocation2 + $0x10] sm:$0x3] %vm335_vm1, %v13085_v1  ;;  %s327_s23 = scalar_select %p326_p10, %s9535_s13, 1  ;;  %8094 = vmatpush3.bf16.msra.mxu0 %v9086_v2  ;;  %v9089_v5 = vld [vmem:[%s13076_s1 + $0x50] sm:$0xff]  }
  0x18   : > { %333 = vst.msk [vmem:[#allocation2] sm:$0xff] %vm332_vm0, %v13085_v1  ;;  %334 = vst.msk [vmem:[#allocation2 + $0x8] sm:$0xff] %vm332_vm0, %v13085_v1  ;;  %8095 = vmatprep.subr.bf16.mxu0 %v9087_v3  ;;  %v9090_v45 = vld [vmem:[%s13076_s1 + $0x10] sm:$0xff]   ;;  %v9091_v50 = vld [vmem:[%s13076_s1 + $0x58] sm:$0xff]   ;;  %s9456_s24 = smov 48   ;;  %vm7138_vm3 = vcmask 1043456  }
  0x19   : > { %340 = vst.msk [vmem:[#allocation2 + $0x30] sm:$0xff] %vm332_vm0, %v13085_v1  ;;  %341 = vst.msk [vmem:[#allocation2 + $0x38] sm:$0xff] %vm332_vm0, %v13085_v1  ;;  %s8012_s28 = sshll.u32 %s327_s23, 7  ;;  %v9092_v57 = vld [vmem:[%s13076_s1 + $0x18] sm:$0xff]   ;;  %v9093_v59 = vld [vmem:[%s13076_s1 + $0x60] sm:$0xff]   ;;  %vm9457_vm4 = vmmov 1  }
  0x1a   : > { %342 = vst.msk [vmem:[#allocation2 + $0x40] sm:$0x3] %vm335_vm1, %v13085_v1  ;;  %345 = vst.msk [vmem:[#allocation2 + $0x58] sm:$0x3] %vm335_vm1, %v13085_v1  ;;  %s9689_s21 = scalar_lea.vmem %s13075_s0, %s8012_s28  ;;  %s9458_s14 = smov 80   ;;  %vm7041_vm6 = vcmask 97280  }
  0x1b   : > { %343 = vst.msk [vmem:[#allocation2 + $0x48] sm:$0xff] %vm332_vm0, %v13085_v1  ;;  %344 = vst.msk [vmem:[#allocation2 + $0x50] sm:$0xff] %vm332_vm0, %v13085_v1  ;;  %v8015_v6 = vld [vmem:[%s9689_s21] sm:$0xff]   ;;  %v8078_v7 = vld [vmem:[%s9689_s21 + $0x8] sm:$0xff]   ;;  %8096 = vmatpush3.bf16.msra.mxu0 %v9088_v4  ;;  %s9459_s29 = smov 104   ;;  %vm7399_vm7 = vcmask 195584  }
  0x1c   : > { %346 = vst.msk [vmem:[#allocation2 + $0x60] sm:$0xff] %vm332_vm0, %v13085_v1  ;;  %347 = vst.msk [vmem:[#allocation2 + $0x68] sm:$0xff] %vm332_vm0, %v13085_v1  ;;  %v8079_v8 = vld [vmem:[%s9689_s21 + $0x10] sm:$0xff]   ;;  %v8016_v9 = vunpack.c.l.bf16 %v8015_v6  ;;  %v8017_v10 = vunpack.c.h.bf16 %v8015_v6  ;;  %v8020_v11 = vunpack.c.l.bf16 %v8078_v7  ;;  %v8021_v12 = vunpack.c.h.bf16 %v8078_v7  ;;  %v8080_v13 = vld [vmem:[%s9689_s21 + $0x18] sm:$0xff]   ;;  %8097 = vmatprep.subr.bf16.mxu0 %v9089_v5  ;;  %s8013_s23 = sshll.u32 %s9535_s13, 12  ;;  %s9461_s16 = smov [#allocation4]  }
  0x1d   : > { %348 = vst.msk [vmem:[#allocation2 + $0x70] sm:$0x3] %vm335_vm1, %v13085_v1  ;;  %351 = vst.msk [vmem:[#allocation2 + $0x88] sm:$0x3] %vm335_vm1, %v13085_v1  ;;  %v8081_v14 = vld [vmem:[%s9689_s21 + $0x20] sm:$0xff]   ;;  %v8082_v15 = vld [vmem:[%s9689_s21 + $0x28] sm:$0xff]   ;;  %v8024_v16 = vunpack.c.l.bf16 %v8079_v8  ;;  %v8025_v17 = vunpack.c.h.bf16 %v8079_v8  ;;  %v8028_v18 = vunpack.c.l.bf16 %v8080_v13  ;;  %v8029_v19 = vunpack.c.h.bf16 %v8080_v13  ;;  %s13024_s28 = scalar_lea.hbm %s13084_s9, %s8013_s23 }
  0x1e   : > { %349 = vst.msk [vmem:[#allocation2 + $0x78] sm:$0xff] %vm332_vm0, %v13085_v1  ;;  %350 = vst.msk [vmem:[#allocation2 + $0x80] sm:$0xff] %vm332_vm0, %v13085_v1  ;;  %v8083_v20 = vld [vmem:[%s9689_s21 + $0x30] sm:$0xff]   ;;  %v8032_v21 = vunpack.c.l.bf16 %v8081_v14  ;;  %v8033_v22 = vunpack.c.h.bf16 %v8081_v14  ;;  %v8036_v23 = vunpack.c.l.bf16 %v8082_v15  ;;  %v8084_v24 = vld [vmem:[%s9689_s21 + $0x38] sm:$0xff]   ;;  %v8037_v27 = vunpack.c.h.bf16 %v8082_v15 }
  0x1f   : > { %352 = vst.msk [vmem:[#allocation2 + $0x90] sm:$0xff] %vm332_vm0, %v13085_v1  ;;  %353 = vst.msk [vmem:[#allocation2 + $0x98] sm:$0xff] %vm332_vm0, %v13085_v1  ;;  %v8085_v25 = vld [vmem:[%s9689_s21 + $0x40] sm:$0xff]   ;;  %v8086_v26 = vld [vmem:[%s9689_s21 + $0x48] sm:$0xff]   ;;  %v8040_v28 = vunpack.c.l.bf16 %v8083_v20  ;;  %v8041_v29 = vunpack.c.h.bf16 %v8083_v20  ;;  %v8044_v30 = vunpack.c.l.bf16 %v8084_v24  ;;  %v8045_v34 = vunpack.c.h.bf16 %v8084_v24  ;;  %8098 = vmatpush3.bf16.msra.mxu0 %v9090_v45 }
  0x20   : > { %354 = vst.msk [vmem:[#allocation2 + $0xa0] sm:$0x3] %vm335_vm1, %v13085_v1  ;;  %357 = vst.msk [vmem:[#allocation2 + $0xb8] sm:$0x3] %vm335_vm1, %v13085_v1  ;;  %v8087_v31 = vld [vmem:[%s9689_s21 + $0x50] sm:$0xff]   ;;  %v8088_v32 = vld [vmem:[%s9689_s21 + $0x58] sm:$0xff]   ;;  %v8048_v35 = vunpack.c.l.bf16 %v8085_v25  ;;  %v8049_v36 = vunpack.c.h.bf16 %v8085_v25  ;;  %v8052_v37 = vunpack.c.l.bf16 %v8086_v26  ;;  %v8053_v41 = vunpack.c.h.bf16 %v8086_v26  ;;  %8099 = vmatprep.subr.bf16.mxu0 %v9091_v50 }
  0x21   : > { %355 = vst.msk [vmem:[#allocation2 + $0xa8] sm:$0xff] %vm332_vm0, %v13085_v1  ;;  %356 = vst.msk [vmem:[#allocation2 + $0xb0] sm:$0xff] %vm332_vm0, %v13085_v1  ;;  %v8089_v33 = vld [vmem:[%s9689_s21 + $0x60] sm:$0xff]   ;;  %v8090_v38 = vld [vmem:[%s9689_s21 + $0x68] sm:$0xff]   ;;  %v8056_v42 = vunpack.c.l.bf16 %v8087_v31  ;;  %v8057_v43 = vunpack.c.h.bf16 %v8087_v31  ;;  %v8060_v44 = vunpack.c.l.bf16 %v8088_v32  ;;  %v8061_v46 = vunpack.c.h.bf16 %v8088_v32 }
  0x22   : > { %358 = vst.msk [vmem:[#allocation2 + $0xc0] sm:$0xff] %vm332_vm0, %v13085_v1  ;;  %359 = vst.msk [vmem:[#allocation2 + $0xc8] sm:$0xff] %vm332_vm0, %v13085_v1  ;;  %v8091_v39 = vld [vmem:[%s9689_s21 + $0x70] sm:$0xff]   ;;  %v8092_v40 = vld [vmem:[%s9689_s21 + $0x78] sm:$0xff]   ;;  %v8064_v47 = vunpack.c.l.bf16 %v8089_v33  ;;  %v8065_v48 = vunpack.c.h.bf16 %v8089_v33  ;;  %v8068_v49 = vunpack.c.l.bf16 %v8090_v38  ;;  %v8069_v53 = vunpack.c.h.bf16 %v8090_v38  ;;  %s323_s21 = sand.u32 1, %s9444_s10  }
  0x23   : > { %360 = vst.msk [vmem:[#allocation2 + $0xd0] sm:$0x3] %vm335_vm1, %v13085_v1  ;;  %363 = vst.msk [vmem:[#allocation2 + $0xe8] sm:$0x3] %vm335_vm1, %v13085_v1  ;;  %v622_v51 = vld [vmem:[#allocation2 + $0x1] sm:$0xff]  ;;  %v623_v52 = vld [vmem:[#allocation2 + $0x9] sm:$0xff]  ;;  %v8072_v54 = vunpack.c.l.bf16 %v8091_v39  ;;  %v8073_v55 = vunpack.c.h.bf16 %v8091_v39  ;;  %v8076_v56 = vunpack.c.l.bf16 %v8092_v40  ;;  %v8077_v58 = vunpack.c.h.bf16 %v8092_v40  ;;  %8100 = vmatpush3.bf16.msra.mxu0 %v9092_v57 }
  0x24   : > { %361 = vst.msk [vmem:[#allocation2 + $0xd8] sm:$0xff] %vm332_vm0, %v13085_v1  ;;  %362 = vst.msk [vmem:[#allocation2 + $0xe0] sm:$0xff] %vm332_vm0, %v13085_v1  ;;  %v654_v7 = vpack.c.bf16 %v623_v52, %v622_v51  ;;  %8101 = vmatprep.subr.bf16.mxu0 %v9093_v59  ;;  %s7706_s22 = sshll.u32 %s323_s21, 8  ;;  %vm7432_vm8 = vcmask 294080   ;;  %vm7593_vm9 = vcmask 392480   ;;  %s13034_s13 = scalar_lea.sflag [#allocation5], %s323_s21 }
  0x25   : > { %364 = vst.msk [vmem:[#allocation2 + $0xf0] sm:$0xff] %vm332_vm0, %v13085_v1  ;;  %365 = vst.msk [vmem:[#allocation2 + $0xf8] sm:$0xff] %vm332_vm0, %v13085_v1 }
  0x26   : > { %366 = vst.msk [vmem:[#allocation2 + $0x100] sm:$0x3] %vm335_vm1, %v13085_v1  ;;  %369 = vst.msk [vmem:[#allocation2 + $0x118] sm:$0x3] %vm335_vm1, %v13085_v1 }
  0x27   : > { %367 = vst.msk [vmem:[#allocation2 + $0x108] sm:$0xff] %vm332_vm0, %v13085_v1  ;;  %368 = vst.msk [vmem:[#allocation2 + $0x110] sm:$0xff] %vm332_vm0, %v13085_v1 }
  0x28   : > { %370 = vst.msk [vmem:[#allocation2 + $0x120] sm:$0xff] %vm332_vm0, %v13085_v1  ;;  %371 = vst.msk [vmem:[#allocation2 + $0x128] sm:$0xff] %vm332_vm0, %v13085_v1 }
  0x29   : > { %372 = vst.msk [vmem:[#allocation2 + $0x130] sm:$0x3] %vm335_vm1, %v13085_v1  ;;  %375 = vst.msk [vmem:[#allocation2 + $0x148] sm:$0x3] %vm335_vm1, %v13085_v1 }
  0x2a   : > { %373 = vst.msk [vmem:[#allocation2 + $0x138] sm:$0xff] %vm332_vm0, %v13085_v1  ;;  %374 = vst.msk [vmem:[#allocation2 + $0x140] sm:$0xff] %vm332_vm0, %v13085_v1 }
  0x2b   : > { %376 = vst.msk [vmem:[#allocation2 + $0x150] sm:$0xff] %vm332_vm0, %v13085_v1  ;;  %377 = vst.msk [vmem:[#allocation2 + $0x158] sm:$0xff] %vm332_vm0, %v13085_v1 }
  0x2c   : > { %378 = vst.msk [vmem:[#allocation2 + $0x160] sm:$0x3] %vm335_vm1, %v13085_v1  ;;  %381 = vst.msk [vmem:[#allocation2 + $0x178] sm:$0x3] %vm335_vm1, %v13085_v1 }
  0x2d   : > { %379 = vst.msk [vmem:[#allocation2 + $0x168] sm:$0xff] %vm332_vm0, %v13085_v1  ;;  %380 = vst.msk [vmem:[#allocation2 + $0x170] sm:$0xff] %vm332_vm0, %v13085_v1 }
  0x2e   : > { %382 = vst.msk [vmem:[#allocation2 + $0x180] sm:$0xff] %vm332_vm0, %v13085_v1  ;;  %383 = vst.msk [vmem:[#allocation2 + $0x188] sm:$0xff] %vm332_vm0, %v13085_v1 }
  0x2f   : > { %384 = vst.msk [vmem:[#allocation2 + $0x190] sm:$0x3] %vm335_vm1, %v13085_v1  ;;  %387 = vst.msk [vmem:[#allocation2 + $0x1a8] sm:$0x3] %vm335_vm1, %v13085_v1 }
  0x30   : > { %385 = vst.msk [vmem:[#allocation2 + $0x198] sm:$0xff] %vm332_vm0, %v13085_v1  ;;  %386 = vst.msk [vmem:[#allocation2 + $0x1a0] sm:$0xff] %vm332_vm0, %v13085_v1 }
  0x31   : > { %526 = vst.msk [vmem:[#allocation2 + $0x19] sm:$0xff] %vm332_vm0, %v8016_v9  ;;  %527 = vst.msk [vmem:[#allocation2 + $0x21] sm:$0xff] %vm332_vm0, %v8017_v10 }
  0x32   : > { %528 = vst.msk [vmem:[#allocation2 + $0x31] sm:$0xff] %vm332_vm0, %v8020_v11  ;;  %529 = vst.msk [vmem:[#allocation2 + $0x39] sm:$0xff] %vm332_vm0, %v8021_v12 }
  0x33   : > { %530 = vst.msk [vmem:[#allocation2 + $0x49] sm:$0xff] %vm332_vm0, %v8024_v16  ;;  %531 = vst.msk [vmem:[#allocation2 + $0x51] sm:$0xff] %vm332_vm0, %v8025_v17 }
  0x34   : > { %532 = vst.msk [vmem:[#allocation2 + $0x61] sm:$0xff] %vm332_vm0, %v8028_v18  ;;  %533 = vst.msk [vmem:[#allocation2 + $0x69] sm:$0xff] %vm332_vm0, %v8029_v19 }
  0x35   : > { %534 = vst.msk [vmem:[#allocation2 + $0x79] sm:$0xff] %vm332_vm0, %v8032_v21  ;;  %535 = vst.msk [vmem:[#allocation2 + $0x81] sm:$0xff] %vm332_vm0, %v8033_v22 }
  0x36   : > { %536 = vst.msk [vmem:[#allocation2 + $0x91] sm:$0xff] %vm332_vm0, %v8036_v23  ;;  %537 = vst.msk [vmem:[#allocation2 + $0x99] sm:$0xff] %vm332_vm0, %v8037_v27 }
  0x37   : > { %538 = vst.msk [vmem:[#allocation2 + $0xa9] sm:$0xff] %vm332_vm0, %v8040_v28  ;;  %539 = vst.msk [vmem:[#allocation2 + $0xb1] sm:$0xff] %vm332_vm0, %v8041_v29 }
  0x38   : > { %540 = vst.msk [vmem:[#allocation2 + $0xc1] sm:$0xff] %vm332_vm0, %v8044_v30  ;;  %541 = vst.msk [vmem:[#allocation2 + $0xc9] sm:$0xff] %vm332_vm0, %v8045_v34  ;;  %v815_v60 = vld [vmem:[#allocation2 + $0x18] sm:$0xff]  ;;  %v816_v61 = vld [vmem:[#allocation2 + $0x20] sm:$0xff] }
  0x39   : > { %542 = vst.msk [vmem:[#allocation2 + $0xd9] sm:$0xff] %vm332_vm0, %v8048_v35  ;;  %543 = vst.msk [vmem:[#allocation2 + $0xe1] sm:$0xff] %vm332_vm0, %v8049_v36  ;;  %v817_v62 = vld [vmem:[#allocation2 + $0x30] sm:$0xff]  ;;  %v847_v63 = vpack.c.bf16 %v816_v61, %v815_v60  ;;  %v818_v0 = vld [vmem:[#allocation2 + $0x38] sm:$0xff] }
  0x3a   : > { %544 = vst.msk [vmem:[#allocation2 + $0xf1] sm:$0xff] %vm332_vm0, %v8052_v37  ;;  %545 = vst.msk [vmem:[#allocation2 + $0xf9] sm:$0xff] %vm332_vm0, %v8053_v41  ;;  %v624_v2 = vld [vmem:[#allocation2 + $0x19] sm:$0xff]  ;;  %v625_v3 = vld [vmem:[#allocation2 + $0x21] sm:$0xff]  ;;  %v848_v4 = vpack.c.bf16 %v818_v0, %v817_v62 }
  0x3b   : > { %546 = vst.msk [vmem:[#allocation2 + $0x109] sm:$0xff] %vm332_vm0, %v8056_v42  ;;  %547 = vst.msk [vmem:[#allocation2 + $0x111] sm:$0xff] %vm332_vm0, %v8057_v43  ;;  %v819_v5 = vld [vmem:[#allocation2 + $0x48] sm:$0xff]  ;;  %v820_v6 = vld [vmem:[#allocation2 + $0x50] sm:$0xff]  ;;  %879 = vrot.lane.b32.xlu0 %v847_v63, %s9455_s17  ;;  %v655_v11 = vpack.c.bf16 %v625_v3, %v624_v2 }
  0x3c   : > { %548 = vst.msk [vmem:[#allocation2 + $0x121] sm:$0xff] %vm332_vm0, %v8060_v44  ;;  %549 = vst.msk [vmem:[#allocation2 + $0x129] sm:$0xff] %vm332_vm0, %v8061_v46  ;;  %v849_v8 = vpack.c.bf16 %v820_v6, %v819_v5  ;;  %v821_v9 = vld [vmem:[#allocation2 + $0x60] sm:$0xff]  ;;  %v822_v10 = vld [vmem:[#allocation2 + $0x68] sm:$0xff]  ;;  %881 = vrot.lane.b32.xlu1 %v848_v4, %s9455_s17 }
  0x3d   : > { %550 = vst.msk [vmem:[#allocation2 + $0x139] sm:$0xff] %vm332_vm0, %v8064_v47  ;;  %551 = vst.msk [vmem:[#allocation2 + $0x141] sm:$0xff] %vm332_vm0, %v8065_v48  ;;  %v850_v12 = vpack.c.bf16 %v822_v10, %v821_v9  ;;  %v823_v13 = vld [vmem:[#allocation2 + $0x78] sm:$0xff]  ;;  %v824_v16 = vld [vmem:[#allocation2 + $0x80] sm:$0xff] }
  0x3e   : > { %552 = vst.msk [vmem:[#allocation2 + $0x151] sm:$0xff] %vm332_vm0, %v8068_v49  ;;  %553 = vst.msk [vmem:[#allocation2 + $0x159] sm:$0xff] %vm332_vm0, %v8069_v53  ;;  %v626_v14 = vld [vmem:[#allocation2 + $0x31] sm:$0xff]  ;;  %v627_v15 = vld [vmem:[#allocation2 + $0x39] sm:$0xff]  ;;  %v851_v17 = vpack.c.bf16 %v824_v16, %v823_v13 }
  0x3f   : > { %554 = vst.msk [vmem:[#allocation2 + $0x169] sm:$0xff] %vm332_vm0, %v8072_v54  ;;  %555 = vst.msk [vmem:[#allocation2 + $0x171] sm:$0xff] %vm332_vm0, %v8073_v55  ;;  %v825_v18 = vld [vmem:[#allocation2 + $0x90] sm:$0xff]  ;;  %v826_v19 = vld [vmem:[#allocation2 + $0x98] sm:$0xff]  ;;  %686 = vrot.lane.b32.xlu0 %v654_v7, %s9455_s17  ;;  %v9764_v23 = vpack.c.bf16 %v627_v15, %v626_v14 }
  0x40   : > { %556 = vst.msk [vmem:[#allocation2 + $0x181] sm:$0xff] %vm332_vm0, %v8076_v56  ;;  %557 = vst.msk [vmem:[#allocation2 + $0x189] sm:$0xff] %vm332_vm0, %v8077_v58  ;;  %v9761_v20 = vpack.c.bf16 %v826_v19, %v825_v18  ;;  %v827_v21 = vld [vmem:[#allocation2 + $0xa8] sm:$0xff]  ;;  %v828_v22 = vld [vmem:[#allocation2 + $0xb0] sm:$0xff]  ;;  %688 = vrot.lane.b32.xlu1 %v655_v11, %s9455_s17 }
  0x41   : > { %607 = vst.msk [vmem:[#allocation3 + $0x28] sm:$0xff] %vm332_vm0, %v847_v63  ;;  %608 = vst.msk [vmem:[#allocation3 + $0x50] sm:$0xff] %vm332_vm0, %v848_v4  ;;  %v9766_v24 = vpack.c.bf16 %v828_v22, %v827_v21  ;;  %v829_v25 = vld [vmem:[#allocation2 + $0xc0] sm:$0xff]  ;;  %v628_v26 = vld [vmem:[#allocation2 + $0x49] sm:$0xff] }
  0x42   : > { %609 = vst.msk [vmem:[#allocation3 + $0x78] sm:$0xff] %vm332_vm0, %v849_v8  ;;  %610 = vst.msk [vmem:[#allocation3 + $0xa0] sm:$0xff] %vm332_vm0, %v850_v12  ;;  %v629_v27 = vld [vmem:[#allocation2 + $0x51] sm:$0xff]  ;;  %v830_v28 = vld [vmem:[#allocation2 + $0xc8] sm:$0xff] }
  0x43   : > { %611 = vst.msk [vmem:[#allocation3 + $0xc8] sm:$0xff] %vm332_vm0, %v851_v17  ;;  %612 = vst.msk [vmem:[#allocation3 + $0xf0] sm:$0xff] %vm332_vm0, %v9761_v20  ;;  %v9771_v29 = vpack.c.bf16 %v830_v28, %v829_v25  ;;  %v831_v30 = vld [vmem:[#allocation2 + $0xd8] sm:$0xff]  ;;  %v832_v31 = vld [vmem:[#allocation2 + $0xe0] sm:$0xff]  ;;  %883 = vrot.lane.b32.xlu0 %v849_v8, %s9455_s17  ;;  %v9780_v35 = vpack.c.bf16 %v629_v27, %v628_v26 }
  0x44   : > { %613 = vst.msk [vmem:[#allocation3 + $0x118] sm:$0xff] %vm332_vm0, %v9766_v24  ;;  %v9776_v32 = vpack.c.bf16 %v832_v31, %v831_v30  ;;  %v833_v33 = vld [vmem:[#allocation2 + $0xf0] sm:$0xff]  ;;  %v834_v34 = vld [vmem:[#allocation2 + $0xf8] sm:$0xff]  ;;  %690 = vrot.lane.b32.xlu1 %v9764_v23, %s9455_s17  ;;  %v835_v37 = vld [vmem:[#allocation2 + $0x108] sm:$0xff] }
  0x45   : > { %v9782_v36 = vpack.c.bf16 %v834_v34, %v833_v33  ;;  %614 = vst.msk [vmem:[#allocation3 + $0x140] sm:$0xff] %vm332_vm0, %v9771_v29  ;;  %v630_v38 = vld [vmem:[#allocation2 + $0x61] sm:$0xff]  ;;  %v631_v39 = vld [vmem:[#allocation2 + $0x69] sm:$0xff]  ;;  %v839_v45 = vld [vmem:[#allocation2 + $0x138] sm:$0xff] }
  0x46   : > { %v836_v40 = vld [vmem:[#allocation2 + $0x110] sm:$0xff]  ;;  %615 = vst.msk [vmem:[#allocation3 + $0x168] sm:$0xff] %vm332_vm0, %v9776_v32  ;;  %v837_v42 = vld [vmem:[#allocation2 + $0x120] sm:$0xff]  ;;  %v838_v43 = vld [vmem:[#allocation2 + $0x128] sm:$0xff]  ;;  %v9797_v47 = vpack.c.bf16 %v631_v39, %v630_v38 }
  0x47   : > { %v9788_v41 = vpack.c.bf16 %v836_v40, %v835_v37  ;;  %616 = vst.msk [vmem:[#allocation3 + $0x190] sm:$0xff] %vm332_vm0, %v9782_v36  ;;  %885 = vrot.lane.b32.xlu0 %v850_v12, %s9455_s17  ;;  %v9793_v44 = vpack.c.bf16 %v838_v43, %v837_v42  ;;  %v840_v46 = vld [vmem:[#allocation2 + $0x140] sm:$0xff]  ;;  %v841_v49 = vld [vmem:[#allocation2 + $0x150] sm:$0xff]  ;;  %v842_v52 = vld [vmem:[#allocation2 + $0x158] sm:$0xff] }
  0x48   : > { %692 = vrot.lane.b32.xlu1 %v9780_v35, %s9455_s17  ;;  %v9799_v48 = vpack.c.bf16 %v840_v46, %v839_v45  ;;  %v632_v50 = vld [vmem:[#allocation2 + $0x79] sm:$0xff]  ;;  %v633_v51 = vld [vmem:[#allocation2 + $0x81] sm:$0xff]  ;;  %v9805_v53 = vpack.c.bf16 %v842_v52, %v841_v49  ;;  %v844_v55 = vld [vmem:[#allocation2 + $0x170] sm:$0xff] }
  0x49   : > { %617 = vst.msk [vmem:[#allocation3 + $0x1b8] sm:$0xff] %vm332_vm0, %v9788_v41  ;;  %618 = vst.msk [vmem:[#allocation3 + $0x1e0] sm:$0xff] %vm332_vm0, %v9793_v44  ;;  %v843_v54 = vld [vmem:[#allocation2 + $0x168] sm:$0xff]  ;;  %v9814_v57 = vpack.c.bf16 %v633_v51, %v632_v50  ;;  %v634_v58 = vld [vmem:[#allocation2 + $0x91] sm:$0xff] }
  0x4a   : > { %619 = vst.msk [vmem:[#allocation3 + $0x208] sm:$0xff] %vm332_vm0, %v9799_v48  ;;  %v9810_v56 = vpack.c.bf16 %v844_v55, %v843_v54  ;;  %v635_v59 = vld [vmem:[#allocation2 + $0x99] sm:$0xff]  ;;  %620 = vst.msk [vmem:[#allocation3 + $0x230] sm:$0xff] %vm332_vm0, %v9805_v53  ;;  %v1008_v61 = vld [vmem:[#allocation2 + $0x22] sm:$0xff] }
  0x4b   : > { %887 = vrot.lane.b32.xlu0 %v851_v17, %s9455_s17  ;;  %v1007_v60 = vld [vmem:[#allocation2 + $0x1a] sm:$0xff]  ;;  %v1009_v62 = vld [vmem:[#allocation2 + $0x32] sm:$0xff]  ;;  %v1011_v3 = vld [vmem:[#allocation2 + $0x4a] sm:$0xff]  ;;  %v9830_v12 = vpack.c.bf16 %v635_v59, %v634_v58 }
  0x4c   : > { %694 = vrot.lane.b32.xlu1 %v9797_v47, %s9455_s17  ;;  %v1010_v63 = vld [vmem:[#allocation2 + $0x3a] sm:$0xff]  ;;  %621 = vst.msk [vmem:[#allocation3 + $0x258] sm:$0xff] %vm332_vm0, %v9810_v56  ;;  %v9820_v0 = vpack.c.bf16 %v1008_v61, %v1007_v60  ;;  %v1012_v4 = vld [vmem:[#allocation2 + $0x52] sm:$0xff]  ;;  %v1013_v5 = vld [vmem:[#allocation2 + $0x62] sm:$0xff] }
  0x4d   : > { %v9822_v2 = vpack.c.bf16 %v1010_v63, %v1009_v62  ;;  %v636_v6 = vld [vmem:[#allocation2 + $0xa9] sm:$0xff]  ;;  %v637_v7 = vld [vmem:[#allocation2 + $0xb1] sm:$0xff]  ;;  %v9826_v8 = vpack.c.bf16 %v1012_v4, %v1011_v3  ;;  %v1015_v10 = vld [vmem:[#allocation2 + $0x7a] sm:$0xff] }
  0x4e   : > { %v1014_v9 = vld [vmem:[#allocation2 + $0x6a] sm:$0xff]  ;;  %v1016_v11 = vld [vmem:[#allocation2 + $0x82] sm:$0xff]  ;;  %v1017_v15 = vld [vmem:[#allocation2 + $0x92] sm:$0xff]  ;;  %800 = vst.msk [vmem:[#allocation3 + $0x30] sm:$0xff] %vm332_vm0, %v9820_v0  ;;  %v9862_v30 = vpack.c.bf16 %v637_v7, %v636_v6 }
  0x4f   : > { %889 = vrot.lane.b32.xlu0 %v9761_v20, %s9455_s17  ;;  %v9832_v13 = vpack.c.bf16 %v1014_v9, %v1013_v5  ;;  %v9834_v14 = vpack.c.bf16 %v1016_v11, %v1015_v10  ;;  %v1018_v16 = vld [vmem:[#allocation2 + $0x9a] sm:$0xff]  ;;  %801 = vst.msk [vmem:[#allocation3 + $0x58] sm:$0xff] %vm332_vm0, %v9822_v2  ;;  %v1019_v19 = vld [vmem:[#allocation2 + $0xaa] sm:$0xff]  ;;  %v1020_v20 = vld [vmem:[#allocation2 + $0xb2] sm:$0xff] }
  0x50   : > { %696 = vrot.lane.b32.xlu1 %v9814_v57, %s9455_s17  ;;  %v9840_v17 = vpack.c.bf16 %v1018_v16, %v1017_v15  ;;  %v9094_v18 = vld [vmem:[%s13076_s1 + $0x20] sm:$0xff]   ;;  %802 = vst.msk [vmem:[#allocation3 + $0x80] sm:$0xff] %vm332_vm0, %v9826_v8  ;;  %v9847_v21 = vpack.c.bf16 %v1020_v20, %v1019_v19  ;;  %v9095_v22 = vld [vmem:[%s13076_s1 + $0x68] sm:$0xff]   ;;  %v9098_v42 = vld [vmem:[%s13076_s1 + $0x30] sm:$0xff]  }
  0x51   : > { %803 = vst.msk [vmem:[#allocation3 + $0xa8] sm:$0xff] %vm332_vm0, %v9832_v13  ;;  %804 = vst.msk [vmem:[#allocation3 + $0xd0] sm:$0xff] %vm332_vm0, %v9834_v14  ;;  %v638_v25 = vld [vmem:[#allocation2 + $0xc1] sm:$0xff]  ;;  %v639_v26 = vld [vmem:[#allocation2 + $0xc9] sm:$0xff]  ;;  %8102 = vmatpush3.bf16.msra.mxu0 %v9094_v18 }
  0x52   : > { %v751_v27 = vld [vmem:[#allocation2 + $0x2] sm:$0xff]  ;;  %v752_v28 = vld [vmem:[#allocation2 + $0xa] sm:$0xff]  ;;  %805 = vst.msk [vmem:[#allocation3 + $0xf8] sm:$0xff] %vm332_vm0, %v9840_v17  ;;  %8103 = vmatprep.subr.bf16.mxu0 %v9095_v22  ;;  %806 = vst.msk [vmem:[#allocation3 + $0x120] sm:$0xff] %vm332_vm0, %v9847_v21  ;;  %v9880_v46 = vpack.c.bf16 %v639_v26, %v638_v25 }
  0x53   : > { %891 = vrot.lane.b32.xlu0 %v9766_v24, %s9455_s17  ;;  %v783_v31 = vpack.c.bf16 %v752_v28, %v751_v27  ;;  %v9096_v33 = vld [vmem:[%s13076_s1 + $0x28] sm:$0xff]   ;;  %v9097_v24 = vld [vmem:[%s13076_s1 + $0x70] sm:$0xff]   ;;  %v558_v34 = vld [vmem:[#allocation2] sm:$0xff] }
  0x54   : > { %698 = vrot.lane.b32.xlu1 %v9830_v12, %s9455_s17  ;;  %v559_v37 = vld [vmem:[#allocation2 + $0x8] sm:$0xff]  ;;  %v640_v38 = vld [vmem:[#allocation2 + $0xd9] sm:$0xff]  ;;  %v642_v52 = vld [vmem:[#allocation2 + $0xf1] sm:$0xff] }
  0x55   : > { %799 = vst.msk [vmem:[#allocation3 + $0x8] sm:$0xff] %vm332_vm0, %v783_v31  ;;  %v641_v39 = vld [vmem:[#allocation2 + $0xe1] sm:$0xff]  ;;  %8104 = vmatpush3.bf16.msra.mxu0 %v9096_v33  ;;  %v590_v40 = vpack.c.bf16 %v559_v37, %v558_v34  ;;  %v1022_v45 = vld [vmem:[#allocation2 + $0xca] sm:$0xff]  ;;  %v9100_v50 = vld [vmem:[%s13076_s1 + $0x38] sm:$0xff]  }
  0x56   : > { %v1021_v43 = vld [vmem:[#allocation2 + $0xc2] sm:$0xff]  ;;  %8105 = vmatprep.subr.bf16.mxu0 %v9097_v24  ;;  %v643_v54 = vld [vmem:[#allocation2 + $0xf9] sm:$0xff]  ;;  %v9902_v60 = vpack.c.bf16 %v641_v39, %v640_v38  ;;  %v1027_v63 = vld [vmem:[#allocation2 + $0x10a] sm:$0xff] }
  0x57   : > { %893 = vrot.lane.b32.xlu0 %v9771_v29, %s9455_s17  ;;  %v9882_v49 = vpack.c.bf16 %v1022_v45, %v1021_v43  ;;  %v9099_v29 = vld [vmem:[%s13076_s1 + $0x78] sm:$0xff]   ;;  %606 = vst.msk [vmem:[#allocation3] sm:$0xff] %vm332_vm0, %v590_v40  ;;  %v9894_v51 = vld [vmem:[%s13076_s1 + $0x100] sm:$0xff]   ;;  %v1030_v6 = vld [vmem:[#allocation2 + $0x12a] sm:$0xff]  ;;  %v9928_v15 = vpack.c.bf16 %v643_v54, %v642_v52 }
  0x58   : > { %700 = vrot.lane.b32.xlu1 %v9862_v30, %s9455_s17  ;;  %v1023_v55 = vld [vmem:[#allocation2 + $0xda] sm:$0xff]  ;;  %v1024_v58 = vld [vmem:[#allocation2 + $0xe2] sm:$0xff]  ;;  %v1025_v59 = vld [vmem:[#allocation2 + $0xf2] sm:$0xff] }
  0x59   : > { %807 = vst.msk [vmem:[#allocation3 + $0x148] sm:$0xff] %vm332_vm0, %v9882_v49  ;;  %8106 = vmatpush3.bf16.msra.mxu0 %v9098_v42  ;;  %v9904_v61 = vpack.c.bf16 %v1024_v58, %v1023_v55  ;;  %v1026_v62 = vld [vmem:[#allocation2 + $0xfa] sm:$0xff]  ;;  %v1028_v3 = vld [vmem:[#allocation2 + $0x112] sm:$0xff]  ;;  %v1029_v5 = vld [vmem:[#allocation2 + $0x122] sm:$0xff] }
  0x5a   : > { %8107 = vmatprep.subr.bf16.mxu0 %v9099_v29  ;;  %v9906_v4 = vpack.c.bf16 %v1026_v62, %v1025_v59  ;;  %v9912_v7 = vpack.c.bf16 %v1030_v6, %v1029_v5  ;;  %v9102_v9 = vld [vmem:[%s13076_s1 + $0xc0] sm:$0xff]   ;;  %v644_v10 = vld [vmem:[#allocation2 + $0x109] sm:$0xff]  ;;  %v645_v16 = vld [vmem:[#allocation2 + $0x111] sm:$0xff] }
  0x5b   : > { %895 = vrot.lane.b32.xlu0 %v9776_v32, %s9455_s17  ;;  %v9908_v32 = vpack.c.bf16 %v1028_v3, %v1027_v63  ;;  %808 = vst.msk [vmem:[#allocation3 + $0x170] sm:$0xff] %vm332_vm0, %v9904_v61  ;;  %v9103_v11 = vld [vmem:[%s13076_s1 + $0x80] sm:$0xff]   ;;  %8205 = vmatprep.subr.bf16.mxu1 %v9102_v9  ;;  %v9106_v18 = vld [vmem:[%s13076_s1 + $0x88] sm:$0xff]   ;;  %v9943_v25 = vpack.c.bf16 %v645_v16, %v644_v10  ;;  %v9107_v27 = vld [vmem:[%s13076_s1 + $0xd0] sm:$0xff]  }
  0x5c   : > { %702 = vrot.lane.b32.xlu1 %v9880_v46, %s9455_s17  ;;  %809 = vst.msk [vmem:[#allocation3 + $0x198] sm:$0xff] %vm332_vm0, %v9906_v4  ;;  %811 = vst.msk [vmem:[#allocation3 + $0x1e8] sm:$0xff] %vm332_vm0, %v9912_v7  ;;  %8206 = vmatpush3.bf16.msra.mxu1 %v9103_v11  ;;  %v1031_v19 = vld [vmem:[#allocation2 + $0x13a] sm:$0xff]  ;;  %v1032_v22 = vld [vmem:[#allocation2 + $0x142] sm:$0xff] }
  0x5d   : > { %8108 = vmatpush3.bf16.msra.mxu0 %v9100_v50  ;;  %810 = vst.msk [vmem:[#allocation3 + $0x1c0] sm:$0xff] %vm332_vm0, %v9908_v32  ;;  %v646_v20 = vld [vmem:[#allocation2 + $0x121] sm:$0xff]  ;;  %v9945_v26 = vpack.c.bf16 %v1032_v22, %v1031_v19  ;;  %v647_v28 = vld [vmem:[#allocation2 + $0x129] sm:$0xff]  ;;  %v648_v31 = vld [vmem:[#allocation2 + $0x139] sm:$0xff] }
  0x5e   : > { %8859 = vmatprep.subr.bf16.mxu0 %v9894_v51  ;;  %v9109_v33 = vld [vmem:[%s13076_s1 + $0xd8] sm:$0xff]   ;;  %v9964_v37 = vpack.c.bf16 %v647_v28, %v646_v20  ;;  %v649_v38 = vld [vmem:[#allocation2 + $0x141] sm:$0xff]  ;;  %v781_v40 = vld [vmem:[#allocation2 + $0x16a] sm:$0xff] }
  0x5f   : > { %897 = vrot.lane.b32.xlu0 %v9782_v36, %s9455_s17  ;;  %v9105_v36 = vld [vmem:[%s13076_s1 + $0xc8] sm:$0xff]   ;;  %812 = vst.msk [vmem:[#allocation3 + $0x210] sm:$0xff] %vm332_vm0, %v9945_v26  ;;  %1387 = vst.msk [vmem:[#allocation3 + $0x1d8] sm:$0xff] %vm332_vm0, %v9945_v26  ;;  %v1033_v24 = vld [vmem:[#allocation2 + $0x152] sm:$0xff]  ;;  %v9984_v54 = vpack.c.bf16 %v649_v38, %v648_v31 }
  0x60   : > { %704 = vrot.lane.b32.xlu1 %v9902_v60, %s9455_s17  ;;  %8207 = vmatprep.subr.bf16.mxu1 %v9105_v36  ;;  %v1034_v34 = vld [vmem:[#allocation2 + $0x15a] sm:$0xff]  ;;  %v782_v42 = vld [vmem:[#allocation2 + $0x172] sm:$0xff]  ;;  %v1229_v55 = vld [vmem:[#allocation2 + $0x189] sm:$0xff] }
  0x61   : > { %8208 = vmatpush3.bf16.msra.mxu1 %v9106_v18  ;;  %v9966_v39 = vpack.c.bf16 %v1034_v34, %v1033_v24  ;;  %v650_v43 = vld [vmem:[#allocation2 + $0x151] sm:$0xff]  ;;  %v651_v45 = vld [vmem:[#allocation2 + $0x159] sm:$0xff]  ;;  %v9980_v50 = vpack.c.bf16 %v782_v42, %v781_v40  ;;  %v1228_v52 = vld [vmem:[#allocation2 + $0x181] sm:$0xff] }
  0x62   : > { %8209 = vmatprep.subr.bf16.mxu1 %v9107_v27  ;;  %v9111_v29 = vld [vmem:[%s13076_s1 + $0xe0] sm:$0xff]   ;;  %v9991_v58 = vpack.c.bf16 %v1229_v55, %v1228_v52  ;;  %v1136_v59 = vld [vmem:[#allocation2 + $0x30] sm:$0xff]  ;;  %v1137_v62 = vld [vmem:[#allocation2 + $0x38] sm:$0xff]  ;;  %v10004_v11 = vpack.c.bf16 %v651_v45, %v650_v43 }
  0x63   : > { %899 = vrot.lane.b32.xlu0 %v9788_v41, %s9455_s17  ;;  %v9108_v41 = vld [vmem:[%s13076_s1 + $0x90] sm:$0xff]   ;;  %813 = vst.msk [vmem:[#allocation3 + $0x238] sm:$0xff] %vm332_vm0, %v9966_v39  ;;  %1388 = vst.msk [vmem:[#allocation3 + $0x200] sm:$0xff] %vm332_vm0, %v9966_v39  ;;  %v845_v63 = vld [vmem:[#allocation2 + $0x180] sm:$0xff]  ;;  %v1168_v3 = vpack.c.bf16 %v1137_v62, %v1136_v59 }
  0x64   : > { %706 = vrot.lane.b32.xlu1 %v9928_v15, %s9455_s17  ;;  %814 = vst.msk [vmem:[#allocation3 + $0x260] sm:$0xff] %vm332_vm0, %v9980_v50  ;;  %1389 = vst.msk [vmem:[#allocation3 + $0x228] sm:$0xff] %vm332_vm0, %v9980_v50  ;;  %v943_v5 = vld [vmem:[#allocation2 + $0x19] sm:$0xff]  ;;  %v944_v6 = vld [vmem:[#allocation2 + $0x21] sm:$0xff] }
  0x65   : > { %8210 = vmatpush3.bf16.msra.mxu1 %v9108_v41  ;;  %v9113_v9 = vld [vmem:[%s13076_s1 + $0xe8] sm:$0xff]   ;;  %v975_v10 = vpack.c.bf16 %v944_v6, %v943_v5  ;;  %1006 = vst.msk [vmem:[#allocation3 + $0x268] sm:$0xff] %vm332_vm0, %v9991_v58  ;;  %1184 = vst.msk [vmem:[#allocation3 + $0x18] sm:$0xff] %vm332_vm0, %v1168_v3  ;;  %v653_v18 = vld [vmem:[#allocation2 + $0x171] sm:$0xff] }
  0x66   : > { %8211 = vmatprep.subr.bf16.mxu1 %v9109_v33  ;;  %v846_v16 = vld [vmem:[#allocation2 + $0x188] sm:$0xff]  ;;  %v9115_v20 = vld [vmem:[%s13076_s1 + $0xf0] sm:$0xff]   ;;  %v946_v38 = vld [vmem:[#allocation2 + $0x39] sm:$0xff] }
  0x67   : > { %901 = vrot.lane.b32.xlu0 %v9793_v44, %s9455_s17  ;;  %v9110_v44 = vld [vmem:[%s13076_s1 + $0x98] sm:$0xff]   ;;  %v652_v36 = vld [vmem:[#allocation2 + $0x169] sm:$0xff]  ;;  %991 = vst.msk [vmem:[#allocation3 + $0x10] sm:$0xff] %vm332_vm0, %v975_v10  ;;  %v862_v19 = vpack.c.bf16 %v846_v16, %v845_v63  ;;  %v1140_v43 = vld [vmem:[#allocation2 + $0x60] sm:$0xff] }
  0x68   : > { %708 = vrot.lane.b32.xlu1 %v9943_v25, %s9455_s17  ;;  %v1037_v22 = vld [vmem:[#allocation2 + $0x182] sm:$0xff]  ;;  %v1038_v27 = vld [vmem:[#allocation2 + $0x18a] sm:$0xff]  ;;  %v10018_v28 = vpack.c.bf16 %v653_v18, %v652_v36  ;;  %v9117_v40 = vld [vmem:[%s13076_s1 + $0xf8] sm:$0xff]  }
  0x69   : > { %8212 = vmatpush3.bf16.msra.mxu1 %v9110_v44  ;;  %v9116_v41 = vld [vmem:[%s13076_s1 + $0xb0] sm:$0xff]   ;;  %v10023_v31 = vpack.c.bf16 %v1038_v27, %v1037_v22  ;;  %v9118_v42 = vld [vmem:[%s13076_s1 + $0xb8] sm:$0xff]   ;;  %v1141_v45 = vld [vmem:[#allocation2 + $0x68] sm:$0xff] }
  0x6a   : > { %8213 = vmatprep.subr.bf16.mxu1 %v9111_v29  ;;  %v1139_v33 = vld [vmem:[#allocation2 + $0x50] sm:$0xff]  ;;  %v1170_v52 = vpack.c.bf16 %v1141_v45, %v1140_v43  ;;  %v1142_v59 = vld [vmem:[#allocation2 + $0x78] sm:$0xff]  ;;  %v949_v62 = vld [vmem:[#allocation2 + $0x61] sm:$0xff] }
  0x6b   : > { %903 = vrot.lane.b32.xlu0 %v9799_v48, %s9455_s17  ;;  %v9112_v48 = vld [vmem:[%s13076_s1 + $0xa0] sm:$0xff]   ;;  %v945_v24 = vld [vmem:[#allocation2 + $0x31] sm:$0xff]  ;;  %1390 = vst.msk [vmem:[#allocation3 + $0x250] sm:$0xff] %vm332_vm0, %v10023_v31  ;;  %v947_v29 = vld [vmem:[#allocation2 + $0x49] sm:$0xff] }
  0x6c   : > { %710 = vrot.lane.b32.xlu1 %v9964_v37, %s9455_s17  ;;  %v976_v44 = vpack.c.bf16 %v946_v38, %v945_v24  ;;  %v948_v55 = vld [vmem:[#allocation2 + $0x51] sm:$0xff]  ;;  %1186 = vst.msk [vmem:[#allocation3 + $0x68] sm:$0xff] %vm332_vm0, %v1170_v52  ;;  %v951_v5 = vld [vmem:[#allocation2 + $0x79] sm:$0xff]  ;;  %v952_v6 = vld [vmem:[#allocation2 + $0x81] sm:$0xff] }
  0x6d   : > { %8214 = vmatpush3.bf16.msra.mxu1 %v9112_v48  ;;  %v977_v48 = vpack.c.bf16 %v948_v55, %v947_v29  ;;  %v954_v10 = vld [vmem:[#allocation2 + $0x99] sm:$0xff]  ;;  %v955_v16 = vld [vmem:[#allocation2 + $0xa9] sm:$0xff]  ;;  %v956_v36 = vld [vmem:[#allocation2 + $0xb1] sm:$0xff] }
  0x6e   : > { %8215 = vmatprep.subr.bf16.mxu1 %v9113_v9  ;;  %992 = vst.msk [vmem:[#allocation3 + $0x38] sm:$0xff] %vm332_vm0, %v976_v44  ;;  %v953_v9 = vld [vmem:[#allocation2 + $0x91] sm:$0xff]  ;;  %v957_v18 = vld [vmem:[#allocation2 + $0xc1] sm:$0xff]  ;;  %vm9032_vm5 = vmpackc.low %vm7138_vm3, %vm9457_vm4 }
  0x6f   : > { %905 = vrot.lane.b32.xlu0 %v9805_v53, %s9455_s17  ;;  %v9114_v53 = vld [vmem:[%s13076_s1 + $0xa8] sm:$0xff]   ;;  %993 = vst.msk [vmem:[#allocation3 + $0x60] sm:$0xff] %vm332_vm0, %v977_v48 }
  0x70   : > { %712 = vrot.lane.b32.xlu1 %v9984_v54, %s9455_s17  ;;  %v1231_v27 = vld [vmem:[#allocation2 + $0x1a1] sm:$0xff] }
  0x71   : > { %8216 = vmatpush3.bf16.msra.mxu1 %v9114_v53  ;;  %v958_v53 = vld [vmem:[#allocation2 + $0xc9] sm:$0xff] }
  0x72   : > { %8217 = vmatprep.subr.bf16.mxu1 %v9115_v20  ;;  %v1154_v44 = vld [vmem:[#allocation2 + $0x108] sm:$0xff] }
  0x73   : > { %907 = vrot.lane.b32.xlu0 %v9810_v56, %s9455_s17  ;;  %v1138_v56 = vld [vmem:[#allocation2 + $0x48] sm:$0xff] }
  0x74   : > { %714 = vrot.lane.b32.xlu1 %v10004_v11, %s9455_s17  ;;  %v1169_v34 = vpack.c.bf16 %v1139_v33, %v1138_v56  ;;  %v1329_v56 = vld [vmem:[#allocation2 + $0x3a] sm:$0xff]  ;;  %v1331_v33 = vld [vmem:[#allocation2 + $0x52] sm:$0xff]  ;;  %v1332_v48 = vld [vmem:[#allocation2 + $0x62] sm:$0xff] }
  0x75   : > { %8218 = vmatpush3.bf16.msra.mxu1 %v9116_v41  ;;  %v1328_v41 = vld [vmem:[#allocation2 + $0x32] sm:$0xff] }
  0x76   : > { %1185 = vst.msk [vmem:[#allocation3 + $0x40] sm:$0xff] %vm332_vm0, %v1169_v34  ;;  %8219 = vmatprep.subr.bf16.mxu1 %v9117_v40  ;;  %v1155_v40 = vld [vmem:[#allocation2 + $0x110] sm:$0xff] }
  0x77   : > { %909 = vrot.lane.b32.xlu0 %v862_v19, %s9455_s17  ;;  %v959_v19 = vld [vmem:[#allocation2 + $0xd9] sm:$0xff]  ;;  %v1177_v43 = vpack.c.bf16 %v1155_v40, %v1154_v44  ;;  %v968_v44 = vld [vmem:[#allocation2 + $0x141] sm:$0xff] }
  0x78   : > { %716 = vrot.lane.b32.xlu1 %v10018_v28, %s9455_s17 }
  0x79   : > { %8220 = vmatpush3.bf16.msra.mxu1 %v9118_v42  ;;  %v961_v42 = vld [vmem:[#allocation2 + $0xf1] sm:$0xff]  ;;  %1193 = vst.msk [vmem:[#allocation3 + $0x180] sm:$0xff] %vm332_vm0, %v1177_v43 }
  0x7a   : > { %v1344_v43 = vld [vmem:[#allocation2 + $0xf2] sm:$0xff] }
  0x7b   : > { %1264 = vrot.lane.b32.xlu0 %v9764_v23, %s9455_s17  ;;  %v1143_v23 = vld [vmem:[#allocation2 + $0x80] sm:$0xff] }
  0x7c   : > { %1071 = vrot.lane.b32.xlu1 %v9820_v0, %s9455_s17  ;;  %v1171_v63 = vpack.c.bf16 %v1143_v23, %v1142_v59  ;;  %v950_v0 = vld [vmem:[#allocation2 + $0x69] sm:$0xff]  ;;  %v1334_v23 = vld [vmem:[#allocation2 + $0x7a] sm:$0xff] }
  0x7d   : > { %v978_v3 = vpack.c.bf16 %v950_v0, %v949_v62  ;;  %v1333_v59 = vld [vmem:[#allocation2 + $0x6a] sm:$0xff] }
  0x7e   : > { %1187 = vst.msk [vmem:[#allocation3 + $0x90] sm:$0xff] %vm332_vm0, %v1171_v63  ;;  %v9104_v63 = vld [vmem:[%s13076_s1 + $0x108] sm:$0xff]  }
  0x7f   : > { %1266 = vrot.lane.b32.xlu0 %v9780_v35, %s9455_s17  ;;  %994 = vst.msk [vmem:[#allocation3 + $0x88] sm:$0xff] %vm332_vm0, %v978_v3  ;;  %v1144_v35 = vld [vmem:[#allocation2 + $0x90] sm:$0xff] }
  0x80   : > { %1073 = vrot.lane.b32.xlu1 %v9822_v2, %s9455_s17  ;;  %v1145_v2 = vld [vmem:[#allocation2 + $0x98] sm:$0xff] }
  0x83   : > { %1268 = vrot.lane.b32.xlu0 %v9797_v47, %s9455_s17  ;;  %v1172_v47 = vpack.c.bf16 %v1145_v2, %v1144_v35 }
  0x84   : > { %1075 = vrot.lane.b32.xlu1 %v9826_v8, %s9455_s17  ;;  %v979_v8 = vpack.c.bf16 %v952_v6, %v951_v5  ;;  %v1156_v5 = vld [vmem:[#allocation2 + $0x120] sm:$0xff] }
  0x85   : > { %1188 = vst.msk [vmem:[#allocation3 + $0xb8] sm:$0xff] %vm332_vm0, %v1172_v47  ;;  %v1157_v47 = vld [vmem:[#allocation2 + $0x128] sm:$0xff] }
  0x86   : > { %995 = vst.msk [vmem:[#allocation3 + $0xb0] sm:$0xff] %vm332_vm0, %v979_v8  ;;  %v1178_v6 = vpack.c.bf16 %v1157_v47, %v1156_v5  ;;  %v964_v8 = vld [vmem:[#allocation2 + $0x111] sm:$0xff]  ;;  %v1348_v47 = vld [vmem:[#allocation2 + $0x122] sm:$0xff] }
  0x87   : > { %1270 = vrot.lane.b32.xlu0 %v9814_v57, %s9455_s17  ;;  %v1146_v57 = vld [vmem:[#allocation2 + $0xa8] sm:$0xff] }
  0x88   : > { %1077 = vrot.lane.b32.xlu1 %v9832_v13, %s9455_s17  ;;  %v1147_v13 = vld [vmem:[#allocation2 + $0xb0] sm:$0xff]  ;;  %1194 = vst.msk [vmem:[#allocation3 + $0x1a8] sm:$0xff] %vm332_vm0, %v1178_v6 }
  0x89   : > { %v1349_v6 = vld [vmem:[#allocation2 + $0x12a] sm:$0xff] }
  0x8b   : > { %1272 = vrot.lane.b32.xlu0 %v9830_v12, %s9455_s17  ;;  %v1173_v12 = vpack.c.bf16 %v1147_v13, %v1146_v57  ;;  %v9119_v57 = vld [vmem:[%s13076_s1 + $0x110] sm:$0xff]  }
  0x8c   : > { %1079 = vrot.lane.b32.xlu1 %v9834_v14, %s9455_s17  ;;  %v980_v14 = vpack.c.bf16 %v954_v10, %v953_v9  ;;  %v1337_v10 = vld [vmem:[#allocation2 + $0x9a] sm:$0xff] }
  0x8d   : > { %1189 = vst.msk [vmem:[#allocation3 + $0xe0] sm:$0xff] %vm332_vm0, %v1173_v12 }
  0x8e   : > { %996 = vst.msk [vmem:[#allocation3 + $0xd8] sm:$0xff] %vm332_vm0, %v980_v14 }
  0x8f   : > { %1274 = vrot.lane.b32.xlu0 %v9862_v30, %s9455_s17  ;;  %v1149_v30 = vld [vmem:[#allocation2 + $0xc8] sm:$0xff] }
  0x90   : > { %1081 = vrot.lane.b32.xlu1 %v9840_v17, %s9455_s17  ;;  %v1148_v17 = vld [vmem:[#allocation2 + $0xc0] sm:$0xff] }
  0x93   : > { %1276 = vrot.lane.b32.xlu0 %v9880_v46, %s9455_s17  ;;  %v1174_v46 = vpack.c.bf16 %v1149_v30, %v1148_v17  ;;  %v1338_v30 = vld [vmem:[#allocation2 + $0xaa] sm:$0xff] }
  0x94   : > { %1083 = vrot.lane.b32.xlu1 %v9847_v21, %s9455_s17  ;;  %v981_v21 = vpack.c.bf16 %v956_v36, %v955_v16  ;;  %v1339_v16 = vld [vmem:[#allocation2 + $0xb2] sm:$0xff] }
  0x95   : > { %1190 = vst.msk [vmem:[#allocation3 + $0x108] sm:$0xff] %vm332_vm0, %v1174_v46  ;;  %v9120_v36 = vld [vmem:[%s13076_s1 + $0x118] sm:$0xff]  }
  0x96   : > { %997 = vst.msk [vmem:[#allocation3 + $0x100] sm:$0xff] %vm332_vm0, %v981_v21  ;;  %v1365_v21 = vpack.c.bf16 %v1339_v16, %v1338_v30 }
  0x97   : > { %1278 = vrot.lane.b32.xlu0 %v9902_v60, %s9455_s17  ;;  %v1151_v60 = vld [vmem:[#allocation2 + $0xe0] sm:$0xff] }
  0x98   : > { %1085 = vrot.lane.b32.xlu1 %v9882_v49, %s9455_s17  ;;  %v1150_v49 = vld [vmem:[#allocation2 + $0xd8] sm:$0xff]  ;;  %1381 = vst.msk [vmem:[#allocation3 + $0xe8] sm:$0xff] %vm332_vm0, %v1365_v21 }
  0x9b   : > { %1280 = vrot.lane.b32.xlu0 %v9928_v15, %s9455_s17  ;;  %v1175_v15 = vpack.c.bf16 %v1151_v60, %v1150_v49 }
  0x9c   : > { %1087 = vrot.lane.b32.xlu1 %v9904_v61, %s9455_s17  ;;  %v982_v61 = vpack.c.bf16 %v958_v53, %v957_v18  ;;  %v1158_v18 = vld [vmem:[#allocation2 + $0x138] sm:$0xff] }
  0x9d   : > { %1191 = vst.msk [vmem:[#allocation3 + $0x130] sm:$0xff] %vm332_vm0, %v1175_v15  ;;  %v1159_v15 = vld [vmem:[#allocation2 + $0x140] sm:$0xff] }
  0x9e   : > { %998 = vst.msk [vmem:[#allocation3 + $0x128] sm:$0xff] %vm332_vm0, %v982_v61  ;;  %v1179_v53 = vpack.c.bf16 %v1159_v15, %v1158_v18  ;;  %v965_v61 = vld [vmem:[#allocation2 + $0x121] sm:$0xff]  ;;  %v1166_v18 = vld [vmem:[#allocation2 + $0x198] sm:$0xff] }
  0x9f   : > { %1282 = vrot.lane.b32.xlu0 %v9943_v25, %s9455_s17  ;;  %v1153_v25 = vld [vmem:[#allocation2 + $0xf8] sm:$0xff]  ;;  %v1167_v15 = vld [vmem:[#allocation2 + $0x1a0] sm:$0xff] }
  0xa0   : > { %1089 = vrot.lane.b32.xlu1 %v9906_v4, %s9455_s17  ;;  %v1152_v4 = vld [vmem:[#allocation2 + $0xf0] sm:$0xff]  ;;  %1195 = vst.msk [vmem:[#allocation3 + $0x1d0] sm:$0xff] %vm332_vm0, %v1179_v53  ;;  %v1183_v53 = vpack.c.bf16 %v1167_v15, %v1166_v18 }
  0xa2   : > { %1199 = vst.msk [vmem:[#allocation3 + $0x270] sm:$0xff] %vm332_vm0, %v1183_v53 }
  0xa3   : > { %1284 = vrot.lane.b32.xlu0 %v9964_v37, %s9455_s17  ;;  %v1176_v37 = vpack.c.bf16 %v1153_v25, %v1152_v4  ;;  %v966_v4 = vld [vmem:[#allocation2 + $0x129] sm:$0xff] }
  0xa4   : > { %1091 = vrot.lane.b32.xlu1 %v9908_v32, %s9455_s17  ;;  %v960_v32 = vld [vmem:[#allocation2 + $0xe1] sm:$0xff]  ;;  %v986_v25 = vpack.c.bf16 %v966_v4, %v965_v61 }
  0xa5   : > { %v983_v20 = vpack.c.bf16 %v960_v32, %v959_v19  ;;  %1192 = vst.msk [vmem:[#allocation3 + $0x158] sm:$0xff] %vm332_vm0, %v1176_v37  ;;  %v1340_v32 = vld [vmem:[#allocation2 + $0xc2] sm:$0xff] }
  0xa6   : > { %1002 = vst.msk [vmem:[#allocation3 + $0x1c8] sm:$0xff] %vm332_vm0, %v986_v25 }
  0xa7   : > { %1286 = vrot.lane.b32.xlu0 %v9984_v54, %s9455_s17  ;;  %999 = vst.msk [vmem:[#allocation3 + $0x150] sm:$0xff] %vm332_vm0, %v983_v20  ;;  %v1341_v20 = vld [vmem:[#allocation2 + $0xca] sm:$0xff] }
  0xa8   : > { %1093 = vrot.lane.b32.xlu1 %v9912_v7, %s9455_s17  ;;  %v1230_v7 = vld [vmem:[#allocation2 + $0x199] sm:$0xff] }
  0xab   : > { %1288 = vrot.lane.b32.xlu0 %v10004_v11, %s9455_s17  ;;  %v1360_v11 = vpack.c.bf16 %v1329_v56, %v1328_v41 }
  0xac   : > { %1095 = vrot.lane.b32.xlu1 %v9945_v26, %s9455_s17  ;;  %v1330_v26 = vld [vmem:[#allocation2 + $0x4a] sm:$0xff] }
  0xad   : > { %v880_v22 = vpop.permute.xlu0 %879  ;;  %v1361_v24 = vpack.c.bf16 %v1331_v33, %v1330_v26  ;;  %1376 = vst.msk [vmem:[#allocation3 + $0x20] sm:$0xff] %vm332_vm0, %v1360_v11  ;;  %v1160_v33 = vld [vmem:[#allocation2 + $0x150] sm:$0xff] }
  0xae   : > { %927 = vst.msk [vmem:[#allocation3 + $0x8] sm:$0xff] %vm734_vm2, %v880_v22  ;;  %v882_v54 = vpop.permute.xlu1 %881 }
  0xaf   : > { %928 = vst.msk [vmem:[#allocation3 + $0x30] sm:$0xff] %vm734_vm2, %v882_v54  ;;  %1290 = vrot.lane.b32.xlu0 %v10018_v28, %s9455_s17  ;;  %v1247_v28 = vpack.c.bf16 %v1231_v27, %v1230_v7  ;;  %v1366_v54 = vpack.c.bf16 %v1341_v20, %v1340_v32  ;;  %v1342_v7 = vld [vmem:[#allocation2 + $0xda] sm:$0xff]  ;;  %v1343_v27 = vld [vmem:[#allocation2 + $0xe2] sm:$0xff] }
  0xb0   : > { %1097 = vrot.lane.b32.xlu1 %v9966_v39, %s9455_s17  ;;  %1377 = vst.msk [vmem:[#allocation3 + $0x48] sm:$0xff] %vm332_vm0, %v1361_v24  ;;  %v962_v39 = vld [vmem:[#allocation2 + $0xf9] sm:$0xff]  ;;  %v1367_v56 = vpack.c.bf16 %v1343_v27, %v1342_v7  ;;  %v1359_v32 = vld [vmem:[#allocation2 + $0x1a2] sm:$0xff] }
  0xb1   : > { %v687_v34 = vpop.permute.xlu0 %686  ;;  %v984_v45 = vpack.c.bf16 %v962_v39, %v961_v42  ;;  %1382 = vst.msk [vmem:[#allocation3 + $0x110] sm:$0xff] %vm332_vm0, %v1366_v54  ;;  %v1161_v24 = vld [vmem:[#allocation2 + $0x158] sm:$0xff] }
  0xb2   : > { %735 = vst.msk [vmem:[#allocation3] sm:$0xff] %vm734_vm2, %v687_v34  ;;  %v689_v38 = vpop.permute.xlu1 %688  ;;  %v1180_v34 = vpack.c.bf16 %v1161_v24, %v1160_v33  ;;  %v1345_v39 = vld [vmem:[#allocation2 + $0xfa] sm:$0xff] }
  0xb3   : > { %736 = vst.msk [vmem:[#allocation3 + $0x28] sm:$0xff] %vm734_vm2, %v689_v38  ;;  %1292 = vrot.lane.b32.xlu0 %v9991_v58, %s9455_s17  ;;  %v1362_v58 = vpack.c.bf16 %v1333_v59, %v1332_v48  ;;  %v967_v38 = vld [vmem:[#allocation2 + $0x139] sm:$0xff] }
  0xb4   : > { %1099 = vrot.lane.b32.xlu1 %v9980_v50, %s9455_s17  ;;  %1000 = vst.msk [vmem:[#allocation3 + $0x178] sm:$0xff] %vm332_vm0, %v984_v45  ;;  %v1335_v50 = vld [vmem:[#allocation2 + $0x82] sm:$0xff]  ;;  %1383 = vst.msk [vmem:[#allocation3 + $0x138] sm:$0xff] %vm332_vm0, %v1367_v56  ;;  %v987_v40 = vpack.c.bf16 %v968_v44, %v967_v38 }
  0xb5   : > { %v884_v29 = vpop.permute.xlu0 %883  ;;  %v1393_v52 = vld [vmem:[#allocation3 + $0x8] sm:$0xff]  ;;  %v1363_v0 = vpack.c.bf16 %v1335_v50, %v1334_v23  ;;  %1378 = vst.msk [vmem:[#allocation3 + $0x70] sm:$0xff] %vm332_vm0, %v1362_v58  ;;  %1196 = vst.msk [vmem:[#allocation3 + $0x1f8] sm:$0xff] %vm332_vm0, %v1180_v34  ;;  %v1162_v50 = vld [vmem:[#allocation2 + $0x168] sm:$0xff] }
  0xb6   : > { %929 = vst.msk [vmem:[#allocation3 + $0x58] sm:$0xff] %vm734_vm2, %v884_v29  ;;  %1774 = vmatprep.mubr.bf16.mxu0 %v1393_v52  ;;  %v691_v55 = vpop.permute.xlu1 %690  ;;  %v1398_v62 = vld [vmem:[#allocation3 + $0x30] sm:$0xff]  ;;  %v1368_v29 = vpack.c.bf16 %v1345_v39, %v1344_v43  ;;  %v1346_v52 = vld [vmem:[#allocation2 + $0x10a] sm:$0xff] }
  0xb7   : > { %737 = vst.msk [vmem:[#allocation3 + $0x50] sm:$0xff] %vm734_vm2, %v691_v55  ;;  %1294 = vrot.lane.b32.xlu0 %v1247_v28, %s9455_s17  ;;  %v1347_v55 = vld [vmem:[#allocation2 + $0x112] sm:$0xff] }
  0xb8   : > { %1101 = vrot.lane.b32.xlu1 %v10023_v31, %s9455_s17  ;;  %1379 = vst.msk [vmem:[#allocation3 + $0x98] sm:$0xff] %vm332_vm0, %v1363_v0  ;;  %v963_v31 = vld [vmem:[#allocation2 + $0x109] sm:$0xff]  ;;  %1003 = vst.msk [vmem:[#allocation3 + $0x1f0] sm:$0xff] %vm332_vm0, %v987_v40  ;;  %v1369_v59 = vpack.c.bf16 %v1347_v55, %v1346_v52  ;;  %v969_v0 = vld [vmem:[#allocation2 + $0x151] sm:$0xff] }
  0xb9   : > { %v886_v3 = vpop.permute.xlu0 %885  ;;  %v1392_v35 = vld [vmem:[#allocation3] sm:$0xff]  ;;  %v985_v13 = vpack.c.bf16 %v964_v8, %v963_v31  ;;  %1384 = vst.msk [vmem:[#allocation3 + $0x160] sm:$0xff] %vm332_vm0, %v1368_v29  ;;  %v1370_v8 = vpack.c.bf16 %v1349_v6, %v1348_v47 }
  0xba   : > { %930 = vst.msk [vmem:[#allocation3 + $0x80] sm:$0xff] %vm734_vm2, %v886_v3  ;;  %1775 = vmatmul.mubr.bf16.vlgmr.msra.gmra.mrb[0].mxu0 %v1392_v35  ;;  %v693_v2 = vpop.permute.xlu1 %692  ;;  %v1397_v14 = vld [vmem:[#allocation3 + $0x28] sm:$0xff] }
  0xbb   : > { %8860 = vmatpush3.bf16.msra.mxu0 %v9894_v51  ;;  %738 = vst.msk [vmem:[#allocation3 + $0x78] sm:$0xff] %vm734_vm2, %v693_v2  ;;  %1782 = vmatprep.mubr.bf16.mxu0 %v1398_v62  ;;  %v1336_v51 = vld [vmem:[#allocation2 + $0x92] sm:$0xff] }
  0xbc   : > { %8861 = vmatprep.subr.bf16.mxu0 %v9104_v63  ;;  %1001 = vst.msk [vmem:[#allocation3 + $0x1a0] sm:$0xff] %vm332_vm0, %v985_v13  ;;  %v1364_v17 = vpack.c.bf16 %v1337_v10, %v1336_v51  ;;  %v1163_v62 = vld [vmem:[#allocation2 + $0x170] sm:$0xff]  ;;  %1385 = vst.msk [vmem:[#allocation3 + $0x188] sm:$0xff] %vm332_vm0, %v1369_v59  ;;  %v970_v3 = vld [vmem:[#allocation2 + $0x159] sm:$0xff] }
  0xbd   : > { %v888_v9 = vpop.permute.xlu0 %887  ;;  %v1403_v46 = vld [vmem:[#allocation3 + $0x58] sm:$0xff]  ;;  %v988_v35 = vpack.c.bf16 %v970_v3, %v969_v0  ;;  %1386 = vst.msk [vmem:[#allocation3 + $0x1b0] sm:$0xff] %vm332_vm0, %v1370_v8 }
  0xbe   : > { %931 = vst.msk [vmem:[#allocation3 + $0xa8] sm:$0xff] %vm734_vm2, %v888_v9  ;;  %v695_v12 = vpop.permute.xlu1 %694  ;;  %v1402_v22 = vld [vmem:[#allocation3 + $0x50] sm:$0xff]  ;;  %v1165_v51 = vld [vmem:[#allocation2 + $0x188] sm:$0xff] }
  0xbf   : > { %739 = vst.msk [vmem:[#allocation3 + $0xa0] sm:$0xff] %vm734_vm2, %v695_v12  ;;  %8862 = vmatpush3.bf16.msra.mxu0 %v9104_v63  ;;  %v1181_v63 = vpack.c.bf16 %v1163_v62, %v1162_v50  ;;  %v1164_v12 = vld [vmem:[#allocation2 + $0x180] sm:$0xff] }
  0xc0   : > { %8863 = vmatprep.subr.bf16.mxu0 %v9119_v57  ;;  %1380 = vst.msk [vmem:[#allocation3 + $0xc0] sm:$0xff] %vm332_vm0, %v1364_v17  ;;  %1004 = vst.msk [vmem:[#allocation3 + $0x218] sm:$0xff] %vm332_vm0, %v988_v35  ;;  %v1182_v10 = vpack.c.bf16 %v1165_v51, %v1164_v12  ;;  %v972_v17 = vld [vmem:[#allocation2 + $0x171] sm:$0xff] }
  0xc1   : > { %v890_v49 = vpop.permute.xlu0 %889  ;;  %v1408_v41 = vld [vmem:[#allocation3 + $0x80] sm:$0xff]  ;;  %1197 = vst.msk [vmem:[#allocation3 + $0x220] sm:$0xff] %vm332_vm0, %v1181_v63 }
  0xc2   : > { %932 = vst.msk [vmem:[#allocation3 + $0xd0] sm:$0xff] %vm734_vm2, %v890_v49  ;;  %v697_v60 = vpop.permute.xlu1 %696  ;;  %1783 = vmatmul.mubr.bf16.gmra.mrb[4].mxu0 %v1397_v14  ;;  %v1407_v45 = vld [vmem:[#allocation3 + $0x78] sm:$0xff] }
  0xc3   : > { %740 = vst.msk [vmem:[#allocation3 + $0xc8] sm:$0xff] %vm734_vm2, %v697_v60  ;;  %1790 = vmatprep.mubr.bf16.mxu0 %v1403_v46  ;;  %8864 = vmatpush3.bf16.msra.mxu0 %v9119_v57  ;;  %v971_v14 = vld [vmem:[#allocation2 + $0x169] sm:$0xff] }
  0xc4   : > { %8865 = vmatprep.subr.bf16.mxu0 %v9120_v36  ;;  %v989_v30 = vpack.c.bf16 %v972_v17, %v971_v14  ;;  %1198 = vst.msk [vmem:[#allocation3 + $0x248] sm:$0xff] %vm332_vm0, %v1182_v10 }
  0xc5   : > { %v892_v19 = vpop.permute.xlu0 %891  ;;  %v1413_v48 = vld [vmem:[#allocation3 + $0xa8] sm:$0xff] }
  0xc6   : > { %933 = vst.msk [vmem:[#allocation3 + $0xf8] sm:$0xff] %vm734_vm2, %v892_v19  ;;  %v699_v37 = vpop.permute.xlu1 %698  ;;  %v1412_v31 = vld [vmem:[#allocation3 + $0xa0] sm:$0xff]  ;;  %v1358_v19 = vld [vmem:[#allocation2 + $0x19a] sm:$0xff] }
  0xc7   : > { %741 = vst.msk [vmem:[#allocation3 + $0xf0] sm:$0xff] %vm734_vm2, %v699_v37  ;;  %8866 = vmatpush3.bf16.msra.mxu0 %v9120_v36 }
  0xc8   : > { %1005 = vst.msk [vmem:[#allocation3 + $0x240] sm:$0xff] %vm332_vm0, %v989_v30 }
  0xc9   : > { %v894_v11 = vpop.permute.xlu0 %893  ;;  %v1418_v57 = vld [vmem:[#allocation3 + $0xd0] sm:$0xff] }
  0xca   : > { %934 = vst.msk [vmem:[#allocation3 + $0x120] sm:$0xff] %vm734_vm2, %v894_v11  ;;  %v701_v26 = vpop.permute.xlu1 %700  ;;  %1791 = vmatmul.mubr.bf16.gmra.mrb[8].mxu0 %v1402_v22  ;;  %v1417_v36 = vld [vmem:[#allocation3 + $0xc8] sm:$0xff]  ;;  %v1375_v22 = vpack.c.bf16 %v1359_v32, %v1358_v19 }
  0xcb   : > { %742 = vst.msk [vmem:[#allocation3 + $0x118] sm:$0xff] %vm734_vm2, %v701_v26  ;;  %1798 = vmatprep.mubr.bf16.mxu0 %v1408_v41 }
  0xcc   : > { %1391 = vst.msk [vmem:[#allocation3 + $0x278] sm:$0xff] %vm332_vm0, %v1375_v22 }
  0xcd   : > { %v896_v42 = vpop.permute.xlu0 %895  ;;  %v1423_v21 = vld [vmem:[#allocation3 + $0xf8] sm:$0xff] }
  0xce   : > { %935 = vst.msk [vmem:[#allocation3 + $0x148] sm:$0xff] %vm734_vm2, %v896_v42  ;;  %v703_v28 = vpop.permute.xlu1 %702  ;;  %v1422_v25 = vld [vmem:[#allocation3 + $0xf0] sm:$0xff] }
  0xcf   : > { %743 = vst.msk [vmem:[#allocation3 + $0x140] sm:$0xff] %vm734_vm2, %v703_v28 }
  0xd1   : > { %v898_v58 = vpop.permute.xlu0 %897  ;;  %v1428_v37 = vld [vmem:[#allocation3 + $0x120] sm:$0xff] }
  0xd2   : > { %936 = vst.msk [vmem:[#allocation3 + $0x170] sm:$0xff] %vm734_vm2, %v898_v58  ;;  %v705_v23 = vpop.permute.xlu1 %704  ;;  %1799 = vmatmul.mubr.bf16.gmra.mrb[12].mxu0 %v1407_v45  ;;  %v1427_v41 = vld [vmem:[#allocation3 + $0x118] sm:$0xff] }
  0xd3   : > { %744 = vst.msk [vmem:[#allocation3 + $0x168] sm:$0xff] %vm734_vm2, %v705_v23  ;;  %1806 = vmatprep.mubr.bf16.mxu0 %v1413_v48  ;;  %v10185_v33 = vld [vmem:[#allocation3 + $0x278] sm:$0xff] }
  0xd4   : > { %3195 = vst.msk [vmem:[#allocation3 + $0x278] sm:$0xff] %vm332_vm0, %v1375_v22 }
  0xd5   : > { %v900_v2 = vpop.permute.xlu0 %899  ;;  %v1433_v56 = vld [vmem:[#allocation3 + $0x148] sm:$0xff] }
  0xd6   : > { %937 = vst.msk [vmem:[#allocation3 + $0x198] sm:$0xff] %vm734_vm2, %v900_v2  ;;  %v707_v5 = vpop.permute.xlu1 %706  ;;  %v1432_v40 = vld [vmem:[#allocation3 + $0x140] sm:$0xff] }
  0xd7   : > { %745 = vst.msk [vmem:[#allocation3 + $0x190] sm:$0xff] %vm734_vm2, %v707_v5 }
  0xd9   : > { %v902_v13 = vpop.permute.xlu0 %901  ;;  %v1438_v42 = vld [vmem:[#allocation3 + $0x170] sm:$0xff] }
  0xda   : > { %938 = vst.msk [vmem:[#allocation3 + $0x1c0] sm:$0xff] %vm734_vm2, %v902_v13  ;;  %v709_v9 = vpop.permute.xlu1 %708  ;;  %1807 = vmatmul.mubr.bf16.gmra.mrb[16].mxu0 %v1412_v31  ;;  %v1437_v48 = vld [vmem:[#allocation3 + $0x168] sm:$0xff] }
  0xdb   : > { %746 = vst.msk [vmem:[#allocation3 + $0x1b8] sm:$0xff] %vm734_vm2, %v709_v9  ;;  %1814 = vmatprep.mubr.bf16.mxu0 %v1418_v57 }
  0xdd   : > { %v904_v16 = vpop.permute.xlu0 %903  ;;  %v1443_v59 = vld [vmem:[#allocation3 + $0x198] sm:$0xff] }
  0xde   : > { %939 = vst.msk [vmem:[#allocation3 + $0x1e8] sm:$0xff] %vm734_vm2, %v904_v16  ;;  %v711_v46 = vpop.permute.xlu1 %710  ;;  %v1442_v3 = vld [vmem:[#allocation3 + $0x190] sm:$0xff] }
  0xdf   : > { %747 = vst.msk [vmem:[#allocation3 + $0x1e0] sm:$0xff] %vm734_vm2, %v711_v46 }
  0xe1   : > { %v906_v49 = vpop.permute.xlu0 %905  ;;  %v1448_v35 = vld [vmem:[#allocation3 + $0x1c0] sm:$0xff] }
  0xe2   : > { %940 = vst.msk [vmem:[#allocation3 + $0x210] sm:$0xff] %vm734_vm2, %v906_v49  ;;  %v713_v60 = vpop.permute.xlu1 %712  ;;  %1815 = vmatmul.mubr.bf16.gmra.mrb[20].mxu0 %v1417_v36  ;;  %v1447_v57 = vld [vmem:[#allocation3 + $0x1b8] sm:$0xff] }
  0xe3   : > { %748 = vst.msk [vmem:[#allocation3 + $0x208] sm:$0xff] %vm734_vm2, %v713_v60  ;;  %1822 = vmatprep.mubr.bf16.mxu0 %v1423_v21 }
  0xe5   : > { %v908_v61 = vpop.permute.xlu0 %907  ;;  %v1453_v13 = vld [vmem:[#allocation3 + $0x1e8] sm:$0xff] }
  0xe6   : > { %941 = vst.msk [vmem:[#allocation3 + $0x238] sm:$0xff] %vm734_vm2, %v908_v61  ;;  %v715_v4 = vpop.permute.xlu1 %714  ;;  %v1452_v30 = vld [vmem:[#allocation3 + $0x1e0] sm:$0xff] }
  0xe7   : > { %749 = vst.msk [vmem:[#allocation3 + $0x230] sm:$0xff] %vm734_vm2, %v715_v4 }
  0xe9   : > { %v910_v20 = vpop.permute.xlu0 %909  ;;  %v1458_v16 = vld [vmem:[#allocation3 + $0x210] sm:$0xff] }
  0xea   : > { %942 = vst.msk [vmem:[#allocation3 + $0x260] sm:$0xff] %vm734_vm2, %v910_v20  ;;  %v717_v54 = vpop.permute.xlu1 %716  ;;  %1823 = vmatmul.mubr.bf16.gmra.mrb[24].mxu0 %v1422_v25  ;;  %v1457_v15 = vld [vmem:[#allocation3 + $0x208] sm:$0xff] }
  0xeb   : > { %750 = vst.msk [vmem:[#allocation3 + $0x258] sm:$0xff] %vm734_vm2, %v717_v54  ;;  %1830 = vmatprep.mubr.bf16.mxu0 %v1428_v37 }
  0xed   : > { %v1265_v7 = vpop.permute.xlu0 %1264  ;;  %v1463_v53 = vld [vmem:[#allocation3 + $0x238] sm:$0xff] }
  0xee   : > { %1312 = vst.msk [vmem:[#allocation3 + $0x18] sm:$0xff] %vm734_vm2, %v1265_v7  ;;  %v1072_v27 = vpop.permute.xlu1 %1071  ;;  %v1462_v20 = vld [vmem:[#allocation3 + $0x230] sm:$0xff] }
  0xef   : > { %1119 = vst.msk [vmem:[#allocation3 + $0x10] sm:$0xff] %vm734_vm2, %v1072_v27 }
  0xf1   : > { %v1267_v11 = vpop.permute.xlu0 %1266  ;;  %v1468_v22 = vld [vmem:[#allocation3 + $0x260] sm:$0xff] }
  0xf2   : > { %1831 = vmatmul.mubr.bf16.gmra.mrb[28].mxu0 %v1427_v41  ;;  %1313 = vst.msk [vmem:[#allocation3 + $0x40] sm:$0xff] %vm734_vm2, %v1267_v11  ;;  %v1074_v26 = vpop.permute.xlu1 %1073  ;;  %v1467_v11 = vld [vmem:[#allocation3 + $0x258] sm:$0xff] }
  0xf3   : > { %1120 = vst.msk [vmem:[#allocation3 + $0x38] sm:$0xff] %vm734_vm2, %v1074_v26  ;;  %1838 = vmatprep.mubr.bf16.mxu0 %v1433_v56  ;;  %v1396_v56 = vld [vmem:[#allocation3 + $0x20] sm:$0xff] }
  0xf5   : > { %v1395_v24 = vld [vmem:[#allocation3 + $0x18] sm:$0xff]  ;;  %v1269_v34 = vpop.permute.xlu0 %1268 }
  0xf6   : > { %1935 = vmatprep.mubr.bf16.mxu1 %v1395_v24  ;;  %v1394_v38 = vld [vmem:[#allocation3 + $0x10] sm:$0xff]  ;;  %1314 = vst.msk [vmem:[#allocation3 + $0x68] sm:$0xff] %vm734_vm2, %v1269_v34  ;;  %v1076_v44 = vpop.permute.xlu1 %1075  ;;  %v1401_v34 = vld [vmem:[#allocation3 + $0x48] sm:$0xff] }
  0xf7   : > { %1936 = vmatmul.mubr.bf16.vlgmr.msra.gmra.mrb[0].mxu1 %v1394_v38  ;;  %1121 = vst.msk [vmem:[#allocation3 + $0x60] sm:$0xff] %vm734_vm2, %v1076_v44  ;;  %v1406_v38 = vld [vmem:[#allocation3 + $0x70] sm:$0xff] }
  0xf9   : > { %v1400_v28 = vld [vmem:[#allocation3 + $0x40] sm:$0xff]  ;;  %v1271_v43 = vpop.permute.xlu0 %1270 }
  0xfa   : > { %1839 = vmatmul.mubr.bf16.gmra.mrb[32].mxu0 %v1432_v40  ;;  %1943 = vmatprep.mubr.bf16.mxu1 %v1400_v28  ;;  %1315 = vst.msk [vmem:[#allocation3 + $0x90] sm:$0xff] %vm734_vm2, %v1271_v43  ;;  %v1078_v39 = vpop.permute.xlu1 %1077  ;;  %v1399_v45 = vld [vmem:[#allocation3 + $0x38] sm:$0xff]  ;;  %v1416_v28 = vld [vmem:[#allocation3 + $0xc0] sm:$0xff] }
  0xfb   : > { %1846 = vmatprep.mubr.bf16.mxu0 %v1438_v42  ;;  %1122 = vst.msk [vmem:[#allocation3 + $0x88] sm:$0xff] %vm734_vm2, %v1078_v39  ;;  %v1411_v42 = vld [vmem:[#allocation3 + $0x98] sm:$0xff] }
  0xfd   : > { %v1405_v29 = vld [vmem:[#allocation3 + $0x68] sm:$0xff]  ;;  %v1273_v52 = vpop.permute.xlu0 %1272 }
  0xfe   : > { %1316 = vst.msk [vmem:[#allocation3 + $0xb8] sm:$0xff] %vm734_vm2, %v1273_v52  ;;  %v1080_v55 = vpop.permute.xlu1 %1079  ;;  %v1404_v50 = vld [vmem:[#allocation3 + $0x60] sm:$0xff] }
  0xff   : > { %1944 = vmatmul.mubr.bf16.gmra.mrb[4].mxu1 %v1399_v45  ;;  %1123 = vst.msk [vmem:[#allocation3 + $0xb0] sm:$0xff] %vm734_vm2, %v1080_v55  ;;  %v1421_v45 = vld [vmem:[#allocation3 + $0xe8] sm:$0xff] }
 0x100   : > { %1951 = vmatprep.mubr.bf16.mxu1 %v1405_v29  ;;  %v1426_v29 = vld [vmem:[#allocation3 + $0x110] sm:$0xff] }
 0x101   : > { %v1275_v58 = vpop.permute.xlu0 %1274  ;;  %v1410_v62 = vld [vmem:[#allocation3 + $0x90] sm:$0xff] }
 0x102   : > { %1847 = vmatmul.mubr.bf16.gmra.mrb[36].mxu0 %v1437_v48  ;;  %1317 = vst.msk [vmem:[#allocation3 + $0xe0] sm:$0xff] %vm734_vm2, %v1275_v58  ;;  %v1082_v23 = vpop.permute.xlu1 %1081  ;;  %v1409_v47 = vld [vmem:[#allocation3 + $0x88] sm:$0xff]  ;;  %v1431_v48 = vld [vmem:[#allocation3 + $0x138] sm:$0xff] }
 0x103   : > { %1854 = vmatprep.mubr.bf16.mxu0 %v1443_v59  ;;  %1124 = vst.msk [vmem:[#allocation3 + $0xd8] sm:$0xff] %vm734_vm2, %v1082_v23  ;;  %v1436_v59 = vld [vmem:[#allocation3 + $0x160] sm:$0xff] }
 0x105   : > { %v1277_v63 = vpop.permute.xlu0 %1276  ;;  %v1415_v6 = vld [vmem:[#allocation3 + $0xb8] sm:$0xff] }
 0x106   : > { %1318 = vst.msk [vmem:[#allocation3 + $0x108] sm:$0xff] %vm734_vm2, %v1277_v63  ;;  %v1084_v0 = vpop.permute.xlu1 %1083  ;;  %v1414_v51 = vld [vmem:[#allocation3 + $0xb0] sm:$0xff] }
 0x107   : > { %1952 = vmatmul.mubr.bf16.gmra.mrb[8].mxu1 %v1404_v50  ;;  %1125 = vst.msk [vmem:[#allocation3 + $0x100] sm:$0xff] %vm734_vm2, %v1084_v0  ;;  %v1441_v50 = vld [vmem:[#allocation3 + $0x188] sm:$0xff] }
 0x108   : > { %1959 = vmatprep.mubr.bf16.mxu1 %v1410_v62  ;;  %v1446_v62 = vld [vmem:[#allocation3 + $0x1b0] sm:$0xff] }
 0x109   : > { %v1279_v2 = vpop.permute.xlu0 %1278  ;;  %v1420_v10 = vld [vmem:[#allocation3 + $0xe0] sm:$0xff] }
 0x10a   : > { %1855 = vmatmul.mubr.bf16.gmra.mrb[40].mxu0 %v1442_v3  ;;  %1319 = vst.msk [vmem:[#allocation3 + $0x130] sm:$0xff] %vm734_vm2, %v1279_v2  ;;  %v1086_v5 = vpop.permute.xlu1 %1085  ;;  %v1419_v21 = vld [vmem:[#allocation3 + $0xd8] sm:$0xff] }
 0x10b   : > { %1862 = vmatprep.mubr.bf16.mxu0 %v1448_v35  ;;  %1126 = vst.msk [vmem:[#allocation3 + $0x128] sm:$0xff] %vm734_vm2, %v1086_v5  ;;  %v1451_v3 = vld [vmem:[#allocation3 + $0x1d8] sm:$0xff]  ;;  %v1456_v35 = vld [vmem:[#allocation3 + $0x200] sm:$0xff] }
 0x10d   : > { %v1281_v31 = vpop.permute.xlu0 %1280  ;;  %v1425_v49 = vld [vmem:[#allocation3 + $0x108] sm:$0xff] }
 0x10e   : > { %1320 = vst.msk [vmem:[#allocation3 + $0x158] sm:$0xff] %vm734_vm2, %v1281_v31  ;;  %v1088_v8 = vpop.permute.xlu1 %1087  ;;  %v1424_v25 = vld [vmem:[#allocation3 + $0x100] sm:$0xff] }
 0x10f   : > { %1960 = vmatmul.mubr.bf16.gmra.mrb[12].mxu1 %v1409_v47  ;;  %1127 = vst.msk [vmem:[#allocation3 + $0x150] sm:$0xff] %vm734_vm2, %v1088_v8  ;;  %v1461_v47 = vld [vmem:[#allocation3 + $0x228] sm:$0xff] }
 0x110   : > { %1967 = vmatprep.mubr.bf16.mxu1 %v1415_v6  ;;  %v1466_v6 = vld [vmem:[#allocation3 + $0x250] sm:$0xff] }
 0x111   : > { %v1283_v9 = vpop.permute.xlu0 %1282  ;;  %v1430_v19 = vld [vmem:[#allocation3 + $0x130] sm:$0xff] }
 0x112   : > { %1863 = vmatmul.mubr.bf16.gmra.mrb[44].mxu0 %v1447_v57  ;;  %1321 = vst.msk [vmem:[#allocation3 + $0x180] sm:$0xff] %vm734_vm2, %v1283_v9  ;;  %v1090_v12 = vpop.permute.xlu1 %1089  ;;  %v1429_v27 = vld [vmem:[#allocation3 + $0x128] sm:$0xff] }
 0x113   : > { %1870 = vmatprep.mubr.bf16.mxu0 %v1453_v13  ;;  %1128 = vst.msk [vmem:[#allocation3 + $0x178] sm:$0xff] %vm734_vm2, %v1090_v12 }
 0x115   : > { %v1285_v14 = vpop.permute.xlu0 %1284  ;;  %v1435_v41 = vld [vmem:[#allocation3 + $0x158] sm:$0xff] }
 0x116   : > { %1322 = vst.msk [vmem:[#allocation3 + $0x1a8] sm:$0xff] %vm734_vm2, %v1285_v14  ;;  %v1092_v17 = vpop.permute.xlu1 %1091  ;;  %v1434_v26 = vld [vmem:[#allocation3 + $0x150] sm:$0xff] }
 0x117   : > { %1968 = vmatmul.mubr.bf16.gmra.mrb[16].mxu1 %v1414_v51  ;;  %1129 = vst.msk [vmem:[#allocation3 + $0x1a0] sm:$0xff] %vm734_vm2, %v1092_v17 }
 0x118   : > { %1975 = vmatprep.mubr.bf16.mxu1 %v1420_v10 }
 0x119   : > { %v1287_v46 = vpop.permute.xlu0 %1286  ;;  %v1440_v24 = vld [vmem:[#allocation3 + $0x180] sm:$0xff] }
 0x11a   : > { %1871 = vmatmul.mubr.bf16.gmra.mrb[48].mxu0 %v1452_v30  ;;  %1323 = vst.msk [vmem:[#allocation3 + $0x1d0] sm:$0xff] %vm734_vm2, %v1287_v46  ;;  %v1094_v36 = vpop.permute.xlu1 %1093  ;;  %v1439_v44 = vld [vmem:[#allocation3 + $0x178] sm:$0xff] }
 0x11b   : > { %1878 = vmatprep.mubr.bf16.mxu0 %v1458_v16  ;;  %1130 = vst.msk [vmem:[#allocation3 + $0x1c8] sm:$0xff] %vm734_vm2, %v1094_v36  ;;  %v2428_v46 = vld [vmem:[#allocation2 + $0x1] sm:$0xff]  ;;  %v2429_v36 = vld [vmem:[#allocation2 + $0x9] sm:$0xff] }
 0x11d   : > { %v1289_v60 = vpop.permute.xlu0 %1288  ;;  %v1445_v40 = vld [vmem:[#allocation3 + $0x1a8] sm:$0xff] }
 0x11e   : > { %1324 = vst.msk [vmem:[#allocation3 + $0x1f8] sm:$0xff] %vm734_vm2, %v1289_v60  ;;  %v1096_v18 = vpop.permute.xlu1 %1095  ;;  %v1444_v43 = vld [vmem:[#allocation3 + $0x1a0] sm:$0xff]  ;;  %v9121_v60 = vld [vmem:[%s13076_s1 + $0x160] sm:$0xff]  }
 0x11f   : > { %1976 = vmatmul.mubr.bf16.gmra.mrb[20].mxu1 %v1419_v21  ;;  %1131 = vst.msk [vmem:[#allocation3 + $0x1f0] sm:$0xff] %vm734_vm2, %v1096_v18  ;;  %v9122_v18 = vld [vmem:[%s13076_s1 + $0x120] sm:$0xff]   ;;  %8337 = vmatprep.subr.bf16.mxu1 %v9121_v60 }
 0x120   : > { %1983 = vmatprep.mubr.bf16.mxu1 %v1425_v49  ;;  %v2460_v49 = vpack.c.bf16 %v2429_v36, %v2428_v46  ;;  %8338 = vmatpush3.bf16.msra.mxu1 %v9122_v18 }
 0x121   : > { %v1291_v61 = vpop.permute.xlu0 %1290  ;;  %v1450_v39 = vld [vmem:[#allocation3 + $0x1d0] sm:$0xff] }
 0x122   : > { %1879 = vmatmul.mubr.bf16.gmra.mrb[52].mxu0 %v1457_v15  ;;  %1325 = vst.msk [vmem:[#allocation3 + $0x220] sm:$0xff] %vm734_vm2, %v1291_v61  ;;  %v1098_v4 = vpop.permute.xlu1 %1097  ;;  %v1449_v52 = vld [vmem:[#allocation3 + $0x1c8] sm:$0xff]  ;;  %2492 = vrot.lane.b32.xlu1 %v2460_v49, %s9455_s17 }
 0x123   : > { %1886 = vmatprep.mubr.bf16.mxu0 %v1463_v53  ;;  %1132 = vst.msk [vmem:[#allocation3 + $0x218] sm:$0xff] %vm734_vm2, %v1098_v4 }
 0x125   : > { %v1293_v37 = vpop.permute.xlu0 %1292  ;;  %v1455_v55 = vld [vmem:[#allocation3 + $0x1f8] sm:$0xff] }
 0x126   : > { %1326 = vst.msk [vmem:[#allocation3 + $0x248] sm:$0xff] %vm734_vm2, %v1293_v37  ;;  %v1100_v32 = vpop.permute.xlu1 %1099  ;;  %v1454_v58 = vld [vmem:[#allocation3 + $0x1f0] sm:$0xff] }
 0x127   : > { %1984 = vmatmul.mubr.bf16.gmra.mrb[24].mxu1 %v1424_v25  ;;  %1133 = vst.msk [vmem:[#allocation3 + $0x240] sm:$0xff] %vm734_vm2, %v1100_v32 }
 0x128   : > { %1991 = vmatprep.mubr.bf16.mxu1 %v1430_v19 }
 0x129   : > { %v1295_v54 = vpop.permute.xlu0 %1294  ;;  %v1460_v23 = vld [vmem:[#allocation3 + $0x220] sm:$0xff] }
 0x12a   : > { %1887 = vmatmul.mubr.bf16.gmra.mrb[56].mxu0 %v1462_v20  ;;  %1327 = vst.msk [vmem:[#allocation3 + $0x270] sm:$0xff] %vm734_vm2, %v1295_v54  ;;  %v1102_v7 = vpop.permute.xlu1 %1101  ;;  %v1459_v63 = vld [vmem:[#allocation3 + $0x218] sm:$0xff] }
 0x12b   : > { %1894 = vmatprep.mubr.bf16.mxu0 %v1468_v22  ;;  %1134 = vst.msk [vmem:[#allocation3 + $0x268] sm:$0xff] %vm734_vm2, %v1102_v7 }
 0x12d   : > { %v1465_v0 = vld [vmem:[#allocation3 + $0x248] sm:$0xff] }
 0x12e   : > { %v1464_v2 = vld [vmem:[#allocation3 + $0x240] sm:$0xff] }
 0x12f   : > { %1992 = vmatmul.mubr.bf16.gmra.mrb[28].mxu1 %v1429_v27  ;;  %v9123_v27 = vld [vmem:[%s13076_s1 + $0x168] sm:$0xff]  }
 0x130   : > { %1999 = vmatprep.mubr.bf16.mxu1 %v1435_v41  ;;  %v9124_v41 = vld [vmem:[%s13076_s1 + $0x128] sm:$0xff]   ;;  %8339 = vmatprep.subr.bf16.mxu1 %v9123_v27 }
 0x131   : > { %v1470_v5 = vld [vmem:[#allocation3 + $0x270] sm:$0xff]  ;;  %8340 = vmatpush3.bf16.msra.mxu1 %v9124_v41 }
 0x132   : > { %1895 = vmatmul.mubr.bf16.gmra.mrb[60].mxu0 %v1467_v11  ;;  %v1469_v31 = vld [vmem:[#allocation3 + $0x268] sm:$0xff] }
 0x133   : > { %8867 = vmatprep.mubr.msk.bf16.mxu0 %vm332_vm0, %v1396_v56 }
 0x137   : > { %2000 = vmatmul.mubr.bf16.gmra.mrb[32].mxu1 %v1434_v26 }
 0x138   : > { %2007 = vmatprep.mubr.bf16.mxu1 %v1440_v24 }
 0x13a   : > { %8868 = vmatmul.mubr.msk.bf16.vlgmr.msra.gmra.mrb[64].mxu0 %vm332_vm0, %v1401_v34 }
 0x13b   : > { %8871 = vmatprep.mubr.msk.bf16.mxu0 %vm332_vm0, %v1406_v38 }
 0x13f   : > { %2008 = vmatmul.mubr.bf16.gmra.mrb[36].mxu1 %v1439_v44 }
 0x140   : > { %2015 = vmatprep.mubr.bf16.mxu1 %v1445_v40 }
 0x142   : > { %8872 = vmatmul.mubr.msk.bf16.gmra.mrb[68].mxu0 %vm332_vm0, %v1411_v42 }
 0x143   : > { %8875 = vmatprep.mubr.msk.bf16.mxu0 %vm332_vm0, %v1416_v28 }
 0x147   : > { %2016 = vmatmul.mubr.bf16.gmra.mrb[40].mxu1 %v1444_v43 }
 0x148   : > { %2023 = vmatprep.mubr.bf16.mxu1 %v1450_v39 }
 0x14a   : > { %8876 = vmatmul.mubr.msk.bf16.gmra.mrb[72].mxu0 %vm332_vm0, %v1421_v45  ;;  %v9125_v45 = vld [vmem:[%s13076_s1 + $0x170] sm:$0xff]  }
 0x14b   : > { %8879 = vmatprep.mubr.msk.bf16.mxu0 %vm332_vm0, %v1426_v29  ;;  %v9126_v29 = vld [vmem:[%s13076_s1 + $0x130] sm:$0xff]   ;;  %8341 = vmatprep.subr.bf16.mxu1 %v9125_v45 }
 0x14c   : > { %8342 = vmatpush3.bf16.msra.mxu1 %v9126_v29 }
 0x14f   : > { %2024 = vmatmul.mubr.bf16.gmra.mrb[44].mxu1 %v1449_v52 }
 0x150   : > { %2031 = vmatprep.mubr.bf16.mxu1 %v1455_v55 }
 0x152   : > { %8880 = vmatmul.mubr.msk.bf16.gmra.mrb[76].mxu0 %vm332_vm0, %v1431_v48 }
 0x153   : > { %8883 = vmatprep.mubr.msk.bf16.mxu0 %vm332_vm0, %v1436_v59 }
 0x157   : > { %2032 = vmatmul.mubr.bf16.gmra.mrb[48].mxu1 %v1454_v58 }
 0x158   : > { %2039 = vmatprep.mubr.bf16.mxu1 %v1460_v23 }
 0x15a   : > { %8884 = vmatmul.mubr.msk.bf16.gmra.mrb[80].mxu0 %vm332_vm0, %v1441_v50 }
 0x15b   : > { %8887 = vmatprep.mubr.msk.bf16.mxu0 %vm332_vm0, %v1446_v62 }
 0x15f   : > { %2040 = vmatmul.mubr.bf16.gmra.mrb[52].mxu1 %v1459_v63 }
 0x160   : > { %2047 = vmatprep.mubr.bf16.mxu1 %v1465_v0 }
 0x162   : > { %8888 = vmatmul.mubr.msk.bf16.gmra.mrb[84].mxu0 %vm332_vm0, %v1451_v3  ;;  %v10286_v3 = vld [vmem:[%s13077_s2] ss:$0 sm:$0xff] }
 0x163   : > { %8891 = vmatprep.mubr.msk.bf16.mxu0 %vm332_vm0, %v1456_v35 }
 0x167   : > { %2048 = vmatmul.mubr.bf16.gmra.mrb[56].mxu1 %v1464_v2 }
 0x168   : > { %2055 = vmatprep.mubr.bf16.mxu1 %v1470_v5 }
 0x16a   : > { %8892 = vmatmul.mubr.msk.bf16.gmra.mrb[88].mxu0 %vm332_vm0, %v1461_v47 }
 0x16b   : > { %8895 = vmatprep.mubr.msk.bf16.mxu0 %vm332_vm0, %v1466_v6 }
 0x16f   : > { %2056 = vmatmul.mubr.bf16.gmra.mrb[60].mxu1 %v1469_v31 }
 0x172   : > { %8896 = vmatmul.mubr.msk.bf16.gmra.mrb[92].mxu0 %vm332_vm0, %v10185_v33 }
 0x18d   : > { %v8109_v8 = vpop.f32.mrb[0].mxu0 }
 0x18e   : > { %v8110_v57 = vpop.f32.mrb[1].mxu0 }
 0x18f   : > { %v10234_v13 = vadd.f32 %v8110_v57, %v8109_v8  ;;  %v8112_v9 = vpop.f32.mrb[2].mxu0 }
 0x190   : > { %v8113_v12 = vpop.f32.mrb[3].mxu0 }
 0x191   : > { %v10236_v51 = vadd.f32 %v8113_v12, %v8112_v9  ;;  %v1777_v47 = vadd.f32 %v10234_v13, %v10286_v3 }
 0x193   : > { %v1780_v9 = vadd.f32 %v10236_v51, %v10286_v3 }
 0x195   : > { %v8115_v10 = vpop.f32.mrb[4].mxu0 }
 0x196   : > { %v8116_v14 = vpop.f32.mrb[5].mxu0 }
 0x197   : > { %v10238_v17 = vadd.f32 %v8116_v14, %v8115_v10  ;;  %v8118_v30 = vpop.f32.mrb[6].mxu0 }
 0x198   : > { %v8119_v16 = vpop.f32.mrb[7].mxu0 }
 0x199   : > { %v10240_v21 = vadd.f32 %v8119_v16, %v8118_v30  ;;  %v9127_v30 = vld [vmem:[%s13076_s1 + $0x178] sm:$0xff]   ;;  %v1785_v18 = vadd.f32 %v10238_v17, %v10286_v3  ;;  %v9130_v17 = vld [vmem:[%s13076_s1 + $0x140] sm:$0xff]  }
 0x19a   : > { %v9128_v16 = vld [vmem:[%s13076_s1 + $0x138] sm:$0xff]   ;;  %8343 = vmatprep.subr.bf16.mxu1 %v9127_v30 }
 0x19b   : > { %8344 = vmatpush3.bf16.msra.mxu1 %v9128_v16 }
 0x19d   : > { %v8121_v33 = vpop.f32.mrb[8].mxu0 }
 0x19e   : > { %v8122_v15 = vpop.f32.mrb[9].mxu0 }
 0x19f   : > { %v10249_v53 = vadd.f32 %v8122_v15, %v8121_v33  ;;  %v8124_v61 = vpop.f32.mrb[10].mxu0 }
 0x1a0   : > { %v8125_v4 = vpop.f32.mrb[11].mxu0 }
 0x1a1   : > { %v10251_v25 = vadd.f32 %v8125_v4, %v8124_v61 }
 0x1a5   : > { %v8127_v19 = vpop.f32.mrb[12].mxu0 }
 0x1a6   : > { %v8128_v37 = vpop.f32.mrb[13].mxu0 }
 0x1a7   : > { %v10253_v32 = vadd.f32 %v8128_v37, %v8127_v19  ;;  %v8130_v20 = vpop.f32.mrb[14].mxu0  ;;  %v1788_v37 = vadd.f32 %v10240_v21, %v10286_v3 }
 0x1a8   : > { %v8131_v22 = vpop.f32.mrb[15].mxu0 }
 0x1a9   : > { %v10255_v54 = vadd.f32 %v8131_v22, %v8130_v20 }
 0x1ad   : > { %v8133_v7 = vpop.f32.mrb[16].mxu0 }
 0x1ae   : > { %v8134_v56 = vpop.f32.mrb[17].mxu0 }
 0x1af   : > { %v10263_v11 = vadd.f32 %v8134_v56, %v8133_v7  ;;  %v8136_v26 = vpop.f32.mrb[18].mxu0  ;;  %v9129_v56 = vld [vmem:[%s13076_s1 + $0x180] sm:$0xff]  }
 0x1b0   : > { %v8137_v24 = vpop.f32.mrb[19].mxu0  ;;  %8345 = vmatprep.subr.bf16.mxu1 %v9129_v56 }
 0x1b1   : > { %v10265_v34 = vadd.f32 %v8137_v24, %v8136_v26  ;;  %8346 = vmatpush3.bf16.msra.mxu1 %v9130_v17 }
 0x1b5   : > { %v8139_v38 = vpop.f32.mrb[20].mxu0 }
 0x1b6   : > { %v8140_v44 = vpop.f32.mrb[21].mxu0 }
 0x1b7   : > { %v10267_v40 = vadd.f32 %v8140_v44, %v8139_v38  ;;  %v8142_v42 = vpop.f32.mrb[22].mxu0 }
 0x1b8   : > { %v8143_v28 = vpop.f32.mrb[23].mxu0 }
 0x1b9   : > { %v10269_v43 = vadd.f32 %v8143_v28, %v8142_v42  ;;  %v1793_v42 = vadd.f32 %v10249_v53, %v10286_v3 }
 0x1bd   : > { %v8145_v39 = vpop.f32.mrb[24].mxu0 }
 0x1be   : > { %v8146_v52 = vpop.f32.mrb[25].mxu0 }
 0x1bf   : > { %v10277_v55 = vadd.f32 %v8146_v52, %v8145_v39  ;;  %v8148_v48 = vpop.f32.mrb[26].mxu0  ;;  %v1796_v52 = vadd.f32 %v10251_v25, %v10286_v3 }
 0x1c0   : > { %v8149_v59 = vpop.f32.mrb[27].mxu0 }
 0x1c1   : > { %v10279_v58 = vadd.f32 %v8149_v59, %v8148_v48 }
 0x1c5   : > { %v8151_v23 = vpop.f32.mrb[28].mxu0 }
 0x1c6   : > { %v8152_v50 = vpop.f32.mrb[29].mxu0 }
 0x1c7   : > { %v10281_v62 = vadd.f32 %v8152_v50, %v8151_v23  ;;  %v8154_v63 = vpop.f32.mrb[30].mxu0 }
 0x1c8   : > { %v8155_v0 = vpop.f32.mrb[31].mxu0 }
 0x1c9   : > { %v10288_v35 = vadd.f32 %v8155_v0, %v8154_v63 }
 0x1ca   : > { %v8221_v2 = vpop.f32.mrb[0].mxu1 }
 0x1cb   : > { %v8222_v5 = vpop.f32.mrb[1].mxu1 }
 0x1cc   : > { %v8223_v6 = vadd.f32 %v8222_v5, %v8221_v2  ;;  %v8224_v31 = vpop.f32.mrb[2].mxu1 }
 0x1cd   : > { %v8157_v8 = vpop.f32.mrb[32].mxu0  ;;  %v8225_v57 = vpop.f32.mrb[3].mxu1 }
 0x1ce   : > { %v8226_v12 = vadd.f32 %v8225_v57, %v8224_v31  ;;  %v8158_v10 = vpop.f32.mrb[33].mxu0  ;;  %v10294_v14 = vadd.f32 %v8223_v6, %v1777_v47  ;;  %v1801_v6 = vadd.f32 %v10253_v32, %v10286_v3  ;;  %v9132_v32 = vld [vmem:[%s13076_s1 + $0x148] sm:$0xff]  }
 0x1cf   : > { %v10302_v13 = vadd.f32 %v8158_v10, %v8157_v8  ;;  %v8160_v46 = vpop.f32.mrb[34].mxu0 }
 0x1d0   : > { %v8161_v36 = vpop.f32.mrb[35].mxu0  ;;  %v10304_v49 = vadd.f32 %v8226_v12, %v1780_v9  ;;  %v1804_v9 = vadd.f32 %v10255_v54, %v10286_v3 }
 0x1d1   : > { %v10306_v51 = vadd.f32 %v8161_v36, %v8160_v46  ;;  %v9131_v36 = vld [vmem:[%s13076_s1 + $0x188] sm:$0xff]  }
 0x1d2   : > { %v8227_v33 = vpop.f32.mrb[4].mxu1  ;;  %8347 = vmatprep.subr.bf16.mxu1 %v9131_v36 }
 0x1d3   : > { %v8228_v60 = vpop.f32.mrb[5].mxu1  ;;  %8348 = vmatpush3.bf16.msra.mxu1 %v9132_v32 }
 0x1d4   : > { %v8229_v15 = vadd.f32 %v8228_v60, %v8227_v33  ;;  %v8230_v61 = vpop.f32.mrb[6].mxu1 }
 0x1d5   : > { %v8163_v4 = vpop.f32.mrb[36].mxu0  ;;  %v8231_v19 = vpop.f32.mrb[7].mxu1 }
 0x1d6   : > { %v8232_v20 = vadd.f32 %v8231_v19, %v8230_v61  ;;  %v8164_v22 = vpop.f32.mrb[37].mxu0  ;;  %v10312_v7 = vadd.f32 %v8229_v15, %v1785_v18  ;;  %v1809_v61 = vadd.f32 %v10263_v11, %v10286_v3 }
 0x1d7   : > { %v10314_v27 = vadd.f32 %v8164_v22, %v8163_v4  ;;  %v8166_v41 = vpop.f32.mrb[38].mxu0  ;;  %v1812_v22 = vadd.f32 %v10265_v34, %v10286_v3 }
 0x1d8   : > { %v8167_v26 = vpop.f32.mrb[39].mxu0  ;;  %v10322_v24 = vadd.f32 %v8232_v20, %v1788_v37 }
 0x1d9   : > { %v10324_v38 = vadd.f32 %v8167_v26, %v8166_v41 }
 0x1da   : > { %v8233_v21 = vpop.f32.mrb[8].mxu1 }
 0x1db   : > { %v8234_v44 = vpop.f32.mrb[9].mxu1 }
 0x1dc   : > { %v8235_v28 = vadd.f32 %v8234_v44, %v8233_v21  ;;  %v8236_v39 = vpop.f32.mrb[10].mxu1 }
 0x1dd   : > { %v8169_v45 = vpop.f32.mrb[40].mxu0  ;;  %v8237_v29 = vpop.f32.mrb[11].mxu1 }
 0x1de   : > { %v8238_v48 = vadd.f32 %v8237_v29, %v8236_v39  ;;  %v8170_v59 = vpop.f32.mrb[41].mxu0  ;;  %v10330_v23 = vadd.f32 %v8235_v28, %v1793_v42 }
 0x1df   : > { %v10332_v50 = vadd.f32 %v8170_v59, %v8169_v45  ;;  %v8172_v63 = vpop.f32.mrb[42].mxu0  ;;  %v1817_v45 = vadd.f32 %v10267_v40, %v10286_v3  ;;  %v1820_v59 = vadd.f32 %v10269_v43, %v10286_v3  ;;  %v9134_v40 = vld [vmem:[%s13076_s1 + $0x150] sm:$0xff]  }
 0x1e0   : > { %v8173_v0 = vpop.f32.mrb[43].mxu0  ;;  %v10334_v2 = vadd.f32 %v8238_v48, %v1796_v52 }
 0x1e1   : > { %v10336_v5 = vadd.f32 %v8173_v0, %v8172_v63 }
 0x1e2   : > { %v8239_v53 = vpop.f32.mrb[12].mxu1 }
 0x1e3   : > { %v8240_v47 = vpop.f32.mrb[13].mxu1 }
 0x1e4   : > { %v8241_v31 = vadd.f32 %v8240_v47, %v8239_v53  ;;  %v8242_v8 = vpop.f32.mrb[14].mxu1 }
 0x1e5   : > { %v8175_v25 = vpop.f32.mrb[44].mxu0  ;;  %v8243_v57 = vpop.f32.mrb[15].mxu1 }
 0x1e6   : > { %v8244_v12 = vadd.f32 %v8243_v57, %v8242_v8  ;;  %v8176_v10 = vpop.f32.mrb[45].mxu0  ;;  %v10342_v30 = vadd.f32 %v8241_v31, %v1801_v6  ;;  %v9133_v31 = vld [vmem:[%s13076_s1 + $0x190] sm:$0xff]  }
 0x1e7   : > { %v10344_v16 = vadd.f32 %v8176_v10, %v8175_v25  ;;  %v8178_v46 = vpop.f32.mrb[46].mxu0  ;;  %8349 = vmatprep.subr.bf16.mxu1 %v9133_v31 }
 0x1e8   : > { %v8179_v33 = vpop.f32.mrb[47].mxu0  ;;  %v10352_v60 = vadd.f32 %v8244_v12, %v1804_v9  ;;  %8350 = vmatpush3.bf16.msra.mxu1 %v9134_v40  ;;  %v1825_v12 = vadd.f32 %v10277_v55, %v10286_v3  ;;  %v2364_v40 = vld [vmem:[#allocation2] sm:$0xff] }
 0x1e9   : > { %v10354_v18 = vadd.f32 %v8179_v33, %v8178_v46  ;;  %v1828_v33 = vadd.f32 %v10279_v58, %v10286_v3 }
 0x1ea   : > { %v8245_v54 = vpop.f32.mrb[16].mxu1 }
 0x1eb   : > { %v8246_v15 = vpop.f32.mrb[17].mxu1 }
 0x1ec   : > { %v8247_v4 = vadd.f32 %v8246_v15, %v8245_v54  ;;  %v8248_v19 = vpop.f32.mrb[18].mxu1 }
 0x1ed   : > { %v8181_v37 = vpop.f32.mrb[48].mxu0  ;;  %v8249_v20 = vpop.f32.mrb[19].mxu1 }
 0x1ee   : > { %v8250_v41 = vadd.f32 %v8249_v20, %v8248_v19  ;;  %v8182_v56 = vpop.f32.mrb[49].mxu0  ;;  %v10360_v17 = vadd.f32 %v8247_v4, %v1809_v61 }
 0x1ef   : > { %v10362_v26 = vadd.f32 %v8182_v56, %v8181_v37  ;;  %v8184_v21 = vpop.f32.mrb[50].mxu0  ;;  %v1833_v56 = vadd.f32 %v10281_v62, %v10286_v3  ;;  %v9136_v62 = vld [vmem:[%s13076_s1 + $0x158] sm:$0xff]  }
 0x1f0   : > { %v8185_v44 = vpop.f32.mrb[51].mxu0  ;;  %v10364_v42 = vadd.f32 %v8250_v41, %v1812_v22 }
 0x1f1   : > { %v10366_v28 = vadd.f32 %v8185_v44, %v8184_v21 }
 0x1f2   : > { %v8251_v11 = vpop.f32.mrb[20].mxu1 }
 0x1f3   : > { %v8252_v39 = vpop.f32.mrb[21].mxu1 }
 0x1f4   : > { %v8253_v29 = vadd.f32 %v8252_v39, %v8251_v11  ;;  %v8254_v52 = vpop.f32.mrb[22].mxu1  ;;  %v1836_v39 = vadd.f32 %v10288_v35, %v10286_v3 }
 0x1f5   : > { %v8187_v34 = vpop.f32.mrb[52].mxu0  ;;  %v8255_v48 = vpop.f32.mrb[23].mxu1 }
 0x1f6   : > { %v8256_v63 = vadd.f32 %v8255_v48, %v8254_v52  ;;  %v8188_v0 = vpop.f32.mrb[53].mxu0  ;;  %v10372_v53 = vadd.f32 %v8253_v29, %v1817_v45 }
 0x1f7   : > { %v10374_v47 = vadd.f32 %v8188_v0, %v8187_v34  ;;  %v8190_v6 = vpop.f32.mrb[54].mxu0 }
 0x1f8   : > { %v8191_v8 = vpop.f32.mrb[55].mxu0  ;;  %v10382_v25 = vadd.f32 %v8256_v63, %v1820_v59  ;;  %v9135_v59 = vld [vmem:[%s13076_s1 + $0x198] sm:$0xff]  }
 0x1f9   : > { %v10384_v57 = vadd.f32 %v8191_v8, %v8190_v6  ;;  %8351 = vmatprep.subr.bf16.mxu1 %v9135_v59  ;;  %v2365_v8 = vld [vmem:[#allocation2 + $0x8] sm:$0xff] }
 0x1fa   : > { %v8257_v43 = vpop.f32.mrb[24].mxu1  ;;  %8352 = vmatpush3.bf16.msra.mxu1 %v9136_v62 }
 0x1fb   : > { %v8258_v9 = vpop.f32.mrb[25].mxu1 }
 0x1fc   : > { %v8259_v10 = vadd.f32 %v8258_v9, %v8257_v43  ;;  %v8260_v46 = vpop.f32.mrb[26].mxu1  ;;  %v1841_v43 = vadd.f32 %v10302_v13, %v10286_v3 }
 0x1fd   : > { %v8193_v36 = vpop.f32.mrb[56].mxu0  ;;  %v8261_v32 = vpop.f32.mrb[27].mxu1 }
 0x1fe   : > { %v8262_v54 = vadd.f32 %v8261_v32, %v8260_v46  ;;  %v8194_v15 = vpop.f32.mrb[57].mxu0  ;;  %v10390_v61 = vadd.f32 %v8259_v10, %v1825_v12  ;;  %v2396_v10 = vpack.c.bf16 %v2365_v8, %v2364_v40  ;;  %v1844_v32 = vadd.f32 %v10306_v51, %v10286_v3 }
 0x1ff   : > { %v10392_v4 = vadd.f32 %v8194_v15, %v8193_v36  ;;  %v8196_v19 = vpop.f32.mrb[58].mxu0 }
 0x200   : > { %v8197_v37 = vpop.f32.mrb[59].mxu0  ;;  %v10394_v20 = vadd.f32 %v8262_v54, %v1828_v33  ;;  %2412 = vst.msk [vmem:[#allocation3] sm:$0xff] %vm332_vm0, %v2396_v10 }
 0x201   : > { %v10396_v22 = vadd.f32 %v8197_v37, %v8196_v19  ;;  %v2493_v37 = vpop.permute.xlu1 %2492 }
 0x202   : > { %v8263_v55 = vpop.f32.mrb[28].mxu1  ;;  %2540 = vst.msk [vmem:[#allocation3] sm:$0xff] %vm734_vm2, %v2493_v37 }
 0x203   : > { %v8264_v41 = vpop.f32.mrb[29].mxu1 }
 0x204   : > { %v8265_v21 = vadd.f32 %v8264_v41, %v8263_v55  ;;  %v8266_v44 = vpop.f32.mrb[30].mxu1  ;;  %v2556_v41 = vld [vmem:[#allocation2 + $0x2] sm:$0xff] }
 0x205   : > { %v8199_v58 = vpop.f32.mrb[60].mxu0  ;;  %v8267_v11 = vpop.f32.mrb[31].mxu1 }
 0x206   : > { %v8268_v45 = vadd.f32 %v8267_v11, %v8266_v44  ;;  %v8200_v29 = vpop.f32.mrb[61].mxu0  ;;  %v10402_v52 = vadd.f32 %v8265_v21, %v1833_v56  ;;  %v2557_v56 = vld [vmem:[#allocation2 + $0xa] sm:$0xff] }
 0x207   : > { %v10404_v34 = vadd.f32 %v8200_v29, %v8199_v58  ;;  %v8202_v48 = vpop.f32.mrb[62].mxu0 }
 0x208   : > { %v8203_v63 = vpop.f32.mrb[63].mxu0  ;;  %v10412_v0 = vadd.f32 %v8268_v45, %v1836_v39 }
 0x209   : > { %v10414_v6 = vadd.f32 %v8203_v63, %v8202_v48 }
 0x20a   : > { %v8269_v35 = vpop.f32.mrb[32].mxu1 }
 0x20b   : > { %v8270_v31 = vpop.f32.mrb[33].mxu1 }
 0x20c   : > { %v8271_v9 = vadd.f32 %v8270_v31, %v8269_v35  ;;  %v8272_v12 = vpop.f32.mrb[34].mxu1  ;;  %v1852_v35 = vadd.f32 %v10324_v38, %v10286_v3 }
 0x20d   : > { %v8273_v46 = vpop.f32.mrb[35].mxu1  ;;  %v8869_v36 = vpop.f32.mrb[64].mxu0 }
 0x20e   : > { %v8274_v33 = vadd.f32 %v8273_v46, %v8272_v12  ;;  %v2107_v54 = vadd.f32 %v8869_v36, %v10312_v7  ;;  %v2098_v15 = vpop.f32.mrb[65].mxu0  ;;  %v10421_v19 = vadd.f32 %v8271_v9, %v1841_v43  ;;  %v2588_v7 = vpack.c.bf16 %v2557_v56, %v2556_v41 }
 0x20f   : > { %v2099_v55 = vadd.f32 %v2098_v15, %v10294_v14  ;;  %v8870_v13 = vpop.f32.mrb[66].mxu0 }
 0x210   : > { %v2227_v21 = vmax.f32 %v2107_v54, 0.0  ;;  %v2110_v44 = vadd.f32 %v8870_v13, %v10322_v24  ;;  %v2101_v51 = vpop.f32.mrb[67].mxu0  ;;  %v10427_v58 = vadd.f32 %v8274_v33, %v1844_v32  ;;  %2604 = vst.msk [vmem:[#allocation3 + $0x8] sm:$0xff] %vm332_vm0, %v2588_v7  ;;  %v1849_v24 = vadd.f32 %v10314_v27, %v10286_v3 }
 0x211   : > { %v2225_v11 = vmax.f32 %v2099_v55, 0.0  ;;  %v2102_v39 = vadd.f32 %v2101_v51, %v10304_v49 }
 0x212   : > { %2334 = vst.msk [vmem:[#allocation2 + $0x31] sm:$0xff] %vm332_vm0, %v2227_v21  ;;  %v2228_v45 = vmax.f32 %v2110_v44, 0.0  ;;  %v8275_v29 = vpop.f32.mrb[36].mxu1 }
 0x213   : > { %2332 = vst.msk [vmem:[#allocation2 + $0x19] sm:$0xff] %vm332_vm0, %v2225_v11  ;;  %v2226_v14 = vmax.f32 %v2102_v39, 0.0  ;;  %v8276_v48 = vpop.f32.mrb[37].mxu1 }
 0x214   : > { %2335 = vst.msk [vmem:[#allocation2 + $0x39] sm:$0xff] %vm332_vm0, %v2228_v45  ;;  %v8277_v59 = vadd.f32 %v8276_v48, %v8275_v29  ;;  %v8278_v62 = vpop.f32.mrb[38].mxu1  ;;  %v1860_v29 = vadd.f32 %v10336_v5, %v10286_v3 }
 0x215   : > { %2333 = vst.msk [vmem:[#allocation2 + $0x21] sm:$0xff] %vm332_vm0, %v2226_v14  ;;  %v8279_v49 = vpop.f32.mrb[39].mxu1  ;;  %v8873_v63 = vpop.f32.mrb[68].mxu0 }
 0x216   : > { %v8280_v31 = vadd.f32 %v8279_v49, %v8278_v62  ;;  %v2123_v40 = vadd.f32 %v8873_v63, %v10342_v30  ;;  %v2114_v8 = vpop.f32.mrb[69].mxu0  ;;  %v10440_v43 = vadd.f32 %v8277_v59, %v1849_v24 }
 0x217   : > { %v2115_v9 = vadd.f32 %v2114_v8, %v10330_v23  ;;  %v8874_v27 = vpop.f32.mrb[70].mxu0  ;;  %v9137_v23 = vld [vmem:[%s13076_s1 + $0x220] sm:$0xff]  }
 0x218   : > { %v2231_v12 = vmax.f32 %v2123_v40, 0.0  ;;  %v2126_v10 = vadd.f32 %v8874_v27, %v10352_v60  ;;  %v2117_v46 = vpop.f32.mrb[71].mxu0  ;;  %v10444_v36 = vadd.f32 %v8280_v31, %v1852_v35  ;;  %8899 = vmatprep.subr.bf16.mxu1 %v9137_v23 }
 0x219   : > { %v2229_v32 = vmax.f32 %v2115_v9, 0.0  ;;  %v2118_v33 = vadd.f32 %v2117_v46, %v10334_v2  ;;  %v2622_v54 = vld [vmem:[#allocation2 + $0x30] sm:$0xff]  ;;  %v1857_v2 = vadd.f32 %v10332_v50, %v10286_v3 }
 0x21a   : > { %2338 = vst.msk [vmem:[#allocation2 + $0x61] sm:$0xff] %vm332_vm0, %v2231_v12  ;;  %v2232_v38 = vmax.f32 %v2126_v10, 0.0  ;;  %v8281_v30 = vpop.f32.mrb[40].mxu1  ;;  %v2620_v15 = vld [vmem:[#allocation2 + $0x18] sm:$0xff] }
 0x21b   : > { %v2430_v37 = vld [vmem:[#allocation2 + $0x19] sm:$0xff]  ;;  %v2432_v55 = vld [vmem:[#allocation2 + $0x31] sm:$0xff]  ;;  %2336 = vst.msk [vmem:[#allocation2 + $0x49] sm:$0xff] %vm332_vm0, %v2229_v32  ;;  %v2230_v60 = vmax.f32 %v2118_v33, 0.0  ;;  %v8282_v13 = vpop.f32.mrb[41].mxu1 }
 0x21c   : > { %v2623_v41 = vld [vmem:[#allocation2 + $0x38] sm:$0xff]  ;;  %2339 = vst.msk [vmem:[#allocation2 + $0x69] sm:$0xff] %vm332_vm0, %v2232_v38  ;;  %v8283_v44 = vadd.f32 %v8282_v13, %v8281_v30  ;;  %v8284_v51 = vpop.f32.mrb[42].mxu1  ;;  %v2621_v7 = vld [vmem:[#allocation2 + $0x20] sm:$0xff]  ;;  %v2940_v32 = vld [vmem:[#allocation2 + $0x30] sm:$0xff] }
 0x21d   : > { %v2433_v56 = vld [vmem:[#allocation2 + $0x39] sm:$0xff]  ;;  %v2431_v11 = vld [vmem:[#allocation2 + $0x21] sm:$0xff]  ;;  %v2653_v39 = vpack.c.bf16 %v2623_v41, %v2622_v54  ;;  %2337 = vst.msk [vmem:[#allocation2 + $0x51] sm:$0xff] %vm332_vm0, %v2230_v60  ;;  %v8285_v14 = vpop.f32.mrb[43].mxu1  ;;  %v8877_v48 = vpop.f32.mrb[72].mxu0  ;;  %v2652_v24 = vpack.c.bf16 %v2621_v7, %v2620_v15 }
 0x21e   : > { %v2814_v21 = vld [vmem:[#allocation2 + $0x32] sm:$0xff]  ;;  %v2812_v45 = vld [vmem:[#allocation2 + $0x1a] sm:$0xff]  ;;  %v2461_v59 = vpack.c.bf16 %v2431_v11, %v2430_v37  ;;  %v10458_v62 = vpack.c.bf16 %v2433_v56, %v2432_v55  ;;  %v2813_v50 = vld [vmem:[#allocation2 + $0x22] sm:$0xff]  ;;  %v8286_v63 = vadd.f32 %v8285_v14, %v8284_v51  ;;  %v2139_v35 = vadd.f32 %v8877_v48, %v10372_v53  ;;  %v2130_v31 = vpop.f32.mrb[73].mxu0 }
 0x21f   : > { %v2815_v49 = vld [vmem:[#allocation2 + $0x3a] sm:$0xff]  ;;  %v10461_v40 = vadd.f32 %v8283_v44, %v1857_v2  ;;  %v10463_v8 = vpack.c.bf16 %v2813_v50, %v2812_v45  ;;  %2414 = vst.msk [vmem:[#allocation3 + $0x50] sm:$0xff] %vm332_vm0, %v2653_v39  ;;  %v2131_v12 = vadd.f32 %v2130_v31, %v10360_v17  ;;  %v8878_v10 = vpop.f32.mrb[74].mxu0  ;;  %2684 = vrot.lane.b32.xlu0 %v2652_v24, %s9455_s17  ;;  %2413 = vst.msk [vmem:[#allocation3 + $0x28] sm:$0xff] %vm332_vm0, %v2652_v24  ;;  %v3132_v54 = vld [vmem:[#allocation2 + $0x32] sm:$0xff] }
 0x220   : > { %v2748_v5 = vld [vmem:[#allocation2 + $0x19] sm:$0xff]  ;;  %v2749_v9 = vld [vmem:[#allocation2 + $0x21] sm:$0xff]  ;;  %2494 = vrot.lane.b32.xlu1 %v2461_v59, %s9455_s17  ;;  %v10469_v46 = vpack.c.bf16 %v2815_v49, %v2814_v21  ;;  %v2235_v38 = vmax.f32 %v2139_v35, 0.0  ;;  %v2142_v30 = vadd.f32 %v8878_v10, %v10382_v25  ;;  %v2133_v15 = vpop.f32.mrb[75].mxu0  ;;  %v10473_v37 = vadd.f32 %v8286_v63, %v1860_v29  ;;  %v2750_v55 = vld [vmem:[#allocation2 + $0x31] sm:$0xff] }
 0x221   : > { %v2941_v27 = vld [vmem:[#allocation2 + $0x38] sm:$0xff]  ;;  %v2780_v53 = vpack.c.bf16 %v2749_v9, %v2748_v5  ;;  %2605 = vst.msk [vmem:[#allocation3 + $0x30] sm:$0xff] %vm332_vm0, %v10463_v8  ;;  %v2233_v60 = vmax.f32 %v2131_v12, 0.0  ;;  %v2134_v13 = vadd.f32 %v2133_v15, %v10364_v42  ;;  %v2626_v41 = vld [vmem:[#allocation2 + $0x60] sm:$0xff]  ;;  %v1865_v48 = vadd.f32 %v10344_v16, %v10286_v3 }
 0x222   : > { %v2751_v33 = vld [vmem:[#allocation2 + $0x39] sm:$0xff]  ;;  %v2972_v17 = vpack.c.bf16 %v2941_v27, %v2940_v32  ;;  %2606 = vst.msk [vmem:[#allocation3 + $0x58] sm:$0xff] %vm332_vm0, %v10469_v46  ;;  %2342 = vst.msk [vmem:[#allocation2 + $0x91] sm:$0xff] %vm332_vm0, %v2235_v38  ;;  %v2236_v21 = vmax.f32 %v2142_v30, 0.0  ;;  %v8287_v2 = vpop.f32.mrb[44].mxu1  ;;  %v2624_v44 = vld [vmem:[#allocation2 + $0x48] sm:$0xff]  ;;  %v1868_v31 = vadd.f32 %v10354_v18, %v10286_v3 }
 0x223   : > { %v3133_v23 = vld [vmem:[#allocation2 + $0x3a] sm:$0xff]  ;;  %2796 = vst.msk [vmem:[#allocation3 + $0x10] sm:$0xff] %vm332_vm0, %v2780_v53  ;;  %v2781_v56 = vpack.c.bf16 %v2751_v33, %v2750_v55  ;;  %v2434_v51 = vld [vmem:[#allocation2 + $0x49] sm:$0xff]  ;;  %2340 = vst.msk [vmem:[#allocation2 + $0x79] sm:$0xff] %vm332_vm0, %v2233_v60  ;;  %v2234_v42 = vmax.f32 %v2134_v13, 0.0  ;;  %v8288_v11 = vpop.f32.mrb[45].mxu1  ;;  %2686 = vrot.lane.b32.xlu0 %v2653_v39, %s9455_s17 }
 0x224   : > { %v3164_v25 = vpack.c.bf16 %v3133_v23, %v3132_v54  ;;  %v2436_v7 = vld [vmem:[#allocation2 + $0x61] sm:$0xff]  ;;  %2988 = vst.msk [vmem:[#allocation3 + $0x18] sm:$0xff] %vm332_vm0, %v2972_v17  ;;  %2496 = vrot.lane.b32.xlu1 %v10458_v62, %s9455_s17  ;;  %v2437_v29 = vld [vmem:[#allocation2 + $0x69] sm:$0xff]  ;;  %2343 = vst.msk [vmem:[#allocation2 + $0x99] sm:$0xff] %vm332_vm0, %v2236_v21  ;;  %v8289_v24 = vadd.f32 %v8288_v11, %v8287_v2  ;;  %v8290_v59 = vpop.f32.mrb[46].mxu1 }
 0x225   : > { %v2627_v45 = vld [vmem:[#allocation2 + $0x68] sm:$0xff]  ;;  %2797 = vst.msk [vmem:[#allocation3 + $0x38] sm:$0xff] %vm332_vm0, %v2781_v56  ;;  %v2625_v50 = vld [vmem:[#allocation2 + $0x50] sm:$0xff]  ;;  %2341 = vst.msk [vmem:[#allocation2 + $0x81] sm:$0xff] %vm332_vm0, %v2234_v42  ;;  %v8291_v5 = vpop.f32.mrb[47].mxu1  ;;  %v8881_v9 = vpop.f32.mrb[76].mxu0  ;;  %v10497_v16 = vpack.c.bf16 %v2437_v29, %v2436_v7 }
 0x226   : > { %v2818_v14 = vld [vmem:[#allocation2 + $0x62] sm:$0xff]  ;;  %3180 = vst.msk [vmem:[#allocation3 + $0x20] sm:$0xff] %vm332_vm0, %v3164_v25  ;;  %v2435_v49 = vld [vmem:[#allocation2 + $0x51] sm:$0xff]  ;;  %v2655_v39 = vpack.c.bf16 %v2627_v45, %v2626_v41  ;;  %v2654_v27 = vpack.c.bf16 %v2625_v50, %v2624_v44  ;;  %v8292_v33 = vadd.f32 %v8291_v5, %v8290_v59  ;;  %v2155_v54 = vadd.f32 %v8881_v9, %v10402_v52  ;;  %v2146_v38 = vpop.f32.mrb[77].mxu0 }
 0x227   : > { %v2816_v63 = vld [vmem:[#allocation2 + $0x4a] sm:$0xff]  ;;  %v10495_v12 = vpack.c.bf16 %v2435_v49, %v2434_v51  ;;  %v2817_v10 = vld [vmem:[#allocation2 + $0x52] sm:$0xff]  ;;  %v10500_v30 = vadd.f32 %v8289_v24, %v1865_v48  ;;  %v2944_v55 = vld [vmem:[#allocation2 + $0x60] sm:$0xff]  ;;  %v2147_v60 = vadd.f32 %v2146_v38, %v10390_v61  ;;  %v8882_v13 = vpop.f32.mrb[78].mxu0 }
 0x228   : > { %v2942_v35 = vld [vmem:[#allocation2 + $0x48] sm:$0xff]  ;;  %v2943_v32 = vld [vmem:[#allocation2 + $0x50] sm:$0xff]  ;;  %v10502_v15 = vpack.c.bf16 %v2817_v10, %v2816_v63  ;;  %2416 = vst.msk [vmem:[#allocation3 + $0xa0] sm:$0xff] %vm332_vm0, %v2655_v39  ;;  %2688 = vrot.lane.b32.xlu0 %v2654_v27, %s9455_s17  ;;  %2415 = vst.msk [vmem:[#allocation3 + $0x78] sm:$0xff] %vm332_vm0, %v2654_v27  ;;  %v2239_v2 = vmax.f32 %v2155_v54, 0.0  ;;  %v2158_v44 = vadd.f32 %v8882_v13, %v10412_v0  ;;  %v2149_v51 = vpop.f32.mrb[79].mxu0 }
 0x229   : > { %v2819_v53 = vld [vmem:[#allocation2 + $0x6a] sm:$0xff]  ;;  %2498 = vrot.lane.b32.xlu1 %v10495_v12, %s9455_s17  ;;  %v2973_v41 = vpack.c.bf16 %v2943_v32, %v2942_v35  ;;  %v2754_v56 = vld [vmem:[#allocation2 + $0x61] sm:$0xff]  ;;  %v10513_v7 = vadd.f32 %v8292_v33, %v1868_v31  ;;  %v3135_v42 = vld [vmem:[#allocation2 + $0x52] sm:$0xff]  ;;  %v2237_v29 = vmax.f32 %v2147_v60, 0.0  ;;  %v1873_v32 = vadd.f32 %v10362_v26, %v10286_v3 }
 0x22a   : > { %v2752_v18 = vld [vmem:[#allocation2 + $0x49] sm:$0xff]  ;;  %v2753_v17 = vld [vmem:[#allocation2 + $0x51] sm:$0xff]  ;;  %v10509_v52 = vpack.c.bf16 %v2819_v53, %v2818_v14  ;;  %2607 = vst.msk [vmem:[#allocation3 + $0x80] sm:$0xff] %vm332_vm0, %v10502_v15  ;;  %v2150_v14 = vadd.f32 %v2149_v51, %v10394_v20  ;;  %2346 = vst.msk [vmem:[#allocation2 + $0xc1] sm:$0xff] %vm332_vm0, %v2239_v2  ;;  %v2240_v59 = vmax.f32 %v2158_v44, 0.0  ;;  %v8293_v50 = vpop.f32.mrb[48].mxu1 }
 0x22b   : > { %v2945_v23 = vld [vmem:[#allocation2 + $0x68] sm:$0xff]  ;;  %v2782_v61 = vpack.c.bf16 %v2753_v17, %v2752_v18  ;;  %v2630_v48 = vld [vmem:[#allocation2 + $0x90] sm:$0xff]  ;;  %2989 = vst.msk [vmem:[#allocation3 + $0x40] sm:$0xff] %vm332_vm0, %v2973_v41  ;;  %v2628_v49 = vld [vmem:[#allocation2 + $0x78] sm:$0xff]  ;;  %v8294_v9 = vpop.f32.mrb[49].mxu1 }
 0x22c   : > { %v2755_v25 = vld [vmem:[#allocation2 + $0x69] sm:$0xff]  ;;  %2608 = vst.msk [vmem:[#allocation3 + $0xa8] sm:$0xff] %vm332_vm0, %v10509_v52  ;;  %v2974_v0 = vpack.c.bf16 %v2945_v23, %v2944_v55  ;;  %v2438_v63 = vld [vmem:[#allocation2 + $0x79] sm:$0xff]  ;;  %v2440_v35 = vld [vmem:[#allocation2 + $0x91] sm:$0xff]  ;;  %v2238_v20 = vmax.f32 %v2150_v14, 0.0  ;;  %2690 = vrot.lane.b32.xlu0 %v2655_v39, %s9455_s17  ;;  %v8295_v33 = vadd.f32 %v8294_v9, %v8293_v50  ;;  %v8296_v54 = vpop.f32.mrb[50].mxu1  ;;  %v1876_v55 = vadd.f32 %v10366_v28, %v10286_v3 }
 0x22d   : > { %v3134_v21 = vld [vmem:[#allocation2 + $0x4a] sm:$0xff]  ;;  %v3136_v11 = vld [vmem:[#allocation2 + $0x62] sm:$0xff]  ;;  %v2783_v24 = vpack.c.bf16 %v2755_v25, %v2754_v56  ;;  %2798 = vst.msk [vmem:[#allocation3 + $0x60] sm:$0xff] %vm332_vm0, %v2782_v61  ;;  %2344 = vst.msk [vmem:[#allocation2 + $0xa9] sm:$0xff] %vm332_vm0, %v2237_v29  ;;  %2500 = vrot.lane.b32.xlu1 %v10497_v16, %s9455_s17  ;;  %v8297_v23 = vpop.f32.mrb[51].mxu1  ;;  %v8885_v60 = vpop.f32.mrb[80].mxu0 }
 0x22e   : > { %v3137_v45 = vld [vmem:[#allocation2 + $0x6a] sm:$0xff]  ;;  %v3165_v31 = vpack.c.bf16 %v3135_v42, %v3134_v21  ;;  %v2631_v27 = vld [vmem:[#allocation2 + $0x98] sm:$0xff]  ;;  %2990 = vst.msk [vmem:[#allocation3 + $0x68] sm:$0xff] %vm332_vm0, %v2974_v0  ;;  %2347 = vst.msk [vmem:[#allocation2 + $0xc9] sm:$0xff] %vm332_vm0, %v2240_v59  ;;  %v8298_v2 = vadd.f32 %v8297_v23, %v8296_v54  ;;  %v2171_v44 = vadd.f32 %v8885_v60, %v10440_v43  ;;  %v2162_v51 = vpop.f32.mrb[81].mxu0 }
 0x22f   : > { %v3166_v5 = vpack.c.bf16 %v3137_v45, %v3136_v11  ;;  %v2441_v10 = vld [vmem:[#allocation2 + $0x99] sm:$0xff]  ;;  %2799 = vst.msk [vmem:[#allocation3 + $0x88] sm:$0xff] %vm332_vm0, %v2783_v24  ;;  %v2439_v18 = vld [vmem:[#allocation2 + $0x81] sm:$0xff]  ;;  %v2657_v39 = vpack.c.bf16 %v2631_v27, %v2630_v48  ;;  %2345 = vst.msk [vmem:[#allocation2 + $0xb1] sm:$0xff] %vm332_vm0, %v2238_v20  ;;  %v10542_v61 = vadd.f32 %v8295_v33, %v1873_v32  ;;  %v8886_v14 = vpop.f32.mrb[82].mxu0 }
 0x230   : > { %v2822_v53 = vld [vmem:[#allocation2 + $0x92] sm:$0xff]  ;;  %v2629_v38 = vld [vmem:[#allocation2 + $0x80] sm:$0xff]  ;;  %3181 = vst.msk [vmem:[#allocation3 + $0x48] sm:$0xff] %vm332_vm0, %v3165_v31  ;;  %v10537_v13 = vpack.c.bf16 %v2439_v18, %v2438_v63  ;;  %v10539_v41 = vpack.c.bf16 %v2441_v10, %v2440_v35  ;;  %v2163_v29 = vadd.f32 %v2162_v51, %v10421_v19  ;;  %v2243_v50 = vmax.f32 %v2171_v44, 0.0  ;;  %v2165_v63 = vpop.f32.mrb[83].mxu0 }
 0x231   : > { %v2820_v17 = vld [vmem:[#allocation2 + $0x7a] sm:$0xff]  ;;  %3182 = vst.msk [vmem:[#allocation3 + $0x70] sm:$0xff] %vm332_vm0, %v3166_v5  ;;  %v2656_v26 = vpack.c.bf16 %v2629_v38, %v2628_v49  ;;  %v2821_v56 = vld [vmem:[#allocation2 + $0x82] sm:$0xff]  ;;  %2418 = vst.msk [vmem:[#allocation3 + $0xf0] sm:$0xff] %vm332_vm0, %v2657_v39  ;;  %v2174_v49 = vadd.f32 %v8886_v14, %v10444_v36  ;;  %v10555_v35 = vadd.f32 %v8298_v2, %v1876_v55 }
 0x232   : > { %v2823_v25 = vld [vmem:[#allocation2 + $0x9a] sm:$0xff]  ;;  %v10544_v42 = vpack.c.bf16 %v2821_v56, %v2820_v17  ;;  %2502 = vrot.lane.b32.xlu1 %v10537_v13, %s9455_s17  ;;  %v2948_v24 = vld [vmem:[#allocation2 + $0x90] sm:$0xff]  ;;  %v3139_v20 = vld [vmem:[#allocation2 + $0x82] sm:$0xff]  ;;  %v2241_v9 = vmax.f32 %v2163_v29, 0.0  ;;  %v2166_v27 = vadd.f32 %v2165_v63, %v10427_v58  ;;  %2350 = vst.msk [vmem:[#allocation2 + $0xf1] sm:$0xff] %vm332_vm0, %v2243_v50  ;;  %v8299_v33 = vpop.f32.mrb[52].mxu1  ;;  %v1881_v56 = vadd.f32 %v10374_v47, %v10286_v3 }
 0x233   : > { %v2947_v21 = vld [vmem:[#allocation2 + $0x80] sm:$0xff]  ;;  %v2946_v28 = vld [vmem:[#allocation2 + $0x78] sm:$0xff]  ;;  %2692 = vrot.lane.b32.xlu0 %v2656_v26, %s9455_s17  ;;  %v10551_v48 = vpack.c.bf16 %v2823_v25, %v2822_v53  ;;  %2417 = vst.msk [vmem:[#allocation3 + $0xc8] sm:$0xff] %vm332_vm0, %v2656_v26  ;;  %v2244_v32 = vmax.f32 %v2174_v49, 0.0  ;;  %v8300_v55 = vpop.f32.mrb[53].mxu1 }
 0x234   : > { %v2757_v11 = vld [vmem:[#allocation2 + $0x81] sm:$0xff]  ;;  %v2949_v45 = vld [vmem:[#allocation2 + $0x98] sm:$0xff]  ;;  %v2975_v43 = vpack.c.bf16 %v2947_v21, %v2946_v28  ;;  %2609 = vst.msk [vmem:[#allocation3 + $0xd0] sm:$0xff] %vm332_vm0, %v10544_v42  ;;  %v2442_v38 = vld [vmem:[#allocation2 + $0xa9] sm:$0xff]  ;;  %v2242_v58 = vmax.f32 %v2166_v27, 0.0  ;;  %v8301_v25 = vadd.f32 %v8300_v55, %v8299_v33  ;;  %v8302_v21 = vpop.f32.mrb[54].mxu1  ;;  %v1884_v28 = vadd.f32 %v10384_v57, %v10286_v3 }
 0x235   : > { %v2756_v0 = vld [vmem:[#allocation2 + $0x79] sm:$0xff]  ;;  %v2758_v31 = vld [vmem:[#allocation2 + $0x91] sm:$0xff]  ;;  %2610 = vst.msk [vmem:[#allocation3 + $0xf8] sm:$0xff] %vm332_vm0, %v10551_v48  ;;  %v2976_v36 = vpack.c.bf16 %v2949_v45, %v2948_v24  ;;  %v2632_v54 = vld [vmem:[#allocation2 + $0xa8] sm:$0xff]  ;;  %v8889_v45 = vpop.f32.mrb[84].mxu0 }
 0x236   : > { %v2759_v59 = vld [vmem:[#allocation2 + $0x99] sm:$0xff]  ;;  %v2784_v19 = vpack.c.bf16 %v2757_v11, %v2756_v0  ;;  %2991 = vst.msk [vmem:[#allocation3 + $0x90] sm:$0xff] %vm332_vm0, %v2975_v43  ;;  %v2444_v18 = vld [vmem:[#allocation2 + $0xc1] sm:$0xff]  ;;  %2348 = vst.msk [vmem:[#allocation2 + $0xd9] sm:$0xff] %vm332_vm0, %v2241_v9  ;;  %2504 = vrot.lane.b32.xlu1 %v10539_v41, %s9455_s17  ;;  %v8303_v11 = vpop.f32.mrb[55].mxu1  ;;  %v2187_v50 = vadd.f32 %v8889_v45, %v10500_v30  ;;  %v2178_v49 = vpop.f32.mrb[85].mxu0  ;;  %v10583_v63 = vadd.f32 %v8301_v25, %v1881_v56 }
 0x237   : > { %v3138_v5 = vld [vmem:[#allocation2 + $0x7a] sm:$0xff]  ;;  %v2785_v53 = vpack.c.bf16 %v2759_v59, %v2758_v31  ;;  %2694 = vrot.lane.b32.xlu0 %v2657_v39, %s9455_s17  ;;  %v2635_v23 = vld [vmem:[#allocation2 + $0xc8] sm:$0xff]  ;;  %2992 = vst.msk [vmem:[#allocation3 + $0xb8] sm:$0xff] %vm332_vm0, %v2976_v36  ;;  %2351 = vst.msk [vmem:[#allocation2 + $0xf9] sm:$0xff] %vm332_vm0, %v2244_v32  ;;  %v8304_v59 = vadd.f32 %v8303_v11, %v8302_v21  ;;  %v8890_v9 = vpop.f32.mrb[86].mxu0 }
 0x238   : > { %v2634_v10 = vld [vmem:[#allocation2 + $0xc0] sm:$0xff]  ;;  %2800 = vst.msk [vmem:[#allocation3 + $0xb0] sm:$0xff] %vm332_vm0, %v2784_v19  ;;  %v3167_v17 = vpack.c.bf16 %v3139_v20, %v3138_v5  ;;  %v2445_v60 = vld [vmem:[#allocation2 + $0xc9] sm:$0xff]  ;;  %v2443_v44 = vld [vmem:[#allocation2 + $0xb1] sm:$0xff]  ;;  %v2179_v20 = vadd.f32 %v2178_v49, %v10461_v40  ;;  %v2247_v32 = vmax.f32 %v2187_v50, 0.0  ;;  %v2190_v33 = vadd.f32 %v8890_v9, %v10513_v7 }
 0x239   : > { %v2826_v26 = vld [vmem:[#allocation2 + $0xc2] sm:$0xff]  ;;  %2801 = vst.msk [vmem:[#allocation3 + $0xd8] sm:$0xff] %vm332_vm0, %v2785_v53  ;;  %v2633_v2 = vld [vmem:[#allocation2 + $0xb0] sm:$0xff]  ;;  %v2659_v39 = vpack.c.bf16 %v2635_v23, %v2634_v10  ;;  %2349 = vst.msk [vmem:[#allocation2 + $0xe1] sm:$0xff] %vm332_vm0, %v2242_v58  ;;  %v10578_v14 = vpack.c.bf16 %v2443_v44, %v2442_v38  ;;  %v10580_v47 = vpack.c.bf16 %v2445_v60, %v2444_v18 }
 0x23a   : > { %v2824_v51 = vld [vmem:[#allocation2 + $0xaa] sm:$0xff]  ;;  %3183 = vst.msk [vmem:[#allocation3 + $0x98] sm:$0xff] %vm332_vm0, %v3167_v17  ;;  %v2658_v29 = vpack.c.bf16 %v2633_v2, %v2632_v54  ;;  %v2825_v43 = vld [vmem:[#allocation2 + $0xb2] sm:$0xff]  ;;  %v2181_v54 = vpop.f32.mrb[87].mxu0  ;;  %v10596_v38 = vadd.f32 %v8304_v59, %v1884_v28  ;;  %v2952_v18 = vld [vmem:[#allocation2 + $0xc0] sm:$0xff]  ;;  %v2245_v55 = vmax.f32 %v2179_v20, 0.0 }
 0x23b   : > { %v2827_v0 = vld [vmem:[#allocation2 + $0xca] sm:$0xff]  ;;  %v10585_v19 = vpack.c.bf16 %v2825_v43, %v2824_v51  ;;  %2420 = vst.msk [vmem:[#allocation3 + $0x140] sm:$0xff] %vm332_vm0, %v2659_v39  ;;  %2506 = vrot.lane.b32.xlu1 %v10578_v14, %s9455_s17  ;;  %v3140_v53 = vld [vmem:[#allocation2 + $0x92] sm:$0xff]  ;;  %v2762_v17 = vld [vmem:[#allocation2 + $0xc1] sm:$0xff]  ;;  %v2182_v23 = vadd.f32 %v2181_v54, %v10473_v37  ;;  %v8305_v56 = vpop.f32.mrb[56].mxu1 }
 0x23c   : > { %v2951_v24 = vld [vmem:[#allocation2 + $0xb0] sm:$0xff]  ;;  %v2950_v57 = vld [vmem:[#allocation2 + $0xa8] sm:$0xff]  ;;  %2696 = vrot.lane.b32.xlu0 %v2658_v29, %s9455_s17  ;;  %v10592_v27 = vpack.c.bf16 %v2827_v0, %v2826_v26  ;;  %2419 = vst.msk [vmem:[#allocation3 + $0x118] sm:$0xff] %vm332_vm0, %v2658_v29  ;;  %v3141_v58 = vld [vmem:[#allocation2 + $0x9a] sm:$0xff]  ;;  %v2248_v26 = vmax.f32 %v2190_v33, 0.0  ;;  %v8306_v51 = vpop.f32.mrb[57].mxu1  ;;  %v1889_v29 = vadd.f32 %v10392_v4, %v10286_v3 }
 0x23d   : > { %v2761_v31 = vld [vmem:[#allocation2 + $0xb1] sm:$0xff]  ;;  %v2953_v5 = vld [vmem:[#allocation2 + $0xc8] sm:$0xff]  ;;  %v2977_v30 = vpack.c.bf16 %v2951_v24, %v2950_v57  ;;  %2611 = vst.msk [vmem:[#allocation3 + $0x120] sm:$0xff] %vm332_vm0, %v10585_v19  ;;  %2354 = vst.msk [vmem:[#allocation2 + $0x121] sm:$0xff] %vm332_vm0, %v2247_v32  ;;  %v3168_v44 = vpack.c.bf16 %v3141_v58, %v3140_v53  ;;  %v2246_v37 = vmax.f32 %v2182_v23, 0.0  ;;  %v8307_v43 = vadd.f32 %v8306_v51, %v8305_v56  ;;  %v8308_v0 = vpop.f32.mrb[58].mxu1 }
 0x23e   : > { %v2760_v10 = vld [vmem:[#allocation2 + $0xa9] sm:$0xff]  ;;  %2612 = vst.msk [vmem:[#allocation3 + $0x148] sm:$0xff] %vm332_vm0, %v10592_v27  ;;  %v2978_v60 = vpack.c.bf16 %v2953_v5, %v2952_v18  ;;  %v2636_v25 = vld [vmem:[#allocation2 + $0xd8] sm:$0xff]  ;;  %2352 = vst.msk [vmem:[#allocation2 + $0x109] sm:$0xff] %vm332_vm0, %v2245_v55  ;;  %v8309_v3 = vpop.f32.mrb[59].mxu1  ;;  %v8893_v4 = vpop.f32.mrb[88].mxu0 }
 0x23f   : > { %v2763_v36 = vld [vmem:[#allocation2 + $0xc9] sm:$0xff]  ;;  %v2786_v40 = vpack.c.bf16 %v2761_v31, %v2760_v10  ;;  %2993 = vst.msk [vmem:[#allocation3 + $0xe0] sm:$0xff] %vm332_vm0, %v2977_v30  ;;  %v2446_v21 = vld [vmem:[#allocation2 + $0xd9] sm:$0xff]  ;;  %2508 = vrot.lane.b32.xlu1 %v10580_v47, %s9455_s17  ;;  %2355 = vst.msk [vmem:[#allocation2 + $0x129] sm:$0xff] %vm332_vm0, %v2248_v26  ;;  %v8310_v10 = vadd.f32 %v8309_v3, %v8308_v0  ;;  %v2194_v53 = vpop.f32.mrb[89].mxu0  ;;  %v10630_v33 = vadd.f32 %v8307_v43, %v1889_v29 }
 0x240   : > { %v2787_v7 = vpack.c.bf16 %v2763_v36, %v2762_v17  ;;  %v2638_v2 = vld [vmem:[#allocation2 + $0xf0] sm:$0xff]  ;;  %2698 = vrot.lane.b32.xlu0 %v2659_v39, %s9455_s17  ;;  %v2639_v28 = vld [vmem:[#allocation2 + $0xf8] sm:$0xff]  ;;  %2994 = vst.msk [vmem:[#allocation3 + $0x108] sm:$0xff] %vm332_vm0, %v2978_v60  ;;  %v2637_v24 = vld [vmem:[#allocation2 + $0xe0] sm:$0xff]  ;;  %v2203_v36 = vadd.f32 %v8893_v4, %v10583_v63  ;;  %v2195_v18 = vadd.f32 %v2194_v53, %v10542_v61  ;;  %v8894_v17 = vpop.f32.mrb[90].mxu0 }
 0x241   : > { %2802 = vst.msk [vmem:[#allocation3 + $0x100] sm:$0xff] %vm332_vm0, %v2786_v40  ;;  %v2449_v11 = vld [vmem:[#allocation2 + $0xf9] sm:$0xff]  ;;  %v2447_v59 = vld [vmem:[#allocation2 + $0xe1] sm:$0xff]  ;;  %v2661_v39 = vpack.c.bf16 %v2639_v28, %v2638_v2  ;;  %3184 = vst.msk [vmem:[#allocation3 + $0xc0] sm:$0xff] %vm332_vm0, %v3168_v44  ;;  %v2660_v31 = vpack.c.bf16 %v2637_v24, %v2636_v25  ;;  %v2206_v26 = vadd.f32 %v8894_v17, %v10596_v38  ;;  %v2197_v56 = vpop.f32.mrb[91].mxu0 }
 0x242   : > { %v2830_v45 = vld [vmem:[#allocation2 + $0xf2] sm:$0xff]  ;;  %2803 = vst.msk [vmem:[#allocation3 + $0x128] sm:$0xff] %vm332_vm0, %v2787_v7  ;;  %v2828_v50 = vld [vmem:[#allocation2 + $0xda] sm:$0xff]  ;;  %2353 = vst.msk [vmem:[#allocation2 + $0x111] sm:$0xff] %vm332_vm0, %v2246_v37  ;;  %v10624_v5 = vpack.c.bf16 %v2447_v59, %v2446_v21  ;;  %v2251_v7 = vmax.f32 %v2203_v36, 0.0  ;;  %v2249_v37 = vmax.f32 %v2195_v18, 0.0  ;;  %v2198_v51 = vadd.f32 %v2197_v56, %v10555_v35 }
 0x243   : > { %v10619_v49 = vld [vmem:[%s13077_s2] ss:$0 sm:$0xff]  ;;  %v2829_v20 = vld [vmem:[#allocation2 + $0xe2] sm:$0xff]  ;;  %v2448_v32 = vld [vmem:[#allocation2 + $0xf1] sm:$0xff]  ;;  %2422 = vst.msk [vmem:[#allocation3 + $0x190] sm:$0xff] %vm332_vm0, %v2661_v39  ;;  %v2252_v43 = vmax.f32 %v2206_v26, 0.0 }
 0x244   : > { %v1892_v57 = vadd.f32 %v10619_v49, %v10396_v22  ;;  %v2831_v9 = vld [vmem:[#allocation2 + $0xfa] sm:$0xff]  ;;  %v10632_v22 = vpack.c.bf16 %v2829_v20, %v2828_v50  ;;  %v9141_v40 = vld [vmem:[%s13076_s1 + $0x1e8] sm:$0xff]   ;;  %2700 = vrot.lane.b32.xlu0 %v2660_v31, %s9455_s17  ;;  %2510 = vrot.lane.b32.xlu1 %v10624_v5, %s9455_s17  ;;  %v10645_v63 = vpack.c.bf16 %v2449_v11, %v2448_v32  ;;  %v2956_v60 = vld [vmem:[#allocation2 + $0xf0] sm:$0xff]  ;;  %v8311_v0 = vpop.f32.mrb[60].mxu1  ;;  %v2250_v50 = vmax.f32 %v2198_v51, 0.0 }
 0x245   : > { %v9139_v30 = vld [vmem:[%s13076_s1 + $0x1e0] sm:$0xff]   ;;  %v10647_v58 = vpack.c.bf16 %v2831_v9, %v2830_v45  ;;  %2421 = vst.msk [vmem:[#allocation3 + $0x168] sm:$0xff] %vm332_vm0, %v2660_v31  ;;  %v2954_v55 = vld [vmem:[#allocation2 + $0xd8] sm:$0xff]  ;;  %v9142_v38 = vld [vmem:[%s13076_s1 + $0x1a8] sm:$0xff]   ;;  %v1897_v20 = vadd.f32 %v10619_v49, %v10404_v34  ;;  %v1900_v32 = vadd.f32 %v10619_v49, %v10414_v6 }
 0x246   : > { %v9140_v54 = vld [vmem:[%s13076_s1 + $0x1a0] sm:$0xff]   ;;  %v10651_v61 = vadd.f32 %v8310_v10, %v1892_v57  ;;  %2613 = vst.msk [vmem:[#allocation3 + $0x170] sm:$0xff] %vm332_vm0, %v10632_v22  ;;  %8449 = vmatprep.subr.bf16.mxu0 %v9139_v30  ;;  %v2957_v44 = vld [vmem:[#allocation2 + $0xf8] sm:$0xff]  ;;  %2358 = vst.msk [vmem:[#allocation2 + $0x151] sm:$0xff] %vm332_vm0, %v2251_v7  ;;  %v8312_v57 = vpop.f32.mrb[61].mxu1 }
 0x247   : > { %v2955_v23 = vld [vmem:[#allocation2 + $0xe0] sm:$0xff]  ;;  %2614 = vst.msk [vmem:[#allocation3 + $0x198] sm:$0xff] %vm332_vm0, %v10647_v58  ;;  %8450 = vmatpush3.bf16.msra.mxu0 %v9140_v54  ;;  %v2980_v11 = vpack.c.bf16 %v2957_v44, %v2956_v60  ;;  %v2766_v45 = vld [vmem:[#allocation2 + $0xf1] sm:$0xff]  ;;  %v2640_v24 = vld [vmem:[#allocation2 + $0x108] sm:$0xff]  ;;  %v8313_v9 = vadd.f32 %v8312_v57, %v8311_v0  ;;  %v8314_v30 = vpop.f32.mrb[62].mxu1 }
 0x248   : > { %v2979_v25 = vpack.c.bf16 %v2955_v23, %v2954_v55  ;;  %v2764_v21 = vld [vmem:[#allocation2 + $0xd9] sm:$0xff]  ;;  %v2765_v2 = vld [vmem:[#allocation2 + $0xe1] sm:$0xff]  ;;  %8451 = vmatprep.subr.bf16.mxu0 %v9141_v40  ;;  %2356 = vst.msk [vmem:[#allocation2 + $0x139] sm:$0xff] %vm332_vm0, %v2249_v37  ;;  %2702 = vrot.lane.b32.xlu0 %v2661_v39, %s9455_s17  ;;  %v2450_v3 = vld [vmem:[#allocation2 + $0x109] sm:$0xff]  ;;  %v8315_v54 = vpop.f32.mrb[63].mxu1  ;;  %v8897_v40 = vpop.f32.mrb[92].mxu0 }
 0x249   : > { %v2788_v28 = vpack.c.bf16 %v2765_v2, %v2764_v21  ;;  %v2767_v29 = vld [vmem:[#allocation2 + $0xf9] sm:$0xff]  ;;  %2512 = vrot.lane.b32.xlu1 %v10645_v63, %s9455_s17  ;;  %v2643_v4 = vld [vmem:[#allocation2 + $0x128] sm:$0xff]  ;;  %2996 = vst.msk [vmem:[#allocation3 + $0x158] sm:$0xff] %vm332_vm0, %v2980_v11  ;;  %2359 = vst.msk [vmem:[#allocation2 + $0x159] sm:$0xff] %vm332_vm0, %v2252_v43  ;;  %v8316_v7 = vadd.f32 %v8315_v54, %v8314_v30  ;;  %v2058_v26 = vadd.f32 %v8313_v9, %v1897_v20  ;;  %v2210_v56 = vpop.f32.mrb[93].mxu0 }
 0x24a   : > { %v2642_v59 = vld [vmem:[#allocation2 + $0x120] sm:$0xff]  ;;  %2995 = vst.msk [vmem:[#allocation3 + $0x130] sm:$0xff] %vm332_vm0, %v2979_v25  ;;  %v2789_v35 = vpack.c.bf16 %v2767_v29, %v2766_v45  ;;  %v2641_v10 = vld [vmem:[#allocation2 + $0x110] sm:$0xff]  ;;  %2357 = vst.msk [vmem:[#allocation2 + $0x141] sm:$0xff] %vm332_vm0, %v2250_v50  ;;  %v2211_v44 = vadd.f32 %v2210_v56, %v10630_v33  ;;  %v8898_v37 = vpop.f32.mrb[94].mxu0 }
 0x24b   : > { %v2834_v31 = vld [vmem:[#allocation2 + $0x122] sm:$0xff]  ;;  %2804 = vst.msk [vmem:[#allocation3 + $0x150] sm:$0xff] %vm332_vm0, %v2788_v28  ;;  %v2451_v36 = vld [vmem:[#allocation2 + $0x111] sm:$0xff]  ;;  %v2663_v39 = vpack.c.bf16 %v2643_v4, %v2642_v59  ;;  %v2662_v18 = vpack.c.bf16 %v2641_v10, %v2640_v24  ;;  %8452 = vmatpush3.bf16.msra.mxu0 %v9142_v38  ;;  %v2219_v11 = vadd.f32 %v8897_v40, %v2058_v26  ;;  %v2213_v29 = vpop.f32.mrb[95].mxu0 }
 0x24c   : > { %v2832_v53 = vld [vmem:[#allocation2 + $0x10a] sm:$0xff]  ;;  %2805 = vst.msk [vmem:[#allocation3 + $0x178] sm:$0xff] %vm332_vm0, %v2789_v35  ;;  %v10676_v17 = vpack.c.bf16 %v2451_v36, %v2450_v3  ;;  %v2833_v34 = vld [vmem:[#allocation2 + $0x112] sm:$0xff]  ;;  %v2061_v45 = vadd.f32 %v8316_v7, %v1900_v32  ;;  %v2452_v43 = vld [vmem:[#allocation2 + $0x121] sm:$0xff]  ;;  %v2253_v35 = vmax.f32 %v2211_v44, 0.0  ;;  %v2214_v50 = vadd.f32 %v2213_v29, %v10651_v61 }
 0x24d   : > { %v2835_v55 = vld [vmem:[#allocation2 + $0x12a] sm:$0xff]  ;;  %v10681_v6 = vpack.c.bf16 %v2833_v34, %v2832_v53  ;;  %2424 = vst.msk [vmem:[#allocation3 + $0x1e0] sm:$0xff] %vm332_vm0, %v2663_v39  ;;  %v9145_v2 = vld [vmem:[%s13076_s1 + $0x1f8] sm:$0xff]   ;;  %2704 = vrot.lane.b32.xlu0 %v2662_v18, %s9455_s17  ;;  %2423 = vst.msk [vmem:[#allocation3 + $0x1b8] sm:$0xff] %vm332_vm0, %v2662_v18  ;;  %v2255_v9 = vmax.f32 %v2219_v11, 0.0 }
 0x24e   : > { %v9143_v23 = vld [vmem:[%s13076_s1 + $0x1f0] sm:$0xff]   ;;  %v2958_v60 = vld [vmem:[#allocation2 + $0x108] sm:$0xff]  ;;  %v10683_v49 = vpack.c.bf16 %v2835_v55, %v2834_v31  ;;  %2514 = vrot.lane.b32.xlu1 %v10676_v17, %s9455_s17  ;;  %v2960_v24 = vld [vmem:[#allocation2 + $0x120] sm:$0xff]  ;;  %v2222_v30 = vadd.f32 %v8898_v37, %v2061_v45  ;;  %2360 = vst.msk [vmem:[#allocation2 + $0x169] sm:$0xff] %vm332_vm0, %v2253_v35  ;;  %v2254_v53 = vmax.f32 %v2214_v50, 0.0 }
 0x24f   : > { %v2453_v25 = vld [vmem:[#allocation2 + $0x129] sm:$0xff]  ;;  %v2769_v28 = vld [vmem:[#allocation2 + $0x111] sm:$0xff]  ;;  %2615 = vst.msk [vmem:[#allocation3 + $0x1c0] sm:$0xff] %vm332_vm0, %v10681_v6  ;;  %8453 = vmatprep.subr.bf16.mxu0 %v9143_v23  ;;  %v2770_v31 = vld [vmem:[#allocation2 + $0x121] sm:$0xff] }
 0x250   : > { %v9144_v21 = vld [vmem:[%s13076_s1 + $0x1b0] sm:$0xff]   ;;  %2616 = vst.msk [vmem:[#allocation3 + $0x1e8] sm:$0xff] %vm332_vm0, %v10683_v49  ;;  %v2961_v59 = vld [vmem:[#allocation2 + $0x128] sm:$0xff]  ;;  %v10702_v57 = vpack.c.bf16 %v2453_v25, %v2452_v43  ;;  %v9146_v3 = vld [vmem:[%s13076_s1 + $0x1b8] sm:$0xff]   ;;  %v2256_v18 = vmax.f32 %v2222_v30, 0.0 }
 0x251   : > { %v2959_v51 = vld [vmem:[#allocation2 + $0x110] sm:$0xff]  ;;  %8454 = vmatpush3.bf16.msra.mxu0 %v9144_v21  ;;  %v2982_v4 = vpack.c.bf16 %v2961_v59, %v2960_v24  ;;  %v2644_v10 = vld [vmem:[#allocation2 + $0x138] sm:$0xff]  ;;  %2706 = vrot.lane.b32.xlu0 %v2663_v39, %s9455_s17  ;;  %2362 = vst.msk [vmem:[#allocation2 + $0x181] sm:$0xff] %vm332_vm0, %v2255_v9  ;;  %v2645_v34 = vld [vmem:[#allocation2 + $0x140] sm:$0xff] }
 0x252   : > { %v2768_v38 = vld [vmem:[#allocation2 + $0x109] sm:$0xff]  ;;  %v2981_v33 = vpack.c.bf16 %v2959_v51, %v2958_v60  ;;  %8455 = vmatprep.subr.bf16.mxu0 %v9145_v2  ;;  %2516 = vrot.lane.b32.xlu1 %v10702_v57, %s9455_s17  ;;  %v2454_v32 = vld [vmem:[#allocation2 + $0x139] sm:$0xff]  ;;  %v2455_v55 = vld [vmem:[#allocation2 + $0x141] sm:$0xff]  ;;  %2361 = vst.msk [vmem:[#allocation2 + $0x171] sm:$0xff] %vm332_vm0, %v2254_v53  ;;  %v2664_v39 = vpack.c.bf16 %v2645_v34, %v2644_v10 }
 0x253   : > { %v2790_v0 = vpack.c.bf16 %v2769_v28, %v2768_v38  ;;  %v2771_v20 = vld [vmem:[#allocation2 + $0x129] sm:$0xff]  ;;  %v2647_v54 = vld [vmem:[#allocation2 + $0x158] sm:$0xff]  ;;  %2998 = vst.msk [vmem:[#allocation3 + $0x1a8] sm:$0xff] %vm332_vm0, %v2982_v4  ;;  %v10717_v7 = vpack.c.bf16 %v2455_v55, %v2454_v32  ;;  %v9147_v25 = vld [vmem:[%s13076_s1 + $0x200] sm:$0xff]  }
 0x254   : > { %v2646_v36 = vld [vmem:[#allocation2 + $0x150] sm:$0xff]  ;;  %2997 = vst.msk [vmem:[#allocation3 + $0x180] sm:$0xff] %vm332_vm0, %v2981_v33  ;;  %v2791_v61 = vpack.c.bf16 %v2771_v20, %v2770_v31  ;;  %v2836_v60 = vld [vmem:[#allocation2 + $0x13a] sm:$0xff]  ;;  %v2837_v26 = vld [vmem:[#allocation2 + $0x142] sm:$0xff] }
 0x255   : > { %2806 = vst.msk [vmem:[#allocation3 + $0x1a0] sm:$0xff] %vm332_vm0, %v2790_v0  ;;  %v2838_v40 = vld [vmem:[#allocation2 + $0x152] sm:$0xff]  ;;  %v2665_v23 = vpack.c.bf16 %v2647_v54, %v2646_v36  ;;  %v2839_v56 = vld [vmem:[#allocation2 + $0x15a] sm:$0xff]  ;;  %8456 = vmatpush3.bf16.msra.mxu0 %v9146_v3  ;;  %2363 = vst.msk [vmem:[#allocation2 + $0x189] sm:$0xff] %vm332_vm0, %v2256_v18  ;;  %v10723_v44 = vpack.c.bf16 %v2837_v26, %v2836_v60  ;;  %2708 = vrot.lane.b32.xlu0 %v2664_v39, %s9455_s17 }
 0x256   : > { %2807 = vst.msk [vmem:[#allocation3 + $0x1c8] sm:$0xff] %vm332_vm0, %v2791_v61  ;;  %v2962_v21 = vld [vmem:[#allocation2 + $0x138] sm:$0xff]  ;;  %v10725_v37 = vpack.c.bf16 %v2839_v56, %v2838_v40  ;;  %v9148_v51 = vld [vmem:[%s13076_s1 + $0x1c0] sm:$0xff]   ;;  %v9149_v38 = vld [vmem:[%s13076_s1 + $0x208] sm:$0xff]   ;;  %2518 = vrot.lane.b32.xlu1 %v10717_v7, %s9455_s17  ;;  %8457 = vmatprep.subr.bf16.mxu0 %v9147_v25 }
 0x257   : > { %v2457_v2 = vld [vmem:[#allocation2 + $0x159] sm:$0xff]  ;;  %2426 = vst.msk [vmem:[#allocation3 + $0x230] sm:$0xff] %vm332_vm0, %v2665_v23  ;;  %2425 = vst.msk [vmem:[#allocation3 + $0x208] sm:$0xff] %vm332_vm0, %v2664_v39  ;;  %v2773_v45 = vld [vmem:[#allocation2 + $0x141] sm:$0xff] }
 0x258   : > { %v2963_v28 = vld [vmem:[#allocation2 + $0x140] sm:$0xff]  ;;  %v2456_v29 = vld [vmem:[#allocation2 + $0x151] sm:$0xff]  ;;  %2617 = vst.msk [vmem:[#allocation3 + $0x210] sm:$0xff] %vm332_vm0, %v10723_v44  ;;  %2618 = vst.msk [vmem:[#allocation3 + $0x238] sm:$0xff] %vm332_vm0, %v10725_v37 }
 0x259   : > { %v2772_v11 = vld [vmem:[#allocation2 + $0x139] sm:$0xff]  ;;  %v2983_v43 = vpack.c.bf16 %v2963_v28, %v2962_v21  ;;  %v2964_v0 = vld [vmem:[#allocation2 + $0x150] sm:$0xff]  ;;  %v10742_v59 = vpack.c.bf16 %v2457_v2, %v2456_v29  ;;  %8458 = vmatpush3.bf16.msra.mxu0 %v9148_v51  ;;  %v9150_v35 = vld [vmem:[%s13076_s1 + $0x1c8] sm:$0xff]   ;;  %2710 = vrot.lane.b32.xlu0 %v2665_v23, %s9455_s17 }
 0x25a   : > { %v2792_v33 = vpack.c.bf16 %v2773_v45, %v2772_v11  ;;  %v2965_v24 = vld [vmem:[#allocation2 + $0x158] sm:$0xff]  ;;  %8459 = vmatprep.subr.bf16.mxu0 %v9149_v38  ;;  %v2648_v20 = vld [vmem:[#allocation2 + $0x168] sm:$0xff]  ;;  %v9151_v30 = vld [vmem:[%s13076_s1 + $0x210] sm:$0xff]  }
 0x25b   : > { %v2984_v50 = vpack.c.bf16 %v2965_v24, %v2964_v0  ;;  %v2774_v3 = vld [vmem:[#allocation2 + $0x151] sm:$0xff]  ;;  %v2775_v4 = vld [vmem:[#allocation2 + $0x159] sm:$0xff]  ;;  %2999 = vst.msk [vmem:[#allocation3 + $0x1d0] sm:$0xff] %vm332_vm0, %v2983_v43  ;;  %2520 = vrot.lane.b32.xlu1 %v10742_v59, %s9455_s17  ;;  %v2458_v9 = vld [vmem:[#allocation2 + $0x169] sm:$0xff] }
 0x25c   : > { %2808 = vst.msk [vmem:[#allocation3 + $0x1f0] sm:$0xff] %vm332_vm0, %v2792_v33  ;;  %v2793_v31 = vpack.c.bf16 %v2775_v4, %v2774_v3  ;;  %v2649_v10 = vld [vmem:[#allocation2 + $0x170] sm:$0xff]  ;;  %v2651_v40 = vld [vmem:[#allocation2 + $0x188] sm:$0xff]  ;;  %v2650_v55 = vld [vmem:[#allocation2 + $0x180] sm:$0xff] }
 0x25d   : > { %3000 = vst.msk [vmem:[#allocation3 + $0x1f8] sm:$0xff] %vm332_vm0, %v2984_v50  ;;  %v2459_v36 = vld [vmem:[#allocation2 + $0x171] sm:$0xff]  ;;  %v2666_v53 = vpack.c.bf16 %v2649_v10, %v2648_v20  ;;  %8460 = vmatpush3.bf16.msra.mxu0 %v9150_v35  ;;  %v2966_v60 = vld [vmem:[#allocation2 + $0x168] sm:$0xff]  ;;  %v2667_v21 = vpack.c.bf16 %v2651_v40, %v2650_v55  ;;  %v2968_v38 = vld [vmem:[#allocation2 + $0x180] sm:$0xff] }
 0x25e   : > { %v2840_v61 = vld [vmem:[#allocation2 + $0x16a] sm:$0xff]  ;;  %2809 = vst.msk [vmem:[#allocation3 + $0x218] sm:$0xff] %vm332_vm0, %v2793_v31  ;;  %v10757_v32 = vpack.c.bf16 %v2459_v36, %v2458_v9  ;;  %v2841_v54 = vld [vmem:[#allocation2 + $0x172] sm:$0xff]  ;;  %8461 = vmatprep.subr.bf16.mxu0 %v9151_v30  ;;  %v2778_v29 = vld [vmem:[#allocation2 + $0x181] sm:$0xff] }
 0x25f   : > { %v10759_v18 = vpack.c.bf16 %v2841_v54, %v2840_v61  ;;  %v9152_v34 = vld [vmem:[%s13076_s1 + $0x1d0] sm:$0xff]   ;;  %2712 = vrot.lane.b32.xlu0 %v2666_v53, %s9455_s17  ;;  %2427 = vst.msk [vmem:[#allocation3 + $0x258] sm:$0xff] %vm332_vm0, %v2666_v53  ;;  %v9153_v23 = vld [vmem:[%s13076_s1 + $0x218] sm:$0xff]   ;;  %v2969_v28 = vld [vmem:[#allocation2 + $0x188] sm:$0xff] }
 0x260   : > { %2522 = vrot.lane.b32.xlu1 %v10757_v32, %s9455_s17  ;;  %v3142_v39 = vld [vmem:[#allocation2 + $0xaa] sm:$0xff]  ;;  %v9154_v26 = vld [vmem:[%s13076_s1 + $0x1d8] sm:$0xff]   ;;  %v2986_v45 = vpack.c.bf16 %v2969_v28, %v2968_v38  ;;  %v3144_v24 = vld [vmem:[#allocation2 + $0xc2] sm:$0xff] }
 0x261   : > { %2619 = vst.msk [vmem:[#allocation3 + $0x260] sm:$0xff] %vm332_vm0, %v10759_v18  ;;  %v2967_v56 = vld [vmem:[#allocation2 + $0x170] sm:$0xff]  ;;  %8462 = vmatpush3.bf16.msra.mxu0 %v9152_v34  ;;  %v3146_v4 = vld [vmem:[#allocation2 + $0xda] sm:$0xff]  ;;  %v3147_v31 = vld [vmem:[#allocation2 + $0xe2] sm:$0xff] }
 0x262   : > { %v2776_v25 = vld [vmem:[#allocation2 + $0x169] sm:$0xff]  ;;  %v2985_v2 = vpack.c.bf16 %v2967_v56, %v2966_v60  ;;  %v2777_v51 = vld [vmem:[#allocation2 + $0x171] sm:$0xff]  ;;  %8463 = vmatprep.subr.bf16.mxu0 %v9153_v23  ;;  %3002 = vst.msk [vmem:[#allocation3 + $0x248] sm:$0xff] %vm332_vm0, %v2986_v45  ;;  %v3171_v9 = vpack.c.bf16 %v3147_v31, %v3146_v4  ;;  %v3154_v40 = vld [vmem:[#allocation2 + $0x13a] sm:$0xff] }
 0x263   : > { %v2794_v11 = vpack.c.bf16 %v2777_v51, %v2776_v25  ;;  %v2779_v43 = vld [vmem:[#allocation2 + $0x189] sm:$0xff]  ;;  %2714 = vrot.lane.b32.xlu0 %v2667_v21, %s9455_s17  ;;  %v3143_v0 = vld [vmem:[#allocation2 + $0xb2] sm:$0xff]  ;;  %v3157_v60 = vld [vmem:[#allocation2 + $0x15a] sm:$0xff] }
 0x264   : > { %2876 = vrot.lane.b32.xlu1 %v10463_v8, %s9455_s17  ;;  %3001 = vst.msk [vmem:[#allocation3 + $0x220] sm:$0xff] %vm332_vm0, %v2985_v2  ;;  %v2795_v33 = vpack.c.bf16 %v2779_v43, %v2778_v29  ;;  %v3145_v35 = vld [vmem:[#allocation2 + $0xca] sm:$0xff]  ;;  %v3169_v50 = vpack.c.bf16 %v3143_v0, %v3142_v39  ;;  %v3148_v20 = vld [vmem:[#allocation2 + $0xf2] sm:$0xff]  ;;  %v3149_v8 = vld [vmem:[#allocation2 + $0xfa] sm:$0xff] }
 0x265   : > { %2810 = vst.msk [vmem:[#allocation3 + $0x240] sm:$0xff] %vm332_vm0, %v2794_v11  ;;  %v3170_v3 = vpack.c.bf16 %v3145_v35, %v3144_v24  ;;  %8464 = vmatpush3.bf16.msra.mxu0 %v9154_v26  ;;  %v3150_v30 = vld [vmem:[#allocation2 + $0x10a] sm:$0xff]  ;;  %v3151_v10 = vld [vmem:[#allocation2 + $0x112] sm:$0xff]  ;;  %v3172_v36 = vpack.c.bf16 %v3149_v8, %v3148_v20  ;;  %v3152_v53 = vld [vmem:[#allocation2 + $0x122] sm:$0xff] }
 0x266   : > { %2811 = vst.msk [vmem:[#allocation3 + $0x268] sm:$0xff] %vm332_vm0, %v2795_v33  ;;  %3185 = vst.msk [vmem:[#allocation3 + $0xe8] sm:$0xff] %vm332_vm0, %v3169_v50  ;;  %v3173_v61 = vpack.c.bf16 %v3151_v10, %v3150_v30  ;;  %v3153_v54 = vld [vmem:[#allocation2 + $0x12a] sm:$0xff]  ;;  %v3155_v55 = vld [vmem:[#allocation2 + $0x142] sm:$0xff] }
 0x267   : > { %3186 = vst.msk [vmem:[#allocation3 + $0x110] sm:$0xff] %vm332_vm0, %v3170_v3  ;;  %3068 = vrot.lane.b32.xlu0 %v10458_v62, %s9455_s17  ;;  %3187 = vst.msk [vmem:[#allocation3 + $0x138] sm:$0xff] %vm332_vm0, %v3171_v9  ;;  %v3174_v34 = vpack.c.bf16 %v3153_v54, %v3152_v53  ;;  %v3156_v23 = vld [vmem:[#allocation2 + $0x152] sm:$0xff]  ;;  %v3175_v39 = vpack.c.bf16 %v3155_v55, %v3154_v40  ;;  %v3158_v56 = vld [vmem:[#allocation2 + $0x16a] sm:$0xff] }
 0x268   : > { %2878 = vrot.lane.b32.xlu1 %v10469_v46, %s9455_s17  ;;  %3188 = vst.msk [vmem:[#allocation3 + $0x160] sm:$0xff] %vm332_vm0, %v3172_v36  ;;  %3189 = vst.msk [vmem:[#allocation3 + $0x188] sm:$0xff] %vm332_vm0, %v3173_v61  ;;  %v3176_v26 = vpack.c.bf16 %v3157_v60, %v3156_v23  ;;  %v3159_v25 = vld [vmem:[#allocation2 + $0x172] sm:$0xff]  ;;  %v3160_v21 = vld [vmem:[#allocation2 + $0x182] sm:$0xff] }
 0x269   : > { %3190 = vst.msk [vmem:[#allocation3 + $0x1b0] sm:$0xff] %vm332_vm0, %v3174_v34  ;;  %v3177_v62 = vpack.c.bf16 %v3159_v25, %v3158_v56  ;;  %v3161_v2 = vld [vmem:[#allocation2 + $0x18a] sm:$0xff]  ;;  %3191 = vst.msk [vmem:[#allocation3 + $0x1d8] sm:$0xff] %vm332_vm0, %v3175_v39  ;;  %v2970_v55 = vld [vmem:[#allocation2 + $0x198] sm:$0xff] }
 0x26a   : > { %3192 = vst.msk [vmem:[#allocation3 + $0x200] sm:$0xff] %vm332_vm0, %v3176_v26  ;;  %v3178_v46 = vpack.c.bf16 %v3161_v2, %v3160_v21  ;;  %v2971_v23 = vld [vmem:[#allocation2 + $0x1a0] sm:$0xff] }
 0x26b   : > { %3070 = vrot.lane.b32.xlu0 %v10495_v12, %s9455_s17  ;;  %3193 = vst.msk [vmem:[#allocation3 + $0x228] sm:$0xff] %vm332_vm0, %v3177_v62  ;;  %v2987_v26 = vpack.c.bf16 %v2971_v23, %v2970_v55 }
 0x26c   : > { %2880 = vrot.lane.b32.xlu1 %v10502_v15, %s9455_s17  ;;  %3194 = vst.msk [vmem:[#allocation3 + $0x250] sm:$0xff] %vm332_vm0, %v3178_v46  ;;  %v3033_v15 = vld [vmem:[#allocation2 + $0x189] sm:$0xff] }
 0x26d   : > { %3003 = vst.msk [vmem:[#allocation3 + $0x270] sm:$0xff] %vm332_vm0, %v2987_v26 }
 0x26f   : > { %3072 = vrot.lane.b32.xlu0 %v10497_v16, %s9455_s17 }
 0x270   : > { %2882 = vrot.lane.b32.xlu1 %v10509_v52, %s9455_s17  ;;  %v2842_v52 = vld [vmem:[#allocation2 + $0x182] sm:$0xff] }
 0x273   : > { %3074 = vrot.lane.b32.xlu0 %v10537_v13, %s9455_s17  ;;  %v2843_v13 = vld [vmem:[#allocation2 + $0x18a] sm:$0xff] }
 0x274   : > { %2884 = vrot.lane.b32.xlu1 %v10544_v42, %s9455_s17  ;;  %v3034_v42 = vld [vmem:[#allocation2 + $0x199] sm:$0xff] }
 0x277   : > { %3076 = vrot.lane.b32.xlu0 %v10539_v41, %s9455_s17  ;;  %v3032_v41 = vld [vmem:[#allocation2 + $0x181] sm:$0xff] }
 0x278   : > { %2886 = vrot.lane.b32.xlu1 %v10551_v48, %s9455_s17  ;;  %v3035_v48 = vld [vmem:[#allocation2 + $0x1a1] sm:$0xff] }
 0x27b   : > { %3078 = vrot.lane.b32.xlu0 %v10578_v14, %s9455_s17 }
 0x27c   : > { %2888 = vrot.lane.b32.xlu1 %v10585_v19, %s9455_s17  ;;  %v3050_v19 = vpack.c.bf16 %v3033_v15, %v3032_v41  ;;  %v4965_v41 = vld [vmem:[#allocation2 + $0x1a2] sm:$0xff] }
 0x27f   : > { %3080 = vrot.lane.b32.xlu0 %v10580_v47, %s9455_s17 }
 0x280   : > { %2890 = vrot.lane.b32.xlu1 %v10592_v27, %s9455_s17  ;;  %v2859_v27 = vpack.c.bf16 %v2843_v13, %v2842_v52  ;;  %v4964_v13 = vld [vmem:[#allocation2 + $0x19a] sm:$0xff] }
 0x283   : > { %3082 = vrot.lane.b32.xlu0 %v10624_v5, %s9455_s17  ;;  %v3051_v5 = vpack.c.bf16 %v3035_v48, %v3034_v42  ;;  %v4981_v42 = vpack.c.bf16 %v4965_v41, %v4964_v13 }
 0x284   : > { %2892 = vrot.lane.b32.xlu1 %v10632_v22, %s9455_s17  ;;  %v3196_v22 = vld [vmem:[#allocation3] sm:$0xff] }
 0x287   : > { %3084 = vrot.lane.b32.xlu0 %v10645_v63, %s9455_s17 }
 0x288   : > { %2894 = vrot.lane.b32.xlu1 %v10647_v58, %s9455_s17 }
 0x28b   : > { %3086 = vrot.lane.b32.xlu0 %v10676_v17, %s9455_s17 }
 0x28c   : > { %2896 = vrot.lane.b32.xlu1 %v10681_v6, %s9455_s17  ;;  %v9138_v6 = vld [vmem:[%s13076_s1 + $0x228] sm:$0xff]  }
 0x28f   : > { %3088 = vrot.lane.b32.xlu0 %v10702_v57, %s9455_s17 }
 0x290   : > { %2898 = vrot.lane.b32.xlu1 %v10683_v49, %s9455_s17  ;;  %v9386_v49 = vld [vmem:[%s13076_s1 + $0x220] sm:$0xff]  }
 0x291   : > { %v2685_v12 = vpop.permute.xlu0 %2684 }
 0x292   : > { %v2495_v16 = vpop.permute.xlu1 %2494  ;;  %2732 = vst.msk [vmem:[#allocation3 + $0x8] sm:$0xff] %vm734_vm2, %v2685_v12 }
 0x293   : > { %3090 = vrot.lane.b32.xlu0 %v10717_v7, %s9455_s17  ;;  %2541 = vst.msk [vmem:[#allocation3 + $0x28] sm:$0xff] %vm734_vm2, %v2495_v16 }
 0x294   : > { %2900 = vrot.lane.b32.xlu1 %v10723_v44, %s9455_s17 }
 0x295   : > { %v2687_v14 = vpop.permute.xlu0 %2686 }
 0x296   : > { %v2497_v47 = vpop.permute.xlu1 %2496  ;;  %2733 = vst.msk [vmem:[#allocation3 + $0x30] sm:$0xff] %vm734_vm2, %v2687_v14 }
 0x297   : > { %3092 = vrot.lane.b32.xlu0 %v10742_v59, %s9455_s17  ;;  %2542 = vst.msk [vmem:[#allocation3 + $0x50] sm:$0xff] %vm734_vm2, %v2497_v47  ;;  %v10899_v47 = vld [vmem:[#allocation3 + $0x278] sm:$0xff] }
 0x298   : > { %2902 = vrot.lane.b32.xlu1 %v10725_v37, %s9455_s17  ;;  %v9155_v37 = vld [vmem:[%s13076_s1 + $0x230] sm:$0xff]   ;;  %4997 = vst.msk [vmem:[#allocation3 + $0x278] sm:$0xff] %vm332_vm0, %v4981_v42 }
 0x299   : > { %v3197_v17 = vld [vmem:[#allocation3 + $0x8] sm:$0xff]  ;;  %v3200_v42 = vld [vmem:[#allocation3 + $0x20] sm:$0xff] }
 0x29a   : > { %v2689_v63 = vpop.permute.xlu0 %2688  ;;  %3578 = vmatprep.mubr.bf16.mxu1 %v3197_v17  ;;  %v3201_v51 = vld [vmem:[#allocation3 + $0x28] sm:$0xff] }
 0x29b   : > { %3094 = vrot.lane.b32.xlu0 %v10757_v32, %s9455_s17  ;;  %v2499_v58 = vpop.permute.xlu1 %2498  ;;  %2734 = vst.msk [vmem:[#allocation3 + $0x58] sm:$0xff] %vm734_vm2, %v2689_v63  ;;  %3579 = vmatmul.mubr.bf16.vlgmr.msra.gmra.mrb[64].mxu1 %v3196_v22 }
 0x29c   : > { %2904 = vrot.lane.b32.xlu1 %v10759_v18, %s9455_s17  ;;  %2543 = vst.msk [vmem:[#allocation3 + $0x78] sm:$0xff] %vm734_vm2, %v2499_v58  ;;  %8900 = vmatpush3.bf16.msra.mxu1 %v9386_v49  ;;  %v9156_v18 = vld [vmem:[%s13076_s1 + $0x238] sm:$0xff]  }
 0x29d   : > { %v3202_v44 = vld [vmem:[#allocation3 + $0x30] sm:$0xff]  ;;  %8901 = vmatprep.subr.bf16.mxu1 %v9138_v6 }
 0x29e   : > { %v2691_v57 = vpop.permute.xlu0 %2690  ;;  %3586 = vmatprep.mubr.bf16.mxu1 %v3202_v44  ;;  %v3206_v43 = vld [vmem:[#allocation3 + $0x50] sm:$0xff] }
 0x29f   : > { %3096 = vrot.lane.b32.xlu0 %v3050_v19, %s9455_s17  ;;  %v2501_v7 = vpop.permute.xlu1 %2500  ;;  %2735 = vst.msk [vmem:[#allocation3 + $0x80] sm:$0xff] %vm734_vm2, %v2691_v57 }
 0x2a0   : > { %2906 = vrot.lane.b32.xlu1 %v2859_v27, %s9455_s17  ;;  %2544 = vst.msk [vmem:[#allocation3 + $0xa0] sm:$0xff] %vm734_vm2, %v2501_v7  ;;  %8902 = vmatpush3.bf16.msra.mxu1 %v9138_v6 }
 0x2a1   : > { %8903 = vmatprep.subr.bf16.mxu1 %v9155_v37 }
 0x2a2   : > { %v3207_v38 = vld [vmem:[#allocation3 + $0x58] sm:$0xff] }
 0x2a3   : > { %3098 = vrot.lane.b32.xlu0 %v3051_v5, %s9455_s17  ;;  %3587 = vmatmul.mubr.bf16.gmra.mrb[68].mxu1 %v3201_v51  ;;  %v3211_v3 = vld [vmem:[#allocation3 + $0x78] sm:$0xff] }
 0x2a4   : > { %v2503_v32 = vpop.permute.xlu1 %2502  ;;  %3594 = vmatprep.mubr.bf16.mxu1 %v3207_v38  ;;  %8904 = vmatpush3.bf16.msra.mxu1 %v9155_v37 }
 0x2a5   : > { %v2693_v59 = vpop.permute.xlu0 %2692  ;;  %2545 = vst.msk [vmem:[#allocation3 + $0xc8] sm:$0xff] %vm734_vm2, %v2503_v32  ;;  %8905 = vmatprep.subr.bf16.mxu1 %v9156_v18 }
 0x2a6   : > { %2736 = vst.msk [vmem:[#allocation3 + $0xa8] sm:$0xff] %vm734_vm2, %v2693_v59  ;;  %v3212_v33 = vld [vmem:[#allocation3 + $0x80] sm:$0xff] }
 0x2a7   : > { %v3216_v30 = vld [vmem:[#allocation3 + $0xa0] sm:$0xff] }
 0x2a8   : > { %v2505_v11 = vpop.permute.xlu1 %2504  ;;  %8906 = vmatpush3.bf16.msra.mxu1 %v9156_v18 }
 0x2a9   : > { %v2695_v28 = vpop.permute.xlu0 %2694  ;;  %2546 = vst.msk [vmem:[#allocation3 + $0xf0] sm:$0xff] %vm734_vm2, %v2505_v11 }
 0x2aa   : > { %2737 = vst.msk [vmem:[#allocation3 + $0xd0] sm:$0xff] %vm734_vm2, %v2695_v28 }
 0x2ab   : > { %3595 = vmatmul.mubr.bf16.gmra.mrb[72].mxu1 %v3206_v43 }
 0x2ac   : > { %3602 = vmatprep.mubr.bf16.mxu1 %v3212_v33  ;;  %v3221_v40 = vld [vmem:[#allocation3 + $0xc8] sm:$0xff] }
 0x2ad   : > { %v2507_v29 = vpop.permute.xlu1 %2506  ;;  %v3217_v4 = vld [vmem:[#allocation3 + $0xa8] sm:$0xff] }
 0x2ae   : > { %v2697_v45 = vpop.permute.xlu0 %2696  ;;  %2547 = vst.msk [vmem:[#allocation3 + $0x118] sm:$0xff] %vm734_vm2, %v2507_v29 }
 0x2af   : > { %2738 = vst.msk [vmem:[#allocation3 + $0xf8] sm:$0xff] %vm734_vm2, %v2697_v45 }
 0x2b0   : > { %v3226_v21 = vld [vmem:[#allocation3 + $0xf0] sm:$0xff] }
 0x2b1   : > { %v2509_v24 = vpop.permute.xlu1 %2508  ;;  %v3222_v10 = vld [vmem:[#allocation3 + $0xd0] sm:$0xff] }
 0x2b2   : > { %v2699_v0 = vpop.permute.xlu0 %2698  ;;  %2548 = vst.msk [vmem:[#allocation3 + $0x140] sm:$0xff] %vm734_vm2, %v2509_v24 }
 0x2b3   : > { %2739 = vst.msk [vmem:[#allocation3 + $0x120] sm:$0xff] %vm734_vm2, %v2699_v0  ;;  %3603 = vmatmul.mubr.bf16.gmra.mrb[76].mxu1 %v3211_v3 }
 0x2b4   : > { %3610 = vmatprep.mubr.bf16.mxu1 %v3217_v4 }
 0x2b5   : > { %v3231_v15 = vld [vmem:[#allocation3 + $0x118] sm:$0xff] }
 0x2b6   : > { %v2701_v35 = vpop.permute.xlu0 %2700  ;;  %v2511_v50 = vpop.permute.xlu1 %2510  ;;  %v3227_v34 = vld [vmem:[#allocation3 + $0xf8] sm:$0xff] }
 0x2b7   : > { %2740 = vst.msk [vmem:[#allocation3 + $0x148] sm:$0xff] %vm734_vm2, %v2701_v35  ;;  %2549 = vst.msk [vmem:[#allocation3 + $0x168] sm:$0xff] %vm734_vm2, %v2511_v50 }
 0x2b9   : > { %v3236_v22 = vld [vmem:[#allocation3 + $0x140] sm:$0xff] }
 0x2ba   : > { %v2703_v31 = vpop.permute.xlu0 %2702  ;;  %v3232_v62 = vld [vmem:[#allocation3 + $0x120] sm:$0xff] }
 0x2bb   : > { %v2513_v20 = vpop.permute.xlu1 %2512  ;;  %2741 = vst.msk [vmem:[#allocation3 + $0x170] sm:$0xff] %vm734_vm2, %v2703_v31  ;;  %3611 = vmatmul.mubr.bf16.gmra.mrb[80].mxu1 %v3216_v30 }
 0x2bc   : > { %2550 = vst.msk [vmem:[#allocation3 + $0x190] sm:$0xff] %vm734_vm2, %v2513_v20  ;;  %3618 = vmatprep.mubr.bf16.mxu1 %v3222_v10 }
 0x2be   : > { %v3237_v52 = vld [vmem:[#allocation3 + $0x148] sm:$0xff] }
 0x2bf   : > { %v2705_v9 = vpop.permute.xlu0 %2704  ;;  %v3241_v44 = vld [vmem:[#allocation3 + $0x168] sm:$0xff] }
 0x2c0   : > { %v2515_v8 = vpop.permute.xlu1 %2514  ;;  %2742 = vst.msk [vmem:[#allocation3 + $0x198] sm:$0xff] %vm734_vm2, %v2705_v9 }
 0x2c1   : > { %2551 = vst.msk [vmem:[#allocation3 + $0x1b8] sm:$0xff] %vm734_vm2, %v2515_v8 }
 0x2c2   : > { %v3242_v58 = vld [vmem:[#allocation3 + $0x170] sm:$0xff] }
 0x2c3   : > { %v2707_v36 = vpop.permute.xlu0 %2706  ;;  %3619 = vmatmul.mubr.bf16.gmra.mrb[84].mxu1 %v3221_v40  ;;  %v3246_v11 = vld [vmem:[#allocation3 + $0x190] sm:$0xff] }
 0x2c4   : > { %v2517_v61 = vpop.permute.xlu1 %2516  ;;  %2743 = vst.msk [vmem:[#allocation3 + $0x1c0] sm:$0xff] %vm734_vm2, %v2707_v36  ;;  %3626 = vmatprep.mubr.bf16.mxu1 %v3227_v34 }
 0x2c5   : > { %2552 = vst.msk [vmem:[#allocation3 + $0x1e0] sm:$0xff] %vm734_vm2, %v2517_v61 }
 0x2c7   : > { %v2709_v53 = vpop.permute.xlu0 %2708  ;;  %v3247_v59 = vld [vmem:[#allocation3 + $0x198] sm:$0xff] }
 0x2c8   : > { %v2519_v54 = vpop.permute.xlu1 %2518  ;;  %2744 = vst.msk [vmem:[#allocation3 + $0x1e8] sm:$0xff] %vm734_vm2, %v2709_v53  ;;  %v3251_v50 = vld [vmem:[#allocation3 + $0x1b8] sm:$0xff] }
 0x2c9   : > { %2553 = vst.msk [vmem:[#allocation3 + $0x208] sm:$0xff] %vm734_vm2, %v2519_v54 }
 0x2cb   : > { %v2711_v60 = vpop.permute.xlu0 %2710  ;;  %3627 = vmatmul.mubr.bf16.gmra.mrb[88].mxu1 %v3226_v21  ;;  %v3252_v29 = vld [vmem:[#allocation3 + $0x1c0] sm:$0xff] }
 0x2cc   : > { %2745 = vst.msk [vmem:[#allocation3 + $0x210] sm:$0xff] %vm734_vm2, %v2711_v60  ;;  %3634 = vmatprep.mubr.bf16.mxu1 %v3232_v62  ;;  %v3256_v10 = vld [vmem:[#allocation3 + $0x1e0] sm:$0xff] }
 0x2cd   : > { %v2521_v39 = vpop.permute.xlu1 %2520 }
 0x2ce   : > { %2554 = vst.msk [vmem:[#allocation3 + $0x230] sm:$0xff] %vm734_vm2, %v2521_v39 }
 0x2cf   : > { %v3257_v4 = vld [vmem:[#allocation3 + $0x1e8] sm:$0xff] }
 0x2d0   : > { %v3261_v23 = vld [vmem:[#allocation3 + $0x208] sm:$0xff] }
 0x2d1   : > { %v2713_v56 = vpop.permute.xlu0 %2712 }
 0x2d2   : > { %v2523_v25 = vpop.permute.xlu1 %2522  ;;  %2746 = vst.msk [vmem:[#allocation3 + $0x238] sm:$0xff] %vm734_vm2, %v2713_v56 }
 0x2d3   : > { %2555 = vst.msk [vmem:[#allocation3 + $0x258] sm:$0xff] %vm734_vm2, %v2523_v25  ;;  %3635 = vmatmul.mubr.bf16.gmra.mrb[92].mxu1 %v3231_v15  ;;  %v3262_v61 = vld [vmem:[#allocation3 + $0x210] sm:$0xff] }
 0x2d4   : > { %3642 = vmatprep.mubr.bf16.mxu1 %v3237_v52 }
 0x2d5   : > { %v2715_v2 = vpop.permute.xlu0 %2714 }
 0x2d6   : > { %v2877_v46 = vpop.permute.xlu1 %2876  ;;  %2747 = vst.msk [vmem:[#allocation3 + $0x260] sm:$0xff] %vm734_vm2, %v2715_v2  ;;  %v3266_v2 = vld [vmem:[#allocation3 + $0x230] sm:$0xff] }
 0x2d7   : > { %2924 = vst.msk [vmem:[#allocation3 + $0x10] sm:$0xff] %vm734_vm2, %v2877_v46 }
 0x2d9   : > { %v3069_v12 = vpop.permute.xlu0 %3068  ;;  %v3267_v39 = vld [vmem:[#allocation3 + $0x238] sm:$0xff] }
 0x2da   : > { %v2879_v16 = vpop.permute.xlu1 %2878  ;;  %3116 = vst.msk [vmem:[#allocation3 + $0x18] sm:$0xff] %vm734_vm2, %v3069_v12  ;;  %v3271_v52 = vld [vmem:[#allocation3 + $0x258] sm:$0xff] }
 0x2db   : > { %2925 = vst.msk [vmem:[#allocation3 + $0x38] sm:$0xff] %vm734_vm2, %v2879_v16  ;;  %3643 = vmatmul.mubr.bf16.gmra.mrb[96].mxu1 %v3236_v22  ;;  %v3215_v22 = vld [vmem:[#allocation3 + $0x98] sm:$0xff] }
 0x2dc   : > { %3650 = vmatprep.mubr.bf16.mxu1 %v3242_v58  ;;  %v3220_v58 = vld [vmem:[#allocation3 + $0xc0] sm:$0xff] }
 0x2dd   : > { %v3071_v48 = vpop.permute.xlu0 %3070  ;;  %v3272_v12 = vld [vmem:[#allocation3 + $0x260] sm:$0xff] }
 0x2de   : > { %v2881_v14 = vpop.permute.xlu1 %2880  ;;  %3117 = vst.msk [vmem:[#allocation3 + $0x40] sm:$0xff] %vm734_vm2, %v3071_v48  ;;  %v3198_v63 = vld [vmem:[#allocation3 + $0x10] sm:$0xff] }
 0x2df   : > { %2926 = vst.msk [vmem:[#allocation3 + $0x60] sm:$0xff] %vm734_vm2, %v2881_v14  ;;  %v3205_v14 = vld [vmem:[#allocation3 + $0x48] sm:$0xff] }
 0x2e1   : > { %v3073_v19 = vpop.permute.xlu0 %3072  ;;  %v3199_v5 = vld [vmem:[#allocation3 + $0x18] sm:$0xff] }
 0x2e2   : > { %v2883_v27 = vpop.permute.xlu1 %2882  ;;  %3118 = vst.msk [vmem:[#allocation3 + $0x68] sm:$0xff] %vm734_vm2, %v3073_v19  ;;  %3739 = vmatprep.mubr.bf16.mxu0 %v3199_v5  ;;  %v3203_v37 = vld [vmem:[#allocation3 + $0x38] sm:$0xff] }
 0x2e3   : > { %2927 = vst.msk [vmem:[#allocation3 + $0x88] sm:$0xff] %vm734_vm2, %v2883_v27  ;;  %3740 = vmatmul.mubr.bf16.vlgmr.msra.gmra.mrb[96].mxu0 %v3198_v63  ;;  %3651 = vmatmul.mubr.bf16.gmra.mrb[100].mxu1 %v3241_v44  ;;  %v3210_v27 = vld [vmem:[#allocation3 + $0x70] sm:$0xff]  ;;  %v3235_v44 = vld [vmem:[#allocation3 + $0x138] sm:$0xff] }
 0x2e4   : > { %3658 = vmatprep.mubr.bf16.mxu1 %v3247_v59  ;;  %v3240_v59 = vld [vmem:[#allocation3 + $0x160] sm:$0xff] }
 0x2e5   : > { %v3075_v17 = vpop.permute.xlu0 %3074  ;;  %v3204_v49 = vld [vmem:[#allocation3 + $0x40] sm:$0xff] }
 0x2e6   : > { %v2885_v6 = vpop.permute.xlu1 %2884  ;;  %3119 = vst.msk [vmem:[#allocation3 + $0x90] sm:$0xff] %vm734_vm2, %v3075_v17  ;;  %3747 = vmatprep.mubr.bf16.mxu0 %v3204_v49  ;;  %v3208_v45 = vld [vmem:[#allocation3 + $0x60] sm:$0xff] }
 0x2e7   : > { %2928 = vst.msk [vmem:[#allocation3 + $0xb0] sm:$0xff] %vm734_vm2, %v2885_v6  ;;  %v3225_v6 = vld [vmem:[#allocation3 + $0xe8] sm:$0xff] }
 0x2e9   : > { %v3077_v57 = vpop.permute.xlu0 %3076  ;;  %v3209_v32 = vld [vmem:[#allocation3 + $0x68] sm:$0xff] }
 0x2ea   : > { %v2887_v7 = vpop.permute.xlu1 %2886  ;;  %3120 = vst.msk [vmem:[#allocation3 + $0xb8] sm:$0xff] %vm734_vm2, %v3077_v57  ;;  %v3213_v3 = vld [vmem:[#allocation3 + $0x88] sm:$0xff]  ;;  %v3230_v57 = vld [vmem:[#allocation3 + $0x110] sm:$0xff] }
 0x2eb   : > { %2929 = vst.msk [vmem:[#allocation3 + $0xd8] sm:$0xff] %vm734_vm2, %v2887_v7  ;;  %3748 = vmatmul.mubr.bf16.gmra.mrb[100].mxu0 %v3203_v37  ;;  %3659 = vmatmul.mubr.bf16.gmra.mrb[104].mxu1 %v3246_v11  ;;  %v3255_v11 = vld [vmem:[#allocation3 + $0x1d8] sm:$0xff] }
 0x2ec   : > { %3755 = vmatprep.mubr.bf16.mxu0 %v3209_v32  ;;  %3666 = vmatprep.mubr.bf16.mxu1 %v3252_v29  ;;  %v3260_v29 = vld [vmem:[#allocation3 + $0x200] sm:$0xff] }
 0x2ed   : > { %v3079_v18 = vpop.permute.xlu0 %3078  ;;  %v3214_v43 = vld [vmem:[#allocation3 + $0x90] sm:$0xff] }
 0x2ee   : > { %v2889_v51 = vpop.permute.xlu1 %2888  ;;  %3121 = vst.msk [vmem:[#allocation3 + $0xe0] sm:$0xff] %vm734_vm2, %v3079_v18  ;;  %v3218_v36 = vld [vmem:[#allocation3 + $0xb0] sm:$0xff]  ;;  %v3245_v18 = vld [vmem:[#allocation3 + $0x188] sm:$0xff] }
 0x2ef   : > { %2930 = vst.msk [vmem:[#allocation3 + $0x100] sm:$0xff] %vm734_vm2, %v2889_v51 }
 0x2f1   : > { %v3081_v38 = vpop.permute.xlu0 %3080  ;;  %v3219_v31 = vld [vmem:[#allocation3 + $0xb8] sm:$0xff] }
 0x2f2   : > { %v2891_v28 = vpop.permute.xlu1 %2890  ;;  %3122 = vst.msk [vmem:[#allocation3 + $0x108] sm:$0xff] %vm734_vm2, %v3081_v38  ;;  %v3223_v60 = vld [vmem:[#allocation3 + $0xd8] sm:$0xff]  ;;  %v3250_v38 = vld [vmem:[#allocation3 + $0x1b0] sm:$0xff] }
 0x2f3   : > { %2931 = vst.msk [vmem:[#allocation3 + $0x128] sm:$0xff] %vm734_vm2, %v2891_v28  ;;  %3756 = vmatmul.mubr.bf16.gmra.mrb[104].mxu0 %v3208_v45  ;;  %3667 = vmatmul.mubr.bf16.gmra.mrb[108].mxu1 %v3251_v50 }
 0x2f4   : > { %3763 = vmatprep.mubr.bf16.mxu0 %v3214_v43  ;;  %3674 = vmatprep.mubr.bf16.mxu1 %v3257_v4 }
 0x2f5   : > { %v3083_v33 = vpop.permute.xlu0 %3082  ;;  %v3224_v53 = vld [vmem:[#allocation3 + $0xe0] sm:$0xff] }
 0x2f6   : > { %v2893_v0 = vpop.permute.xlu1 %2892  ;;  %3123 = vst.msk [vmem:[#allocation3 + $0x130] sm:$0xff] %vm734_vm2, %v3083_v33  ;;  %v3228_v46 = vld [vmem:[#allocation3 + $0x100] sm:$0xff] }
 0x2f7   : > { %2932 = vst.msk [vmem:[#allocation3 + $0x150] sm:$0xff] %vm734_vm2, %v2893_v0  ;;  %v3265_v0 = vld [vmem:[#allocation3 + $0x228] sm:$0xff] }
 0x2f9   : > { %v3085_v24 = vpop.permute.xlu0 %3084  ;;  %v3229_v26 = vld [vmem:[#allocation3 + $0x108] sm:$0xff] }
 0x2fa   : > { %v2895_v35 = vpop.permute.xlu1 %2894  ;;  %3124 = vst.msk [vmem:[#allocation3 + $0x158] sm:$0xff] %vm734_vm2, %v3085_v24  ;;  %v3233_v13 = vld [vmem:[#allocation3 + $0x128] sm:$0xff]  ;;  %v3270_v24 = vld [vmem:[#allocation3 + $0x250] sm:$0xff] }
 0x2fb   : > { %2933 = vst.msk [vmem:[#allocation3 + $0x178] sm:$0xff] %vm734_vm2, %v2895_v35  ;;  %3764 = vmatmul.mubr.bf16.gmra.mrb[108].mxu0 %v3213_v3  ;;  %3675 = vmatmul.mubr.bf16.gmra.mrb[112].mxu1 %v3256_v10 }
 0x2fc   : > { %3771 = vmatprep.mubr.bf16.mxu0 %v3219_v31  ;;  %3682 = vmatprep.mubr.bf16.mxu1 %v3262_v61 }
 0x2fd   : > { %v3087_v20 = vpop.permute.xlu0 %3086  ;;  %v3234_v16 = vld [vmem:[#allocation3 + $0x130] sm:$0xff] }
 0x2fe   : > { %v2897_v9 = vpop.permute.xlu1 %2896  ;;  %3125 = vst.msk [vmem:[#allocation3 + $0x180] sm:$0xff] %vm734_vm2, %v3087_v20  ;;  %v3238_v48 = vld [vmem:[#allocation3 + $0x150] sm:$0xff] }
 0x2ff   : > { %2934 = vst.msk [vmem:[#allocation3 + $0x1a0] sm:$0xff] %vm734_vm2, %v2897_v9 }
 0x301   : > { %v3089_v8 = vpop.permute.xlu0 %3088  ;;  %v3239_v41 = vld [vmem:[#allocation3 + $0x158] sm:$0xff] }
 0x302   : > { %v2899_v30 = vpop.permute.xlu1 %2898  ;;  %3126 = vst.msk [vmem:[#allocation3 + $0x1a8] sm:$0xff] %vm734_vm2, %v3089_v8  ;;  %v3243_v5 = vld [vmem:[#allocation3 + $0x178] sm:$0xff] }
 0x303   : > { %2935 = vst.msk [vmem:[#allocation3 + $0x1c8] sm:$0xff] %vm734_vm2, %v2899_v30  ;;  %3772 = vmatmul.mubr.bf16.gmra.mrb[112].mxu0 %v3218_v36  ;;  %3683 = vmatmul.mubr.bf16.gmra.mrb[116].mxu1 %v3261_v23 }
 0x304   : > { %3779 = vmatprep.mubr.bf16.mxu0 %v3224_v53  ;;  %3690 = vmatprep.mubr.bf16.mxu1 %v3267_v39 }
 0x305   : > { %v3091_v54 = vpop.permute.xlu0 %3090  ;;  %v3244_v19 = vld [vmem:[#allocation3 + $0x180] sm:$0xff] }
 0x306   : > { %v2901_v40 = vpop.permute.xlu1 %2900  ;;  %3127 = vst.msk [vmem:[#allocation3 + $0x1d0] sm:$0xff] %vm734_vm2, %v3091_v54  ;;  %v3248_v17 = vld [vmem:[#allocation3 + $0x1a0] sm:$0xff] }
 0x307   : > { %2936 = vst.msk [vmem:[#allocation3 + $0x1f0] sm:$0xff] %vm734_vm2, %v2901_v40  ;;  %v4230_v40 = vld [vmem:[#allocation2 + $0x1] sm:$0xff] }
 0x309   : > { %v3093_v34 = vpop.permute.xlu0 %3092  ;;  %v3249_v63 = vld [vmem:[#allocation3 + $0x1a8] sm:$0xff] }
 0x30a   : > { %v2903_v55 = vpop.permute.xlu1 %2902  ;;  %3128 = vst.msk [vmem:[#allocation3 + $0x1f8] sm:$0xff] %vm734_vm2, %v3093_v34  ;;  %v3253_v7 = vld [vmem:[#allocation3 + $0x1c8] sm:$0xff]  ;;  %v4231_v34 = vld [vmem:[#allocation2 + $0x9] sm:$0xff] }
 0x30b   : > { %2937 = vst.msk [vmem:[#allocation3 + $0x218] sm:$0xff] %vm734_vm2, %v2903_v55  ;;  %3780 = vmatmul.mubr.bf16.gmra.mrb[116].mxu0 %v3223_v60  ;;  %3691 = vmatmul.mubr.bf16.gmra.mrb[120].mxu1 %v3266_v2  ;;  %v4262_v23 = vpack.c.bf16 %v4231_v34, %v4230_v40  ;;  %v9158_v60 = vld [vmem:[%s13078_s3] sm:$0xff]   ;;  %v9163_v40 = vld [vmem:[%s13078_s3 + $0x58] sm:$0xff]  }
 0x30c   : > { %3787 = vmatprep.mubr.bf16.mxu0 %v3229_v26  ;;  %3698 = vmatprep.mubr.bf16.mxu1 %v3272_v12 }
 0x30d   : > { %v3095_v56 = vpop.permute.xlu0 %3094  ;;  %v3254_v49 = vld [vmem:[#allocation3 + $0x1d0] sm:$0xff]  ;;  %4294 = vrot.lane.b32.xlu1 %v4262_v23, %s9455_s17 }
 0x30e   : > { %v2905_v25 = vpop.permute.xlu1 %2904  ;;  %3129 = vst.msk [vmem:[#allocation3 + $0x220] sm:$0xff] %vm734_vm2, %v3095_v56  ;;  %v3258_v32 = vld [vmem:[#allocation3 + $0x1f0] sm:$0xff] }
 0x30f   : > { %2938 = vst.msk [vmem:[#allocation3 + $0x240] sm:$0xff] %vm734_vm2, %v2905_v25 }
 0x311   : > { %v3097_v21 = vpop.permute.xlu0 %3096  ;;  %v3259_v37 = vld [vmem:[#allocation3 + $0x1f8] sm:$0xff] }
 0x312   : > { %v2907_v62 = vpop.permute.xlu1 %2906  ;;  %3130 = vst.msk [vmem:[#allocation3 + $0x248] sm:$0xff] %vm734_vm2, %v3097_v21  ;;  %v3263_v28 = vld [vmem:[#allocation3 + $0x218] sm:$0xff] }
 0x313   : > { %2939 = vst.msk [vmem:[#allocation3 + $0x268] sm:$0xff] %vm734_vm2, %v2907_v62  ;;  %3788 = vmatmul.mubr.bf16.gmra.mrb[120].mxu0 %v3228_v46  ;;  %3699 = vmatmul.mubr.bf16.gmra.mrb[124].mxu1 %v3271_v52  ;;  %v9159_v52 = vld [vmem:[%s13078_s3 + $0x48] sm:$0xff]  }
 0x314   : > { %3795 = vmatprep.mubr.bf16.mxu0 %v3234_v16  ;;  %8907 = vmatprep.mubr.msk.bf16.mxu1 %vm332_vm0, %v3200_v42 }
 0x315   : > { %v3099_v15 = vpop.permute.xlu0 %3098  ;;  %v3264_v51 = vld [vmem:[#allocation3 + $0x220] sm:$0xff] }
 0x316   : > { %3131 = vst.msk [vmem:[#allocation3 + $0x270] sm:$0xff] %vm734_vm2, %v3099_v15  ;;  %v3268_v33 = vld [vmem:[#allocation3 + $0x240] sm:$0xff] }
 0x319   : > { %v3269_v45 = vld [vmem:[#allocation3 + $0x248] sm:$0xff] }
 0x31a   : > { %v3273_v35 = vld [vmem:[#allocation3 + $0x268] sm:$0xff] }
 0x31b   : > { %3796 = vmatmul.mubr.bf16.gmra.mrb[124].mxu0 %v3233_v13  ;;  %8908 = vmatmul.mubr.msk.bf16.vlgmr.msra.gmra.mrb[128].mxu1 %vm332_vm0, %v3205_v14  ;;  %v9160_v13 = vld [vmem:[%s13078_s3 + $0x8] sm:$0xff]  }
 0x31c   : > { %3803 = vmatprep.mubr.bf16.mxu0 %v3239_v41  ;;  %8911 = vmatprep.mubr.msk.bf16.mxu1 %vm332_vm0, %v3210_v27 }
 0x31d   : > { %v3274_v43 = vld [vmem:[#allocation3 + $0x270] sm:$0xff] }
 0x323   : > { %3804 = vmatmul.mubr.bf16.gmra.mrb[128].mxu0 %v3238_v48  ;;  %8912 = vmatmul.mubr.msk.bf16.gmra.mrb[132].mxu1 %vm332_vm0, %v3215_v22 }
 0x324   : > { %3811 = vmatprep.mubr.bf16.mxu0 %v3244_v19  ;;  %8915 = vmatprep.mubr.msk.bf16.mxu1 %vm332_vm0, %v3220_v58 }
 0x32b   : > { %3812 = vmatmul.mubr.bf16.gmra.mrb[132].mxu0 %v3243_v5  ;;  %8916 = vmatmul.mubr.msk.bf16.gmra.mrb[136].mxu1 %vm332_vm0, %v3225_v6 }
 0x32c   : > { %3819 = vmatprep.mubr.bf16.mxu0 %v3249_v63  ;;  %8919 = vmatprep.mubr.msk.bf16.mxu1 %vm332_vm0, %v3230_v57  ;;  %v9162_v57 = vld [vmem:[%s13078_s3 + $0x10] sm:$0xff]  }
 0x333   : > { %3820 = vmatmul.mubr.bf16.gmra.mrb[136].mxu0 %v3248_v17  ;;  %8920 = vmatmul.mubr.msk.bf16.gmra.mrb[140].mxu1 %vm332_vm0, %v3235_v44 }
 0x334   : > { %3827 = vmatprep.mubr.bf16.mxu0 %v3254_v49  ;;  %8923 = vmatprep.mubr.msk.bf16.mxu1 %vm332_vm0, %v3240_v59  ;;  %v9161_v49 = vld [vmem:[%s13078_s3 + $0x50] sm:$0xff]  }
 0x33b   : > { %3828 = vmatmul.mubr.bf16.gmra.mrb[140].mxu0 %v3253_v7  ;;  %8924 = vmatmul.mubr.msk.bf16.gmra.mrb[144].mxu1 %vm332_vm0, %v3245_v18 }
 0x33c   : > { %3835 = vmatprep.mubr.bf16.mxu0 %v3259_v37  ;;  %8927 = vmatprep.mubr.msk.bf16.mxu1 %vm332_vm0, %v3250_v38 }
 0x343   : > { %3836 = vmatmul.mubr.bf16.gmra.mrb[144].mxu0 %v3258_v32  ;;  %8928 = vmatmul.mubr.msk.bf16.gmra.mrb[148].mxu1 %vm332_vm0, %v3255_v11 }
 0x344   : > { %3843 = vmatprep.mubr.bf16.mxu0 %v3264_v51  ;;  %8931 = vmatprep.mubr.msk.bf16.mxu1 %vm332_vm0, %v3260_v29  ;;  %v11002_v29 = vld [vmem:[%s13077_s2 + $0x1] ss:$0 sm:$0xff] }
 0x34b   : > { %3844 = vmatmul.mubr.bf16.gmra.mrb[148].mxu0 %v3263_v28  ;;  %8932 = vmatmul.mubr.msk.bf16.gmra.mrb[152].mxu1 %vm332_vm0, %v3265_v0 }
 0x34c   : > { %3851 = vmatprep.mubr.bf16.mxu0 %v3269_v45  ;;  %8935 = vmatprep.mubr.msk.bf16.mxu1 %vm332_vm0, %v3270_v24 }
 0x353   : > { %3852 = vmatmul.mubr.bf16.gmra.mrb[152].mxu0 %v3268_v33  ;;  %8936 = vmatmul.mubr.msk.bf16.gmra.mrb[156].mxu1 %vm332_vm0, %v10899_v47  ;;  %v9157_v47 = vld [vmem:[%s13078_s3 + $0x40] sm:$0xff]  }
 0x354   : > { %3859 = vmatprep.mubr.bf16.mxu0 %v3274_v43  ;;  %8581 = vmatprep.subr.bf16.mxu0 %v9157_v47 }
 0x355   : > { %8582 = vmatpush3.bf16.msra.mxu0 %v9158_v60 }
 0x356   : > { %8583 = vmatprep.subr.bf16.mxu0 %v9159_v52 }
 0x359   : > { %8584 = vmatpush3.bf16.msra.mxu0 %v9160_v13 }
 0x35a   : > { %8585 = vmatprep.subr.bf16.mxu0 %v9161_v49 }
 0x35b   : > { %3860 = vmatmul.mubr.bf16.gmra.mrb[156].mxu0 %v3273_v35 }
 0x35d   : > { %8586 = vmatpush3.bf16.msra.mxu0 %v9162_v57 }
 0x35e   : > { %8587 = vmatprep.subr.bf16.mxu0 %v9163_v40 }
 0x36e   : > { %v8353_v50 = vpop.f32.mrb[64].mxu1 }
 0x36f   : > { %v8354_v3 = vpop.f32.mrb[65].mxu1 }
 0x370   : > { %v10948_v4 = vadd.f32 %v8354_v3, %v8353_v50  ;;  %v8356_v31 = vpop.f32.mrb[66].mxu1 }
 0x371   : > { %v8357_v20 = vpop.f32.mrb[67].mxu1 }
 0x372   : > { %v10950_v9 = vadd.f32 %v8357_v20, %v8356_v31  ;;  %v3581_v35 = vadd.f32 %v10948_v4, %v11002_v29  ;;  %v9164_v4 = vld [vmem:[%s13078_s3 + $0x18] sm:$0xff]  }
 0x373   : > { %8588 = vmatpush3.bf16.msra.mxu0 %v9164_v4 }
 0x376   : > { %v8359_v8 = vpop.f32.mrb[68].mxu1 }
 0x377   : > { %v8360_v30 = vpop.f32.mrb[69].mxu1 }
 0x378   : > { %v10952_v10 = vadd.f32 %v8360_v30, %v8359_v8  ;;  %v8362_v36 = vpop.f32.mrb[70].mxu1 }
 0x379   : > { %v8363_v61 = vpop.f32.mrb[71].mxu1 }
 0x37a   : > { %v10954_v53 = vadd.f32 %v8363_v61, %v8362_v36  ;;  %v3584_v36 = vadd.f32 %v10950_v9, %v11002_v29 }
 0x37e   : > { %v8365_v54 = vpop.f32.mrb[72].mxu1 }
 0x37f   : > { %v8366_v55 = vpop.f32.mrb[73].mxu1 }
 0x380   : > { %v10962_v39 = vadd.f32 %v8366_v55, %v8365_v54  ;;  %v8368_v26 = vpop.f32.mrb[74].mxu1 }
 0x381   : > { %v8369_v56 = vpop.f32.mrb[75].mxu1 }
 0x382   : > { %v10965_v25 = vadd.f32 %v8369_v56, %v8368_v26  ;;  %v3589_v26 = vadd.f32 %v10952_v10, %v11002_v29  ;;  %v3597_v49 = vadd.f32 %v10962_v39, %v11002_v29 }
 0x386   : > { %v8371_v21 = vpop.f32.mrb[76].mxu1 }
 0x387   : > { %v8372_v62 = vpop.f32.mrb[77].mxu1 }
 0x388   : > { %v10967_v2 = vadd.f32 %v8372_v62, %v8371_v21  ;;  %v8374_v46 = vpop.f32.mrb[78].mxu1 }
 0x389   : > { %v8375_v12 = vpop.f32.mrb[79].mxu1 }
 0x38a   : > { %v10969_v16 = vadd.f32 %v8375_v12, %v8374_v46  ;;  %v9165_v12 = vld [vmem:[%s13078_s3 + $0x60] sm:$0xff]  }
 0x38b   : > { %8589 = vmatprep.subr.bf16.mxu0 %v9165_v12 }
 0x38c   : > { %v3608_v4 = vadd.f32 %v10969_v16, %v11002_v29 }
 0x38e   : > { %v8377_v15 = vpop.f32.mrb[80].mxu1 }
 0x38f   : > { %v8378_v41 = vpop.f32.mrb[81].mxu1 }
 0x390   : > { %v10977_v42 = vadd.f32 %v8378_v41, %v8377_v15  ;;  %v8380_v48 = vpop.f32.mrb[82].mxu1  ;;  %v9166_v15 = vld [vmem:[%s13078_s3 + $0x20] sm:$0xff]   ;;  %v3592_v41 = vadd.f32 %v10954_v53, %v11002_v29 }
 0x391   : > { %v8381_v14 = vpop.f32.mrb[83].mxu1  ;;  %8590 = vmatpush3.bf16.msra.mxu0 %v9166_v15 }
 0x392   : > { %v10979_v19 = vadd.f32 %v8381_v14, %v8380_v48 }
 0x396   : > { %v8383_v27 = vpop.f32.mrb[84].mxu1 }
 0x397   : > { %v8384_v5 = vpop.f32.mrb[85].mxu1 }
 0x398   : > { %v10981_v22 = vadd.f32 %v8384_v5, %v8383_v27  ;;  %v8386_v63 = vpop.f32.mrb[86].mxu1 }
 0x399   : > { %v8387_v58 = vpop.f32.mrb[87].mxu1 }
 0x39a   : > { %v10983_v17 = vadd.f32 %v8387_v58, %v8386_v63 }
 0x39e   : > { %v8389_v6 = vpop.f32.mrb[88].mxu1 }
 0x39f   : > { %v8390_v7 = vpop.f32.mrb[89].mxu1 }
 0x3a0   : > { %v10991_v44 = vadd.f32 %v8390_v7, %v8389_v6  ;;  %v8392_v37 = vpop.f32.mrb[90].mxu1 }
 0x3a1   : > { %v8393_v59 = vpop.f32.mrb[91].mxu1 }
 0x3a2   : > { %v10993_v32 = vadd.f32 %v8393_v59, %v8392_v37 }
 0x3a6   : > { %v8395_v18 = vpop.f32.mrb[92].mxu1 }
 0x3a7   : > { %v8396_v51 = vpop.f32.mrb[93].mxu1 }
 0x3a8   : > { %v10995_v38 = vadd.f32 %v8396_v51, %v8395_v18  ;;  %v8398_v28 = vpop.f32.mrb[94].mxu1  ;;  %v3600_v51 = vadd.f32 %v10965_v25, %v11002_v29  ;;  %v9167_v25 = vld [vmem:[%s13078_s3 + $0x68] sm:$0xff]  }
 0x3a9   : > { %v8399_v11 = vpop.f32.mrb[95].mxu1  ;;  %8591 = vmatprep.subr.bf16.mxu0 %v9167_v25 }
 0x3aa   : > { %v10997_v45 = vadd.f32 %v8399_v11, %v8398_v28 }
 0x3ae   : > { %v8401_v43 = vpop.f32.mrb[96].mxu1 }
 0x3af   : > { %v8402_v0 = vpop.f32.mrb[97].mxu1 }
 0x3b0   : > { %v11006_v50 = vadd.f32 %v8402_v0, %v8401_v43  ;;  %v8404_v31 = vpop.f32.mrb[98].mxu1 }
 0x3b1   : > { %v8405_v8 = vpop.f32.mrb[99].mxu1 }
 0x3b2   : > { %v11010_v61 = vadd.f32 %v8405_v8, %v8404_v31 }
 0x3b6   : > { %v8465_v33 = vpop.f32.mrb[96].mxu0  ;;  %v8407_v55 = vpop.f32.mrb[100].mxu1 }
 0x3b7   : > { %v8466_v24 = vpop.f32.mrb[97].mxu0  ;;  %v8408_v9 = vpop.f32.mrb[101].mxu1 }
 0x3b8   : > { %v8467_v3 = vadd.f32 %v8466_v24, %v8465_v33  ;;  %v8468_v20 = vpop.f32.mrb[98].mxu0  ;;  %v11024_v56 = vadd.f32 %v8408_v9, %v8407_v55  ;;  %v8410_v62 = vpop.f32.mrb[102].mxu1 }
 0x3b9   : > { %v8469_v30 = vpop.f32.mrb[99].mxu0  ;;  %v8411_v52 = vpop.f32.mrb[103].mxu1 }
 0x3ba   : > { %v8470_v54 = vadd.f32 %v8469_v30, %v8468_v20  ;;  %v11012_v47 = vadd.f32 %v8467_v3, %v3581_v35  ;;  %v11034_v48 = vadd.f32 %v8411_v52, %v8410_v62  ;;  %v3605_v3 = vadd.f32 %v10967_v2, %v11002_v29 }
 0x3bc   : > { %v11020_v34 = vadd.f32 %v8470_v54, %v3584_v36  ;;  %v9168_v36 = vld [vmem:[%s13078_s3 + $0x28] sm:$0xff]  }
 0x3bd   : > { %8592 = vmatpush3.bf16.msra.mxu0 %v9168_v36 }
 0x3be   : > { %v8471_v23 = vpop.f32.mrb[100].mxu0  ;;  %v8413_v5 = vpop.f32.mrb[104].mxu1 }
 0x3bf   : > { %v8472_v60 = vpop.f32.mrb[101].mxu0  ;;  %v8414_v58 = vpop.f32.mrb[105].mxu1 }
 0x3c0   : > { %v8473_v21 = vadd.f32 %v8472_v60, %v8471_v23  ;;  %v8474_v46 = vpop.f32.mrb[102].mxu0  ;;  %v11042_v57 = vadd.f32 %v8414_v58, %v8413_v5  ;;  %v8416_v53 = vpop.f32.mrb[106].mxu1 }
 0x3c1   : > { %v8475_v13 = vpop.f32.mrb[103].mxu0  ;;  %v8417_v59 = vpop.f32.mrb[107].mxu1 }
 0x3c2   : > { %v8476_v10 = vadd.f32 %v8475_v13, %v8474_v46  ;;  %v11036_v14 = vadd.f32 %v8473_v21, %v3589_v26  ;;  %v11046_v28 = vadd.f32 %v8417_v59, %v8416_v53  ;;  %v3613_v46 = vadd.f32 %v10977_v42, %v11002_v29 }
 0x3c4   : > { %v11038_v27 = vadd.f32 %v8476_v10, %v3592_v41  ;;  %v3616_v10 = vadd.f32 %v10979_v19, %v11002_v29  ;;  %v9169_v19 = vld [vmem:[%s13078_s3 + $0x70] sm:$0xff]  }
 0x3c5   : > { %8593 = vmatprep.subr.bf16.mxu0 %v9169_v19 }
 0x3c6   : > { %v8477_v63 = vpop.f32.mrb[104].mxu0  ;;  %v8419_v0 = vpop.f32.mrb[108].mxu1 }
 0x3c7   : > { %v8478_v6 = vpop.f32.mrb[105].mxu0  ;;  %v8420_v39 = vpop.f32.mrb[109].mxu1 }
 0x3c8   : > { %v8479_v7 = vadd.f32 %v8478_v6, %v8477_v63  ;;  %v8480_v37 = vpop.f32.mrb[106].mxu0  ;;  %v11054_v31 = vadd.f32 %v8420_v39, %v8419_v0  ;;  %v8422_v8 = vpop.f32.mrb[110].mxu1  ;;  %v9170_v0 = vld [vmem:[%s13078_s3 + $0x30] sm:$0xff]  }
 0x3c9   : > { %v8481_v18 = vpop.f32.mrb[107].mxu0  ;;  %v8423_v54 = vpop.f32.mrb[111].mxu1  ;;  %8594 = vmatpush3.bf16.msra.mxu0 %v9170_v0 }
 0x3ca   : > { %v8482_v11 = vadd.f32 %v8481_v18, %v8480_v37  ;;  %v11048_v43 = vadd.f32 %v8479_v7, %v3597_v49  ;;  %v11064_v55 = vadd.f32 %v8423_v54, %v8422_v8  ;;  %v3621_v37 = vadd.f32 %v10981_v22, %v11002_v29 }
 0x3cc   : > { %v11050_v33 = vadd.f32 %v8482_v11, %v3600_v51 }
 0x3ce   : > { %v8483_v24 = vpop.f32.mrb[108].mxu0  ;;  %v8425_v60 = vpop.f32.mrb[112].mxu1 }
 0x3cf   : > { %v8484_v35 = vpop.f32.mrb[109].mxu0  ;;  %v8426_v21 = vpop.f32.mrb[113].mxu1 }
 0x3d0   : > { %v8485_v20 = vadd.f32 %v8484_v35, %v8483_v24  ;;  %v8486_v30 = vpop.f32.mrb[110].mxu0  ;;  %v11072_v12 = vadd.f32 %v8426_v21, %v8425_v60  ;;  %v8428_v16 = vpop.f32.mrb[114].mxu1  ;;  %v3624_v35 = vadd.f32 %v10983_v17, %v11002_v29 }
 0x3d1   : > { %v8487_v40 = vpop.f32.mrb[111].mxu0  ;;  %v8429_v13 = vpop.f32.mrb[115].mxu1 }
 0x3d2   : > { %v8488_v2 = vadd.f32 %v8487_v40, %v8486_v30  ;;  %v11066_v23 = vadd.f32 %v8485_v20, %v3605_v3  ;;  %v11076_v5 = vadd.f32 %v8429_v13, %v8428_v16  ;;  %v3629_v40 = vadd.f32 %v10991_v44, %v11002_v29 }
 0x3d4   : > { %v11068_v9 = vadd.f32 %v8488_v2, %v3608_v4 }
 0x3d6   : > { %v8489_v26 = vpop.f32.mrb[112].mxu0  ;;  %v8431_v49 = vpop.f32.mrb[116].mxu1 }
 0x3d7   : > { %v8490_v62 = vpop.f32.mrb[113].mxu0  ;;  %v8432_v42 = vpop.f32.mrb[117].mxu1 }
 0x3d8   : > { %v8491_v15 = vadd.f32 %v8490_v62, %v8489_v26  ;;  %v8492_v52 = vpop.f32.mrb[114].mxu0  ;;  %v11084_v59 = vadd.f32 %v8432_v42, %v8431_v49  ;;  %v8434_v51 = vpop.f32.mrb[118].mxu1  ;;  %v3632_v62 = vadd.f32 %v10993_v32, %v11002_v29  ;;  %v9171_v32 = vld [vmem:[%s13078_s3 + $0x78] sm:$0xff]  }
 0x3d9   : > { %v8493_v41 = vpop.f32.mrb[115].mxu0  ;;  %v8435_v24 = vpop.f32.mrb[119].mxu1  ;;  %8595 = vmatprep.subr.bf16.mxu0 %v9171_v32 }
 0x3da   : > { %v8494_v63 = vadd.f32 %v8493_v41, %v8492_v52  ;;  %v11078_v58 = vadd.f32 %v8491_v15, %v3613_v46  ;;  %v11094_v3 = vadd.f32 %v8435_v24, %v8434_v51 }
 0x3dc   : > { %v11080_v6 = vadd.f32 %v8494_v63, %v3616_v10  ;;  %v3637_v63 = vadd.f32 %v10995_v38, %v11002_v29 }
 0x3de   : > { %v8495_v7 = vpop.f32.mrb[116].mxu0  ;;  %v8437_v30 = vpop.f32.mrb[120].mxu1 }
 0x3df   : > { %v8496_v53 = vpop.f32.mrb[117].mxu0  ;;  %v8438_v36 = vpop.f32.mrb[121].mxu1 }
 0x3e0   : > { %v8497_v18 = vadd.f32 %v8496_v53, %v8495_v7  ;;  %v8498_v11 = vpop.f32.mrb[118].mxu0  ;;  %v11102_v4 = vadd.f32 %v8438_v36, %v8437_v30  ;;  %v8440_v17 = vpop.f32.mrb[122].mxu1 }
 0x3e1   : > { %v8499_v39 = vpop.f32.mrb[119].mxu0  ;;  %v8441_v26 = vpop.f32.mrb[123].mxu1 }
 0x3e2   : > { %v8500_v22 = vadd.f32 %v8499_v39, %v8498_v11  ;;  %v11096_v20 = vadd.f32 %v8497_v18, %v3621_v37  ;;  %v11106_v46 = vadd.f32 %v8441_v26, %v8440_v17  ;;  %v9172_v37 = vld [vmem:[%s13078_s3 + $0x38] sm:$0xff]   ;;  %v3640_v11 = vadd.f32 %v10997_v45, %v11002_v29  ;;  %v4166_v39 = vld [vmem:[#allocation2] sm:$0xff] }
 0x3e3   : > { %8596 = vmatpush3.bf16.msra.mxu0 %v9172_v37  ;;  %v3645_v45 = vadd.f32 %v11006_v50, %v11002_v29 }
 0x3e4   : > { %v11098_v8 = vadd.f32 %v8500_v22, %v3624_v35  ;;  %v4167_v35 = vld [vmem:[#allocation2 + $0x8] sm:$0xff] }
 0x3e5   : > { %v4198_v22 = vpack.c.bf16 %v4167_v35, %v4166_v39 }
 0x3e6   : > { %v8501_v25 = vpop.f32.mrb[120].mxu0  ;;  %v8443_v13 = vpop.f32.mrb[124].mxu1 }
 0x3e7   : > { %v8502_v54 = vpop.f32.mrb[121].mxu0  ;;  %v8444_v44 = vpop.f32.mrb[125].mxu1  ;;  %4214 = vst.msk [vmem:[#allocation3] sm:$0xff] %vm332_vm0, %v4198_v22 }
 0x3e8   : > { %v8503_v2 = vadd.f32 %v8502_v54, %v8501_v25  ;;  %v8504_v60 = vpop.f32.mrb[122].mxu0  ;;  %v11114_v49 = vadd.f32 %v8444_v44, %v8443_v13  ;;  %v8446_v42 = vpop.f32.mrb[126].mxu1 }
 0x3e9   : > { %v8505_v21 = vpop.f32.mrb[123].mxu0  ;;  %v8447_v18 = vpop.f32.mrb[127].mxu1 }
 0x3ea   : > { %v8506_v15 = vadd.f32 %v8505_v21, %v8504_v60  ;;  %v11108_v16 = vadd.f32 %v8503_v2, %v3629_v40  ;;  %v11124_v19 = vadd.f32 %v8447_v18, %v8446_v42  ;;  %v4358_v21 = vld [vmem:[#allocation2 + $0x2] sm:$0xff] }
 0x3ec   : > { %v11110_v52 = vadd.f32 %v8506_v15, %v3632_v62  ;;  %v4359_v62 = vld [vmem:[#allocation2 + $0xa] sm:$0xff]  ;;  %v3648_v15 = vadd.f32 %v11010_v61, %v11002_v29 }
 0x3ee   : > { %v8507_v41 = vpop.f32.mrb[124].mxu0  ;;  %v8909_v25 = vpop.f32.mrb[128].mxu1 }
 0x3ef   : > { %v8508_v10 = vpop.f32.mrb[125].mxu0  ;;  %v3911_v36 = vadd.f32 %v8909_v25, %v11036_v14  ;;  %v3902_v40 = vpop.f32.mrb[129].mxu1 }
 0x3f0   : > { %v8509_v7 = vadd.f32 %v8508_v10, %v8507_v41  ;;  %v8510_v53 = vpop.f32.mrb[126].mxu0  ;;  %v3903_v17 = vadd.f32 %v3902_v40, %v11012_v47  ;;  %v8910_v26 = vpop.f32.mrb[130].mxu1  ;;  %v4390_v10 = vpack.c.bf16 %v4359_v62, %v4358_v21 }
 0x3f1   : > { %v8511_v51 = vpop.f32.mrb[127].mxu0  ;;  %v4031_v13 = vmax.f32 %v3911_v36, 0.0  ;;  %v3914_v14 = vadd.f32 %v8910_v26, %v11038_v27  ;;  %v3905_v44 = vpop.f32.mrb[131].mxu1 }
 0x3f2   : > { %v8512_v38 = vadd.f32 %v8511_v51, %v8510_v53  ;;  %v11126_v0 = vadd.f32 %v8509_v7, %v3637_v63  ;;  %v4029_v63 = vmax.f32 %v3903_v17, 0.0  ;;  %v3906_v50 = vadd.f32 %v3905_v44, %v11020_v34  ;;  %v4295_v53 = vpop.permute.xlu1 %4294  ;;  %4406 = vst.msk [vmem:[#allocation3 + $0x8] sm:$0xff] %vm332_vm0, %v4390_v10 }
 0x3f3   : > { %4136 = vst.msk [vmem:[#allocation2 + $0x31] sm:$0xff] %vm332_vm0, %v4031_v13  ;;  %v4032_v47 = vmax.f32 %v3914_v14, 0.0 }
 0x3f4   : > { %v11128_v24 = vadd.f32 %v8512_v38, %v3640_v11  ;;  %4134 = vst.msk [vmem:[#allocation2 + $0x19] sm:$0xff] %vm332_vm0, %v4029_v63  ;;  %v4030_v61 = vmax.f32 %v3906_v50, 0.0  ;;  %v3653_v11 = vadd.f32 %v11024_v56, %v11002_v29 }
 0x3f5   : > { %4342 = vst.msk [vmem:[#allocation3] sm:$0xff] %vm734_vm2, %v4295_v53 }
 0x3f6   : > { %v8513_v30 = vpop.f32.mrb[128].mxu0  ;;  %4137 = vst.msk [vmem:[#allocation2 + $0x39] sm:$0xff] %vm332_vm0, %v4032_v47  ;;  %4135 = vst.msk [vmem:[#allocation2 + $0x21] sm:$0xff] %vm332_vm0, %v4030_v61  ;;  %v8913_v27 = vpop.f32.mrb[132].mxu1  ;;  %v9174_v61 = vld [vmem:[%s13078_s3 + $0x100] sm:$0xff]  }
 0x3f7   : > { %v8514_v54 = vpop.f32.mrb[129].mxu0  ;;  %v3927_v37 = vadd.f32 %v8913_v27, %v11066_v23  ;;  %v3918_v51 = vpop.f32.mrb[133].mxu1  ;;  %8939 = vmatprep.subr.bf16.mxu0 %v9174_v61 }
 0x3f8   : > { %v8515_v2 = vadd.f32 %v8514_v54, %v8513_v30  ;;  %v8516_v60 = vpop.f32.mrb[130].mxu0  ;;  %v3919_v39 = vadd.f32 %v3918_v51, %v11048_v43  ;;  %v8914_v22 = vpop.f32.mrb[134].mxu1  ;;  %v3656_v30 = vadd.f32 %v11034_v48, %v11002_v29  ;;  %v9173_v48 = vld [vmem:[%s13078_s3 + $0xc0] sm:$0xff]  }
 0x3f9   : > { %v8517_v41 = vpop.f32.mrb[131].mxu0  ;;  %v4035_v25 = vmax.f32 %v3927_v37, 0.0  ;;  %v3930_v36 = vadd.f32 %v8914_v22, %v11068_v9  ;;  %v3921_v40 = vpop.f32.mrb[135].mxu1  ;;  %8693 = vmatprep.subr.bf16.mxu1 %v9173_v48 }
 0x3fa   : > { %v8518_v7 = vadd.f32 %v8517_v41, %v8516_v60  ;;  %v11139_v42 = vadd.f32 %v8515_v2, %v3645_v45  ;;  %v4033_v45 = vmax.f32 %v3919_v39, 0.0  ;;  %v3922_v2 = vadd.f32 %v3921_v40, %v11050_v33  ;;  %v4424_v17 = vld [vmem:[#allocation2 + $0x30] sm:$0xff]  ;;  %v9176_v39 = vld [vmem:[%s13078_s3 + $0xc8] sm:$0xff]  }
 0x3fb   : > { %4140 = vst.msk [vmem:[#allocation2 + $0x61] sm:$0xff] %vm332_vm0, %v4035_v25  ;;  %v4036_v56 = vmax.f32 %v3930_v36, 0.0  ;;  %v4422_v43 = vld [vmem:[#allocation2 + $0x18] sm:$0xff]  ;;  %v4742_v36 = vld [vmem:[#allocation2 + $0x30] sm:$0xff] }
 0x3fc   : > { %v11144_v32 = vadd.f32 %v8518_v7, %v3648_v15  ;;  %v4232_v26 = vld [vmem:[#allocation2 + $0x19] sm:$0xff]  ;;  %4138 = vst.msk [vmem:[#allocation2 + $0x49] sm:$0xff] %vm332_vm0, %v4033_v45  ;;  %v4034_v9 = vmax.f32 %v3922_v2, 0.0  ;;  %v4234_v25 = vld [vmem:[#allocation2 + $0x31] sm:$0xff] }
 0x3fd   : > { %v4425_v21 = vld [vmem:[#allocation2 + $0x38] sm:$0xff]  ;;  %4141 = vst.msk [vmem:[#allocation2 + $0x69] sm:$0xff] %vm332_vm0, %v4036_v56  ;;  %v4423_v13 = vld [vmem:[#allocation2 + $0x20] sm:$0xff] }
 0x3fe   : > { %v8519_v34 = vpop.f32.mrb[132].mxu0  ;;  %v4235_v62 = vld [vmem:[#allocation2 + $0x39] sm:$0xff]  ;;  %v4233_v14 = vld [vmem:[#allocation2 + $0x21] sm:$0xff]  ;;  %v4455_v41 = vpack.c.bf16 %v4425_v21, %v4424_v17  ;;  %4139 = vst.msk [vmem:[#allocation2 + $0x51] sm:$0xff] %vm332_vm0, %v4034_v9  ;;  %v8917_v63 = vpop.f32.mrb[136].mxu1  ;;  %v4454_v7 = vpack.c.bf16 %v4423_v13, %v4422_v43 }
 0x3ff   : > { %v8520_v18 = vpop.f32.mrb[133].mxu0  ;;  %v4616_v33 = vld [vmem:[#allocation2 + $0x32] sm:$0xff]  ;;  %v4614_v44 = vld [vmem:[#allocation2 + $0x1a] sm:$0xff]  ;;  %v4263_v50 = vpack.c.bf16 %v4233_v14, %v4232_v26  ;;  %v4615_v47 = vld [vmem:[#allocation2 + $0x22] sm:$0xff]  ;;  %v3943_v27 = vadd.f32 %v8917_v63, %v11096_v20 }
 0x400   : > { %v8521_v38 = vadd.f32 %v8520_v18, %v8519_v34  ;;  %v8522_v35 = vpop.f32.mrb[134].mxu0  ;;  %v4617_v53 = vld [vmem:[#allocation2 + $0x3a] sm:$0xff]  ;;  %v3661_v34 = vadd.f32 %v11042_v57, %v11002_v29  ;;  %v3934_v18 = vpop.f32.mrb[137].mxu1  ;;  %v11174_v51 = vpack.c.bf16 %v4615_v47, %v4614_v44  ;;  %4216 = vst.msk [vmem:[#allocation3 + $0x50] sm:$0xff] %vm332_vm0, %v4455_v41  ;;  %v3664_v57 = vadd.f32 %v11046_v28, %v11002_v29 }
 0x401   : > { %v8523_v54 = vpop.f32.mrb[135].mxu0  ;;  %4486 = vrot.lane.b32.xlu0 %v4454_v7, %s9455_s17  ;;  %4296 = vrot.lane.b32.xlu1 %v4263_v50, %s9455_s17  ;;  %4215 = vst.msk [vmem:[#allocation3 + $0x28] sm:$0xff] %vm332_vm0, %v4454_v7  ;;  %v4039_v40 = vmax.f32 %v3943_v27, 0.0  ;;  %v11192_v28 = vpack.c.bf16 %v4235_v62, %v4234_v25  ;;  %v4551_v56 = vld [vmem:[#allocation2 + $0x21] sm:$0xff]  ;;  %v4553_v43 = vld [vmem:[#allocation2 + $0x39] sm:$0xff]  ;;  %v3672_v25 = vadd.f32 %v11064_v55, %v11002_v29 }
 0x402   : > { %v8524_v23 = vadd.f32 %v8523_v54, %v8522_v35  ;;  %v11157_v60 = vadd.f32 %v8521_v38, %v3653_v11  ;;  %v11176_v11 = vpack.c.bf16 %v4617_v53, %v4616_v33  ;;  %v9175_v38 = vld [vmem:[%s13078_s3 + $0x80] sm:$0xff]   ;;  %v3935_v35 = vadd.f32 %v3934_v18, %v11078_v58  ;;  %v4743_v54 = vld [vmem:[#allocation2 + $0x38] sm:$0xff]  ;;  %4407 = vst.msk [vmem:[#allocation3 + $0x30] sm:$0xff] %vm332_vm0, %v11174_v51  ;;  %v9177_v58 = vld [vmem:[%s13078_s3 + $0x88] sm:$0xff]  }
 0x403   : > { %8694 = vmatpush3.bf16.msra.mxu1 %v9175_v38  ;;  %v4774_v17 = vpack.c.bf16 %v4743_v54, %v4742_v36  ;;  %v4428_v9 = vld [vmem:[#allocation2 + $0x60] sm:$0xff]  ;;  %v4552_v33 = vld [vmem:[#allocation2 + $0x31] sm:$0xff]  ;;  %4144 = vst.msk [vmem:[#allocation2 + $0x91] sm:$0xff] %vm332_vm0, %v4039_v40  ;;  %v4426_v14 = vld [vmem:[#allocation2 + $0x48] sm:$0xff] }
 0x404   : > { %v11164_v15 = vadd.f32 %v8524_v23, %v3656_v30  ;;  %v8918_v30 = vpop.f32.mrb[138].mxu1  ;;  %4408 = vst.msk [vmem:[#allocation3 + $0x58] sm:$0xff] %vm332_vm0, %v11176_v11  ;;  %8695 = vmatprep.subr.bf16.mxu1 %v9176_v39  ;;  %v4550_v62 = vld [vmem:[#allocation2 + $0x19] sm:$0xff]  ;;  %v4236_v44 = vld [vmem:[#allocation2 + $0x49] sm:$0xff]  ;;  %v4583_v7 = vpack.c.bf16 %v4553_v43, %v4552_v33  ;;  %v4238_v40 = vld [vmem:[#allocation2 + $0x61] sm:$0xff] }
 0x405   : > { %v3946_v45 = vadd.f32 %v8918_v30, %v11098_v8  ;;  %v3937_v2 = vpop.f32.mrb[139].mxu1  ;;  %v4037_v8 = vmax.f32 %v3935_v35, 0.0  ;;  %4790 = vst.msk [vmem:[#allocation3 + $0x18] sm:$0xff] %vm332_vm0, %v4774_v17  ;;  %v4582_v63 = vpack.c.bf16 %v4551_v56, %v4550_v62  ;;  %4488 = vrot.lane.b32.xlu0 %v4455_v41, %s9455_s17  ;;  %4298 = vrot.lane.b32.xlu1 %v11192_v28, %s9455_s17  ;;  %v4429_v50 = vld [vmem:[#allocation2 + $0x68] sm:$0xff]  ;;  %v4237_v27 = vld [vmem:[#allocation2 + $0x51] sm:$0xff] }
 0x406   : > { %v8525_v10 = vpop.f32.mrb[136].mxu0  ;;  %v3938_v48 = vadd.f32 %v3937_v2, %v11080_v6  ;;  %v4239_v47 = vld [vmem:[#allocation2 + $0x69] sm:$0xff]  ;;  %4599 = vst.msk [vmem:[#allocation3 + $0x38] sm:$0xff] %vm332_vm0, %v4583_v7  ;;  %v3669_v41 = vadd.f32 %v11054_v31, %v11002_v29  ;;  %v8921_v39 = vpop.f32.mrb[140].mxu1  ;;  %v4619_v35 = vld [vmem:[#allocation2 + $0x52] sm:$0xff] }
 0x407   : > { %v8526_v37 = vpop.f32.mrb[137].mxu0  ;;  %v4040_v13 = vmax.f32 %v3946_v45, 0.0  ;;  %4142 = vst.msk [vmem:[#allocation2 + $0x79] sm:$0xff] %vm332_vm0, %v4037_v8  ;;  %v4620_v61 = vld [vmem:[#allocation2 + $0x62] sm:$0xff]  ;;  %v4618_v18 = vld [vmem:[#allocation2 + $0x4a] sm:$0xff]  ;;  %8696 = vmatpush3.bf16.msra.mxu1 %v9177_v58  ;;  %4598 = vst.msk [vmem:[#allocation3 + $0x10] sm:$0xff] %vm332_vm0, %v4582_v63  ;;  %v3959_v36 = vadd.f32 %v8921_v39, %v11126_v0  ;;  %v11244_v43 = vpack.c.bf16 %v4239_v47, %v4238_v40 }
 0x408   : > { %v8527_v20 = vadd.f32 %v8526_v37, %v8525_v10  ;;  %v8528_v22 = vpop.f32.mrb[138].mxu0  ;;  %v9178_v10 = vld [vmem:[%s13078_s3 + $0xd0] sm:$0xff]   ;;  %v4038_v6 = vmax.f32 %v3938_v48, 0.0  ;;  %v11216_v37 = vpack.c.bf16 %v4429_v50, %v4428_v9  ;;  %v3950_v54 = vpop.f32.mrb[141].mxu1  ;;  %v11231_v45 = vpack.c.bf16 %v4619_v35, %v4618_v18  ;;  %v9180_v2 = vld [vmem:[%s13078_s3 + $0xd8] sm:$0xff]   ;;  %v4746_v58 = vld [vmem:[#allocation2 + $0x60] sm:$0xff] }
 0x409   : > { %v8529_v23 = vpop.f32.mrb[139].mxu0  ;;  %4145 = vst.msk [vmem:[#allocation2 + $0x99] sm:$0xff] %vm332_vm0, %v4040_v13  ;;  %8697 = vmatprep.subr.bf16.mxu1 %v9178_v10  ;;  %v9179_v30 = vld [vmem:[%s13078_s3 + $0x90] sm:$0xff]   ;;  %v3951_v55 = vadd.f32 %v3950_v54, %v11108_v16  ;;  %v8922_v0 = vpop.f32.mrb[142].mxu1  ;;  %v4744_v8 = vld [vmem:[#allocation2 + $0x48] sm:$0xff]  ;;  %v4043_v9 = vmax.f32 %v3959_v36, 0.0 }
 0x40a   : > { %v8530_v26 = vadd.f32 %v8529_v23, %v8528_v22  ;;  %v11202_v21 = vadd.f32 %v8527_v20, %v3661_v34  ;;  %v4427_v34 = vld [vmem:[#allocation2 + $0x50] sm:$0xff]  ;;  %4143 = vst.msk [vmem:[#allocation2 + $0x81] sm:$0xff] %vm332_vm0, %v4038_v6  ;;  %v11223_v20 = vpack.c.bf16 %v4237_v27, %v4236_v44  ;;  %4218 = vst.msk [vmem:[#allocation3 + $0xa0] sm:$0xff] %vm332_vm0, %v11216_v37  ;;  %v4747_v48 = vld [vmem:[#allocation2 + $0x68] sm:$0xff]  ;;  %v3953_v13 = vpop.f32.mrb[143].mxu1 }
 0x40b   : > { %v4621_v22 = vld [vmem:[#allocation2 + $0x6a] sm:$0xff]  ;;  %v3962_v62 = vadd.f32 %v8922_v0, %v11128_v24  ;;  %4409 = vst.msk [vmem:[#allocation3 + $0x80] sm:$0xff] %vm332_vm0, %v11231_v45  ;;  %8698 = vmatpush3.bf16.msra.mxu1 %v9179_v30  ;;  %v9181_v16 = vld [vmem:[%s13078_s3 + $0x98] sm:$0xff]   ;;  %v4776_v44 = vpack.c.bf16 %v4747_v48, %v4746_v58  ;;  %v4041_v7 = vmax.f32 %v3951_v55, 0.0  ;;  %v3954_v24 = vadd.f32 %v3953_v13, %v11110_v52  ;;  %v9182_v39 = vld [vmem:[%s13078_s3 + $0xe0] sm:$0xff]  }
 0x40c   : > { %v11213_v53 = vadd.f32 %v8530_v26, %v3664_v57  ;;  %v4456_v57 = vpack.c.bf16 %v4427_v34, %v4426_v14  ;;  %v11233_v23 = vpack.c.bf16 %v4621_v22, %v4620_v61  ;;  %4300 = vrot.lane.b32.xlu1 %v11223_v20, %s9455_s17  ;;  %v4745_v26 = vld [vmem:[#allocation2 + $0x50] sm:$0xff]  ;;  %8699 = vmatprep.subr.bf16.mxu1 %v9180_v2  ;;  %v4556_v34 = vld [vmem:[#allocation2 + $0x61] sm:$0xff] }
 0x40d   : > { %v4775_v14 = vpack.c.bf16 %v4745_v26, %v4744_v8  ;;  %v4555_v10 = vld [vmem:[#allocation2 + $0x51] sm:$0xff]  ;;  %v4557_v63 = vld [vmem:[#allocation2 + $0x69] sm:$0xff]  ;;  %4148 = vst.msk [vmem:[#allocation2 + $0xc1] sm:$0xff] %vm332_vm0, %v4043_v9  ;;  %v4044_v27 = vmax.f32 %v3962_v62, 0.0  ;;  %4792 = vst.msk [vmem:[#allocation3 + $0x68] sm:$0xff] %vm332_vm0, %v4776_v44  ;;  %v3680_v26 = vadd.f32 %v11076_v5, %v11002_v29 }
 0x40e   : > { %v8531_v38 = vpop.f32.mrb[140].mxu0  ;;  %4490 = vrot.lane.b32.xlu0 %v4456_v57, %s9455_s17  ;;  %4217 = vst.msk [vmem:[#allocation3 + $0x78] sm:$0xff] %vm332_vm0, %v4456_v57  ;;  %4410 = vst.msk [vmem:[#allocation3 + $0xa8] sm:$0xff] %vm332_vm0, %v11233_v23  ;;  %v4432_v50 = vld [vmem:[#allocation2 + $0x90] sm:$0xff]  ;;  %v4430_v18 = vld [vmem:[#allocation2 + $0x78] sm:$0xff]  ;;  %v4585_v57 = vpack.c.bf16 %v4557_v63, %v4556_v34  ;;  %v8925_v58 = vpop.f32.mrb[144].mxu1 }
 0x40f   : > { %v8532_v31 = vpop.f32.mrb[141].mxu0  ;;  %v4554_v61 = vld [vmem:[#allocation2 + $0x49] sm:$0xff]  ;;  %4791 = vst.msk [vmem:[#allocation3 + $0x40] sm:$0xff] %vm332_vm0, %v4775_v14  ;;  %4146 = vst.msk [vmem:[#allocation2 + $0xa9] sm:$0xff] %vm332_vm0, %v4041_v7  ;;  %8700 = vmatpush3.bf16.msra.mxu1 %v9181_v16  ;;  %v9183_v8 = vld [vmem:[%s13078_s3 + $0xa0] sm:$0xff]   ;;  %v3975_v48 = vadd.f32 %v8925_v58, %v11157_v60  ;;  %v3966_v9 = vpop.f32.mrb[145].mxu1 }
 0x410   : > { %v8533_v17 = vadd.f32 %v8532_v31, %v8531_v38  ;;  %v8534_v56 = vpop.f32.mrb[142].mxu0  ;;  %v4240_v38 = vld [vmem:[#allocation2 + $0x79] sm:$0xff]  ;;  %v4584_v52 = vpack.c.bf16 %v4555_v10, %v4554_v61  ;;  %4302 = vrot.lane.b32.xlu1 %v11244_v43, %s9455_s17  ;;  %4149 = vst.msk [vmem:[#allocation2 + $0xc9] sm:$0xff] %vm332_vm0, %v4044_v27  ;;  %4601 = vst.msk [vmem:[#allocation3 + $0x88] sm:$0xff] %vm332_vm0, %v4585_v57  ;;  %8701 = vmatprep.subr.bf16.mxu1 %v9182_v39  ;;  %v4242_v62 = vld [vmem:[#allocation2 + $0x91] sm:$0xff]  ;;  %v8926_v60 = vpop.f32.mrb[146].mxu1 }
 0x411   : > { %v8535_v33 = vpop.f32.mrb[143].mxu0  ;;  %v4433_v35 = vld [vmem:[#allocation2 + $0x98] sm:$0xff]  ;;  %v4431_v31 = vld [vmem:[#allocation2 + $0x80] sm:$0xff]  ;;  %v9184_v16 = vld [vmem:[%s13078_s3 + $0xe8] sm:$0xff]   ;;  %v3967_v5 = vadd.f32 %v3966_v9, %v11139_v42  ;;  %v3978_v61 = vadd.f32 %v8926_v60, %v11164_v15  ;;  %v3969_v27 = vpop.f32.mrb[147].mxu1 }
 0x412   : > { %v8536_v6 = vadd.f32 %v8535_v33, %v8534_v56  ;;  %v11256_v47 = vadd.f32 %v8533_v17, %v3669_v41  ;;  %v4042_v41 = vmax.f32 %v3954_v24, 0.0  ;;  %4492 = vrot.lane.b32.xlu0 %v11216_v37, %s9455_s17  ;;  %v4243_v22 = vld [vmem:[#allocation2 + $0x99] sm:$0xff]  ;;  %v4241_v54 = vld [vmem:[#allocation2 + $0x81] sm:$0xff]  ;;  %v11272_v40 = vpack.c.bf16 %v4433_v35, %v4432_v50  ;;  %4600 = vst.msk [vmem:[#allocation3 + $0x60] sm:$0xff] %vm332_vm0, %v4584_v52  ;;  %v4750_v14 = vld [vmem:[#allocation2 + $0x90] sm:$0xff] }
 0x413   : > { %v4624_v36 = vld [vmem:[#allocation2 + $0x92] sm:$0xff]  ;;  %v4622_v2 = vld [vmem:[#allocation2 + $0x7a] sm:$0xff]  ;;  %v3677_v37 = vadd.f32 %v11072_v12, %v11002_v29  ;;  %v4458_v17 = vpack.c.bf16 %v4431_v31, %v4430_v18  ;;  %v11279_v55 = vpack.c.bf16 %v4241_v54, %v4240_v38  ;;  %v4623_v56 = vld [vmem:[#allocation2 + $0x82] sm:$0xff]  ;;  %v11300_v63 = vpack.c.bf16 %v4243_v22, %v4242_v62  ;;  %8702 = vmatpush3.bf16.msra.mxu1 %v9183_v8 }
 0x414   : > { %v11269_v30 = vadd.f32 %v8536_v6, %v3672_v25  ;;  %4147 = vst.msk [vmem:[#allocation2 + $0xb1] sm:$0xff] %vm332_vm0, %v4042_v41  ;;  %v4625_v0 = vld [vmem:[#allocation2 + $0x9a] sm:$0xff]  ;;  %v11287_v33 = vpack.c.bf16 %v4623_v56, %v4622_v2  ;;  %4220 = vst.msk [vmem:[#allocation3 + $0xf0] sm:$0xff] %vm332_vm0, %v11272_v40  ;;  %v4047_v50 = vmax.f32 %v3975_v48, 0.0  ;;  %v9185_v42 = vld [vmem:[%s13078_s3 + $0xa8] sm:$0xff]   ;;  %v4045_v57 = vmax.f32 %v3967_v5, 0.0  ;;  %8703 = vmatprep.subr.bf16.mxu1 %v9184_v16 }
 0x415   : > { %v11289_v13 = vpack.c.bf16 %v4625_v0, %v4624_v36  ;;  %4304 = vrot.lane.b32.xlu1 %v11279_v55, %s9455_s17  ;;  %4219 = vst.msk [vmem:[#allocation3 + $0xc8] sm:$0xff] %vm332_vm0, %v4458_v17  ;;  %v4748_v7 = vld [vmem:[#allocation2 + $0x78] sm:$0xff]  ;;  %v4749_v6 = vld [vmem:[#allocation2 + $0x80] sm:$0xff]  ;;  %v3970_v15 = vadd.f32 %v3969_v27, %v11144_v32  ;;  %v4048_v31 = vmax.f32 %v3978_v61, 0.0 }
 0x416   : > { %v8537_v25 = vpop.f32.mrb[144].mxu0  ;;  %4494 = vrot.lane.b32.xlu0 %v4458_v17, %s9455_s17  ;;  %v4751_v24 = vld [vmem:[#allocation2 + $0x98] sm:$0xff]  ;;  %4411 = vst.msk [vmem:[#allocation3 + $0xd0] sm:$0xff] %vm332_vm0, %v11287_v33  ;;  %v4777_v18 = vpack.c.bf16 %v4749_v6, %v4748_v7  ;;  %v4559_v39 = vld [vmem:[#allocation2 + $0x81] sm:$0xff]  ;;  %4152 = vst.msk [vmem:[#allocation2 + $0xf1] sm:$0xff] %vm332_vm0, %v4047_v50  ;;  %v8929_v16 = vpop.f32.mrb[148].mxu1 }
 0x417   : > { %v8538_v12 = vpop.f32.mrb[145].mxu0  ;;  %4412 = vst.msk [vmem:[#allocation3 + $0xf8] sm:$0xff] %vm332_vm0, %v11289_v13  ;;  %v4778_v38 = vpack.c.bf16 %v4751_v24, %v4750_v14  ;;  %v4561_v52 = vld [vmem:[#allocation2 + $0x99] sm:$0xff]  ;;  %v4560_v36 = vld [vmem:[#allocation2 + $0x91] sm:$0xff]  ;;  %v4434_v54 = vld [vmem:[#allocation2 + $0xa8] sm:$0xff]  ;;  %8704 = vmatpush3.bf16.msra.mxu1 %v9185_v42  ;;  %v3991_v60 = vadd.f32 %v8929_v16, %v11256_v47  ;;  %v3982_v6 = vpop.f32.mrb[149].mxu1 }
 0x418   : > { %v8539_v44 = vadd.f32 %v8538_v12, %v8537_v25  ;;  %v8540_v10 = vpop.f32.mrb[146].mxu0  ;;  %v4558_v22 = vld [vmem:[#allocation2 + $0x79] sm:$0xff]  ;;  %v9186_v25 = vld [vmem:[%s13078_s3 + $0xf0] sm:$0xff]   ;;  %4793 = vst.msk [vmem:[#allocation3 + $0x90] sm:$0xff] %vm332_vm0, %v4777_v18  ;;  %v4587_v32 = vpack.c.bf16 %v4561_v52, %v4560_v36  ;;  %4150 = vst.msk [vmem:[#allocation2 + $0xd9] sm:$0xff] %vm332_vm0, %v4045_v57  ;;  %v3983_v42 = vadd.f32 %v3982_v6, %v11202_v21  ;;  %v8930_v47 = vpop.f32.mrb[150].mxu1 }
 0x419   : > { %v8541_v34 = vpop.f32.mrb[147].mxu0  ;;  %v4436_v2 = vld [vmem:[#allocation2 + $0xc0] sm:$0xff]  ;;  %4794 = vst.msk [vmem:[#allocation3 + $0xb8] sm:$0xff] %vm332_vm0, %v4778_v38  ;;  %v4586_v58 = vpack.c.bf16 %v4559_v39, %v4558_v22  ;;  %4306 = vrot.lane.b32.xlu1 %v11300_v63, %s9455_s17  ;;  %v4244_v17 = vld [vmem:[#allocation2 + $0xa9] sm:$0xff]  ;;  %4153 = vst.msk [vmem:[#allocation2 + $0xf9] sm:$0xff] %vm332_vm0, %v4048_v31  ;;  %8705 = vmatprep.subr.bf16.mxu1 %v9186_v25  ;;  %v3688_v52 = vadd.f32 %v11094_v3, %v11002_v29  ;;  %v4051_v57 = vmax.f32 %v3991_v60, 0.0 }
 0x41a   : > { %v8542_v41 = vadd.f32 %v8541_v34, %v8540_v10  ;;  %v11312_v35 = vadd.f32 %v8539_v44, %v3677_v37  ;;  %v4046_v37 = vmax.f32 %v3970_v15, 0.0  ;;  %4496 = vrot.lane.b32.xlu0 %v11272_v40, %s9455_s17  ;;  %v4437_v56 = vld [vmem:[#allocation2 + $0xc8] sm:$0xff]  ;;  %4603 = vst.msk [vmem:[#allocation3 + $0xd8] sm:$0xff] %vm332_vm0, %v4587_v32  ;;  %v9187_v10 = vld [vmem:[%s13078_s3 + $0xb0] sm:$0xff]   ;;  %v9188_v61 = vld [vmem:[%s13078_s3 + $0xf8] sm:$0xff]   ;;  %v3685_v34 = vadd.f32 %v11084_v59, %v11002_v29  ;;  %v3985_v15 = vpop.f32.mrb[151].mxu1 }
 0x41b   : > { %v4628_v8 = vld [vmem:[#allocation2 + $0xc2] sm:$0xff]  ;;  %v4435_v48 = vld [vmem:[#allocation2 + $0xb0] sm:$0xff]  ;;  %v4461_v9 = vpack.c.bf16 %v4437_v56, %v4436_v2  ;;  %4602 = vst.msk [vmem:[#allocation3 + $0xb0] sm:$0xff] %vm332_vm0, %v4586_v58  ;;  %v3994_v59 = vadd.f32 %v8930_v47, %v11269_v30  ;;  %8706 = vmatpush3.bf16.msra.mxu1 %v9187_v10  ;;  %v9189_v21 = vld [vmem:[%s13078_s3 + $0xb8] sm:$0xff]   ;;  %v4049_v29 = vmax.f32 %v3983_v42, 0.0  ;;  %v3986_v30 = vadd.f32 %v3985_v15, %v11213_v53 }
 0x41c   : > { %v11325_v0 = vadd.f32 %v8542_v41, %v3680_v26  ;;  %v4245_v12 = vld [vmem:[#allocation2 + $0xb1] sm:$0xff]  ;;  %4151 = vst.msk [vmem:[#allocation2 + $0xe1] sm:$0xff] %vm332_vm0, %v4046_v37  ;;  %v4460_v14 = vpack.c.bf16 %v4435_v48, %v4434_v54  ;;  %v4752_v38 = vld [vmem:[#allocation2 + $0xa8] sm:$0xff]  ;;  %8707 = vmatprep.subr.bf16.mxu1 %v9188_v61  ;;  %v4754_v2 = vld [vmem:[#allocation2 + $0xc0] sm:$0xff] }
 0x41d   : > { %v4626_v62 = vld [vmem:[#allocation2 + $0xaa] sm:$0xff]  ;;  %v11331_v44 = vpack.c.bf16 %v4245_v12, %v4244_v17  ;;  %v4627_v26 = vld [vmem:[#allocation2 + $0xb2] sm:$0xff]  ;;  %4222 = vst.msk [vmem:[#allocation3 + $0x140] sm:$0xff] %vm332_vm0, %v4461_v9  ;;  %4156 = vst.msk [vmem:[#allocation2 + $0x121] sm:$0xff] %vm332_vm0, %v4051_v57  ;;  %v4052_v58 = vmax.f32 %v3994_v59, 0.0  ;;  %v4050_v56 = vmax.f32 %v3986_v30, 0.0 }
 0x41e   : > { %v8543_v40 = vpop.f32.mrb[148].mxu0  ;;  %v4629_v5 = vld [vmem:[#allocation2 + $0xca] sm:$0xff]  ;;  %v11337_v24 = vpack.c.bf16 %v4627_v26, %v4626_v62  ;;  %4498 = vrot.lane.b32.xlu0 %v4460_v14, %s9455_s17  ;;  %4221 = vst.msk [vmem:[#allocation3 + $0x118] sm:$0xff] %vm332_vm0, %v4460_v14  ;;  %4154 = vst.msk [vmem:[#allocation2 + $0x109] sm:$0xff] %vm332_vm0, %v4049_v29  ;;  %v8933_v60 = vpop.f32.mrb[152].mxu1 }
 0x41f   : > { %v8544_v7 = vpop.f32.mrb[149].mxu0  ;;  %v11339_v50 = vpack.c.bf16 %v4629_v5, %v4628_v8  ;;  %4308 = vrot.lane.b32.xlu1 %v11331_v44, %s9455_s17  ;;  %v4753_v39 = vld [vmem:[#allocation2 + $0xb0] sm:$0xff]  ;;  %v4755_v36 = vld [vmem:[#allocation2 + $0xc8] sm:$0xff]  ;;  %4157 = vst.msk [vmem:[#allocation2 + $0x129] sm:$0xff] %vm332_vm0, %v4052_v58  ;;  %8708 = vmatpush3.bf16.msra.mxu1 %v9189_v21  ;;  %4155 = vst.msk [vmem:[#allocation2 + $0x111] sm:$0xff] %vm332_vm0, %v4050_v56 }
 0x420   : > { %v8545_v27 = vadd.f32 %v8544_v7, %v8543_v40  ;;  %v8546_v18 = vpop.f32.mrb[150].mxu0  ;;  %4413 = vst.msk [vmem:[#allocation3 + $0x120] sm:$0xff] %vm332_vm0, %v11337_v24  ;;  %v4779_v22 = vpack.c.bf16 %v4753_v39, %v4752_v38  ;;  %v4563_v31 = vld [vmem:[#allocation2 + $0xb1] sm:$0xff]  ;;  %v4562_v25 = vld [vmem:[#allocation2 + $0xa9] sm:$0xff]  ;;  %v4780_v37 = vpack.c.bf16 %v4755_v36, %v4754_v2  ;;  %v4246_v8 = vld [vmem:[#allocation2 + $0xc1] sm:$0xff] }
 0x421   : > { %v8547_v41 = vpop.f32.mrb[151].mxu0  ;;  %4414 = vst.msk [vmem:[#allocation3 + $0x148] sm:$0xff] %vm332_vm0, %v11339_v50  ;;  %v4247_v32 = vld [vmem:[#allocation2 + $0xc9] sm:$0xff]  ;;  %v4588_v17 = vpack.c.bf16 %v4563_v31, %v4562_v25  ;;  %v4441_v12 = vld [vmem:[#allocation2 + $0xf8] sm:$0xff] }
 0x422   : > { %v8548_v3 = vadd.f32 %v8547_v41, %v8546_v18  ;;  %v3846_v54 = vadd.f32 %v8545_v27, %v3685_v34  ;;  %4795 = vst.msk [vmem:[#allocation3 + $0xe0] sm:$0xff] %vm332_vm0, %v4779_v22  ;;  %4500 = vrot.lane.b32.xlu0 %v4461_v9, %s9455_s17  ;;  %v4440_v48 = vld [vmem:[#allocation2 + $0xf0] sm:$0xff]  ;;  %v4438_v40 = vld [vmem:[#allocation2 + $0xd8] sm:$0xff]  ;;  %4796 = vst.msk [vmem:[#allocation3 + $0x108] sm:$0xff] %vm332_vm0, %v4780_v37  ;;  %v3998_v18 = vpop.f32.mrb[153].mxu1  ;;  %v11384_v47 = vpack.c.bf16 %v4247_v32, %v4246_v8 }
 0x423   : > { %4870 = vrot.lane.b32.xlu1 %v11192_v28, %s9455_s17  ;;  %v4632_v62 = vld [vmem:[#allocation2 + $0xf2] sm:$0xff]  ;;  %v4439_v16 = vld [vmem:[#allocation2 + $0xe0] sm:$0xff]  ;;  %v11370_v14 = vpack.c.bf16 %v4441_v12, %v4440_v48  ;;  %4604 = vst.msk [vmem:[#allocation3 + $0x100] sm:$0xff] %vm332_vm0, %v4588_v17  ;;  %v3999_v59 = vadd.f32 %v3998_v18, %v11312_v35  ;;  %v8934_v15 = vpop.f32.mrb[154].mxu1 }
 0x424   : > { %v3849_v53 = vadd.f32 %v8548_v3, %v3688_v52  ;;  %v4630_v26 = vld [vmem:[#allocation2 + $0xda] sm:$0xff]  ;;  %v4462_v7 = vpack.c.bf16 %v4439_v16, %v4438_v40  ;;  %v4631_v6 = vld [vmem:[#allocation2 + $0xe2] sm:$0xff]  ;;  %v4007_v27 = vadd.f32 %v8933_v60, %v3846_v54  ;;  %v4001_v54 = vpop.f32.mrb[155].mxu1  ;;  %v4758_v17 = vld [vmem:[#allocation2 + $0xf0] sm:$0xff] }
 0x425   : > { %v11377_v28 = vld [vmem:[%s13077_s2 + $0x1] ss:$0 sm:$0xff]  ;;  %v11386_v38 = vpack.c.bf16 %v4631_v6, %v4630_v26  ;;  %4224 = vst.msk [vmem:[#allocation3 + $0x190] sm:$0xff] %vm332_vm0, %v11370_v14  ;;  %v4565_v52 = vld [vmem:[#allocation2 + $0xc9] sm:$0xff]  ;;  %v4566_v22 = vld [vmem:[#allocation2 + $0xd9] sm:$0xff]  ;;  %v4002_v32 = vadd.f32 %v4001_v54, %v11325_v0 }
 0x426   : > { %v3693_v9 = vadd.f32 %v11377_v28, %v11102_v4  ;;  %v3696_v5 = vadd.f32 %v11377_v28, %v11106_v46  ;;  %v8549_v10 = vpop.f32.mrb[152].mxu0  ;;  %v4633_v61 = vld [vmem:[#allocation2 + $0xfa] sm:$0xff]  ;;  %4502 = vrot.lane.b32.xlu0 %v4462_v7, %s9455_s17  ;;  %4223 = vst.msk [vmem:[#allocation3 + $0x168] sm:$0xff] %vm332_vm0, %v4462_v7  ;;  %v4055_v29 = vmax.f32 %v4007_v27, 0.0  ;;  %v4010_v3 = vadd.f32 %v8934_v15, %v3849_v53  ;;  %v4568_v56 = vld [vmem:[#allocation2 + $0xf1] sm:$0xff]  ;;  %v4442_v16 = vld [vmem:[#allocation2 + $0x108] sm:$0xff] }
 0x427   : > { %v4564_v34 = vld [vmem:[#allocation2 + $0xc1] sm:$0xff]  ;;  %v8550_v42 = vpop.f32.mrb[153].mxu0  ;;  %v11388_v39 = vpack.c.bf16 %v4633_v61, %v4632_v62  ;;  %v4756_v4 = vld [vmem:[#allocation2 + $0xd8] sm:$0xff]  ;;  %4678 = vrot.lane.b32.xlu1 %v11174_v51, %s9455_s17  ;;  %4415 = vst.msk [vmem:[#allocation3 + $0x170] sm:$0xff] %vm332_vm0, %v11386_v38  ;;  %v4053_v51 = vmax.f32 %v3999_v59, 0.0  ;;  %v4054_v62 = vmax.f32 %v4002_v32, 0.0 }
 0x428   : > { %v4757_v46 = vld [vmem:[#allocation2 + $0xe0] sm:$0xff]  ;;  %v8551_v57 = vadd.f32 %v8550_v42, %v8549_v10  ;;  %v8552_v41 = vpop.f32.mrb[154].mxu0  ;;  %v4759_v31 = vld [vmem:[#allocation2 + $0xf8] sm:$0xff]  ;;  %v4589_v35 = vpack.c.bf16 %v4565_v52, %v4564_v34  ;;  %4160 = vst.msk [vmem:[#allocation2 + $0x151] sm:$0xff] %vm332_vm0, %v4055_v29  ;;  %v4056_v53 = vmax.f32 %v4010_v3, 0.0  ;;  %v4445_v26 = vld [vmem:[#allocation2 + $0x128] sm:$0xff] }
 0x429   : > { %v4781_v21 = vpack.c.bf16 %v4757_v46, %v4756_v4  ;;  %v4567_v36 = vld [vmem:[#allocation2 + $0xe1] sm:$0xff]  ;;  %v8553_v30 = vpop.f32.mrb[155].mxu0  ;;  %4416 = vst.msk [vmem:[#allocation3 + $0x198] sm:$0xff] %vm332_vm0, %v11388_v39  ;;  %v4569_v25 = vld [vmem:[#allocation2 + $0xf9] sm:$0xff]  ;;  %v4782_v48 = vpack.c.bf16 %v4759_v31, %v4758_v17  ;;  %4158 = vst.msk [vmem:[#allocation2 + $0x139] sm:$0xff] %vm332_vm0, %v4053_v51  ;;  %v8937_v34 = vpop.f32.mrb[156].mxu1 }
 0x42a   : > { %v4590_v2 = vpack.c.bf16 %v4567_v36, %v4566_v22  ;;  %v8554_v58 = vadd.f32 %v8553_v30, %v8552_v41  ;;  %v3854_v37 = vadd.f32 %v8551_v57, %v3693_v9  ;;  %v4444_v8 = vld [vmem:[#allocation2 + $0x120] sm:$0xff]  ;;  %4605 = vst.msk [vmem:[#allocation3 + $0x128] sm:$0xff] %vm332_vm0, %v4589_v35  ;;  %v4591_v12 = vpack.c.bf16 %v4569_v25, %v4568_v56  ;;  %v4934_v10 = vld [vmem:[#allocation2 + $0x32] sm:$0xff]  ;;  %v4634_v6 = vld [vmem:[#allocation2 + $0x10a] sm:$0xff]  ;;  %v4014_v41 = vpop.f32.mrb[157].mxu1 }
 0x42b   : > { %4797 = vst.msk [vmem:[#allocation3 + $0x130] sm:$0xff] %vm332_vm0, %v4781_v21  ;;  %4310 = vrot.lane.b32.xlu0 %v11384_v47, %s9455_s17  ;;  %4872 = vrot.lane.b32.xlu1 %v11223_v20, %s9455_s17  ;;  %v4249_v40 = vld [vmem:[#allocation2 + $0xe1] sm:$0xff]  ;;  %4161 = vst.msk [vmem:[#allocation2 + $0x159] sm:$0xff] %vm332_vm0, %v4056_v53  ;;  %v4443_v60 = vld [vmem:[#allocation2 + $0x110] sm:$0xff]  ;;  %v11412_v7 = vpack.c.bf16 %v4445_v26, %v4444_v8  ;;  %v3701_v20 = vadd.f32 %v11377_v28, %v11114_v49  ;;  %v8938_v54 = vpop.f32.mrb[158].mxu1 }
 0x42c   : > { %4606 = vst.msk [vmem:[#allocation3 + $0x150] sm:$0xff] %vm332_vm0, %v4590_v2  ;;  %v3857_v0 = vadd.f32 %v8554_v58, %v3696_v5  ;;  %v4636_v9 = vld [vmem:[#allocation2 + $0x122] sm:$0xff]  ;;  %4798 = vst.msk [vmem:[#allocation3 + $0x158] sm:$0xff] %vm332_vm0, %v4782_v48  ;;  %v4248_v27 = vld [vmem:[#allocation2 + $0xd9] sm:$0xff]  ;;  %v11419_v42 = vpack.c.bf16 %v4443_v60, %v4442_v16  ;;  %v3704_v57 = vadd.f32 %v11377_v28, %v11124_v19  ;;  %v4017_v51 = vpop.f32.mrb[159].mxu1 }
 0x42d   : > { %4607 = vst.msk [vmem:[#allocation3 + $0x178] sm:$0xff] %vm332_vm0, %v4591_v12  ;;  %v4760_v61 = vld [vmem:[#allocation2 + $0x108] sm:$0xff]  ;;  %4159 = vst.msk [vmem:[#allocation2 + $0x141] sm:$0xff] %vm332_vm0, %v4054_v62  ;;  %v4635_v18 = vld [vmem:[#allocation2 + $0x112] sm:$0xff]  ;;  %v4015_v3 = vadd.f32 %v4014_v41, %v3854_v37  ;;  %v11435_v58 = vpack.c.bf16 %v4249_v40, %v4248_v27 }
 0x42e   : > { %v8555_v5 = vpop.f32.mrb[156].mxu0  ;;  %v4637_v4 = vld [vmem:[#allocation2 + $0x12a] sm:$0xff]  ;;  %v4762_v52 = vld [vmem:[#allocation2 + $0x120] sm:$0xff]  ;;  %v11423_v15 = vpack.c.bf16 %v4635_v18, %v4634_v6  ;;  %4226 = vst.msk [vmem:[#allocation3 + $0x1e0] sm:$0xff] %vm332_vm0, %v11412_v7  ;;  %4225 = vst.msk [vmem:[#allocation3 + $0x1b8] sm:$0xff] %vm332_vm0, %v11419_v42  ;;  %v4018_v48 = vadd.f32 %v4017_v51, %v3857_v0 }
 0x42f   : > { %v4761_v46 = vld [vmem:[#allocation2 + $0x110] sm:$0xff]  ;;  %v8556_v59 = vpop.f32.mrb[157].mxu0  ;;  %v11425_v21 = vpack.c.bf16 %v4637_v4, %v4636_v9  ;;  %v4763_v31 = vld [vmem:[#allocation2 + $0x128] sm:$0xff]  ;;  %4504 = vrot.lane.b32.xlu0 %v11370_v14, %s9455_s17  ;;  %4680 = vrot.lane.b32.xlu1 %v11176_v11, %s9455_s17  ;;  %v4935_v2 = vld [vmem:[#allocation2 + $0x3a] sm:$0xff]  ;;  %v4057_v53 = vmax.f32 %v4015_v3, 0.0 }
 0x430   : > { %v4783_v49 = vpack.c.bf16 %v4761_v46, %v4760_v61  ;;  %v4570_v22 = vld [vmem:[#allocation2 + $0x109] sm:$0xff]  ;;  %v4571_v36 = vld [vmem:[#allocation2 + $0x111] sm:$0xff]  ;;  %v8557_v29 = vadd.f32 %v8556_v59, %v8555_v5  ;;  %v8558_v30 = vpop.f32.mrb[158].mxu0  ;;  %v4572_v28 = vld [vmem:[#allocation2 + $0x121] sm:$0xff]  ;;  %4417 = vst.msk [vmem:[#allocation3 + $0x1c0] sm:$0xff] %vm332_vm0, %v11423_v15  ;;  %v4784_v11 = vpack.c.bf16 %v4763_v31, %v4762_v52  ;;  %v4966_v32 = vpack.c.bf16 %v4935_v2, %v4934_v10 }
 0x431   : > { %v4592_v19 = vpack.c.bf16 %v4571_v36, %v4570_v22  ;;  %v4573_v35 = vld [vmem:[#allocation2 + $0x129] sm:$0xff]  ;;  %v8559_v25 = vpop.f32.mrb[159].mxu0  ;;  %4418 = vst.msk [vmem:[#allocation3 + $0x1e8] sm:$0xff] %vm332_vm0, %v11425_v21  ;;  %v4937_v17 = vld [vmem:[#allocation2 + $0x52] sm:$0xff]  ;;  %4162 = vst.msk [vmem:[#allocation2 + $0x169] sm:$0xff] %vm332_vm0, %v4057_v53  ;;  %v4058_v16 = vmax.f32 %v4018_v48, 0.0 }
 0x432   : > { %4799 = vst.msk [vmem:[#allocation3 + $0x180] sm:$0xff] %vm332_vm0, %v4783_v49  ;;  %v4593_v14 = vpack.c.bf16 %v4573_v35, %v4572_v28  ;;  %v4936_v37 = vld [vmem:[#allocation2 + $0x4a] sm:$0xff]  ;;  %v3862_v56 = vadd.f32 %v8557_v29, %v3701_v20  ;;  %v8560_v8 = vadd.f32 %v8559_v25, %v8558_v30  ;;  %4800 = vst.msk [vmem:[#allocation3 + $0x1a8] sm:$0xff] %vm332_vm0, %v4784_v11  ;;  %v4640_v0 = vld [vmem:[#allocation2 + $0x152] sm:$0xff] }
 0x433   : > { %4608 = vst.msk [vmem:[#allocation3 + $0x1a0] sm:$0xff] %vm332_vm0, %v4592_v19  ;;  %4982 = vst.msk [vmem:[#allocation3 + $0x20] sm:$0xff] %vm332_vm0, %v4966_v32  ;;  %v4967_v12 = vpack.c.bf16 %v4937_v17, %v4936_v37  ;;  %4312 = vrot.lane.b32.xlu0 %v11435_v58, %s9455_s17  ;;  %4874 = vrot.lane.b32.xlu1 %v11244_v43, %s9455_s17  ;;  %v4938_v26 = vld [vmem:[#allocation2 + $0x62] sm:$0xff]  ;;  %v4251_v9 = vld [vmem:[#allocation2 + $0xf9] sm:$0xff] }
 0x434   : > { %4609 = vst.msk [vmem:[#allocation3 + $0x1c8] sm:$0xff] %vm332_vm0, %v4593_v14  ;;  %v4023_v62 = vadd.f32 %v8937_v34, %v3862_v56  ;;  %v3865_v40 = vadd.f32 %v8560_v8, %v3704_v57  ;;  %v4638_v10 = vld [vmem:[#allocation2 + $0x13a] sm:$0xff]  ;;  %v4194_v6 = vld [vmem:[#allocation2 + $0x150] sm:$0xff]  ;;  %4163 = vst.msk [vmem:[#allocation2 + $0x171] sm:$0xff] %vm332_vm0, %v4058_v16 }
 0x435   : > { %v4192_v60 = vld [vmem:[#allocation2 + $0x138] sm:$0xff]  ;;  %4983 = vst.msk [vmem:[#allocation3 + $0x48] sm:$0xff] %vm332_vm0, %v4967_v12  ;;  %v4639_v5 = vld [vmem:[#allocation2 + $0x142] sm:$0xff]  ;;  %v4939_v29 = vld [vmem:[#allocation2 + $0x6a] sm:$0xff] }
 0x436   : > { %v4059_v61 = vmax.f32 %v4023_v62, 0.0  ;;  %v4026_v20 = vadd.f32 %v8938_v54, %v3865_v40  ;;  %v4641_v34 = vld [vmem:[#allocation2 + $0x15a] sm:$0xff]  ;;  %v4250_v18 = vld [vmem:[#allocation2 + $0xf1] sm:$0xff]  ;;  %v11453_v4 = vpack.c.bf16 %v4639_v5, %v4638_v10  ;;  %v4941_v54 = vld [vmem:[#allocation2 + $0x82] sm:$0xff] }
 0x437   : > { %v4193_v27 = vld [vmem:[#allocation2 + $0x140] sm:$0xff]  ;;  %v11455_v46 = vpack.c.bf16 %v4641_v34, %v4640_v0  ;;  %v4195_v52 = vld [vmem:[#allocation2 + $0x158] sm:$0xff]  ;;  %4506 = vrot.lane.b32.xlu0 %v11419_v42, %s9455_s17  ;;  %4682 = vrot.lane.b32.xlu1 %v11231_v45, %s9455_s17  ;;  %v4968_v42 = vpack.c.bf16 %v4939_v29, %v4938_v26  ;;  %v11469_v19 = vpack.c.bf16 %v4251_v9, %v4250_v18  ;;  %v4944_v2 = vld [vmem:[#allocation2 + $0xaa] sm:$0xff] }
 0x438   : > { %v4211_v43 = vpack.c.bf16 %v4193_v27, %v4192_v60  ;;  %v4574_v57 = vld [vmem:[#allocation2 + $0x139] sm:$0xff]  ;;  %v4575_v59 = vld [vmem:[#allocation2 + $0x141] sm:$0xff]  ;;  %4164 = vst.msk [vmem:[#allocation2 + $0x181] sm:$0xff] %vm332_vm0, %v4059_v61  ;;  %v4060_v41 = vmax.f32 %v4026_v20, 0.0  ;;  %v4212_v49 = vpack.c.bf16 %v4195_v52, %v4194_v6  ;;  %v4576_v36 = vld [vmem:[#allocation2 + $0x151] sm:$0xff] }
 0x439   : > { %v4594_v22 = vpack.c.bf16 %v4575_v59, %v4574_v57  ;;  %v4577_v31 = vld [vmem:[#allocation2 + $0x159] sm:$0xff]  ;;  %4419 = vst.msk [vmem:[#allocation3 + $0x210] sm:$0xff] %vm332_vm0, %v11453_v4  ;;  %4420 = vst.msk [vmem:[#allocation3 + $0x238] sm:$0xff] %vm332_vm0, %v11455_v46  ;;  %v4196_v14 = vld [vmem:[#allocation2 + $0x168] sm:$0xff] }
 0x43a   : > { %4227 = vst.msk [vmem:[#allocation3 + $0x208] sm:$0xff] %vm332_vm0, %v4211_v43  ;;  %4801 = vst.msk [vmem:[#allocation3 + $0x1d0] sm:$0xff] %vm332_vm0, %v4211_v43  ;;  %v4595_v3 = vpack.c.bf16 %v4577_v31, %v4576_v36  ;;  %v4940_v30 = vld [vmem:[#allocation2 + $0x7a] sm:$0xff]  ;;  %v4942_v45 = vld [vmem:[#allocation2 + $0x92] sm:$0xff] }
 0x43b   : > { %4165 = vst.msk [vmem:[#allocation2 + $0x189] sm:$0xff] %vm332_vm0, %v4060_v41  ;;  %4228 = vst.msk [vmem:[#allocation3 + $0x230] sm:$0xff] %vm332_vm0, %v4212_v49  ;;  %v4969_v28 = vpack.c.bf16 %v4941_v54, %v4940_v30  ;;  %v4943_v35 = vld [vmem:[#allocation2 + $0x9a] sm:$0xff]  ;;  %4314 = vrot.lane.b32.xlu0 %v11469_v19, %s9455_s17  ;;  %4876 = vrot.lane.b32.xlu1 %v11279_v55, %s9455_s17  ;;  %v4945_v51 = vld [vmem:[#allocation2 + $0xb2] sm:$0xff] }
 0x43c   : > { %4610 = vst.msk [vmem:[#allocation3 + $0x1f0] sm:$0xff] %vm332_vm0, %v4594_v22  ;;  %4802 = vst.msk [vmem:[#allocation3 + $0x1f8] sm:$0xff] %vm332_vm0, %v4212_v49  ;;  %v4970_v25 = vpack.c.bf16 %v4943_v35, %v4942_v45  ;;  %v4642_v11 = vld [vmem:[#allocation2 + $0x16a] sm:$0xff]  ;;  %v4971_v37 = vpack.c.bf16 %v4945_v51, %v4944_v2  ;;  %v4643_v17 = vld [vmem:[#allocation2 + $0x172] sm:$0xff] }
 0x43d   : > { %4611 = vst.msk [vmem:[#allocation3 + $0x218] sm:$0xff] %vm332_vm0, %v4595_v3  ;;  %4984 = vst.msk [vmem:[#allocation3 + $0x70] sm:$0xff] %vm332_vm0, %v4968_v42  ;;  %v4578_v32 = vld [vmem:[#allocation2 + $0x169] sm:$0xff]  ;;  %v4579_v53 = vld [vmem:[#allocation2 + $0x171] sm:$0xff]  ;;  %v11482_v48 = vpack.c.bf16 %v4643_v17, %v4642_v11 }
 0x43e   : > { %4985 = vst.msk [vmem:[#allocation3 + $0x98] sm:$0xff] %vm332_vm0, %v4969_v28  ;;  %4986 = vst.msk [vmem:[#allocation3 + $0xc0] sm:$0xff] %vm332_vm0, %v4970_v25  ;;  %v4197_v56 = vld [vmem:[#allocation2 + $0x170] sm:$0xff]  ;;  %v4596_v62 = vpack.c.bf16 %v4579_v53, %v4578_v32  ;;  %v4946_v55 = vld [vmem:[#allocation2 + $0xc2] sm:$0xff] }
 0x43f   : > { %v4253_v8 = vld [vmem:[#allocation2 + $0x111] sm:$0xff]  ;;  %v4213_v12 = vpack.c.bf16 %v4197_v56, %v4196_v14  ;;  %4987 = vst.msk [vmem:[#allocation3 + $0xe8] sm:$0xff] %vm332_vm0, %v4971_v37  ;;  %4508 = vrot.lane.b32.xlu0 %v11412_v7, %s9455_s17  ;;  %4684 = vrot.lane.b32.xlu1 %v11233_v23, %s9455_s17  ;;  %v4252_v16 = vld [vmem:[#allocation2 + $0x109] sm:$0xff]  ;;  %4421 = vst.msk [vmem:[#allocation3 + $0x260] sm:$0xff] %vm332_vm0, %v11482_v48 }
 0x440   : > { %v4947_v40 = vld [vmem:[#allocation2 + $0xca] sm:$0xff]  ;;  %4612 = vst.msk [vmem:[#allocation3 + $0x240] sm:$0xff] %vm332_vm0, %v4596_v62  ;;  %v4770_v0 = vld [vmem:[#allocation2 + $0x180] sm:$0xff]  ;;  %v11494_v9 = vpack.c.bf16 %v4253_v8, %v4252_v16  ;;  %v4446_v20 = vld [vmem:[#allocation2 + $0x138] sm:$0xff] }
 0x441   : > { %4229 = vst.msk [vmem:[#allocation3 + $0x258] sm:$0xff] %vm332_vm0, %v4213_v12  ;;  %4803 = vst.msk [vmem:[#allocation3 + $0x220] sm:$0xff] %vm332_vm0, %v4213_v12  ;;  %v4972_v26 = vpack.c.bf16 %v4947_v40, %v4946_v55  ;;  %v4580_v10 = vld [vmem:[#allocation2 + $0x181] sm:$0xff]  ;;  %v4950_v18 = vld [vmem:[#allocation2 + $0xf2] sm:$0xff] }
 0x442   : > { %v4771_v7 = vld [vmem:[#allocation2 + $0x188] sm:$0xff]  ;;  %v4447_v23 = vld [vmem:[#allocation2 + $0x140] sm:$0xff]  ;;  %v4953_v49 = vld [vmem:[#allocation2 + $0x112] sm:$0xff] }
 0x443   : > { %v4581_v60 = vld [vmem:[#allocation2 + $0x189] sm:$0xff]  ;;  %v4788_v6 = vpack.c.bf16 %v4771_v7, %v4770_v0  ;;  %4988 = vst.msk [vmem:[#allocation3 + $0x110] sm:$0xff] %vm332_vm0, %v4972_v26  ;;  %4316 = vrot.lane.b32.xlu0 %v11494_v9, %s9455_s17  ;;  %4878 = vrot.lane.b32.xlu1 %v11300_v63, %s9455_s17  ;;  %v4948_v5 = vld [vmem:[#allocation2 + $0xda] sm:$0xff]  ;;  %v4466_v57 = vpack.c.bf16 %v4447_v23, %v4446_v20  ;;  %v4958_v54 = vld [vmem:[#allocation2 + $0x152] sm:$0xff] }
 0x444   : > { %v4597_v61 = vpack.c.bf16 %v4581_v60, %v4580_v10  ;;  %v4949_v34 = vld [vmem:[#allocation2 + $0xe2] sm:$0xff]  ;;  %v4951_v43 = vld [vmem:[#allocation2 + $0xfa] sm:$0xff]  ;;  %v4952_v52 = vld [vmem:[#allocation2 + $0x10a] sm:$0xff] }
 0x445   : > { %4804 = vst.msk [vmem:[#allocation3 + $0x248] sm:$0xff] %vm332_vm0, %v4788_v6  ;;  %v4973_v27 = vpack.c.bf16 %v4949_v34, %v4948_v5  ;;  %v4255_v59 = vld [vmem:[#allocation2 + $0x129] sm:$0xff]  ;;  %v4974_v41 = vpack.c.bf16 %v4951_v43, %v4950_v18  ;;  %v4254_v36 = vld [vmem:[#allocation2 + $0x121] sm:$0xff]  ;;  %v4975_v63 = vpack.c.bf16 %v4953_v49, %v4952_v52  ;;  %v4961_v2 = vld [vmem:[#allocation2 + $0x172] sm:$0xff] }
 0x446   : > { %4613 = vst.msk [vmem:[#allocation3 + $0x268] sm:$0xff] %vm332_vm0, %v4597_v61  ;;  %v4954_v22 = vld [vmem:[#allocation2 + $0x122] sm:$0xff]  ;;  %v4955_v31 = vld [vmem:[#allocation2 + $0x12a] sm:$0xff]  ;;  %v4956_v29 = vld [vmem:[#allocation2 + $0x13a] sm:$0xff]  ;;  %v4274_v11 = vpack.c.bf16 %v4255_v59, %v4254_v36 }
 0x447   : > { %4989 = vst.msk [vmem:[#allocation3 + $0x138] sm:$0xff] %vm332_vm0, %v4973_v27  ;;  %v4957_v3 = vld [vmem:[#allocation2 + $0x142] sm:$0xff]  ;;  %4510 = vrot.lane.b32.xlu0 %v4466_v57, %s9455_s17  ;;  %4686 = vrot.lane.b32.xlu1 %v11287_v33, %s9455_s17  ;;  %4990 = vst.msk [vmem:[#allocation3 + $0x160] sm:$0xff] %vm332_vm0, %v4974_v41  ;;  %v4976_v42 = vpack.c.bf16 %v4955_v31, %v4954_v22  ;;  %v4959_v45 = vld [vmem:[#allocation2 + $0x15a] sm:$0xff] }
 0x448   : > { %v4977_v30 = vpack.c.bf16 %v4957_v3, %v4956_v29  ;;  %v4960_v28 = vld [vmem:[#allocation2 + $0x16a] sm:$0xff]  ;;  %4991 = vst.msk [vmem:[#allocation3 + $0x188] sm:$0xff] %vm332_vm0, %v4975_v63  ;;  %v4978_v35 = vpack.c.bf16 %v4959_v45, %v4958_v54  ;;  %v4962_v25 = vld [vmem:[#allocation2 + $0x182] sm:$0xff]  ;;  %v4449_v32 = vld [vmem:[#allocation2 + $0x158] sm:$0xff] }
 0x449   : > { %v4963_v51 = vld [vmem:[#allocation2 + $0x18a] sm:$0xff]  ;;  %4992 = vst.msk [vmem:[#allocation3 + $0x1b0] sm:$0xff] %vm332_vm0, %v4976_v42  ;;  %v4979_v14 = vpack.c.bf16 %v4961_v2, %v4960_v28  ;;  %v4257_v56 = vld [vmem:[#allocation2 + $0x141] sm:$0xff]  ;;  %v4256_v53 = vld [vmem:[#allocation2 + $0x139] sm:$0xff] }
 0x44a   : > { %4993 = vst.msk [vmem:[#allocation3 + $0x1d8] sm:$0xff] %vm332_vm0, %v4977_v30  ;;  %v4980_v33 = vpack.c.bf16 %v4963_v51, %v4962_v25  ;;  %4994 = vst.msk [vmem:[#allocation3 + $0x200] sm:$0xff] %vm332_vm0, %v4978_v35  ;;  %v4448_v37 = vld [vmem:[#allocation2 + $0x150] sm:$0xff]  ;;  %v4275_v8 = vpack.c.bf16 %v4257_v56, %v4256_v53  ;;  %v4259_v55 = vld [vmem:[#allocation2 + $0x159] sm:$0xff] }
 0x44b   : > { %4318 = vrot.lane.b32.xlu0 %v4274_v11, %s9455_s17  ;;  %4880 = vrot.lane.b32.xlu1 %v11331_v44, %s9455_s17  ;;  %4995 = vst.msk [vmem:[#allocation3 + $0x228] sm:$0xff] %vm332_vm0, %v4979_v14  ;;  %v4467_v17 = vpack.c.bf16 %v4449_v32, %v4448_v37  ;;  %v4451_v12 = vld [vmem:[#allocation2 + $0x170] sm:$0xff]  ;;  %v4450_v44 = vld [vmem:[#allocation2 + $0x168] sm:$0xff]  ;;  %v9388_v34 = vld [vmem:[%s13078_s3 + $0x100] sm:$0xff]  }
 0x44c   : > { %4996 = vst.msk [vmem:[#allocation3 + $0x250] sm:$0xff] %vm332_vm0, %v4980_v33  ;;  %v4468_v62 = vpack.c.bf16 %v4451_v12, %v4450_v44  ;;  %v4258_v40 = vld [vmem:[#allocation2 + $0x151] sm:$0xff]  ;;  %v4453_v0 = vld [vmem:[#allocation2 + $0x188] sm:$0xff]  ;;  %v4773_v63 = vld [vmem:[#allocation2 + $0x1a0] sm:$0xff] }
 0x44d   : > { %v4276_v16 = vpack.c.bf16 %v4259_v55, %v4258_v40  ;;  %v4261_v7 = vld [vmem:[#allocation2 + $0x171] sm:$0xff]  ;;  %v9190_v5 = vld [vmem:[%s13078_s3 + $0x108] sm:$0xff]  }
 0x44e   : > { %v4998_v6 = vld [vmem:[#allocation3] sm:$0xff]  ;;  %v9192_v41 = vld [vmem:[%s13078_s3 + $0x118] sm:$0xff]  }
 0x44f   : > { %4512 = vrot.lane.b32.xlu0 %v4467_v17, %s9455_s17  ;;  %4688 = vrot.lane.b32.xlu1 %v11289_v13, %s9455_s17  ;;  %v4452_v13 = vld [vmem:[#allocation2 + $0x180] sm:$0xff]  ;;  %v9191_v52 = vld [vmem:[%s13078_s3 + $0x110] sm:$0xff]   ;;  %v4772_v36 = vld [vmem:[#allocation2 + $0x198] sm:$0xff] }
 0x450   : > { %v4469_v26 = vpack.c.bf16 %v4453_v0, %v4452_v13  ;;  %v4789_v3 = vpack.c.bf16 %v4773_v63, %v4772_v36 }
 0x452   : > { %4805 = vst.msk [vmem:[#allocation3 + $0x270] sm:$0xff] %vm332_vm0, %v4789_v3 }
 0x453   : > { %4320 = vrot.lane.b32.xlu0 %v4275_v8, %s9455_s17  ;;  %4882 = vrot.lane.b32.xlu1 %v11384_v47, %s9455_s17  ;;  %v4260_v47 = vld [vmem:[#allocation2 + $0x169] sm:$0xff] }
 0x454   : > { %v4277_v10 = vpack.c.bf16 %v4261_v7, %v4260_v47 }
 0x457   : > { %4514 = vrot.lane.b32.xlu0 %v4468_v62, %s9455_s17  ;;  %4690 = vrot.lane.b32.xlu1 %v11337_v24, %s9455_s17 }
 0x45b   : > { %4322 = vrot.lane.b32.xlu0 %v4276_v16, %s9455_s17  ;;  %4884 = vrot.lane.b32.xlu1 %v11435_v58, %s9455_s17  ;;  %v4836_v58 = vld [vmem:[#allocation2 + $0x199] sm:$0xff] }
 0x45f   : > { %4516 = vrot.lane.b32.xlu0 %v4469_v26, %s9455_s17  ;;  %4692 = vrot.lane.b32.xlu1 %v11339_v50, %s9455_s17 }
 0x463   : > { %4324 = vrot.lane.b32.xlu0 %v4277_v10, %s9455_s17  ;;  %4694 = vrot.lane.b32.xlu1 %v11386_v38, %s9455_s17  ;;  %v4835_v38 = vld [vmem:[#allocation2 + $0x189] sm:$0xff] }
 0x467   : > { %4886 = vrot.lane.b32.xlu0 %v11469_v19, %s9455_s17  ;;  %4696 = vrot.lane.b32.xlu1 %v11388_v39, %s9455_s17  ;;  %v4644_v39 = vld [vmem:[#allocation2 + $0x182] sm:$0xff] }
 0x46b   : > { %4888 = vrot.lane.b32.xlu0 %v11494_v9, %s9455_s17  ;;  %4698 = vrot.lane.b32.xlu1 %v11423_v15, %s9455_s17  ;;  %v4645_v15 = vld [vmem:[#allocation2 + $0x18a] sm:$0xff] }
 0x46c   : > { %v4661_v60 = vpack.c.bf16 %v4645_v15, %v4644_v39 }
 0x46f   : > { %4890 = vrot.lane.b32.xlu0 %v4274_v11, %s9455_s17  ;;  %4700 = vrot.lane.b32.xlu1 %v11425_v21, %s9455_s17  ;;  %v4834_v21 = vld [vmem:[#allocation2 + $0x181] sm:$0xff] }
 0x473   : > { %4892 = vrot.lane.b32.xlu0 %v4275_v8, %s9455_s17  ;;  %4702 = vrot.lane.b32.xlu1 %v11453_v4, %s9455_s17  ;;  %v4487_v24 = vpop.permute.xlu0 %4486  ;;  %v4297_v50 = vpop.permute.xlu1 %4296  ;;  %v4837_v4 = vld [vmem:[#allocation2 + $0x1a1] sm:$0xff] }
 0x474   : > { %4534 = vst.msk [vmem:[#allocation3 + $0x8] sm:$0xff] %vm734_vm2, %v4487_v24  ;;  %4343 = vst.msk [vmem:[#allocation3 + $0x28] sm:$0xff] %vm734_vm2, %v4297_v50  ;;  %v4853_v23 = vpack.c.bf16 %v4837_v4, %v4836_v58 }
 0x477   : > { %4894 = vrot.lane.b32.xlu0 %v4276_v16, %s9455_s17  ;;  %4704 = vrot.lane.b32.xlu1 %v11455_v46, %s9455_s17  ;;  %v4489_v19 = vpop.permute.xlu0 %4488  ;;  %v4299_v9 = vpop.permute.xlu1 %4298  ;;  %v4852_v46 = vpack.c.bf16 %v4835_v38, %v4834_v21 }
 0x478   : > { %4535 = vst.msk [vmem:[#allocation3 + $0x30] sm:$0xff] %vm734_vm2, %v4489_v19  ;;  %4344 = vst.msk [vmem:[#allocation3 + $0x50] sm:$0xff] %vm734_vm2, %v4299_v9 }
 0x47b   : > { %4896 = vrot.lane.b32.xlu0 %v4277_v10, %s9455_s17  ;;  %4706 = vrot.lane.b32.xlu1 %v11482_v48, %s9455_s17  ;;  %v4999_v48 = vld [vmem:[#allocation3 + $0x8] sm:$0xff] }
 0x47c   : > { %5380 = vmatprep.mubr.bf16.mxu0 %v4999_v48  ;;  %v5003_v49 = vld [vmem:[#allocation3 + $0x28] sm:$0xff] }
 0x47d   : > { %5381 = vmatmul.mubr.bf16.vlgmr.msra.gmra.mrb[160].mxu0 %v4998_v6 }
 0x47e   : > { %v4301_v20 = vpop.permute.xlu1 %4300  ;;  %8940 = vmatpush3.bf16.msra.mxu0 %v9388_v34 }
 0x47f   : > { %4898 = vrot.lane.b32.xlu0 %v4852_v46, %s9455_s17  ;;  %4708 = vrot.lane.b32.xlu1 %v4661_v60, %s9455_s17  ;;  %4345 = vst.msk [vmem:[#allocation3 + $0x78] sm:$0xff] %vm734_vm2, %v4301_v20  ;;  %v5004_v43 = vld [vmem:[#allocation3 + $0x30] sm:$0xff] }
 0x480   : > { %v4491_v61 = vpop.permute.xlu0 %4490  ;;  %8941 = vmatprep.subr.bf16.mxu0 %v9190_v5  ;;  %5388 = vmatprep.mubr.bf16.mxu0 %v5004_v43  ;;  %v5008_v54 = vld [vmem:[#allocation3 + $0x50] sm:$0xff] }
 0x481   : > { %4536 = vst.msk [vmem:[#allocation3 + $0x58] sm:$0xff] %vm734_vm2, %v4491_v61 }
 0x482   : > { %v4303_v18 = vpop.permute.xlu1 %4302  ;;  %8942 = vmatpush3.bf16.msra.mxu0 %v9190_v5 }
 0x483   : > { %4900 = vrot.lane.b32.xlu0 %v4853_v23, %s9455_s17  ;;  %4346 = vst.msk [vmem:[#allocation3 + $0xa0] sm:$0xff] %vm734_vm2, %v4303_v18  ;;  %8943 = vmatprep.subr.bf16.mxu0 %v9191_v52 }
 0x484   : > { %v4493_v27 = vpop.permute.xlu0 %4492 }
 0x485   : > { %4537 = vst.msk [vmem:[#allocation3 + $0x80] sm:$0xff] %vm734_vm2, %v4493_v27  ;;  %5389 = vmatmul.mubr.bf16.gmra.mrb[164].mxu0 %v5003_v49 }
 0x486   : > { %8944 = vmatpush3.bf16.msra.mxu0 %v9191_v52  ;;  %v5013_v51 = vld [vmem:[#allocation3 + $0x78] sm:$0xff] }
 0x487   : > { %v4305_v59 = vpop.permute.xlu1 %4304  ;;  %8945 = vmatprep.subr.bf16.mxu0 %v9192_v41 }
 0x488   : > { %v4495_v57 = vpop.permute.xlu0 %4494  ;;  %4347 = vst.msk [vmem:[#allocation3 + $0xc8] sm:$0xff] %vm734_vm2, %v4305_v59  ;;  %v5009_v22 = vld [vmem:[#allocation3 + $0x58] sm:$0xff] }
 0x489   : > { %4538 = vst.msk [vmem:[#allocation3 + $0xa8] sm:$0xff] %vm734_vm2, %v4495_v57  ;;  %5396 = vmatprep.mubr.bf16.mxu0 %v5009_v22 }
 0x48a   : > { %8946 = vmatpush3.bf16.msra.mxu0 %v9192_v41  ;;  %v5018_v53 = vld [vmem:[#allocation3 + $0xa0] sm:$0xff] }
 0x48b   : > { %v4307_v29 = vpop.permute.xlu1 %4306 }
 0x48c   : > { %v4497_v31 = vpop.permute.xlu0 %4496  ;;  %4348 = vst.msk [vmem:[#allocation3 + $0xf0] sm:$0xff] %vm734_vm2, %v4307_v29  ;;  %v5014_v45 = vld [vmem:[#allocation3 + $0x80] sm:$0xff] }
 0x48d   : > { %4539 = vst.msk [vmem:[#allocation3 + $0xd0] sm:$0xff] %vm734_vm2, %v4497_v31  ;;  %5397 = vmatmul.mubr.bf16.gmra.mrb[168].mxu0 %v5008_v54 }
 0x48e   : > { %5404 = vmatprep.mubr.bf16.mxu0 %v5014_v45 }
 0x48f   : > { %v5023_v0 = vld [vmem:[#allocation3 + $0xc8] sm:$0xff] }
 0x490   : > { %v4499_v42 = vpop.permute.xlu0 %4498  ;;  %v5019_v11 = vld [vmem:[#allocation3 + $0xa8] sm:$0xff] }
 0x491   : > { %v4309_v30 = vpop.permute.xlu1 %4308  ;;  %4540 = vst.msk [vmem:[#allocation3 + $0xf8] sm:$0xff] %vm734_vm2, %v4499_v42 }
 0x492   : > { %4349 = vst.msk [vmem:[#allocation3 + $0x118] sm:$0xff] %vm734_vm2, %v4309_v30 }
 0x493   : > { %v5028_v38 = vld [vmem:[#allocation3 + $0xf0] sm:$0xff] }
 0x494   : > { %v4501_v28 = vpop.permute.xlu0 %4500  ;;  %v5024_v8 = vld [vmem:[#allocation3 + $0xd0] sm:$0xff] }
 0x495   : > { %v4871_v35 = vpop.permute.xlu1 %4870  ;;  %4541 = vst.msk [vmem:[#allocation3 + $0x120] sm:$0xff] %vm734_vm2, %v4501_v28  ;;  %5405 = vmatmul.mubr.bf16.gmra.mrb[172].mxu0 %v5013_v51 }
 0x496   : > { %4918 = vst.msk [vmem:[#allocation3 + $0x18] sm:$0xff] %vm734_vm2, %v4871_v35  ;;  %5412 = vmatprep.mubr.bf16.mxu0 %v5019_v11 }
 0x498   : > { %v4503_v2 = vpop.permute.xlu0 %4502  ;;  %v5029_v13 = vld [vmem:[#allocation3 + $0xf8] sm:$0xff] }
 0x499   : > { %v4679_v25 = vpop.permute.xlu1 %4678  ;;  %4542 = vst.msk [vmem:[#allocation3 + $0x148] sm:$0xff] %vm734_vm2, %v4503_v2  ;;  %v5033_v46 = vld [vmem:[#allocation3 + $0x118] sm:$0xff] }
 0x49a   : > { %4726 = vst.msk [vmem:[#allocation3 + $0x10] sm:$0xff] %vm734_vm2, %v4679_v25 }
 0x49c   : > { %v5034_v39 = vld [vmem:[#allocation3 + $0x120] sm:$0xff] }
 0x49d   : > { %v4311_v14 = vpop.permute.xlu0 %4310  ;;  %v4873_v33 = vpop.permute.xlu1 %4872  ;;  %v5001_v32 = vld [vmem:[#allocation3 + $0x18] sm:$0xff]  ;;  %5413 = vmatmul.mubr.bf16.gmra.mrb[176].mxu0 %v5018_v53 }
 0x49e   : > { %4350 = vst.msk [vmem:[#allocation3 + $0x140] sm:$0xff] %vm734_vm2, %v4311_v14  ;;  %4919 = vst.msk [vmem:[#allocation3 + $0x40] sm:$0xff] %vm734_vm2, %v4873_v33  ;;  %5541 = vmatprep.mubr.bf16.mxu1 %v5001_v32  ;;  %5420 = vmatprep.mubr.bf16.mxu0 %v5024_v8 }
 0x4a0   : > { %v5039_v60 = vld [vmem:[#allocation3 + $0x148] sm:$0xff] }
 0x4a1   : > { %v4505_v37 = vpop.permute.xlu0 %4504  ;;  %v4681_v17 = vpop.permute.xlu1 %4680  ;;  %v5000_v56 = vld [vmem:[#allocation3 + $0x10] sm:$0xff] }
 0x4a2   : > { %4543 = vst.msk [vmem:[#allocation3 + $0x170] sm:$0xff] %vm734_vm2, %v4505_v37  ;;  %4727 = vst.msk [vmem:[#allocation3 + $0x38] sm:$0xff] %vm734_vm2, %v4681_v17  ;;  %5542 = vmatmul.mubr.bf16.vlgmr.msra.gmra.mrb[160].mxu1 %v5000_v56 }
 0x4a5   : > { %v4313_v12 = vpop.permute.xlu0 %4312  ;;  %v4875_v44 = vpop.permute.xlu1 %4874  ;;  %v5006_v62 = vld [vmem:[#allocation3 + $0x40] sm:$0xff]  ;;  %5421 = vmatmul.mubr.bf16.gmra.mrb[180].mxu0 %v5023_v0 }
 0x4a6   : > { %4351 = vst.msk [vmem:[#allocation3 + $0x168] sm:$0xff] %vm734_vm2, %v4313_v12  ;;  %4920 = vst.msk [vmem:[#allocation3 + $0x68] sm:$0xff] %vm734_vm2, %v4875_v44  ;;  %5549 = vmatprep.mubr.bf16.mxu1 %v5006_v62  ;;  %5428 = vmatprep.mubr.bf16.mxu0 %v5029_v13  ;;  %v5038_v34 = vld [vmem:[#allocation3 + $0x140] sm:$0xff]  ;;  %v7941_v44 = vld [vmem:[%s13081_s6] ss:$0 sm:$0xff] }
 0x4a7   : > { %6415 = vrot.lane.b32.xlu0 %v7941_v44, %s9456_s24  ;;  %s12535_s24 = scalar_lea.vmem [#allocation4], %s7706_s22 }
 0x4a8   : > { %s7640_s25 = sshll.u32 %s12535_s24, 4  ;;  %s13026_s25 = int_to_ptr.vmem [resolvable:$true] %s7640_s25 }
 0x4a9   : > { %v4507_v55 = vpop.permute.xlu0 %4506  ;;  %v4683_v40 = vpop.permute.xlu1 %4682  ;;  %v5005_v16 = vld [vmem:[#allocation3 + $0x38] sm:$0xff]  ;;  %v5044_v27 = vld [vmem:[#allocation3 + $0x170] sm:$0xff]  ;;  %s9390_s17 = scalar_lea.vmem %s13026_s25, 4096 }
 0x4aa   : > { %4544 = vst.msk [vmem:[#allocation3 + $0x198] sm:$0xff] %vm734_vm2, %v4507_v55  ;;  %4728 = vst.msk [vmem:[#allocation3 + $0x60] sm:$0xff] %vm734_vm2, %v4683_v40  ;;  %5550 = vmatmul.mubr.bf16.gmra.mrb[164].mxu1 %v5005_v16  ;;  %p9391_p11 = scmp.ne.s32.totalorder %s13026_s25, %s9390_s17 }
 0x4ac   : > { %p9392_p12 = pnand %p9391_p11, %p9552_p5 }
 0x4ad   : > { %v4315_v26 = vpop.permute.xlu0 %4314  ;;  %v4877_v7 = vpop.permute.xlu1 %4876  ;;  %v5011_v47 = vld [vmem:[#allocation3 + $0x68] sm:$0xff]  ;;  %5429 = vmatmul.mubr.bf16.gmra.mrb[184].mxu0 %v5028_v38 }
 0x4ae   : > { %4352 = vst.msk [vmem:[#allocation3 + $0x190] sm:$0xff] %vm734_vm2, %v4315_v26  ;;  %4921 = vst.msk [vmem:[#allocation3 + $0x90] sm:$0xff] %vm734_vm2, %v4877_v7  ;;  %5557 = vmatprep.mubr.bf16.mxu1 %v5011_v47  ;;  %5436 = vmatprep.mubr.bf16.mxu0 %v5034_v39  ;;  %v5043_v49 = vld [vmem:[#allocation3 + $0x168] sm:$0xff]  ;;  %p9393_p13 = pneg %p9392_p12 }
 0x4b1   : > { %v4509_v10 = vpop.permute.xlu0 %4508  ;;  %v4685_v24 = vpop.permute.xlu1 %4684  ;;  %v5010_v50 = vld [vmem:[#allocation3 + $0x60] sm:$0xff]  ;;  %v5049_v22 = vld [vmem:[#allocation3 + $0x198] sm:$0xff] }
 0x4b2   : > { %4545 = vst.msk [vmem:[#allocation3 + $0x1c0] sm:$0xff] %vm734_vm2, %v4509_v10  ;;  %4729 = vst.msk [vmem:[#allocation3 + $0x88] sm:$0xff] %vm734_vm2, %v4685_v24  ;;  %5558 = vmatmul.mubr.bf16.gmra.mrb[168].mxu1 %v5010_v50 }
 0x4b5   : > { %v4317_v15 = vpop.permute.xlu0 %4316  ;;  %v4879_v21 = vpop.permute.xlu1 %4878  ;;  %v5016_v58 = vld [vmem:[#allocation3 + $0x90] sm:$0xff]  ;;  %5437 = vmatmul.mubr.bf16.gmra.mrb[188].mxu0 %v5033_v46 }
 0x4b6   : > { %4353 = vst.msk [vmem:[#allocation3 + $0x1b8] sm:$0xff] %vm734_vm2, %v4317_v15  ;;  %4922 = vst.msk [vmem:[#allocation3 + $0xb8] sm:$0xff] %vm734_vm2, %v4879_v21  ;;  %5565 = vmatprep.mubr.bf16.mxu1 %v5016_v58  ;;  %5444 = vmatprep.mubr.bf16.mxu0 %v5039_v60  ;;  %v5048_v30 = vld [vmem:[#allocation3 + $0x190] sm:$0xff]  ;;  %v5002_v60 = vld [vmem:[#allocation3 + $0x20] sm:$0xff] }
 0x4b9   : > { %v4511_v4 = vpop.permute.xlu0 %4510  ;;  %v4687_v19 = vpop.permute.xlu1 %4686  ;;  %v5015_v9 = vld [vmem:[#allocation3 + $0x88] sm:$0xff]  ;;  %v5054_v54 = vld [vmem:[#allocation3 + $0x1c0] sm:$0xff] }
 0x4ba   : > { %4546 = vst.msk [vmem:[#allocation3 + $0x1e8] sm:$0xff] %vm734_vm2, %v4511_v4  ;;  %4730 = vst.msk [vmem:[#allocation3 + $0xb0] sm:$0xff] %vm734_vm2, %v4687_v19  ;;  %5566 = vmatmul.mubr.bf16.gmra.mrb[172].mxu1 %v5015_v9 }
 0x4bd   : > { %v4319_v23 = vpop.permute.xlu0 %4318  ;;  %v4881_v6 = vpop.permute.xlu1 %4880  ;;  %v5021_v61 = vld [vmem:[#allocation3 + $0xb8] sm:$0xff]  ;;  %5445 = vmatmul.mubr.bf16.gmra.mrb[192].mxu0 %v5038_v34 }
 0x4be   : > { %4354 = vst.msk [vmem:[#allocation3 + $0x1e0] sm:$0xff] %vm734_vm2, %v4319_v23  ;;  %4923 = vst.msk [vmem:[#allocation3 + $0xe0] sm:$0xff] %vm734_vm2, %v4881_v6  ;;  %5573 = vmatprep.mubr.bf16.mxu1 %v5021_v61  ;;  %5452 = vmatprep.mubr.bf16.mxu0 %v5044_v27  ;;  %v5053_v11 = vld [vmem:[#allocation3 + $0x1b8] sm:$0xff]  ;;  %v5007_v6 = vld [vmem:[#allocation3 + $0x48] sm:$0xff] }
 0x4bf   : > { %v5022_v27 = vld [vmem:[#allocation3 + $0xc0] sm:$0xff] }
 0x4c1   : > { %v4513_v20 = vpop.permute.xlu0 %4512  ;;  %v4689_v48 = vpop.permute.xlu1 %4688  ;;  %v5020_v5 = vld [vmem:[#allocation3 + $0xb0] sm:$0xff]  ;;  %v5059_v14 = vld [vmem:[#allocation3 + $0x1e8] sm:$0xff] }
 0x4c2   : > { %4547 = vst.msk [vmem:[#allocation3 + $0x210] sm:$0xff] %vm734_vm2, %v4513_v20  ;;  %4731 = vst.msk [vmem:[#allocation3 + $0xd8] sm:$0xff] %vm734_vm2, %v4689_v48  ;;  %5574 = vmatmul.mubr.bf16.gmra.mrb[176].mxu1 %v5020_v5  ;;  %v5012_v20 = vld [vmem:[#allocation3 + $0x70] sm:$0xff]  ;;  %v5017_v5 = vld [vmem:[#allocation3 + $0x98] sm:$0xff] }
 0x4c5   : > { %v4321_v18 = vpop.permute.xlu0 %4320  ;;  %v4883_v43 = vpop.permute.xlu1 %4882  ;;  %v5026_v52 = vld [vmem:[#allocation3 + $0xe0] sm:$0xff]  ;;  %5453 = vmatmul.mubr.bf16.gmra.mrb[196].mxu0 %v5043_v49 }
 0x4c6   : > { %4355 = vst.msk [vmem:[#allocation3 + $0x208] sm:$0xff] %vm734_vm2, %v4321_v18  ;;  %4924 = vst.msk [vmem:[#allocation3 + $0x108] sm:$0xff] %vm734_vm2, %v4883_v43  ;;  %5581 = vmatprep.mubr.bf16.mxu1 %v5026_v52  ;;  %5460 = vmatprep.mubr.bf16.mxu0 %v5049_v22  ;;  %v5058_v53 = vld [vmem:[#allocation3 + $0x1e0] sm:$0xff]  ;;  %v5027_v52 = vld [vmem:[#allocation3 + $0xe8] sm:$0xff] }
 0x4c7   : > { %v5042_v49 = vld [vmem:[#allocation3 + $0x160] sm:$0xff]  ;;  %v5047_v22 = vld [vmem:[#allocation3 + $0x188] sm:$0xff] }
 0x4c9   : > { %v4515_v57 = vpop.permute.xlu0 %4514  ;;  %v4691_v59 = vpop.permute.xlu1 %4690  ;;  %v5025_v41 = vld [vmem:[#allocation3 + $0xd8] sm:$0xff]  ;;  %v5064_v12 = vld [vmem:[#allocation3 + $0x210] sm:$0xff] }
 0x4ca   : > { %4548 = vst.msk [vmem:[#allocation3 + $0x238] sm:$0xff] %vm734_vm2, %v4515_v57  ;;  %4732 = vst.msk [vmem:[#allocation3 + $0x100] sm:$0xff] %vm734_vm2, %v4691_v59  ;;  %5582 = vmatmul.mubr.bf16.gmra.mrb[180].mxu1 %v5025_v41  ;;  %v5032_v57 = vld [vmem:[#allocation3 + $0x110] sm:$0xff]  ;;  %v5037_v41 = vld [vmem:[#allocation3 + $0x138] sm:$0xff] }
 0x4cd   : > { %v4323_v36 = vpop.permute.xlu0 %4322  ;;  %v4885_v63 = vpop.permute.xlu1 %4884  ;;  %v5031_v31 = vld [vmem:[#allocation3 + $0x108] sm:$0xff]  ;;  %5461 = vmatmul.mubr.bf16.gmra.mrb[200].mxu0 %v5048_v30 }
 0x4ce   : > { %4356 = vst.msk [vmem:[#allocation3 + $0x230] sm:$0xff] %vm734_vm2, %v4323_v36  ;;  %4925 = vst.msk [vmem:[#allocation3 + $0x130] sm:$0xff] %vm734_vm2, %v4885_v63  ;;  %5589 = vmatprep.mubr.bf16.mxu1 %v5031_v31  ;;  %5468 = vmatprep.mubr.bf16.mxu0 %v5054_v54  ;;  %v5063_v13 = vld [vmem:[#allocation3 + $0x208] sm:$0xff]  ;;  %v5052_v36 = vld [vmem:[#allocation3 + $0x1b0] sm:$0xff] }
 0x4cf   : > { %v5057_v63 = vld [vmem:[#allocation3 + $0x1d8] sm:$0xff]  ;;  %v5062_v31 = vld [vmem:[#allocation3 + $0x200] sm:$0xff] }
 0x4d1   : > { %v4517_v29 = vpop.permute.xlu0 %4516  ;;  %v4693_v3 = vpop.permute.xlu1 %4692  ;;  %v5030_v42 = vld [vmem:[#allocation3 + $0x100] sm:$0xff]  ;;  %v5069_v7 = vld [vmem:[#allocation3 + $0x238] sm:$0xff] }
 0x4d2   : > { %4549 = vst.msk [vmem:[#allocation3 + $0x260] sm:$0xff] %vm734_vm2, %v4517_v29  ;;  %4733 = vst.msk [vmem:[#allocation3 + $0x128] sm:$0xff] %vm734_vm2, %v4693_v3  ;;  %5590 = vmatmul.mubr.bf16.gmra.mrb[184].mxu1 %v5030_v42  ;;  %v5067_v29 = vld [vmem:[#allocation3 + $0x228] sm:$0xff]  ;;  %v5072_v3 = vld [vmem:[#allocation3 + $0x250] sm:$0xff] }
 0x4d3   : > { %v5077_v42 = vld [vmem:[#allocation3 + $0x278] sm:$0xff] }
 0x4d5   : > { %v4325_v45 = vpop.permute.xlu0 %4324  ;;  %v4695_v28 = vpop.permute.xlu1 %4694  ;;  %v5036_v35 = vld [vmem:[#allocation3 + $0x130] sm:$0xff]  ;;  %5469 = vmatmul.mubr.bf16.gmra.mrb[204].mxu0 %v5053_v11 }
 0x4d6   : > { %4357 = vst.msk [vmem:[#allocation3 + $0x258] sm:$0xff] %vm734_vm2, %v4325_v45  ;;  %4734 = vst.msk [vmem:[#allocation3 + $0x150] sm:$0xff] %vm734_vm2, %v4695_v28  ;;  %5597 = vmatprep.mubr.bf16.mxu1 %v5036_v35  ;;  %5476 = vmatprep.mubr.bf16.mxu0 %v5059_v14  ;;  %v5068_v39 = vld [vmem:[#allocation3 + $0x230] sm:$0xff] }
 0x4d9   : > { %v4887_v2 = vpop.permute.xlu0 %4886  ;;  %v4697_v25 = vpop.permute.xlu1 %4696  ;;  %v5035_v51 = vld [vmem:[#allocation3 + $0x128] sm:$0xff]  ;;  %v5074_v21 = vld [vmem:[#allocation3 + $0x260] sm:$0xff] }
 0x4da   : > { %4926 = vst.msk [vmem:[#allocation3 + $0x158] sm:$0xff] %vm734_vm2, %v4887_v2  ;;  %4735 = vst.msk [vmem:[#allocation3 + $0x178] sm:$0xff] %vm734_vm2, %v4697_v25  ;;  %5598 = vmatmul.mubr.bf16.gmra.mrb[188].mxu1 %v5035_v51 }
 0x4dd   : > { %v4889_v33 = vpop.permute.xlu0 %4888  ;;  %v4699_v32 = vpop.permute.xlu1 %4698  ;;  %v5040_v8 = vld [vmem:[#allocation3 + $0x150] sm:$0xff]  ;;  %5477 = vmatmul.mubr.bf16.gmra.mrb[208].mxu0 %v5058_v53  ;;  %v5073_v19 = vld [vmem:[#allocation3 + $0x258] sm:$0xff] }
 0x4de   : > { %4927 = vst.msk [vmem:[#allocation3 + $0x180] sm:$0xff] %vm734_vm2, %v4889_v33  ;;  %4736 = vst.msk [vmem:[#allocation3 + $0x1a0] sm:$0xff] %vm734_vm2, %v4699_v32  ;;  %5484 = vmatprep.mubr.bf16.mxu0 %v5064_v12 }
 0x4e1   : > { %v4891_v37 = vpop.permute.xlu0 %4890  ;;  %v4701_v17 = vpop.permute.xlu1 %4700  ;;  %v5041_v56 = vld [vmem:[#allocation3 + $0x158] sm:$0xff] }
 0x4e2   : > { %4928 = vst.msk [vmem:[#allocation3 + $0x1a8] sm:$0xff] %vm734_vm2, %v4891_v37  ;;  %4737 = vst.msk [vmem:[#allocation3 + $0x1c8] sm:$0xff] %vm734_vm2, %v4701_v17  ;;  %5605 = vmatprep.mubr.bf16.mxu1 %v5041_v56  ;;  %v5045_v26 = vld [vmem:[#allocation3 + $0x178] sm:$0xff] }
 0x4e3   : > { %5606 = vmatmul.mubr.bf16.gmra.mrb[192].mxu1 %v5040_v8 }
 0x4e5   : > { %v4893_v62 = vpop.permute.xlu0 %4892  ;;  %v4703_v55 = vpop.permute.xlu1 %4702  ;;  %v5046_v40 = vld [vmem:[#allocation3 + $0x180] sm:$0xff]  ;;  %5485 = vmatmul.mubr.bf16.gmra.mrb[212].mxu0 %v5063_v13  ;;  %v11656_v13 = vld [vmem:[%s13079_s4] ss:$0 sm:$0xff] }
 0x4e6   : > { %4929 = vst.msk [vmem:[#allocation3 + $0x1d0] sm:$0xff] %vm734_vm2, %v4893_v62  ;;  %4738 = vst.msk [vmem:[#allocation3 + $0x1f0] sm:$0xff] %vm734_vm2, %v4703_v55  ;;  %5613 = vmatprep.mubr.bf16.mxu1 %v5046_v40  ;;  %5492 = vmatprep.mubr.bf16.mxu0 %v5069_v7  ;;  %v5050_v15 = vld [vmem:[#allocation3 + $0x1a0] sm:$0xff] }
 0x4e9   : > { %v4895_v16 = vpop.permute.xlu0 %4894  ;;  %v4705_v0 = vpop.permute.xlu1 %4704  ;;  %v5051_v47 = vld [vmem:[#allocation3 + $0x1a8] sm:$0xff] }
 0x4ea   : > { %4930 = vst.msk [vmem:[#allocation3 + $0x1f8] sm:$0xff] %vm734_vm2, %v4895_v16  ;;  %4739 = vst.msk [vmem:[#allocation3 + $0x218] sm:$0xff] %vm734_vm2, %v4705_v0  ;;  %v5055_v9 = vld [vmem:[#allocation3 + $0x1c8] sm:$0xff] }
 0x4eb   : > { %5614 = vmatmul.mubr.bf16.gmra.mrb[196].mxu1 %v5045_v26 }
 0x4ec   : > { %5621 = vmatprep.mubr.bf16.mxu1 %v5051_v47 }
 0x4ed   : > { %v4897_v10 = vpop.permute.xlu0 %4896  ;;  %v4707_v24 = vpop.permute.xlu1 %4706  ;;  %5493 = vmatmul.mubr.bf16.gmra.mrb[216].mxu0 %v5068_v39  ;;  %v5056_v58 = vld [vmem:[#allocation3 + $0x1d0] sm:$0xff] }
 0x4ee   : > { %4931 = vst.msk [vmem:[#allocation3 + $0x220] sm:$0xff] %vm734_vm2, %v4897_v10  ;;  %4740 = vst.msk [vmem:[#allocation3 + $0x240] sm:$0xff] %vm734_vm2, %v4707_v24  ;;  %5500 = vmatprep.mubr.bf16.mxu0 %v5074_v21  ;;  %v5060_v23 = vld [vmem:[#allocation3 + $0x1f0] sm:$0xff] }
 0x4f1   : > { %v4899_v50 = vpop.permute.xlu0 %4898  ;;  %v4709_v38 = vpop.permute.xlu1 %4708  ;;  %v5061_v46 = vld [vmem:[#allocation3 + $0x1f8] sm:$0xff] }
 0x4f2   : > { %4932 = vst.msk [vmem:[#allocation3 + $0x248] sm:$0xff] %vm734_vm2, %v4899_v50  ;;  %4741 = vst.msk [vmem:[#allocation3 + $0x268] sm:$0xff] %vm734_vm2, %v4709_v38  ;;  %v5065_v48 = vld [vmem:[#allocation3 + $0x218] sm:$0xff] }
 0x4f3   : > { %5622 = vmatmul.mubr.bf16.gmra.mrb[200].mxu1 %v5050_v15 }
 0x4f4   : > { %5629 = vmatprep.mubr.bf16.mxu1 %v5056_v58 }
 0x4f5   : > { %v4901_v4 = vpop.permute.xlu0 %4900  ;;  %5501 = vmatmul.mubr.bf16.gmra.mrb[220].mxu0 %v5073_v19  ;;  %v5066_v61 = vld [vmem:[#allocation3 + $0x220] sm:$0xff] }
 0x4f6   : > { %4933 = vst.msk [vmem:[#allocation3 + $0x270] sm:$0xff] %vm734_vm2, %v4901_v4  ;;  %8947 = vmatprep.mubr.msk.bf16.mxu0 %vm332_vm0, %v5002_v60  ;;  %v5070_v43 = vld [vmem:[#allocation3 + $0x240] sm:$0xff] }
 0x4f9   : > { %v5071_v34 = vld [vmem:[#allocation3 + $0x248] sm:$0xff] }
 0x4fa   : > { %v5075_v59 = vld [vmem:[#allocation3 + $0x268] sm:$0xff] }
 0x4fb   : > { %5630 = vmatmul.mubr.bf16.gmra.mrb[204].mxu1 %v5055_v9 }
 0x4fc   : > { %5637 = vmatprep.mubr.bf16.mxu1 %v5061_v46 }
 0x4fd   : > { %8948 = vmatmul.mubr.msk.bf16.vlgmr.msra.gmra.mrb[224].mxu0 %vm332_vm0, %v5007_v6  ;;  %v5076_v18 = vld [vmem:[#allocation3 + $0x270] sm:$0xff] }
 0x4fe   : > { %8951 = vmatprep.mubr.msk.bf16.mxu0 %vm332_vm0, %v5012_v20 }
 0x503   : > { %5638 = vmatmul.mubr.bf16.gmra.mrb[208].mxu1 %v5060_v23 }
 0x504   : > { %5645 = vmatprep.mubr.bf16.mxu1 %v5066_v61 }
 0x505   : > { %8952 = vmatmul.mubr.msk.bf16.gmra.mrb[228].mxu0 %vm332_vm0, %v5017_v5 }
 0x506   : > { %8955 = vmatprep.mubr.msk.bf16.mxu0 %vm332_vm0, %v5022_v27 }
 0x50b   : > { %5646 = vmatmul.mubr.bf16.gmra.mrb[212].mxu1 %v5065_v48 }
 0x50c   : > { %5653 = vmatprep.mubr.bf16.mxu1 %v5071_v34 }
 0x50d   : > { %8956 = vmatmul.mubr.msk.bf16.gmra.mrb[232].mxu0 %vm332_vm0, %v5027_v52 }
 0x50e   : > { %8959 = vmatprep.mubr.msk.bf16.mxu0 %vm332_vm0, %v5032_v57 }
 0x513   : > { %5654 = vmatmul.mubr.bf16.gmra.mrb[216].mxu1 %v5070_v43 }
 0x514   : > { %5661 = vmatprep.mubr.bf16.mxu1 %v5076_v18 }
 0x515   : > { %8960 = vmatmul.mubr.msk.bf16.gmra.mrb[236].mxu0 %vm332_vm0, %v5037_v41 }
 0x516   : > { %8963 = vmatprep.mubr.msk.bf16.mxu0 %vm332_vm0, %v5042_v49 }
 0x51b   : > { %5662 = vmatmul.mubr.bf16.gmra.mrb[220].mxu1 %v5075_v59 }
 0x51d   : > { %8964 = vmatmul.mubr.msk.bf16.gmra.mrb[240].mxu0 %vm332_vm0, %v5047_v22 }
 0x51e   : > { %8967 = vmatprep.mubr.msk.bf16.mxu0 %vm332_vm0, %v5052_v36 }
 0x525   : > { %8968 = vmatmul.mubr.msk.bf16.gmra.mrb[244].mxu0 %vm332_vm0, %v5057_v63 }
 0x526   : > { %8971 = vmatprep.mubr.msk.bf16.mxu0 %vm332_vm0, %v5062_v31 }
 0x52d   : > { %8972 = vmatmul.mubr.msk.bf16.gmra.mrb[248].mxu0 %vm332_vm0, %v5067_v29 }
 0x52e   : > { %8975 = vmatprep.mubr.msk.bf16.mxu0 %vm332_vm0, %v5072_v3 }
 0x535   : > { %8976 = vmatmul.mubr.msk.bf16.gmra.mrb[252].mxu0 %vm332_vm0, %v5077_v42 }
 0x550   : > { %v8597_v30 = vpop.f32.mrb[160].mxu0 }
 0x551   : > { %v8598_v54 = vpop.f32.mrb[161].mxu0 }
 0x552   : > { %v8599_v45 = vadd.f32 %v8598_v54, %v8597_v30  ;;  %v8600_v28 = vpop.f32.mrb[162].mxu0 }
 0x553   : > { %v8601_v35 = vpop.f32.mrb[163].mxu0 }
 0x554   : > { %v8602_v2 = vadd.f32 %v8601_v35, %v8600_v28  ;;  %v5383_v10 = vadd.f32 %v8599_v45, %v11656_v13 }
 0x556   : > { %v5386_v58 = vadd.f32 %v8602_v2, %v11656_v13 }
 0x558   : > { %v8603_v25 = vpop.f32.mrb[164].mxu0 }
 0x559   : > { %v8604_v51 = vpop.f32.mrb[165].mxu0 }
 0x55a   : > { %v8605_v11 = vadd.f32 %v8604_v51, %v8603_v25  ;;  %v8606_v14 = vpop.f32.mrb[166].mxu0 }
 0x55b   : > { %v8607_v33 = vpop.f32.mrb[167].mxu0 }
 0x55c   : > { %v8608_v32 = vadd.f32 %v8607_v33, %v8606_v14  ;;  %v5391_v20 = vadd.f32 %v8605_v11, %v11656_v13 }
 0x55e   : > { %v5394_v52 = vadd.f32 %v8608_v32, %v11656_v13 }
 0x560   : > { %v8609_v37 = vpop.f32.mrb[168].mxu0 }
 0x561   : > { %v8610_v17 = vpop.f32.mrb[169].mxu0 }
 0x562   : > { %v8611_v56 = vadd.f32 %v8610_v17, %v8609_v37  ;;  %v8612_v53 = vpop.f32.mrb[170].mxu0 }
 0x563   : > { %v8613_v8 = vpop.f32.mrb[171].mxu0 }
 0x564   : > { %v8614_v12 = vadd.f32 %v8613_v8, %v8612_v53  ;;  %v5399_v29 = vadd.f32 %v8611_v56, %v11656_v13 }
 0x566   : > { %v5402_v35 = vadd.f32 %v8614_v12, %v11656_v13 }
 0x568   : > { %v8615_v44 = vpop.f32.mrb[172].mxu0 }
 0x569   : > { %v8616_v62 = vpop.f32.mrb[173].mxu0 }
 0x56a   : > { %v8617_v55 = vadd.f32 %v8616_v62, %v8615_v44  ;;  %v8618_v40 = vpop.f32.mrb[174].mxu0 }
 0x56b   : > { %v8619_v16 = vpop.f32.mrb[175].mxu0 }
 0x56c   : > { %v8620_v0 = vadd.f32 %v8619_v16, %v8618_v40  ;;  %v5407_v17 = vadd.f32 %v8617_v55, %v11656_v13 }
 0x56e   : > { %v5410_v40 = vadd.f32 %v8620_v0, %v11656_v13 }
 0x570   : > { %v8621_v7 = vpop.f32.mrb[176].mxu0 }
 0x571   : > { %v8622_v50 = vpop.f32.mrb[177].mxu0 }
 0x572   : > { %v8623_v39 = vadd.f32 %v8622_v50, %v8621_v7  ;;  %v8624_v15 = vpop.f32.mrb[178].mxu0 }
 0x573   : > { %v8625_v19 = vpop.f32.mrb[179].mxu0 }
 0x574   : > { %v8626_v46 = vadd.f32 %v8625_v19, %v8624_v15 }
 0x575   : > { %v8709_v26 = vpop.f32.mrb[160].mxu1 }
 0x576   : > { %v8710_v47 = vpop.f32.mrb[161].mxu1 }
 0x577   : > { %v8711_v24 = vadd.f32 %v8710_v47, %v8709_v26  ;;  %v8712_v38 = vpop.f32.mrb[162].mxu1 }
 0x578   : > { %v8713_v21 = vpop.f32.mrb[163].mxu1  ;;  %v8627_v6 = vpop.f32.mrb[180].mxu0 }
 0x579   : > { %v8714_v4 = vadd.f32 %v8713_v21, %v8712_v38  ;;  %v11660_v9 = vadd.f32 %v8711_v24, %v5383_v10  ;;  %v8628_v5 = vpop.f32.mrb[181].mxu0  ;;  %v5415_v38 = vadd.f32 %v8623_v39, %v11656_v13 }
 0x57a   : > { %v8629_v27 = vadd.f32 %v8628_v5, %v8627_v6  ;;  %v8630_v18 = vpop.f32.mrb[182].mxu0 }
 0x57b   : > { %v11662_v60 = vadd.f32 %v8714_v4, %v5386_v58  ;;  %v8631_v59 = vpop.f32.mrb[183].mxu0 }
 0x57c   : > { %v8632_v49 = vadd.f32 %v8631_v59, %v8630_v18 }
 0x57d   : > { %v8715_v23 = vpop.f32.mrb[164].mxu1 }
 0x57e   : > { %v8716_v61 = vpop.f32.mrb[165].mxu1 }
 0x57f   : > { %v8717_v48 = vadd.f32 %v8716_v61, %v8715_v23  ;;  %v8718_v34 = vpop.f32.mrb[166].mxu1  ;;  %v5418_v23 = vadd.f32 %v8626_v46, %v11656_v13 }
 0x580   : > { %v8719_v43 = vpop.f32.mrb[167].mxu1  ;;  %v8633_v63 = vpop.f32.mrb[184].mxu0 }
 0x581   : > { %v8720_v57 = vadd.f32 %v8719_v43, %v8718_v34  ;;  %v11666_v41 = vadd.f32 %v8717_v48, %v5391_v20  ;;  %v8634_v42 = vpop.f32.mrb[185].mxu0  ;;  %v5423_v43 = vadd.f32 %v8629_v27, %v11656_v13 }
 0x582   : > { %v11671_v54 = vadd.f32 %v8634_v42, %v8633_v63  ;;  %v8636_v45 = vpop.f32.mrb[186].mxu0 }
 0x583   : > { %v11668_v22 = vadd.f32 %v8720_v57, %v5394_v52  ;;  %v8637_v25 = vpop.f32.mrb[187].mxu0 }
 0x584   : > { %v11676_v11 = vadd.f32 %v8637_v25, %v8636_v45  ;;  %v7040_v25 = vld [vmem:[%s13083_s8 + $0x8] sm:$0xf] }
 0x585   : > { %v8721_v36 = vpop.f32.mrb[168].mxu1 }
 0x586   : > { %v8722_v31 = vpop.f32.mrb[169].mxu1 }
 0x587   : > { %v8723_v3 = vadd.f32 %v8722_v31, %v8721_v36  ;;  %v8724_v30 = vpop.f32.mrb[170].mxu1  ;;  %v5426_v31 = vadd.f32 %v8632_v49, %v11656_v13  ;;  %v5431_v49 = vadd.f32 %v11671_v54, %v11656_v13 }
 0x588   : > { %v8725_v28 = vpop.f32.mrb[171].mxu1  ;;  %v8639_v32 = vpop.f32.mrb[188].mxu0 }
 0x589   : > { %v8726_v2 = vadd.f32 %v8725_v28, %v8724_v30  ;;  %v11674_v51 = vadd.f32 %v8723_v3, %v5399_v29  ;;  %v8640_v53 = vpop.f32.mrb[189].mxu0 }
 0x58a   : > { %v11681_v44 = vadd.f32 %v8640_v53, %v8639_v32  ;;  %v8642_v62 = vpop.f32.mrb[190].mxu0 }
 0x58b   : > { %v11678_v14 = vadd.f32 %v8726_v2, %v5402_v35  ;;  %v8643_v26 = vpop.f32.mrb[191].mxu0  ;;  %v7039_v2 = vld [vmem:[%s13083_s8] sm:$0xff] }
 0x58c   : > { %v11686_v47 = vadd.f32 %v8643_v26, %v8642_v62  ;;  %v5434_v62 = vadd.f32 %v11676_v11, %v11656_v13 }
 0x58d   : > { %v8727_v33 = vpop.f32.mrb[172].mxu1 }
 0x58e   : > { %v8728_v37 = vpop.f32.mrb[173].mxu1 }
 0x58f   : > { %v8729_v56 = vadd.f32 %v8728_v37, %v8727_v33  ;;  %v8730_v8 = vpop.f32.mrb[174].mxu1 }
 0x590   : > { %v8731_v12 = vpop.f32.mrb[175].mxu1  ;;  %v8645_v50 = vpop.f32.mrb[192].mxu0 }
 0x591   : > { %v8732_v16 = vadd.f32 %v8731_v12, %v8730_v8  ;;  %v11684_v7 = vadd.f32 %v8729_v56, %v5407_v17  ;;  %v8646_v21 = vpop.f32.mrb[193].mxu0  ;;  %v9031_v17 = vpack.c.bf16 %v7040_v25, %v7039_v2 }
 0x592   : > { %v11691_v4 = vadd.f32 %v8646_v21, %v8645_v50  ;;  %v8648_v19 = vpop.f32.mrb[194].mxu0 }
 0x593   : > { %v11688_v10 = vadd.f32 %v8732_v16, %v5410_v40  ;;  %v8649_v61 = vpop.f32.mrb[195].mxu0  ;;  %9033 = vmatprep.subr.msk.bf16.mxu1 %vm9032_vm5, %v9031_v17 }
 0x594   : > { %v11696_v48 = vadd.f32 %v8649_v61, %v8648_v19  ;;  %9036 = vmatpush3.bf16.msk.msra.mxu1 %vm9032_vm5, %v9031_v17 }
 0x595   : > { %v8733_v24 = vpop.f32.mrb[176].mxu1 }
 0x596   : > { %v8734_v55 = vpop.f32.mrb[177].mxu1 }
 0x597   : > { %v8735_v15 = vadd.f32 %v8734_v55, %v8733_v24  ;;  %v8736_v58 = vpop.f32.mrb[178].mxu1 }
 0x598   : > { %v8737_v0 = vpop.f32.mrb[179].mxu1  ;;  %v8651_v18 = vpop.f32.mrb[196].mxu0 }
 0x599   : > { %v8738_v6 = vadd.f32 %v8737_v0, %v8736_v58  ;;  %v11694_v20 = vadd.f32 %v8735_v15, %v5415_v38  ;;  %v8652_v57 = vpop.f32.mrb[197].mxu0  ;;  %v5439_v38 = vadd.f32 %v11681_v44, %v11656_v13 }
 0x59a   : > { %v11701_v36 = vadd.f32 %v8652_v57, %v8651_v18  ;;  %v8654_v63 = vpop.f32.mrb[198].mxu0 }
 0x59b   : > { %v11698_v5 = vadd.f32 %v8738_v6, %v5418_v23  ;;  %v8655_v3 = vpop.f32.mrb[199].mxu0  ;;  %v5442_v23 = vadd.f32 %v11686_v47, %v11656_v13 }
 0x59c   : > { %v11706_v30 = vadd.f32 %v8655_v3, %v8654_v63 }
 0x59d   : > { %v8739_v34 = vpop.f32.mrb[180].mxu1 }
 0x59e   : > { %v8740_v39 = vpop.f32.mrb[181].mxu1 }
 0x59f   : > { %v8741_v52 = vadd.f32 %v8740_v39, %v8739_v34  ;;  %v8742_v59 = vpop.f32.mrb[182].mxu1 }
 0x5a0   : > { %v8743_v46 = vpop.f32.mrb[183].mxu1  ;;  %v8657_v35 = vpop.f32.mrb[200].mxu0 }
 0x5a1   : > { %v8744_v29 = vadd.f32 %v8743_v46, %v8742_v59  ;;  %v11704_v42 = vadd.f32 %v8741_v52, %v5423_v43  ;;  %v8658_v32 = vpop.f32.mrb[201].mxu0  ;;  %v5447_v59 = vadd.f32 %v11691_v4, %v11656_v13 }
 0x5a2   : > { %v11718_v56 = vadd.f32 %v8658_v32, %v8657_v35  ;;  %v8660_v53 = vpop.f32.mrb[202].mxu0 }
 0x5a3   : > { %v11708_v45 = vadd.f32 %v8744_v29, %v5426_v31  ;;  %v8661_v40 = vpop.f32.mrb[203].mxu0 }
 0x5a4   : > { %v8662_v26 = vadd.f32 %v8661_v40, %v8660_v53  ;;  %v5458_v40 = vadd.f32 %v11706_v30, %v11656_v13 }
 0x5a5   : > { %v8745_v28 = vpop.f32.mrb[184].mxu1 }
 0x5a6   : > { %v8746_v27 = vpop.f32.mrb[185].mxu1 }
 0x5a7   : > { %v8747_v33 = vadd.f32 %v8746_v27, %v8745_v28  ;;  %v8748_v37 = vpop.f32.mrb[186].mxu1  ;;  %v5450_v28 = vadd.f32 %v11696_v48, %v11656_v13 }
 0x5a8   : > { %v8749_v8 = vpop.f32.mrb[187].mxu1  ;;  %v8663_v50 = vpop.f32.mrb[204].mxu0 }
 0x5a9   : > { %v8750_v12 = vadd.f32 %v8749_v8, %v8748_v37  ;;  %v11722_v16 = vadd.f32 %v8747_v33, %v5431_v49  ;;  %v8664_v21 = vpop.f32.mrb[205].mxu0  ;;  %v5455_v37 = vadd.f32 %v11701_v36, %v11656_v13 }
 0x5aa   : > { %v8665_v19 = vadd.f32 %v8664_v21, %v8663_v50  ;;  %v8666_v11 = vpop.f32.mrb[206].mxu0 }
 0x5ab   : > { %v11724_v54 = vadd.f32 %v8750_v12, %v5434_v62  ;;  %v8667_v61 = vpop.f32.mrb[207].mxu0 }
 0x5ac   : > { %v8668_v18 = vadd.f32 %v8667_v61, %v8666_v11  ;;  %v5463_v11 = vadd.f32 %v11718_v56, %v11656_v13 }
 0x5ad   : > { %v8751_v24 = vpop.f32.mrb[188].mxu1 }
 0x5ae   : > { %v8752_v55 = vpop.f32.mrb[189].mxu1 }
 0x5af   : > { %v8753_v15 = vadd.f32 %v8752_v55, %v8751_v24  ;;  %v8754_v58 = vpop.f32.mrb[190].mxu1 }
 0x5b0   : > { %v8755_v0 = vpop.f32.mrb[191].mxu1  ;;  %v8669_v43 = vpop.f32.mrb[208].mxu0 }
 0x5b1   : > { %v8756_v6 = vadd.f32 %v8755_v0, %v8754_v58  ;;  %v11730_v34 = vadd.f32 %v8753_v15, %v5439_v38  ;;  %v8670_v57 = vpop.f32.mrb[209].mxu0 }
 0x5b2   : > { %v11736_v63 = vadd.f32 %v8670_v57, %v8669_v43  ;;  %v8672_v31 = vpop.f32.mrb[210].mxu0 }
 0x5b3   : > { %v11732_v39 = vadd.f32 %v8756_v6, %v5442_v23  ;;  %v8673_v47 = vpop.f32.mrb[211].mxu0 }
 0x5b4   : > { %v11740_v35 = vadd.f32 %v8673_v47, %v8672_v31 }
 0x5b6   : > { %v8757_v52 = vpop.f32.mrb[192].mxu1 }
 0x5b7   : > { %v8758_v44 = vpop.f32.mrb[193].mxu1 }
 0x5b8   : > { %v8759_v46 = vadd.f32 %v8758_v44, %v8757_v52  ;;  %v8760_v29 = vpop.f32.mrb[194].mxu1  ;;  %v8675_v49 = vpop.f32.mrb[212].mxu0  ;;  %v5466_v52 = vadd.f32 %v8662_v26, %v11656_v13 }
 0x5b9   : > { %v8761_v3 = vpop.f32.mrb[195].mxu1  ;;  %v8676_v4 = vpop.f32.mrb[213].mxu0 }
 0x5ba   : > { %v8762_v27 = vadd.f32 %v8761_v3, %v8760_v29  ;;  %v11742_v2 = vadd.f32 %v8759_v46, %v5447_v59  ;;  %v11748_v17 = vadd.f32 %v8676_v4, %v8675_v49  ;;  %v8678_v8 = vpop.f32.mrb[214].mxu0  ;;  %v5471_v3 = vadd.f32 %v8665_v19, %v11656_v13 }
 0x5bb   : > { %v8679_v48 = vpop.f32.mrb[215].mxu0 }
 0x5bc   : > { %v11744_v25 = vadd.f32 %v8762_v27, %v5450_v28  ;;  %v11752_v24 = vadd.f32 %v8679_v48, %v8678_v8  ;;  %v11779_v48 = vpop.permute.xlu0 %6415 }
 0x5be   : > { %v8763_v33 = vpop.f32.mrb[196].mxu1 }
 0x5bf   : > { %v8764_v32 = vpop.f32.mrb[197].mxu1 }
 0x5c0   : > { %v8765_v53 = vadd.f32 %v8764_v32, %v8763_v33  ;;  %v8766_v62 = vpop.f32.mrb[198].mxu1  ;;  %v8681_v15 = vpop.f32.mrb[216].mxu0  ;;  %v5474_v32 = vadd.f32 %v8668_v18, %v11656_v13 }
 0x5c1   : > { %v8767_v12 = vpop.f32.mrb[199].mxu1  ;;  %v8682_v36 = vpop.f32.mrb[217].mxu0 }
 0x5c2   : > { %v8768_v50 = vadd.f32 %v8767_v12, %v8766_v62  ;;  %v11754_v55 = vadd.f32 %v8765_v53, %v5455_v37  ;;  %v11760_v0 = vadd.f32 %v8682_v36, %v8681_v15  ;;  %v8684_v6 = vpop.f32.mrb[218].mxu0 }
 0x5c3   : > { %v8685_v30 = vpop.f32.mrb[219].mxu0 }
 0x5c4   : > { %v11756_v38 = vadd.f32 %v8768_v50, %v5458_v40  ;;  %v11763_v57 = vadd.f32 %v8685_v30, %v8684_v6 }
 0x5c6   : > { %v8769_v21 = vpop.f32.mrb[200].mxu1 }
 0x5c7   : > { %v8770_v58 = vpop.f32.mrb[201].mxu1 }
 0x5c8   : > { %v8771_v23 = vadd.f32 %v8770_v58, %v8769_v21  ;;  %v8772_v61 = vpop.f32.mrb[202].mxu1  ;;  %v8687_v31 = vpop.f32.mrb[220].mxu0 }
 0x5c9   : > { %v8773_v43 = vpop.f32.mrb[203].mxu1  ;;  %v8688_v47 = vpop.f32.mrb[221].mxu0 }
 0x5ca   : > { %v8774_v44 = vadd.f32 %v8773_v43, %v8772_v61  ;;  %v11765_v59 = vadd.f32 %v8771_v23, %v5463_v11  ;;  %v11770_v28 = vadd.f32 %v8688_v47, %v8687_v31  ;;  %v8690_v49 = vpop.f32.mrb[222].mxu0 }
 0x5cb   : > { %v8691_v4 = vpop.f32.mrb[223].mxu0 }
 0x5cc   : > { %v11767_v46 = vadd.f32 %v8774_v44, %v5466_v52  ;;  %v11773_v37 = vadd.f32 %v8691_v4, %v8690_v49 }
 0x5ce   : > { %v8775_v29 = vpop.f32.mrb[204].mxu1 }
 0x5cf   : > { %v8776_v56 = vpop.f32.mrb[205].mxu1 }
 0x5d0   : > { %v8777_v27 = vadd.f32 %v8776_v56, %v8775_v29  ;;  %v8778_v33 = vpop.f32.mrb[206].mxu1  ;;  %v8949_v19 = vpop.f32.mrb[224].mxu0 }
 0x5d1   : > { %v8779_v26 = vpop.f32.mrb[207].mxu1  ;;  %v11782_v40 = vadd.f32 %v8949_v19, %v11666_v41  ;;  %v5704_v15 = vpop.f32.mrb[225].mxu0 }
 0x5d2   : > { %v8780_v53 = vadd.f32 %v8779_v26, %v8778_v33  ;;  %v11775_v8 = vadd.f32 %v8777_v27, %v5471_v3  ;;  %v11787_v18 = vadd.f32 %v5704_v15, %v11660_v9  ;;  %v8950_v58 = vpop.f32.mrb[226].mxu0 }
 0x5d3   : > { %v6516_v11 = vmin.f32 %v11782_v40, 4.1351666  ;;  %v11791_v23 = vadd.f32 %v8950_v58, %v11668_v22  ;;  %v5707_v61 = vpop.f32.mrb[227].mxu0  ;;  %v6420_v9 = vmul.f32 %v11779_v48, %v11782_v40 }
 0x5d4   : > { %v11777_v62 = vadd.f32 %v8780_v53, %v5474_v32  ;;  %v6514_v30 = vmin.f32 %v11787_v18, 4.1351666  ;;  %v11797_v43 = vadd.f32 %v5707_v61, %v11662_v60  ;;  %v6418_v56 = vmul.f32 %v11779_v48, %v11787_v18 }
 0x5d5   : > { %v6550_v52 = vmul.f32 1.442695, %v6516_v11  ;;  %v6517_v31 = vmin.f32 %v11791_v23, 4.1351666  ;;  %v7944_v29 = vclamps-f32 %v6420_v9, 32.0  ;;  %v6421_v19 = vmul.f32 %v11779_v48, %v11791_v23 }
 0x5d6   : > { %v8781_v12 = vpop.f32.mrb[208].mxu1  ;;  %v6546_v44 = vmul.f32 1.442695, %v6514_v30  ;;  %v6515_v32 = vmin.f32 %v11797_v43, 4.1351666  ;;  %v6419_v30 = vmul.f32 %v11779_v48, %v11797_v43 }
 0x5d7   : > { %v8782_v50 = vpop.f32.mrb[209].mxu1  ;;  %9193 = vpow2.f32 %v6550_v52  ;;  %6806 = vrot.lane.b32.xlu0 %v7944_v29, %s9458_s14  ;;  %v7945_v11 = vclamps-f32 %v6421_v19, 32.0 }
 0x5d8   : > { %v11784_v21 = vadd.f32 %v8782_v50, %v8781_v12  ;;  %v8784_v36 = vpop.f32.mrb[210].mxu1  ;;  %v8953_v47 = vpop.f32.mrb[228].mxu0  ;;  %9195 = vpow2.f32 %v6546_v44  ;;  %v6552_v50 = vmul.f32 1.442695, %v6517_v31 }
 0x5d9   : > { %v8785_v6 = vpop.f32.mrb[211].mxu1  ;;  %v11805_v3 = vadd.f32 %v8953_v47, %v11684_v7  ;;  %v5720_v60 = vpop.f32.mrb[229].mxu0 }
 0x5da   : > { %v11794_v41 = vadd.f32 %v8785_v6, %v8784_v36  ;;  %v11811_v33 = vadd.f32 %v5720_v60, %v11674_v51  ;;  %v8954_v26 = vpop.f32.mrb[230].mxu0  ;;  %v7942_v36 = vclamps-f32 %v6418_v56, 32.0  ;;  %v6548_v51 = vmul.f32 1.442695, %v6515_v32 }
 0x5db   : > { %v11815_v53 = vadd.f32 %v8954_v26, %v11688_v10  ;;  %v5723_v7 = vpop.f32.mrb[231].mxu0  ;;  %9197 = vpow2.f32 %v6552_v50  ;;  %v6520_v10 = vmin.f32 %v11805_v3, 4.1351666  ;;  %v6424_v60 = vmul.f32 %v11779_v48, %v11805_v3 }
 0x5dc   : > { %6802 = vrot.lane.b32.xlu0 %v7942_v36, %s9458_s14  ;;  %v11823_v58 = vadd.f32 %v5723_v7, %v11678_v14  ;;  %v6518_v56 = vmin.f32 %v11811_v33, 4.1351666  ;;  %9199 = vpow2.f32 %v6548_v51 }
 0x5dd   : > { %v6521_v7 = vmin.f32 %v11815_v53, 4.1351666  ;;  %v7948_v36 = vclamps-f32 %v6424_v60, 32.0  ;;  %v6425_v60 = vmul.f32 %v11779_v48, %v11815_v53 }
 0x5de   : > { %v8787_v22 = vpop.f32.mrb[212].mxu1 }
 0x5df   : > { %v8788_v27 = vpop.f32.mrb[213].mxu1 }
 0x5e0   : > { %v11808_v49 = vadd.f32 %v8788_v27, %v8787_v22  ;;  %v8790_v4 = vpop.f32.mrb[214].mxu1  ;;  %v8957_v61 = vpop.f32.mrb[232].mxu0  ;;  %6808 = vrot.lane.b32.xlu0 %v7945_v11, %s9458_s14  ;;  %v6558_v27 = vmul.f32 1.442695, %v6520_v10  ;;  %v6422_v10 = vmul.f32 %v11779_v48, %v11811_v33 }
 0x5e1   : > { %v8791_v12 = vpop.f32.mrb[215].mxu1  ;;  %v11829_v9 = vadd.f32 %v8957_v61, %v11704_v42  ;;  %v5736_v44 = vpop.f32.mrb[233].mxu0  ;;  %v7943_v42 = vclamps-f32 %v6419_v30, 32.0 }
 0x5e2   : > { %v11819_v15 = vadd.f32 %v8791_v12, %v8790_v4  ;;  %v9194_v31 = vpop.eup %9193  ;;  %v11835_v14 = vadd.f32 %v5736_v44, %v11694_v20  ;;  %v8958_v47 = vpop.f32.mrb[234].mxu0  ;;  %v6554_v20 = vmul.f32 1.442695, %v6518_v56  ;;  %9201 = vpow2.f32 %v6558_v27 }
 0x5e3   : > { %6646 = vrot.lane.b32.xlu1 %v9194_v31, %s9458_s14  ;;  %v11842_v4 = vadd.f32 %v8958_v47, %v11708_v45  ;;  %v5739_v32 = vpop.f32.mrb[235].mxu0  ;;  %v9196_v12 = vpop.eup %9195 }
 0x5e4   : > { %6804 = vrot.lane.b32.xlu0 %v7943_v42, %s9458_s14  ;;  %v11850_v50 = vadd.f32 %v5739_v32, %v11698_v5  ;;  %v6560_v5 = vmul.f32 1.442695, %v6521_v7  ;;  %9203 = vpow2.f32 %v6554_v20  ;;  %v7946_v42 = vclamps-f32 %v6422_v10, 32.0 }
 0x5e5   : > { %v9198_v30 = vpop.eup %9197  ;;  %v6524_v20 = vmin.f32 %v11829_v9, 4.1351666 }
 0x5e6   : > { %v8793_v6 = vpop.f32.mrb[216].mxu1  ;;  %v9200_v32 = vpop.eup %9199  ;;  %9205 = vpow2.f32 %v6560_v5 }
 0x5e7   : > { %v8794_v52 = vpop.f32.mrb[217].mxu1  ;;  %6642 = vrot.lane.b32.xlu1 %v9196_v12, %s9458_s14 }
 0x5e8   : > { %v11832_v29 = vadd.f32 %v8794_v52, %v8793_v6  ;;  %v8796_v22 = vpop.f32.mrb[218].mxu1  ;;  %v8961_v45 = vpop.f32.mrb[236].mxu0  ;;  %6814 = vrot.lane.b32.xlu0 %v7948_v36, %s9458_s14 }
 0x5e9   : > { %v8797_v26 = vpop.f32.mrb[219].mxu1  ;;  %v11855_v11 = vadd.f32 %v8961_v45, %v11730_v34  ;;  %v5752_v61 = vpop.f32.mrb[237].mxu0 }
 0x5ea   : > { %v11846_v19 = vadd.f32 %v8797_v26, %v8796_v22  ;;  %v8962_v31 = vpop.f32.mrb[238].mxu0  ;;  %v6519_v22 = vmin.f32 %v11823_v58, 4.1351666  ;;  %v11862_v47 = vadd.f32 %v5752_v61, %v11722_v16  ;;  %v6522_v61 = vmin.f32 %v11835_v14, 4.1351666 }
 0x5eb   : > { %13135 = vst [vmem:[#allocation7_spill] sm:$0xff] %v11855_v11  ;;  %6648 = vrot.lane.b32.xlu1 %v9198_v30, %s9458_s14  ;;  %v5755_v34 = vpop.f32.mrb[239].mxu0  ;;  %v11866_v27 = vadd.f32 %v8962_v31, %v11732_v39  ;;  %v7949_v39 = vclamps-f32 %v6425_v60, 32.0 }
 0x5ec   : > { %6810 = vrot.lane.b32.xlu0 %v7946_v42, %s9458_s14  ;;  %v11874_v16 = vadd.f32 %v5755_v34, %v11724_v54  ;;  %v6556_v12 = vmul.f32 1.442695, %v6519_v22  ;;  %v9202_v36 = vpop.eup %9201  ;;  %v6525_v22 = vmin.f32 %v11842_v4, 4.1351666  ;;  %v6428_v34 = vmul.f32 %v11779_v48, %v11829_v9 }
 0x5ee   : > { %v8799_v51 = vpop.f32.mrb[220].mxu1  ;;  %9207 = vpow2.f32 %v6556_v12  ;;  %v9204_v5 = vpop.eup %9203 }
 0x5ef   : > { %v8800_v6 = vpop.f32.mrb[221].mxu1  ;;  %6644 = vrot.lane.b32.xlu1 %v9200_v32, %s9458_s14 }
 0x5f0   : > { %v11858_v52 = vadd.f32 %v8800_v6, %v8799_v51  ;;  %v8802_v44 = vpop.f32.mrb[222].mxu1  ;;  %v8965_v7 = vpop.f32.mrb[240].mxu0  ;;  %6816 = vrot.lane.b32.xlu0 %v7949_v39, %s9458_s14  ;;  %v6566_v6 = vmul.f32 1.442695, %v6524_v20  ;;  %v6568_v20 = vmul.f32 1.442695, %v6525_v22 }
 0x5f1   : > { %v8803_v56 = vpop.f32.mrb[223].mxu1  ;;  %v11880_v51 = vadd.f32 %v8965_v7, %v11754_v55  ;;  %v5768_v45 = vpop.f32.mrb[241].mxu0  ;;  %v6423_v55 = vmul.f32 %v11779_v48, %v11823_v58  ;;  %v6523_v39 = vmin.f32 %v11850_v50, 4.1351666 }
 0x5f2   : > { %v11870_v26 = vadd.f32 %v8803_v56, %v8802_v44  ;;  %v11883_v10 = vadd.f32 %v5768_v45, %v11742_v2  ;;  %v8966_v54 = vpop.f32.mrb[242].mxu0  ;;  %9209 = vpow2.f32 %v6566_v6  ;;  %v6562_v2 = vmul.f32 1.442695, %v6522_v61  ;;  %v9206_v42 = vpop.eup %9205 }
 0x5f3   : > { %13136 = vst [vmem:[#allocation8_spill] sm:$0xff] %v11880_v51  ;;  %6654 = vrot.lane.b32.xlu1 %v9202_v36, %s9458_s14  ;;  %v11888_v30 = vadd.f32 %v8966_v54, %v11756_v38  ;;  %v5771_v44 = vpop.f32.mrb[243].mxu0  ;;  %v7947_v56 = vclamps-f32 %v6423_v55, 32.0  ;;  %v7952_v45 = vclamps-f32 %v6428_v34, 32.0  ;;  %v6426_v54 = vmul.f32 %v11779_v48, %v11835_v14 }
 0x5f4   : > { %13137 = vst [vmem:[#allocation9_spill] sm:$0xff] %v11883_v10  ;;  %v11891_v31 = vadd.f32 %v5771_v44, %v11744_v25  ;;  %9211 = vpow2.f32 %v6562_v2  ;;  %v5479_v6 = vadd.f32 %v11736_v63, %v11656_v13  ;;  %v5487_v61 = vadd.f32 %v11748_v17, %v11656_v13 }
 0x5f5   : > { %13138 = vst [vmem:[#allocation10_spill] sm:$0xff] %v11888_v30  ;;  %6812 = vrot.lane.b32.xlu0 %v7947_v56, %s9458_s14  ;;  %9213 = vpow2.f32 %v6568_v20  ;;  %v6528_v44 = vmin.f32 %v11855_v11, 4.1351666  ;;  %v5490_v55 = vadd.f32 %v11752_v24, %v11656_v13  ;;  %v6429_v63 = vmul.f32 %v11779_v48, %v11842_v4 }
 0x5f6   : > { %13139 = vst [vmem:[#allocation11_spill] sm:$0xff] %v11891_v31  ;;  %v5648_v17 = vadd.f32 %v11808_v49, %v5487_v61  ;;  %v5640_v56 = vadd.f32 %v11784_v21, %v5479_v6  ;;  %v6526_v49 = vmin.f32 %v11862_v47, 4.1351666  ;;  %v6432_v61 = vmul.f32 %v11779_v48, %v11855_v11 }
 0x5f7   : > { %6650 = vrot.lane.b32.xlu1 %v9204_v5, %s9458_s14  ;;  %v7950_v5 = vclamps-f32 %v6426_v54, 32.0  ;;  %v7953_v21 = vclamps-f32 %v6429_v63, 32.0  ;;  %v6427_v54 = vmul.f32 %v11779_v48, %v11850_v50 }
 0x5f8   : > { %v8969_v38 = vpop.f32.mrb[244].mxu0 }
 0x5f9   : > { %v11900_v60 = vadd.f32 %v8969_v38, %v11775_v8  ;;  %v5784_v25 = vpop.f32.mrb[245].mxu0  ;;  %6822 = vrot.lane.b32.xlu0 %v7952_v45, %s9458_s14  ;;  %v5651_v38 = vadd.f32 %v11819_v15, %v5490_v55  ;;  %v5503_v45 = vadd.f32 %v11770_v28, %v11656_v13  ;;  %v5495_v28 = vadd.f32 %v11760_v0, %v11656_v13 }
 0x5fa   : > { %v11904_v32 = vadd.f32 %v5784_v25, %v11765_v59  ;;  %v8970_v12 = vpop.f32.mrb[246].mxu0  ;;  %v9208_v59 = vpop.eup %9207  ;;  %v6574_v25 = vmul.f32 1.442695, %v6528_v44  ;;  %v5506_v44 = vadd.f32 %v11773_v37, %v11656_v13  ;;  %v7951_v55 = vclamps-f32 %v6427_v54, 32.0 }
 0x5fb   : > { %13140 = vst [vmem:[#allocation12_spill] sm:$0xff] %v11900_v60  ;;  %6656 = vrot.lane.b32.xlu1 %v9206_v42, %s9458_s14  ;;  %v11909_v7 = vadd.f32 %v8970_v12, %v11777_v62  ;;  %v5787_v36 = vpop.f32.mrb[247].mxu0  ;;  %v5482_v62 = vadd.f32 %v11740_v35, %v11656_v13  ;;  %v5664_v6 = vadd.f32 %v11858_v52, %v5503_v45  ;;  %v7956_v37 = vclamps-f32 %v6432_v61, 32.0 }
 0x5fc   : > { %13141 = vst [vmem:[#allocation13_spill] sm:$0xff] %v11904_v32  ;;  %v11912_v8 = vadd.f32 %v5787_v36, %v11767_v46  ;;  %v6564_v46 = vmul.f32 1.442695, %v6523_v39  ;;  %v9210_v22 = vpop.eup %9209  ;;  %v5656_v0 = vadd.f32 %v11832_v29, %v5495_v28  ;;  %v6436_v28 = vmul.f32 %v11779_v48, %v11880_v51 }
 0x5fd   : > { %13142 = vst [vmem:[#allocation14_spill] sm:$0xff] %v11909_v7  ;;  %6818 = vrot.lane.b32.xlu0 %v7950_v5, %s9458_s14  ;;  %v5643_v24 = vadd.f32 %v11794_v41, %v5482_v62  ;;  %v6529_v41 = vmin.f32 %v11866_v27, 4.1351666 }
 0x5fe   : > { %13143 = vst [vmem:[#allocation15_spill] sm:$0xff] %v11912_v8  ;;  %9215 = vpow2.f32 %v6564_v46  ;;  %v9212_v36 = vpop.eup %9211  ;;  %v5498_v46 = vadd.f32 %v11763_v57, %v11656_v13  ;;  %v5667_v57 = vadd.f32 %v11870_v26, %v5506_v44  ;;  %v6532_v26 = vmin.f32 %v11880_v51, 4.1351666 }
 0x5ff   : > { %6652 = vrot.lane.b32.xlu1 %v9208_v59, %s9458_s14  ;;  %9217 = vpow2.f32 %v6574_v25  ;;  %v6570_v59 = vmul.f32 1.442695, %v6526_v49  ;;  %v9214_v62 = vpop.eup %9213  ;;  %v6576_v63 = vmul.f32 1.442695, %v6529_v41  ;;  %v6430_v25 = vmul.f32 %v11779_v48, %v11862_v47 }
 0x600   : > { %v8973_v2 = vpop.f32.mrb[248].mxu0  ;;  %v5659_v13 = vadd.f32 %v11846_v19, %v5498_v46  ;;  %v6431_v41 = vmul.f32 %v11779_v48, %v11874_v16  ;;  %v6531_v44 = vmin.f32 %v11891_v31, 4.1351666 }
 0x601   : > { %v5800_v34 = vpop.f32.mrb[249].mxu0  ;;  %v11932_v35 = vadd.f32 %v8973_v2, %v5648_v17  ;;  %6824 = vrot.lane.b32.xlu0 %v7953_v21, %s9458_s14  ;;  %v6527_v17 = vmin.f32 %v11874_v16, 4.1351666  ;;  %9219 = vpow2.f32 %v6570_v59  ;;  %v7954_v49 = vclamps-f32 %v6430_v25, 32.0 }
 0x602   : > { %v8974_v42 = vpop.f32.mrb[250].mxu0  ;;  %v11938_v12 = vadd.f32 %v5800_v34, %v5640_v56  ;;  %9221 = vpow2.f32 %v6576_v63  ;;  %v6582_v21 = vmul.f32 1.442695, %v6532_v26  ;;  %v6434_v63 = vmul.f32 %v11779_v48, %v11883_v10 }
 0x603   : > { %13144 = vst [vmem:[#allocation16_spill] sm:$0xff] %v11932_v35  ;;  %6662 = vrot.lane.b32.xlu1 %v9210_v22, %s9458_s14  ;;  %v5803_v20 = vpop.f32.mrb[251].mxu0  ;;  %v11940_v39 = vadd.f32 %v8974_v42, %v5651_v38  ;;  %v6572_v29 = vmul.f32 1.442695, %v6527_v17  ;;  %v6580_v17 = vmul.f32 1.442695, %v6531_v44  ;;  %v6435_v25 = vmul.f32 %v11779_v48, %v11891_v31 }
 0x604   : > { %13145 = vst [vmem:[#allocation17_spill] sm:$0xff] %v11938_v12  ;;  %v11944_v15 = vadd.f32 %v5803_v20, %v5643_v24  ;;  %v6433_v20 = vmul.f32 %v11779_v48, %v11866_v27  ;;  %v6537_v26 = vmin.f32 %v11909_v7, 4.1351666  ;;  %v6538_v44 = vmin.f32 %v11938_v12, 4.1351666 }
 0x605   : > { %13146 = vst [vmem:[#allocation18_spill] sm:$0xff] %v11940_v39  ;;  %6820 = vrot.lane.b32.xlu0 %v7951_v55, %s9458_s14  ;;  %9223 = vpow2.f32 %v6572_v29 }
 0x606   : > { %13147 = vst [vmem:[#allocation19_spill] sm:$0xff] %v11944_v15  ;;  %v7957_v54 = vclamps-f32 %v6433_v20, 32.0  ;;  %9225 = vpow2.f32 %v6582_v21  ;;  %v6440_v20 = vmul.f32 %v11779_v48, %v11900_v60  ;;  %v6592_v21 = vmul.f32 1.442695, %v6537_v26 }
 0x607   : > { %6658 = vrot.lane.b32.xlu1 %v9212_v36, %s9458_s14  ;;  %v6530_v36 = vmin.f32 %v11883_v10, 4.1351666 }
 0x608   : > { %v8977_v5 = vpop.f32.mrb[252].mxu0  ;;  %v9216_v34 = vpop.eup %9215 }
 0x609   : > { %v11961_v2 = vadd.f32 %v8977_v5, %v5664_v6  ;;  %v5816_v52 = vpop.f32.mrb[253].mxu0  ;;  %6830 = vrot.lane.b32.xlu0 %v7956_v37, %s9458_s14  ;;  %v9218_v19 = vpop.eup %9217  ;;  %v6578_v59 = vmul.f32 1.442695, %v6530_v36  ;;  %v6533_v6 = vmin.f32 %v11888_v30, 4.1351666  ;;  %v7960_v5 = vclamps-f32 %v6436_v28, 32.0 }
 0x60a   : > { %v8978_v22 = vpop.f32.mrb[254].mxu0  ;;  %v11968_v38 = vadd.f32 %v5816_v52, %v5656_v0  ;;  %v6536_v52 = vmin.f32 %v11900_v60, 4.1351666  ;;  %v6534_v37 = vmin.f32 %v11904_v32, 4.1351666  ;;  %v6441_v28 = vmul.f32 %v11779_v48, %v11909_v7 }
 0x60b   : > { %13148 = vst [vmem:[#allocation20_spill] sm:$0xff] %v11961_v2  ;;  %6664 = vrot.lane.b32.xlu1 %v9214_v62, %s9458_s14  ;;  %v5819_v56 = vpop.f32.mrb[255].mxu0  ;;  %v11970_v42 = vadd.f32 %v8978_v22, %v5667_v57  ;;  %v9220_v45 = vpop.eup %9219  ;;  %v7955_v62 = vclamps-f32 %v6431_v41, 32.0  ;;  %9227 = vpow2.f32 %v6578_v59  ;;  %v6584_v46 = vmul.f32 1.442695, %v6533_v6 }
 0x60c   : > { %13149 = vst [vmem:[#allocation21_spill] sm:$0xff] %v11968_v38  ;;  %v11972_v24 = vadd.f32 %v5819_v56, %v5659_v13  ;;  %v9222_v61 = vpop.eup %9221  ;;  %v7958_v57 = vclamps-f32 %v6434_v63, 32.0  ;;  %v6437_v22 = vmul.f32 %v11779_v48, %v11888_v30  ;;  %v6590_v13 = vmul.f32 1.442695, %v6536_v52 }
 0x60d   : > { %13150 = vst [vmem:[#allocation22_spill] sm:$0xff] %v11970_v42  ;;  %6826 = vrot.lane.b32.xlu0 %v7954_v49, %s9458_s14  ;;  %9229 = vpow2.f32 %v6584_v46  ;;  %v6586_v29 = vmul.f32 1.442695, %v6534_v37  ;;  %v7959_v49 = vclamps-f32 %v6435_v25, 32.0  ;;  %v6535_v36 = vmin.f32 %v11912_v8, 4.1351666 }
 0x60e   : > { %13151 = vst [vmem:[#allocation23_spill] sm:$0xff] %v11972_v24  ;;  %9231 = vpow2.f32 %v6580_v17  ;;  %v6438_v41 = vmul.f32 %v11779_v48, %v11904_v32  ;;  %v6540_v6 = vmin.f32 %v11932_v35, 4.1351666  ;;  %v6439_v63 = vmul.f32 %v11779_v48, %v11912_v8 }
 0x60f   : > { %6660 = vrot.lane.b32.xlu1 %v9216_v34, %s9458_s14  ;;  %v9224_v55 = vpop.eup %9223  ;;  %v7961_v34 = vclamps-f32 %v6437_v22, 32.0  ;;  %9233 = vpow2.f32 %v6590_v13  ;;  %v6588_v59 = vmul.f32 1.442695, %v6535_v36  ;;  %v6594_v17 = vmul.f32 1.442695, %v6538_v44 }
 0x610   : > { %v9226_v0 = vpop.eup %9225  ;;  %9235 = vpow2.f32 %v6586_v29  ;;  %v6598_v46 = vmul.f32 1.442695, %v6540_v6  ;;  %v6541_v52 = vmin.f32 %v11940_v39, 4.1351666  ;;  %v6444_v22 = vmul.f32 %v11779_v48, %v11932_v35 }
 0x611   : > { %6832 = vrot.lane.b32.xlu0 %v7957_v54, %s9458_s14  ;;  %v7964_v54 = vclamps-f32 %v6440_v20, 32.0  ;;  %9237 = vpow2.f32 %v6592_v21  ;;  %v6539_v37 = vmin.f32 %v11944_v15, 4.1351666  ;;  %v6442_v25 = vmul.f32 %v11779_v48, %v11938_v12 }
 0x612   : > { %9239 = vpow2.f32 %v6588_v59  ;;  %v6600_v13 = vmul.f32 1.442695, %v6541_v52  ;;  %v6544_v26 = vmin.f32 %v11961_v2, 4.1351666  ;;  %v6445_v20 = vmul.f32 %v11779_v48, %v11940_v39 }
 0x613   : > { %6670 = vrot.lane.b32.xlu1 %v9218_v19, %s9458_s14  ;;  %9241 = vpow2.f32 %v6598_v46  ;;  %v6596_v29 = vmul.f32 1.442695, %v6539_v37  ;;  %v6542_v36 = vmin.f32 %v11968_v38, 4.1351666  ;;  %v6543_v6 = vmin.f32 %v11972_v24, 4.1351666 }
 0x614   : > { %9243 = vpow2.f32 %v6594_v17  ;;  %v6606_v21 = vmul.f32 1.442695, %v6544_v26  ;;  %v6545_v46 = vmin.f32 %v11970_v42, 4.1351666  ;;  %v6931_v17 = vlaneseq }
 0x615   : > { %6828 = vrot.lane.b32.xlu0 %v7955_v62, %s9458_s14  ;;  %v9228_v56 = vpop.eup %9227  ;;  %v7962_v62 = vclamps-f32 %v6438_v41, 32.0  ;;  %9245 = vpow2.f32 %v6600_v13  ;;  %v6443_v41 = vmul.f32 %v11779_v48, %v11944_v15  ;;  %v6602_v59 = vmul.f32 1.442695, %v6542_v36 }
 0x616   : > { %9247 = vpow2.f32 %v6596_v29  ;;  %v6604_v44 = vmul.f32 1.442695, %v6543_v6  ;;  %v6446_v52 = vmul.f32 %v11779_v48, %v11968_v38  ;;  %v6932_v13 = vshrl.u32 %v6931_v17, 7  ;;  %v6375_v29 = vld [vmem:[%s13080_s5] sm:$0xff] }
 0x617   : > { %6666 = vrot.lane.b32.xlu1 %v9220_v45, %s9458_s14  ;;  %v9230_v19 = vpop.eup %9229  ;;  %9249 = vpow2.f32 %v6606_v21  ;;  %v6449_v21 = vmul.f32 %v11779_v48, %v11970_v42 }
 0x618   : > { %v9232_v45 = vpop.eup %9231  ;;  %9251 = vpow2.f32 %v6602_v59  ;;  %v7970_v37 = vclamps-f32 %v6446_v52, 32.0 }
 0x619   : > { %6838 = vrot.lane.b32.xlu0 %v7960_v5, %s9458_s14  ;;  %v7965_v5 = vclamps-f32 %v6441_v28, 32.0  ;;  %v6448_v28 = vmul.f32 %v11779_v48, %v11961_v2  ;;  %9253 = vpow2.f32 %v6604_v44 }
 0x61b   : > { %6672 = vrot.lane.b32.xlu1 %v9222_v61, %s9458_s14  ;;  %v9234_v61 = vpop.eup %9233 }
 0x61d   : > { %6834 = vrot.lane.b32.xlu0 %v7958_v57, %s9458_s14  ;;  %v7963_v57 = vclamps-f32 %v6439_v63, 32.0  ;;  %v7972_v63 = vclamps-f32 %v6448_v28, 32.0  ;;  %v12079_v28 = vld [vmem:[%s13081_s6] ss:$0 sm:$0xff] }
 0x61f   : > { %6668 = vrot.lane.b32.xlu1 %v9224_v55, %s9458_s14  ;;  %v9236_v55 = vpop.eup %9235 }
 0x621   : > { %6840 = vrot.lane.b32.xlu0 %v7961_v34, %s9458_s14  ;;  %v7968_v34 = vclamps-f32 %v6444_v22, 32.0 }
 0x623   : > { %6678 = vrot.lane.b32.xlu1 %v9226_v0, %s9458_s14  ;;  %v9238_v0 = vpop.eup %9237 }
 0x625   : > { %6836 = vrot.lane.b32.xlu0 %v7959_v49, %s9458_s14  ;;  %v7966_v49 = vclamps-f32 %v6442_v25, 32.0  ;;  %v6408_v25 = vld [vmem:[%s13082_s7] sm:$0x1] }
 0x626   : > { %v6968_v36 = vsub.f32 1.0, %v6408_v25 }
 0x627   : > { %6674 = vrot.lane.b32.xlu1 %v9228_v56, %s9458_s14  ;;  %v9240_v56 = vpop.eup %9239 }
 0x629   : > { %6846 = vrot.lane.b32.xlu0 %v7964_v54, %s9458_s14  ;;  %v7969_v54 = vclamps-f32 %v6445_v20, 32.0 }
 0x62b   : > { %6680 = vrot.lane.b32.xlu1 %v9230_v19, %s9458_s14  ;;  %v9242_v19 = vpop.eup %9241 }
 0x62d   : > { %6842 = vrot.lane.b32.xlu0 %v7962_v62, %s9458_s14  ;;  %v7967_v62 = vclamps-f32 %v6443_v41, 32.0 }
 0x62f   : > { %6676 = vrot.lane.b32.xlu1 %v9232_v45, %s9458_s14  ;;  %v9244_v45 = vpop.eup %9243 }
 0x631   : > { %6848 = vrot.lane.b32.xlu0 %v7965_v5, %s9458_s14 }
 0x633   : > { %6686 = vrot.lane.b32.xlu1 %v9234_v61, %s9458_s14  ;;  %v9246_v61 = vpop.eup %9245 }
 0x634   : > { %v9248_v5 = vpop.eup %9247 }
 0x635   : > { %6844 = vrot.lane.b32.xlu0 %v7963_v57, %s9458_s14  ;;  %v9250_v22 = vpop.eup %9249 }
 0x637   : > { %6682 = vrot.lane.b32.xlu1 %v9236_v55, %s9458_s14 }
 0x639   : > { %6854 = vrot.lane.b32.xlu0 %v7968_v34, %s9458_s14 }
 0x63b   : > { %6688 = vrot.lane.b32.xlu1 %v9238_v0, %s9458_s14  ;;  %v6608_v0 = vmul.f32 1.442695, %v6545_v46 }
 0x63d   : > { %6850 = vrot.lane.b32.xlu0 %v7966_v49, %s9458_s14  ;;  %9255 = vpow2.f32 %v6608_v0  ;;  %v6933_v49 = vsub.s32 0, %v6932_v13  ;;  %v6377_v0 = vld [vmem:[%s13080_s5 + $0x10] sm:$0xff] }
 0x63f   : > { %6684 = vrot.lane.b32.xlu1 %v9240_v56, %s9458_s14  ;;  %v6447_v56 = vmul.f32 %v11779_v48, %v11972_v24  ;;  %v12072_v6 = vrot.slane %v6408_v25, %v6933_v49 }
 0x641   : > { %6856 = vrot.lane.b32.xlu0 %v7969_v54, %s9458_s14  ;;  %v7971_v20 = vclamps-f32 %v6447_v56, 32.0  ;;  %v6378_v56 = vld [vmem:[%s13080_s5 + $0x18] sm:$0xff] }
 0x643   : > { %6694 = vrot.lane.b32.xlu1 %v9242_v19, %s9458_s14  ;;  %v9252_v19 = vpop.eup %9251 }
 0x644   : > { %v9254_v59 = vpop.eup %9253 }
 0x645   : > { %6852 = vrot.lane.b32.xlu0 %v7967_v62, %s9458_s14  ;;  %v12074_v62 = vrot.slane %v6968_v36, %v6933_v49 }
 0x647   : > { %6690 = vrot.lane.b32.xlu1 %v9244_v45, %s9458_s14  ;;  %v9256_v52 = vpop.eup %9255 }
 0x649   : > { %v6807_v55 = vpop.permute.xlu0 %6806  ;;  %6862 = vrot.lane.b32.xlu0 %v7972_v63, %s9458_s14  ;;  %v6376_v63 = vld [vmem:[%s13080_s5 + $0x8] sm:$0xff] }
 0x64b   : > { %6696 = vrot.lane.b32.xlu1 %v9246_v61, %s9458_s14  ;;  %v7973_v61 = vclamps-f32 %v6449_v21, 32.0 }
 0x64d   : > { %6858 = vrot.lane.b32.xlu0 %v7970_v37, %s9458_s14  ;;  %v6900_v37 = vadd.f32 %v6807_v55, %v6377_v0 }
 0x64e   : > { %v6803_v57 = vpop.permute.xlu0 %6802 }
 0x64f   : > { %6692 = vrot.lane.b32.xlu1 %v9248_v5, %s9458_s14  ;;  %v6898_v45 = vadd.f32 %v6803_v57, %v6375_v29  ;;  %v6938_v36 = vmul.f32 %v12072_v6, %v6900_v37  ;;  %v6381_v37 = vld [vmem:[%s13080_s5 + $0x30] sm:$0xff] }
 0x651   : > { %6860 = vrot.lane.b32.xlu0 %v7971_v20, %s9458_s14  ;;  %v6936_v46 = vmul.f32 %v12072_v6, %v6898_v45  ;;  %v6379_v45 = vld [vmem:[%s13080_s5 + $0x20] sm:$0xff] }
 0x652   : > { %v6809_v34 = vpop.permute.xlu0 %6808 }
 0x653   : > { %6702 = vrot.lane.b32.xlu1 %v9250_v22, %s9458_s14  ;;  %v6901_v20 = vadd.f32 %v6809_v34, %v6378_v56 }
 0x655   : > { %v6647_v26 = vpop.permute.xlu1 %6646  ;;  %6864 = vrot.lane.b32.xlu0 %v7973_v61, %s9458_s14  ;;  %v6939_v34 = vmul.f32 %v12072_v6, %v6901_v20 }
 0x656   : > { %v6805_v54 = vpop.permute.xlu0 %6804  ;;  %v6740_v22 = vmul.f32 %v12079_v28, %v6647_v26 }
 0x657   : > { %6698 = vrot.lane.b32.xlu1 %v9252_v19, %s9458_s14  ;;  %v6899_v13 = vadd.f32 %v6805_v54, %v6376_v63 }
 0x658   : > { %v6977_v49 = vmul.f32 %v12074_v62, %v6740_v22 }
 0x659   : > { %v6643_v41 = vpop.permute.xlu1 %6642  ;;  %5865 = vrot.lane.b32.xlu0 %v11797_v43, %s9459_s29  ;;  %v6937_v21 = vmul.f32 %v12072_v6, %v6899_v13 }
 0x65a   : > { %v6738_v48 = vmul.f32 %v12079_v28, %v6643_v41  ;;  %v6815_v5 = vpop.permute.xlu0 %6814  ;;  %v7009_v61 = vadd.f32 %v6977_v49, %v6938_v36 }
 0x65b   : > { %6700 = vrot.lane.b32.xlu1 %v9254_v59, %s9458_s14 }
 0x65c   : > { %v6975_v44 = vmul.f32 %v12074_v62, %v6738_v48 }
 0x65d   : > { %v6649_v17 = vpop.permute.xlu1 %6648  ;;  %5869 = vrot.lane.b32.xlu0 %v11791_v23, %s9459_s29 }
 0x65e   : > { %v7007_v57 = vadd.f32 %v6975_v44, %v6936_v46  ;;  %v6811_v25 = vpop.permute.xlu0 %6810  ;;  %v6741_v19 = vmul.f32 %v12079_v28, %v6649_v17 }
 0x65f   : > { %6704 = vrot.lane.b32.xlu1 %v9256_v52, %s9458_s14  ;;  %v6902_v46 = vadd.f32 %v6811_v25, %v6379_v45  ;;  %s9394_s14 = sshll.u32 %s9461_s16, 4  ;;  %s9395_s14 = int_to_ptr.vmem [resolvable:$false] %s9394_s14 }
 0x660   : > { %8983 = vmatprep.mubr.msk.f32.mxu1 %vm7041_vm6, %v7007_v57  ;;  %v6978_v41 = vmul.f32 %v12074_v62, %v6741_v19  ;;  %v6380_v57 = vld [vmem:[%s13080_s5 + $0x28] sm:$0xff]  ;;  %v6904_v19 = vadd.f32 %v6815_v5, %v6381_v37  ;;  %s9396_s22 = scalar_lea.vmem %s9395_s14, 8192  ;;  %p9397_p0 = scmp.lt.s32.totalorder %s13026_s25, %s9395_s14 }
 0x661   : > { %v6645_v29 = vpop.permute.xlu1 %6644  ;;  %5873 = vrot.lane.b32.xlu0 %v11823_v58, %s9459_s29  ;;  %v6940_v52 = vmul.f32 %v12072_v6, %v6902_v46  ;;  %p9398_p1 = scmp.lt.s32.totalorder %s9396_s22, %s9390_s17 }
 0x662   : > { %v6739_v26 = vmul.f32 %v12079_v28, %v6645_v29  ;;  %v6817_v48 = vpop.permute.xlu0 %6816  ;;  %v7010_v63 = vadd.f32 %v6978_v41, %v6939_v34  ;;  %v6942_v41 = vmul.f32 %v12072_v6, %v6904_v19 }
 0x663   : > { %5863 = vrot.lane.b32.xlu1 %v11787_v18, %s9459_s29  ;;  %p9399_p2 = por %p9398_p1, %p9397_p0 }
 0x664   : > { %v6976_v55 = vmul.f32 %v12074_v62, %v6739_v26  ;;  %v6382_v26 = vld [vmem:[%s13080_s5 + $0x38] sm:$0xff] }
 0x665   : > { %v6655_v54 = vpop.permute.xlu1 %6654  ;;  %5877 = vrot.lane.b32.xlu0 %v11815_v53, %s9459_s29  ;;  %v6905_v45 = vadd.f32 %v6817_v48, %v6382_v26  ;;  %p9400_p3 = pnand %p9399_p2, %p9393_p13 }
 0x666   : > { %v7008_v59 = vadd.f32 %v6976_v55, %v6937_v21  ;;  %v6744_v25 = vmul.f32 %v12079_v28, %v6655_v54 }
 0x667   : > { %5867 = vrot.lane.b32.xlu1 %v11782_v40, %s9459_s29  ;;  %v6813_v22 = vpop.permute.xlu0 %6812  ;;  %v6943_v48 = vmul.f32 %v12072_v6, %v6905_v45 }
 0x668   : > { %8984 = vmatmul.mubr.msk.f32.vlgmr.msra.gmra.mrb[224].mxu1 %vm7041_vm6, %v7008_v59  ;;  %v6903_v29 = vadd.f32 %v6813_v22, %v6380_v57  ;;  %v6981_v36 = vmul.f32 %v12074_v62, %v6744_v25  ;;  %v6383_v59 = vld [vmem:[%s13080_s5 + $0x40] sm:$0xff] }
 0x669   : > { %8986 = vmatprep.mubr.msk.f32.mxu1 %vm7041_vm6, %v7009_v61  ;;  %v6651_v44 = vpop.permute.xlu1 %6650  ;;  %5881 = vrot.lane.b32.xlu0 %v11850_v50, %s9459_s29 }
 0x66a   : > { %v6742_v17 = vmul.f32 %v12079_v28, %v6651_v44  ;;  %v6941_v54 = vmul.f32 %v12072_v6, %v6903_v29  ;;  %v6385_v29 = vld [vmem:[%s13080_s5 + $0x50] sm:$0xff] }
 0x66b   : > { %5871 = vrot.lane.b32.xlu1 %v11811_v33, %s9459_s29  ;;  %v6823_v49 = vpop.permute.xlu0 %6822 }
 0x66c   : > { %v6979_v0 = vmul.f32 %v12074_v62, %v6742_v17  ;;  %8987 = vmatmul.mubr.msk.f32.gmra.mrb[226].mxu1 %vm7041_vm6, %v7010_v63  ;;  %v7013_v63 = vadd.f32 %v6981_v36, %v6942_v41  ;;  %v6386_v36 = vld [vmem:[%s13080_s5 + $0x58] sm:$0xff] }
 0x66d   : > { %v6657_v13 = vpop.permute.xlu1 %6656  ;;  %5885 = vrot.lane.b32.xlu0 %v11842_v4, %s9459_s29 }
 0x66e   : > { %v7011_v56 = vadd.f32 %v6979_v0, %v6940_v52  ;;  %v6745_v21 = vmul.f32 %v12079_v28, %v6657_v13 }
 0x66f   : > { %5875 = vrot.lane.b32.xlu1 %v11805_v3, %s9459_s29  ;;  %v6819_v61 = vpop.permute.xlu0 %6818 }
 0x670   : > { %8989 = vmatprep.mubr.msk.f32.mxu1 %vm7041_vm6, %v7011_v56  ;;  %v6982_v46 = vmul.f32 %v12074_v62, %v6745_v21  ;;  %v6906_v17 = vadd.f32 %v6819_v61, %v6383_v59  ;;  %v6384_v56 = vld [vmem:[%s13080_s5 + $0x48] sm:$0xff] }
 0x671   : > { %v6653_v20 = vpop.permute.xlu1 %6652  ;;  %5889 = vrot.lane.b32.xlu0 %v11874_v16, %s9459_s29 }
 0x672   : > { %v6743_v55 = vmul.f32 %v12079_v28, %v6653_v20  ;;  %v7014_v57 = vadd.f32 %v6982_v46, %v6943_v48  ;;  %v6944_v13 = vmul.f32 %v12072_v6, %v6906_v17 }
 0x673   : > { %5879 = vrot.lane.b32.xlu1 %v11835_v14, %s9459_s29  ;;  %v6825_v52 = vpop.permute.xlu0 %6824 }
 0x674   : > { %v6980_v5 = vmul.f32 %v12074_v62, %v6743_v55  ;;  %v6908_v55 = vadd.f32 %v6823_v49, %v6385_v29  ;;  %v6909_v61 = vadd.f32 %v6825_v52, %v6386_v36 }
 0x675   : > { %v6663_v34 = vpop.permute.xlu1 %6662  ;;  %5893 = vrot.lane.b32.xlu0 %v11866_v27, %s9459_s29 }
 0x676   : > { %v7012_v44 = vadd.f32 %v6980_v5, %v6941_v54  ;;  %v6748_v20 = vmul.f32 %v12079_v28, %v6663_v34  ;;  %v6946_v46 = vmul.f32 %v12072_v6, %v6908_v55  ;;  %v6947_v52 = vmul.f32 %v12072_v6, %v6909_v61  ;;  %v6389_v55 = vld [vmem:[%s13080_s5 + $0x70] sm:$0xff] }
 0x677   : > { %5883 = vrot.lane.b32.xlu1 %v11829_v9, %s9459_s29  ;;  %v6821_v19 = vpop.permute.xlu0 %6820  ;;  %v5994_v61 = vmin.f32 %v11791_v23, 18.420681 }
 0x678   : > { %8990 = vmatmul.mubr.msk.f32.gmra.mrb[228].mxu1 %vm7041_vm6, %v7012_v44  ;;  %v6907_v21 = vadd.f32 %v6821_v19, %v6384_v56  ;;  %v6985_v59 = vmul.f32 %v12074_v62, %v6748_v20  ;;  %v6387_v44 = vld [vmem:[%s13080_s5 + $0x60] sm:$0xff]  ;;  %v6388_v20 = vld [vmem:[%s13080_s5 + $0x68] sm:$0xff] }
 0x679   : > { %v6659_v0 = vpop.permute.xlu1 %6658  ;;  %8992 = vmatprep.mubr.msk.f32.mxu1 %vm7041_vm6, %v7013_v63  ;;  %5897 = vrot.lane.b32.xlu0 %v11891_v31, %s9459_s29 }
 0x67a   : > { %v6746_v22 = vmul.f32 %v12079_v28, %v6659_v0  ;;  %v6945_v34 = vmul.f32 %v12072_v6, %v6907_v21 }
 0x67b   : > { %5887 = vrot.lane.b32.xlu1 %v11862_v47, %s9459_s29  ;;  %v6831_v54 = vpop.permute.xlu0 %6830 }
 0x67c   : > { %v6983_v37 = vmul.f32 %v12074_v62, %v6746_v22  ;;  %8993 = vmatmul.mubr.msk.f32.gmra.mrb[230].mxu1 %vm7041_vm6, %v7014_v57  ;;  %v7017_v57 = vadd.f32 %v6985_v59, %v6946_v46  ;;  %v6390_v46 = vld [vmem:[%s13080_s5 + $0x78] sm:$0xff] }
 0x67d   : > { %v6665_v25 = vpop.permute.xlu1 %6664  ;;  %5901 = vrot.lane.b32.xlu0 %v11888_v30, %s9459_s29 }
 0x67e   : > { %v7015_v26 = vadd.f32 %v6983_v37, %v6944_v13  ;;  %v6749_v5 = vmul.f32 %v12079_v28, %v6665_v25 }
 0x67f   : > { %5891 = vrot.lane.b32.xlu1 %v11855_v11, %s9459_s29  ;;  %v6827_v17 = vpop.permute.xlu0 %6826 }
 0x680   : > { %8995 = vmatprep.mubr.msk.f32.mxu1 %vm7041_vm6, %v7015_v26  ;;  %v6986_v48 = vmul.f32 %v12074_v62, %v6749_v5  ;;  %v6910_v22 = vadd.f32 %v6827_v17, %v6387_v44  ;;  %v5992_v26 = vmin.f32 %v11797_v43, 18.420681 }
 0x681   : > { %v6661_v45 = vpop.permute.xlu1 %6660  ;;  %5905 = vrot.lane.b32.xlu0 %v11912_v8, %s9459_s29 }
 0x682   : > { %v6747_v41 = vmul.f32 %v12079_v28, %v6661_v45  ;;  %v7018_v37 = vadd.f32 %v6986_v48, %v6947_v52  ;;  %v6948_v29 = vmul.f32 %v12072_v6, %v6910_v22 }
 0x683   : > { %5895 = vrot.lane.b32.xlu1 %v11883_v10, %s9459_s29  ;;  %v6833_v56 = vpop.permute.xlu0 %6832 }
 0x684   : > { %v6984_v49 = vmul.f32 %v12074_v62, %v6747_v41  ;;  %v5991_v41 = vmin.f32 %v11787_v18, 18.420681 }
 0x685   : > { %v6671_v63 = vpop.permute.xlu1 %6670  ;;  %5909 = vrot.lane.b32.xlu0 %v11909_v7, %s9459_s29 }
 0x686   : > { %v7016_v0 = vadd.f32 %v6984_v49, %v6945_v34  ;;  %v6752_v5 = vmul.f32 %v12079_v28, %v6671_v63  ;;  %v6025_v34 = vmul.f32 1.442695, %v5992_v26  ;;  %v6912_v49 = vadd.f32 %v6831_v54, %v6389_v55 }
 0x687   : > { %5899 = vrot.lane.b32.xlu1 %v11880_v51, %s9459_s29  ;;  %v6829_v36 = vpop.permute.xlu0 %6828  ;;  %v6023_v52 = vmul.f32 1.442695, %v5991_v41  ;;  %v6913_v54 = vadd.f32 %v6833_v56, %v6390_v46 }
 0x688   : > { %8996 = vmatmul.mubr.msk.f32.gmra.mrb[232].mxu1 %vm7041_vm6, %v7016_v0  ;;  %v6911_v59 = vadd.f32 %v6829_v36, %v6388_v20  ;;  %v5993_v0 = vmin.f32 %v11782_v40, 18.420681  ;;  %9257 = vpow2.f32 %v6025_v34 }
 0x689   : > { %v6667_v13 = vpop.permute.xlu1 %6666  ;;  %8998 = vmatprep.mubr.msk.f32.mxu1 %vm7041_vm6, %v7017_v57  ;;  %5913 = vrot.lane.b32.xlu0 %v11944_v15, %s9459_s29  ;;  %v6989_v57 = vmul.f32 %v12074_v62, %v6752_v5  ;;  %9259 = vpow2.f32 %v6023_v52  ;;  %v6951_v5 = vmul.f32 %v12072_v6, %v6913_v54  ;;  %v6000_v54 = vmin.f32 %v11850_v50, 18.420681 }
 0x68a   : > { %v6750_v25 = vmul.f32 %v12079_v28, %v6667_v13  ;;  %v6949_v22 = vmul.f32 %v12072_v6, %v6911_v59  ;;  %v6027_v55 = vmul.f32 1.442695, %v5993_v0  ;;  %v5998_v59 = vmin.f32 %v11815_v53, 18.420681 }
 0x68b   : > { %5903 = vrot.lane.b32.xlu1 %v11904_v32, %s9459_s29  ;;  %v12235_v63 = vpop.permute.xlu0 %6838 }
 0x68c   : > { %v6987_v19 = vmul.f32 %v12074_v62, %v6750_v25  ;;  %8999 = vmatmul.mubr.msk.f32.gmra.mrb[234].mxu1 %vm7041_vm6, %v7018_v37  ;;  %v6029_v37 = vmul.f32 1.442695, %v5994_v61  ;;  %v5996_v25 = vmin.f32 %v11823_v58, 18.420681  ;;  %v6037_v52 = vmul.f32 1.442695, %v5998_v59 }
 0x68d   : > { %v6673_v21 = vpop.permute.xlu1 %6672  ;;  %5917 = vrot.lane.b32.xlu0 %v11940_v39, %s9459_s29 }
 0x68e   : > { %v7019_v45 = vadd.f32 %v6987_v19, %v6948_v29  ;;  %v6753_v48 = vmul.f32 %v12079_v28, %v6673_v21  ;;  %v6950_v29 = vmul.f32 %v12072_v6, %v6912_v49  ;;  %v6391_v19 = vld [vmem:[%s13080_s5 + $0x80] sm:$0xff]  ;;  %9261 = vpow2.f32 %v6029_v37  ;;  %v6393_v37 = vld [vmem:[%s13080_s5 + $0x90] sm:$0xff] }
 0x68f   : > { %5907 = vrot.lane.b32.xlu1 %v11900_v60, %s9459_s29  ;;  %v6835_v20 = vpop.permute.xlu0 %6834  ;;  %v6033_v61 = vmul.f32 1.442695, %v5996_v25  ;;  %9263 = vpow2.f32 %v6027_v55 }
 0x690   : > { %9001 = vmatprep.mubr.msk.f32.mxu1 %vm7041_vm6, %v7019_v45  ;;  %v6990_v56 = vmul.f32 %v12074_v62, %v6753_v48  ;;  %v7021_v36 = vadd.f32 %v6989_v57, %v6950_v29  ;;  %v5995_v45 = vmin.f32 %v11811_v33, 18.420681  ;;  %v6914_v41 = vadd.f32 %v6835_v20, %v6391_v19 }
 0x691   : > { %v6669_v44 = vpop.permute.xlu1 %6668  ;;  %5921 = vrot.lane.b32.xlu0 %v11972_v24, %s9459_s29  ;;  %v5997_v48 = vmin.f32 %v11805_v3, 18.420681  ;;  %9265 = vpow2.f32 %v6033_v61 }
 0x692   : > { %v6751_v17 = vmul.f32 %v12079_v28, %v6669_v44  ;;  %v7022_v49 = vadd.f32 %v6990_v56, %v6951_v5  ;;  %v6952_v0 = vmul.f32 %v12072_v6, %v6914_v41  ;;  %v12278_v19 = vpop.eup %9257  ;;  %v6916_v5 = vadd.f32 %v12235_v63, %v6393_v37  ;;  %v6395_v37 = vld [vmem:[%s13080_s5 + $0xa0] sm:$0xff] }
 0x693   : > { %5911 = vrot.lane.b32.xlu1 %v11938_v12, %s9459_s29  ;;  %v6841_v46 = vpop.permute.xlu0 %6840  ;;  %v6035_v56 = vmul.f32 1.442695, %v5997_v48  ;;  %v12292_v59 = vpop.eup %9259  ;;  %v6001_v48 = vmin.f32 %v11829_v9, 18.420681 }
 0x694   : > { %v6988_v13 = vmul.f32 %v12074_v62, %v6751_v17  ;;  %v6031_v17 = vmul.f32 1.442695, %v5995_v45  ;;  %v6041_v45 = vmul.f32 1.442695, %v6000_v54 }
 0x695   : > { %v6679_v26 = vpop.permute.xlu1 %6678  ;;  %5925 = vrot.lane.b32.xlu0 %v11970_v42, %s9459_s29 }
 0x696   : > { %v7020_v21 = vadd.f32 %v6988_v13, %v6949_v22  ;;  %v6392_v22 = vld [vmem:[%s13080_s5 + $0x88] sm:$0xff]  ;;  %v6756_v20 = vmul.f32 %v12079_v28, %v6679_v26  ;;  %9267 = vpow2.f32 %v6031_v17  ;;  %v6394_v26 = vld [vmem:[%s13080_s5 + $0x98] sm:$0xff] }
 0x697   : > { %5915 = vrot.lane.b32.xlu1 %v11932_v35, %s9459_s29  ;;  %v6837_v25 = vpop.permute.xlu0 %6836  ;;  %9269 = vpow2.f32 %v6037_v52 }
 0x698   : > { %9002 = vmatmul.mubr.msk.f32.gmra.mrb[236].mxu1 %vm7041_vm6, %v7020_v21  ;;  %v5999_v21 = vmin.f32 %v11835_v14, 18.420681  ;;  %v6915_v55 = vadd.f32 %v6837_v25, %v6392_v22  ;;  %9271 = vpow2.f32 %v6035_v56  ;;  %v6993_v63 = vmul.f32 %v12074_v62, %v6756_v20 }
 0x699   : > { %v6675_v34 = vpop.permute.xlu1 %6674  ;;  %9004 = vmatprep.mubr.msk.f32.mxu1 %vm7041_vm6, %v7021_v36  ;;  %6153 = vrot.lane.b32.xlu0 %v12278_v19, %s9459_s29  ;;  %v6002_v36 = vmin.f32 %v11842_v4, 18.420681  ;;  %9273 = vpow2.f32 %v6041_v45  ;;  %v6004_v22 = vmin.f32 %v11874_v16, 18.420681  ;;  %v6003_v45 = vmin.f32 %v11862_v47, 18.420681 }
 0x69a   : > { %v6754_v44 = vmul.f32 %v12079_v28, %v6675_v34  ;;  %v6039_v17 = vmul.f32 1.442695, %v5999_v21 }
 0x69b   : > { %5919 = vrot.lane.b32.xlu1 %v11968_v38, %s9459_s29  ;;  %v12294_v61 = vpop.permute.xlu0 %6846  ;;  %v6045_v54 = vmul.f32 1.442695, %v6002_v36 }
 0x69c   : > { %v6991_v57 = vmul.f32 %v12074_v62, %v6754_v44  ;;  %9005 = vmatmul.mubr.msk.f32.gmra.mrb[238].mxu1 %vm7041_vm6, %v7022_v49  ;;  %v12298_v44 = vpop.eup %9261  ;;  %9275 = vpow2.f32 %v6039_v17 }
 0x69d   : > { %v6681_v13 = vpop.permute.xlu1 %6680  ;;  %6157 = vrot.lane.b32.xlu0 %v12298_v44, %s9459_s29  ;;  %9277 = vpow2.f32 %v6045_v54  ;;  %v6047_v54 = vmul.f32 1.442695, %v6003_v45 }
 0x69e   : > { %v7023_v29 = vadd.f32 %v6991_v57, %v6952_v0  ;;  %v6757_v34 = vmul.f32 %v12079_v28, %v6681_v13  ;;  %v6917_v0 = vadd.f32 %v6841_v46, %v6394_v26  ;;  %v6953_v57 = vmul.f32 %v12072_v6, %v6915_v55 }
 0x69f   : > { %5923 = vrot.lane.b32.xlu1 %v11961_v2, %s9459_s29  ;;  %v6954_v13 = vmul.f32 %v12072_v6, %v6916_v5  ;;  %v6843_v56 = vpop.permute.xlu0 %6842  ;;  %v6043_v55 = vmul.f32 1.442695, %v6001_v48 }
 0x6a0   : > { %9007 = vmatprep.mubr.msk.f32.mxu1 %vm7041_vm6, %v7023_v29  ;;  %v12313_v29 = vpop.eup %9263  ;;  %v6994_v46 = vmul.f32 %v12074_v62, %v6757_v34  ;;  %v6955_v5 = vmul.f32 %v12072_v6, %v6917_v0  ;;  %v6918_v26 = vadd.f32 %v6843_v56, %v6395_v37  ;;  %v6049_v34 = vmul.f32 1.442695, %v6004_v22 }
 0x6a1   : > { %v6677_v41 = vpop.permute.xlu1 %6676  ;;  %v12316_v21 = vpop.eup %9265  ;;  %v7025_v36 = vadd.f32 %v6993_v63, %v6954_v13  ;;  %9279 = vpow2.f32 %v6043_v55  ;;  %v6008_v56 = vmin.f32 %v11891_v31, 18.420681 }
 0x6a2   : > { %v6755_v49 = vmul.f32 %v12079_v28, %v6677_v41  ;;  %6161 = vrot.lane.b32.xlu0 %v12316_v21, %s9459_s29  ;;  %v6006_v41 = vmin.f32 %v11866_v27, 18.420681  ;;  %v12327_v48 = vpop.eup %9267  ;;  %v7026_v63 = vadd.f32 %v6994_v46, %v6955_v5  ;;  %v6956_v22 = vmul.f32 %v12072_v6, %v6918_v26 }
 0x6a3   : > { %6151 = vrot.lane.b32.xlu1 %v12292_v59, %s9459_s29  ;;  %v6849_v17 = vpop.permute.xlu0 %6848  ;;  %v12330_v0 = vpop.eup %9269  ;;  %9281 = vpow2.f32 %v6049_v34 }
 0x6a4   : > { %v6992_v52 = vmul.f32 %v12074_v62, %v6755_v49  ;;  %v12340_v37 = vpop.eup %9271  ;;  %v6053_v46 = vmul.f32 1.442695, %v6006_v41  ;;  %9283 = vpow2.f32 %v6047_v54  ;;  %v6007_v41 = vmin.f32 %v11883_v10, 18.420681 }
 0x6a5   : > { %v6687_v25 = vpop.permute.xlu1 %6686  ;;  %v12349_v26 = vpop.eup %9273 }
 0x6a6   : > { %v7024_v20 = vadd.f32 %v6992_v52, %v6953_v57  ;;  %v6005_v52 = vmin.f32 %v11855_v11, 18.420681  ;;  %6165 = vrot.lane.b32.xlu0 %v12330_v0, %s9459_s29  ;;  %9285 = vpow2.f32 %v6053_v46  ;;  %v12363_v54 = vpop.eup %9275  ;;  %v6009_v46 = vmin.f32 %v11880_v51, 18.420681 }
 0x6a7   : > { %6155 = vrot.lane.b32.xlu1 %v12313_v29, %s9459_s29  ;;  %v6845_v45 = vpop.permute.xlu0 %6844 }
 0x6a8   : > { %9008 = vmatmul.mubr.msk.f32.gmra.mrb[240].mxu1 %vm7041_vm6, %v7024_v20  ;;  %v6396_v20 = vld [vmem:[%s13080_s5 + $0xa8] sm:$0xff] }
 0x6a9   : > { %v6683_v49 = vpop.permute.xlu1 %6682  ;;  %9010 = vmatprep.mubr.msk.f32.mxu1 %vm7041_vm6, %v7025_v36  ;;  %v6397_v36 = vld [vmem:[%s13080_s5 + $0xb0] sm:$0xff]  ;;  %v6919_v34 = vadd.f32 %v6845_v45, %v6396_v20 }
 0x6aa   : > { %v6758_v57 = vmul.f32 %v12079_v28, %v6683_v49  ;;  %v6051_v49 = vmul.f32 1.442695, %v6005_v52  ;;  %6169 = vrot.lane.b32.xlu0 %v12349_v26, %s9459_s29  ;;  %v6920_v52 = vadd.f32 %v12294_v61, %v6397_v36 }
 0x6ab   : > { %6159 = vrot.lane.b32.xlu1 %v12327_v48, %s9459_s29  ;;  %v12365_v1 = vpop.permute.xlu0 %6854 }
 0x6ac   : > { %v6995_v13 = vmul.f32 %v12074_v62, %v6758_v57  ;;  %9011 = vmatmul.mubr.msk.f32.gmra.mrb[242].mxu1 %vm7041_vm6, %v7026_v63  ;;  %v6760_v63 = vmul.f32 %v12079_v28, %v6687_v25  ;;  %v6010_v57 = vmin.f32 %v11888_v30, 18.420681  ;;  %v6398_v25 = vld [vmem:[%s13080_s5 + $0xb8] sm:$0xff]  ;;  %9287 = vpow2.f32 %v6051_v49 }
 0x6ad   : > { %v6689_v55 = vpop.permute.xlu1 %6688  ;;  %v6921_v36 = vadd.f32 %v6849_v17, %v6398_v25  ;;  %v6957_v30 = vmul.f32 %v12072_v6, %v6919_v34  ;;  %v6012_v49 = vmin.f32 %v11912_v8, 18.420681  ;;  %v6958_v51 = vmul.f32 %v12072_v6, %v6920_v52 }
 0x6ae   : > { %v7027_v5 = vadd.f32 %v6995_v13, %v6956_v22  ;;  %v6057_v22 = vmul.f32 1.442695, %v6008_v56  ;;  %v6761_v20 = vmul.f32 %v12079_v28, %v6689_v55  ;;  %v6997_v61 = vmul.f32 %v12074_v62, %v6760_v63  ;;  %v6399_v63 = vld [vmem:[%s13080_s5 + $0xc0] sm:$0xff] }
 0x6af   : > { %6163 = vrot.lane.b32.xlu1 %v12340_v37, %s9459_s29  ;;  %v6055_v56 = vmul.f32 1.442695, %v6007_v41  ;;  %v6851_v34 = vpop.permute.xlu0 %6850  ;;  %v6959_v52 = vmul.f32 %v12072_v6, %v6921_v36 }
 0x6b0   : > { %9013 = vmatprep.mubr.msk.f32.mxu1 %vm7041_vm6, %v7027_v5  ;;  %v12369_v5 = vpop.eup %9277  ;;  %9289 = vpow2.f32 %v6057_v22  ;;  %v6998_v17 = vmul.f32 %v12074_v62, %v6761_v20  ;;  %v6011_v22 = vmin.f32 %v11904_v32, 18.420681  ;;  %v6922_v8 = vadd.f32 %v6851_v34, %v6399_v63 }
 0x6b1   : > { %v6685_v13 = vpop.permute.xlu1 %6684  ;;  %6173 = vrot.lane.b32.xlu0 %v12369_v5, %s9459_s29  ;;  %v12384_v41 = vpop.eup %9279  ;;  %9291 = vpow2.f32 %v6055_v56  ;;  %v6065_v20 = vmul.f32 1.442695, %v6012_v49  ;;  %v6013_v63 = vmin.f32 %v11900_v60, 18.420681 }
 0x6b2   : > { %v6759_v45 = vmul.f32 %v12079_v28, %v6685_v13  ;;  %v6061_v13 = vmul.f32 1.442695, %v6010_v57  ;;  %v12387_v31 = vpop.eup %9281  ;;  %v7029_v57 = vadd.f32 %v6997_v61, %v6958_v51  ;;  %v7030_v61 = vadd.f32 %v6998_v17, %v6959_v52 }
 0x6b3   : > { %6167 = vrot.lane.b32.xlu1 %v12363_v54, %s9459_s29  ;;  %v12398_v51 = vpop.eup %9283  ;;  %v6857_v56 = vpop.permute.xlu0 %6856  ;;  %v6960_v49 = vmul.f32 %v12072_v6, %v6922_v8  ;;  %v6401_v8 = vld [vmem:[%s13080_s5 + $0xd0] sm:$0xff] }
 0x6b4   : > { %v6996_v55 = vmul.f32 %v12074_v62, %v6759_v45  ;;  %v6059_v45 = vmul.f32 1.442695, %v6009_v46  ;;  %9293 = vpow2.f32 %v6061_v13  ;;  %v12401_v36 = vpop.eup %9285  ;;  %v6063_v13 = vmul.f32 1.442695, %v6011_v22 }
 0x6b5   : > { %v6695_v10 = vpop.permute.xlu1 %6694  ;;  %6177 = vrot.lane.b32.xlu0 %v12387_v31, %s9459_s29 }
 0x6b6   : > { %v7028_v25 = vadd.f32 %v6996_v55, %v6957_v30  ;;  %v6014_v30 = vmin.f32 %v11909_v7, 18.420681  ;;  %9295 = vpow2.f32 %v6059_v45  ;;  %v12411_v17 = vpop.eup %9287  ;;  %v6400_v45 = vld [vmem:[%s13080_s5 + $0xc8] sm:$0xff]  ;;  %v6764_v60 = vmul.f32 %v12079_v28, %v6695_v10  ;;  %v6402_v10 = vld [vmem:[%s13080_s5 + $0xd8] sm:$0xff] }
 0x6b7   : > { %6171 = vrot.lane.b32.xlu1 %v12384_v41, %s9459_s29  ;;  %9297 = vpow2.f32 %v6065_v20  ;;  %v6853_v52 = vpop.permute.xlu0 %6852 }
 0x6b8   : > { %9014 = vmatmul.mubr.msk.f32.gmra.mrb[244].mxu1 %vm7041_vm6, %v7028_v25  ;;  %v6069_v25 = vmul.f32 1.442695, %v6014_v30  ;;  %9299 = vpow2.f32 %v6063_v13  ;;  %v6015_v30 = vmin.f32 %v11938_v12, 18.420681  ;;  %v6923_v20 = vadd.f32 %v6853_v52, %v6400_v45 }
 0x6b9   : > { %v6691_v46 = vpop.permute.xlu1 %6690  ;;  %9016 = vmatprep.mubr.msk.f32.mxu1 %vm7041_vm6, %v7029_v57  ;;  %6181 = vrot.lane.b32.xlu0 %v12401_v36, %s9459_s29  ;;  %v6016_v57 = vmin.f32 %v11944_v15, 18.420681 }
 0x6ba   : > { %v6762_v55 = vmul.f32 %v12079_v28, %v6691_v46  ;;  %9301 = vpow2.f32 %v6069_v25  ;;  %v6017_v25 = vmin.f32 %v11932_v35, 18.420681 }
 0x6bb   : > { %6175 = vrot.lane.b32.xlu1 %v12398_v51, %s9459_s29  ;;  %v6863_v12 = vpop.permute.xlu0 %6862 }
 0x6bc   : > { %v6999_v34 = vmul.f32 %v12074_v62, %v6762_v55  ;;  %9017 = vmatmul.mubr.msk.f32.gmra.mrb[246].mxu1 %vm7041_vm6, %v7030_v61  ;;  %v12420_v55 = vpop.eup %9289  ;;  %v6067_v61 = vmul.f32 1.442695, %v6013_v63  ;;  %v6924_v63 = vadd.f32 %v12365_v1, %v6401_v8  ;;  %v6071_v1 = vmul.f32 1.442695, %v6015_v30 }
 0x6bd   : > { %v6697_v22 = vpop.permute.xlu1 %6696  ;;  %6185 = vrot.lane.b32.xlu0 %v12420_v55, %s9459_s29  ;;  %v12434_v13 = vpop.eup %9291  ;;  %v6925_v8 = vadd.f32 %v6857_v56, %v6402_v10 }
 0x6be   : > { %v7031_v46 = vadd.f32 %v6999_v34, %v6960_v49  ;;  %v6018_v49 = vmin.f32 %v11940_v39, 18.420681  ;;  %v6073_v34 = vmul.f32 1.442695, %v6016_v57  ;;  %v6765_v45 = vmul.f32 %v12079_v28, %v6697_v22  ;;  %v12438_v7 = vpop.eup %9293 }
 0x6bf   : > { %6179 = vrot.lane.b32.xlu1 %v12411_v17, %s9459_s29  ;;  %9303 = vpow2.f32 %v6067_v61  ;;  %v7001_v57 = vmul.f32 %v12074_v62, %v6764_v60  ;;  %v6022_v61 = vmin.f32 %v11970_v42, 18.420681  ;;  %v6962_v35 = vmul.f32 %v12072_v6, %v6924_v63  ;;  %v6403_v60 = vld [vmem:[%s13080_s5 + $0xe0] sm:$0xff] }
 0x6c0   : > { %9019 = vmatprep.mubr.msk.f32.mxu1 %vm7041_vm6, %v7031_v46  ;;  %v6961_v46 = vmul.f32 %v12072_v6, %v6923_v20  ;;  %9305 = vpow2.f32 %v6073_v34  ;;  %v12453_v30 = vpop.eup %9295  ;;  %v7002_v56 = vmul.f32 %v12074_v62, %v6765_v45  ;;  %v6859_v20 = vpop.permute.xlu0 %6858  ;;  %v6019_v34 = vmin.f32 %v11968_v38, 18.420681 }
 0x6c1   : > { %v6693_v15 = vpop.permute.xlu1 %6692  ;;  %6189 = vrot.lane.b32.xlu0 %v12438_v7, %s9459_s29  ;;  %v12456_v32 = vpop.eup %9297  ;;  %9307 = vpow2.f32 %v6071_v1  ;;  %v6963_v63 = vmul.f32 %v12072_v6, %v6925_v8  ;;  %v6926_v42 = vadd.f32 %v6859_v20, %v6403_v60  ;;  %v6085_v45 = vmul.f32 1.442695, %v6022_v61  ;;  %v6405_v1 = vld [vmem:[%s13080_s5 + $0xf0] sm:$0xff] }
 0x6c2   : > { %v6763_v52 = vmul.f32 %v12079_v28, %v6693_v15  ;;  %v6077_v15 = vmul.f32 1.442695, %v6018_v49  ;;  %v7033_v49 = vadd.f32 %v7001_v57, %v6962_v35  ;;  %v6404_v35 = vld [vmem:[%s13080_s5 + $0xe8] sm:$0xff]  ;;  %v12470_v57 = vpop.eup %9299  ;;  %v6021_v60 = vmin.f32 %v11961_v2, 18.420681 }
 0x6c3   : > { %6183 = vrot.lane.b32.xlu1 %v12434_v13, %s9459_s29  ;;  %13152 = vst [vmem:[#allocation24_spill] sm:$0xff] %v12470_v57  ;;  %v7034_v8 = vadd.f32 %v7002_v56, %v6963_v63 }
 0x6c4   : > { %v7000_v22 = vmul.f32 %v12074_v62, %v6763_v52  ;;  %v6075_v52 = vmul.f32 1.442695, %v6017_v25  ;;  %9309 = vpow2.f32 %v6077_v15  ;;  %v12476_v61 = vpop.eup %9301  ;;  %v6083_v38 = vmul.f32 1.442695, %v6021_v60 }
 0x6c5   : > { %v6703_v39 = vpop.permute.xlu1 %6702  ;;  %6193 = vrot.lane.b32.xlu0 %v12456_v32, %s9459_s29  ;;  %13153 = vst [vmem:[#allocation25_spill] sm:$0xff] %v12476_v61 }
 0x6c6   : > { %v7032_v10 = vadd.f32 %v7000_v22, %v6961_v46  ;;  %v6020_v46 = vmin.f32 %v11972_v24, 18.420681  ;;  %v6861_v22 = vpop.permute.xlu0 %6860  ;;  %9311 = vpow2.f32 %v6075_v52  ;;  %v6768_v20 = vmul.f32 %v12079_v28, %v6703_v39  ;;  %v6406_v39 = vld [vmem:[%s13080_s5 + $0xf8] sm:$0xff] }
 0x6c7   : > { %6187 = vrot.lane.b32.xlu1 %v12453_v30, %s9459_s29  ;;  %v6927_v24 = vadd.f32 %v6861_v22, %v6404_v35  ;;  %9313 = vpow2.f32 %v6085_v45 }
 0x6c8   : > { %9020 = vmatmul.mubr.msk.f32.gmra.mrb[248].mxu1 %vm7041_vm6, %v7032_v10  ;;  %v6079_v10 = vmul.f32 1.442695, %v6019_v34  ;;  %v6081_v52 = vmul.f32 1.442695, %v6020_v46 }
 0x6c9   : > { %v6699_v25 = vpop.permute.xlu1 %6698  ;;  %9022 = vmatprep.mubr.msk.f32.mxu1 %vm7041_vm6, %v7033_v49  ;;  %v6964_v49 = vmul.f32 %v12072_v6, %v6926_v42  ;;  %6197 = vrot.lane.b32.xlu0 %v12476_v61, %s9459_s29  ;;  %v12487_v63 = vpop.eup %9303 }
 0x6ca   : > { %v6766_v15 = vmul.f32 %v12079_v28, %v6699_v25  ;;  %13154 = vst [vmem:[#allocation26_spill] sm:$0xff] %v12487_v63  ;;  %v6928_v25 = vadd.f32 %v6863_v12, %v6405_v1  ;;  %v6865_v2 = vpop.permute.xlu0 %6864  ;;  %v12493_v22 = vpop.eup %9305  ;;  %9315 = vpow2.f32 %v6079_v10  ;;  %v6965_v12 = vmul.f32 %v12072_v6, %v6927_v24 }
 0x6cb   : > { %6191 = vrot.lane.b32.xlu1 %v12470_v57, %s9459_s29  ;;  %13155 = vst [vmem:[#allocation27_spill] sm:$0xff] %v12493_v22  ;;  %v6929_v45 = vadd.f32 %v6865_v2, %v6406_v39  ;;  %9317 = vpow2.f32 %v6081_v52  ;;  %v12504_v60 = vpop.eup %9307 }
 0x6cc   : > { %v7003_v56 = vmul.f32 %v12074_v62, %v6766_v15  ;;  %9023 = vmatmul.mubr.msk.f32.gmra.mrb[250].mxu1 %vm7041_vm6, %v7034_v8  ;;  %v7005_v15 = vmul.f32 %v12074_v62, %v6768_v20  ;;  %v6966_v1 = vmul.f32 %v12072_v6, %v6928_v25  ;;  %13156 = vst [vmem:[#allocation28_spill] sm:$0xff] %v12504_v60  ;;  %9319 = vpow2.f32 %v6083_v38 }
 0x6cd   : > { %v6701_v34 = vpop.permute.xlu1 %6700  ;;  %6201 = vrot.lane.b32.xlu0 %v12493_v22, %s9459_s29 }
 0x6ce   : > { %v7035_v42 = vadd.f32 %v7003_v56, %v6964_v49  ;;  %v6767_v35 = vmul.f32 %v12079_v28, %v6701_v34  ;;  %v12506_v20 = vpop.permute.xlu0 %5865  ;;  %v12509_v24 = vpop.eup %9309  ;;  %v7037_v49 = vadd.f32 %v7005_v15, %v6966_v1  ;;  %v6967_v56 = vmul.f32 %v12072_v6, %v6929_v45 }
 0x6cf   : > { %6195 = vrot.lane.b32.xlu1 %v12487_v63, %s9459_s29  ;;  %13157 = vst [vmem:[#allocation29_spill] sm:$0xff] %v12509_v24  ;;  %v13160_v6 = vmov 0.0  }
 0x6d0   : > { %v7004_v46 = vmul.f32 %v12074_v62, %v6767_v35  ;;  %9025 = vmatprep.mubr.msk.f32.mxu1 %vm7041_vm6, %v7035_v42  ;;  %v12518_v25 = vpop.eup %9311  ;;  %7368 = vst [vmem:[%s12535_s24 + $0x8] sm:$0xff] %v13160_v6  ;;  %7367 = vst [vmem:[%s12535_s24] sm:$0xff] %v13160_v6 }
 0x6d1   : > { %v6705_v8 = vpop.permute.xlu1 %6704  ;;  %6205 = vrot.lane.b32.xlu0 %v12509_v24, %s9459_s29  ;;  %13158 = vst [vmem:[#allocation30_spill] sm:$0xff] %v12518_v25  ;;  %v12528_v38 = vpop.eup %9313  ;;  %7369 = vst [vmem:[%s12535_s24 + $0x10] sm:$0xff] %v13160_v6 }
 0x6d2   : > { %v7036_v10 = vadd.f32 %v7004_v46, %v6965_v12  ;;  %v6769_v2 = vmul.f32 %v12079_v28, %v6705_v8  ;;  %v12524_v28 = vpop.permute.xlu0 %5869  ;;  %13159 = vst [vmem:[#allocation31_spill] sm:$0xff] %v12528_v38  ;;  %7370 = vst [vmem:[%s12535_s24 + $0x18] sm:$0xff] %v13160_v6 }
 0x6d3   : > { %6199 = vrot.lane.b32.xlu1 %v12504_v60, %s9459_s29  ;;  %7371 = vst [vmem:[%s12535_s24 + $0x20] sm:$0xff] %v13160_v6  ;;  %7372 = vst [vmem:[%s12535_s24 + $0x28] sm:$0xff] %v13160_v6 }
 0x6d4   : > { %v7006_v52 = vmul.f32 %v12074_v62, %v6769_v2  ;;  %9026 = vmatmul.mubr.msk.f32.gmra.mrb[252].mxu1 %vm7041_vm6, %v7036_v10  ;;  %7373 = vst [vmem:[%s12535_s24 + $0x30] sm:$0xff] %v13160_v6  ;;  %7374 = vst [vmem:[%s12535_s24 + $0x38] sm:$0xff] %v13160_v6  ;;  %v12603_v42 = vpop.eup %9315 }
 0x6d5   : > { %v12520_v39 = vpop.permute.xlu1 %5863  ;;  %9028 = vmatprep.mubr.msk.f32.mxu1 %vm7041_vm6, %v7037_v49  ;;  %6213 = vrot.lane.b32.xlu0 %v12528_v38, %s9459_s29  ;;  %7375 = vst [vmem:[%s12535_s24 + $0x40] sm:$0xff] %v13160_v6  ;;  %7376 = vst [vmem:[%s12535_s24 + $0x48] sm:$0xff] %v13160_v6  ;;  %v12607_v15 = vpop.eup %9317 }
 0x6d6   : > { %v7038_v34 = vadd.f32 %v7006_v52, %v6967_v56  ;;  %7377 = vst [vmem:[%s12535_s24 + $0x50] sm:$0xff] %v13160_v6  ;;  %7378 = vst [vmem:[%s12535_s24 + $0x58] sm:$0xff] %v13160_v6  ;;  %v12605_v35 = vpop.permute.xlu0 %5873  ;;  %v12615_v45 = vpop.eup %9319 }
 0x6d7   : > { %6203 = vrot.lane.b32.xlu1 %v12518_v25, %s9459_s29  ;;  %7379 = vst [vmem:[%s12535_s24 + $0x60] sm:$0xff] %v13160_v6  ;;  %7380 = vst [vmem:[%s12535_s24 + $0x68] sm:$0xff] %v13160_v6 }
 0x6d8   : > { %9029 = vmatmul.mubr.msk.f32.gmra.mrb[254].mxu1 %vm7041_vm6, %v7038_v34  ;;  %7381 = vst [vmem:[%s12535_s24 + $0x70] sm:$0xff] %v13160_v6  ;;  %7382 = vst [vmem:[%s12535_s24 + $0x78] sm:$0xff] %v13160_v6 }
 0x6d9   : > { %7383 = vst [vmem:[%s12535_s24 + $0x80] sm:$0xff] %v13160_v6  ;;  %7384 = vst [vmem:[%s12535_s24 + $0x88] sm:$0xff] %v13160_v6  ;;  %v12601_v62 = vpop.permute.xlu1 %5867  ;;  %6209 = vrot.lane.b32.xlu0 %v12607_v15, %s9459_s29 }
 0x6da   : > { %7385 = vst [vmem:[%s12535_s24 + $0x90] sm:$0xff] %v13160_v6  ;;  %7386 = vst [vmem:[%s12535_s24 + $0x98] sm:$0xff] %v13160_v6  ;;  %v12617_v46 = vpop.permute.xlu0 %5877 }
 0x6db   : > { %7387 = vst [vmem:[%s12535_s24 + $0xa0] sm:$0xff] %v13160_v6  ;;  %7388 = vst [vmem:[%s12535_s24 + $0xa8] sm:$0xff] %v13160_v6  ;;  %6207 = vrot.lane.b32.xlu1 %v12603_v42, %s9459_s29 }
 0x6dc   : > { %7389 = vst [vmem:[%s12535_s24 + $0xb0] sm:$0xff] %v13160_v6  ;;  %7390 = vst [vmem:[%s12535_s24 + $0xb8] sm:$0xff] %v13160_v6 }
 0x6dd   : > { %7391 = vst [vmem:[%s12535_s24 + $0xc0] sm:$0xff] %v13160_v6  ;;  %7392 = vst [vmem:[%s12535_s24 + $0xc8] sm:$0xff] %v13160_v6  ;;  %v12613_v12 = vpop.permute.xlu1 %5871 }
 0x6de   : > { %7393 = vst [vmem:[%s12535_s24 + $0xd0] sm:$0xff] %v13160_v6  ;;  %7394 = vst [vmem:[%s12535_s24 + $0xd8] sm:$0xff] %v13160_v6  ;;  %v12623_v8 = vpop.permute.xlu0 %5881 }
 0x6df   : > { %7395 = vst [vmem:[%s12535_s24 + $0xe0] sm:$0xff] %v13160_v6  ;;  %7396 = vst [vmem:[%s12535_s24 + $0xe8] sm:$0xff] %v13160_v6  ;;  %6211 = vrot.lane.b32.xlu1 %v12615_v45, %s9459_s29  ;;  %s9460_s29 = smov 36  }
 0x6e0   : > { %7397 = vst [vmem:[%s12535_s24 + $0xf0] sm:$0xff] %v13160_v6  ;;  %7398 = vst [vmem:[%s12535_s24 + $0xf8] sm:$0xff] %v13160_v6 }
 0x6e1   : > { %13161 = vst [vmem:[#allocation32_spill] sm:$0xff] %v12603_v42  ;;  %13162 = vst [vmem:[#allocation33_spill] sm:$0xff] %v12607_v15  ;;  %v12621_v1 = vpop.permute.xlu1 %5875 }
 0x6e2   : > { %13163 = vst [vmem:[#allocation34_spill] sm:$0xff] %v12615_v45  ;;  %v12627_v2 = vpop.permute.xlu0 %5885 }
 0x6e5   : > { %v12625_v10 = vpop.permute.xlu1 %5879 }
 0x6e6   : > { %v12631_v56 = vpop.permute.xlu0 %5889 }
 0x6e9   : > { %v12629_v49 = vpop.permute.xlu1 %5883 }
 0x6ea   : > { %v12635_v34 = vpop.permute.xlu0 %5893 }
 0x6eb   : > { %13164 = vst [vmem:[#allocation35_spill] sm:$0xff] %v12635_v34 }
 0x6ed   : > { %v12633_v52 = vpop.permute.xlu1 %5887 }
 0x6ee   : > { %v12639_v15 = vpop.permute.xlu0 %5897 }
 0x6ef   : > { %13166 = vst [vmem:[#allocation37_spill] sm:$0xff] %v12639_v15 }
 0x6f1   : > { %v12637_v6 = vpop.permute.xlu1 %5891 }
 0x6f2   : > { %13165 = vst [vmem:[#allocation36_spill] sm:$0xff] %v12637_v6  ;;  %v12643_v42 = vpop.permute.xlu0 %5901 }
 0x6f3   : > { %13168 = vst [vmem:[#allocation39_spill] sm:$0xff] %v12643_v42 }
 0x6f5   : > { %v12641_v45 = vpop.permute.xlu1 %5895 }
 0x6f6   : > { %13167 = vst [vmem:[#allocation38_spill] sm:$0xff] %v12641_v45  ;;  %v12647_v25 = vpop.permute.xlu0 %5905 }
 0x6f7   : > { %13170 = vst [vmem:[#allocation41_spill] sm:$0xff] %v12647_v25 }
 0x6f9   : > { %v12645_v38 = vpop.permute.xlu1 %5899 }
 0x6fa   : > { %13169 = vst [vmem:[#allocation40_spill] sm:$0xff] %v12645_v38  ;;  %v12651_v60 = vpop.permute.xlu0 %5909 }
 0x6fb   : > { %13172 = vst [vmem:[#allocation43_spill] sm:$0xff] %v12651_v60 }
 0x6fd   : > { %v12649_v24 = vpop.permute.xlu1 %5903 }
 0x6fe   : > { %13171 = vst [vmem:[#allocation42_spill] sm:$0xff] %v12649_v24  ;;  %v12655_v63 = vpop.permute.xlu0 %5913  ;;  %v6088_v24 = vadd.f32 1.0, %v12278_v19 }
 0x6ff   : > { %13174 = vst [vmem:[#allocation45_spill] sm:$0xff] %v12655_v63  ;;  %v6087_v63 = vadd.f32 1.0, %v12292_v59  ;;  %v6091_v59 = vadd.f32 1.0, %v12327_v48 }
 0x701   : > { %v12653_v22 = vpop.permute.xlu1 %5907 }
 0x702   : > { %13173 = vst [vmem:[#allocation44_spill] sm:$0xff] %v12653_v22  ;;  %v12659_v6 = vpop.permute.xlu0 %5917 }
 0x703   : > { %13176 = vst [vmem:[#allocation47_spill] sm:$0xff] %v12659_v6 }
 0x705   : > { %v12657_v11 = vpop.permute.xlu1 %5911 }
 0x706   : > { %13175 = vst [vmem:[#allocation46_spill] sm:$0xff] %v12657_v11  ;;  %v12663_v45 = vpop.permute.xlu0 %5921  ;;  %v6090_v11 = vadd.f32 1.0, %v12298_v44  ;;  %v6094_v44 = vadd.f32 1.0, %v12330_v0 }
 0x707   : > { %13178 = vst [vmem:[#allocation49_spill] sm:$0xff] %v12663_v45  ;;  %v6089_v45 = vadd.f32 1.0, %v12313_v29  ;;  %v5960_v29 = vadd.f32 %v12506_v20, %v11797_v43  ;;  %v5959_v43 = vadd.f32 %v12520_v39, %v11787_v18 }
 0x709   : > { %v12661_v15 = vpop.permute.xlu1 %5915 }
 0x70a   : > { %13177 = vst [vmem:[#allocation48_spill] sm:$0xff] %v12661_v15  ;;  %v12667_v38 = vpop.permute.xlu0 %5925 }
 0x70b   : > { %13180 = vst [vmem:[#allocation51_spill] sm:$0xff] %v12667_v38 }
 0x70d   : > { %v12665_v42 = vpop.permute.xlu1 %5919 }
 0x70e   : > { %13179 = vst [vmem:[#allocation50_spill] sm:$0xff] %v12665_v42  ;;  %v6154_v60 = vpop.permute.xlu0 %6153  ;;  %v6092_v42 = vadd.f32 1.0, %v12316_v21  ;;  %v6093_v21 = vadd.f32 1.0, %v12340_v37  ;;  %v5962_v37 = vadd.f32 %v12524_v28, %v11791_v23 }
 0x70f   : > { %v6248_v22 = vadd.f32 %v6154_v60, %v6088_v24  ;;  %v6096_v24 = vadd.f32 1.0, %v12349_v26  ;;  %v6095_v26 = vadd.f32 1.0, %v12363_v54  ;;  %v5961_v54 = vadd.f32 %v12601_v62, %v11782_v40 }
 0x710   : > { %v6100_v40 = vadd.f32 1.0, %v12387_v31  ;;  %v5966_v31 = vadd.f32 %v12617_v46, %v11815_v53 }
 0x711   : > { %v12670_v25 = vpop.permute.xlu1 %5923  ;;  %9321 = vlog2.f32 %v6248_v22 }
 0x712   : > { %13181 = vst [vmem:[#allocation52_spill] sm:$0xff] %v12670_v25  ;;  %v6158_v61 = vpop.permute.xlu0 %6157 }
 0x713   : > { %v6250_v57 = vadd.f32 %v6158_v61, %v6090_v11 }
 0x715   : > { %v6152_v6 = vpop.permute.xlu1 %6151 }
 0x716   : > { %v6247_v15 = vadd.f32 %v6152_v6, %v6087_v63  ;;  %v6162_v38 = vpop.permute.xlu0 %6161 }
 0x717   : > { %v6252_v34 = vadd.f32 %v6162_v38, %v6092_v42 }
 0x718   : > { %9323 = vlog2.f32 %v6247_v15 }
 0x719   : > { %9325 = vlog2.f32 %v6250_v57  ;;  %v6156_v19 = vpop.permute.xlu1 %6155 }
 0x71a   : > { %v6249_v25 = vadd.f32 %v6156_v19, %v6089_v45  ;;  %v6166_v60 = vpop.permute.xlu0 %6165 }
 0x71b   : > { %v9322_v11 = vpop.eup %9321  ;;  %v6254_v61 = vadd.f32 %v6166_v60, %v6094_v44 }
 0x71c   : > { %9327 = vlog2.f32 %v6249_v25  ;;  %v6282_v57 = vmul.f32 0.6931472, %v9322_v11 }
 0x71d   : > { %9329 = vlog2.f32 %v6252_v34  ;;  %v6160_v22 = vpop.permute.xlu1 %6159 }
 0x71e   : > { %v6251_v63 = vadd.f32 %v6160_v22, %v6091_v59  ;;  %v6344_v0 = vsub.f32 %v5960_v29, %v6282_v57  ;;  %v6170_v38 = vpop.permute.xlu0 %6169  ;;  %v6098_v59 = vadd.f32 1.0, %v12369_v5  ;;  %v5964_v5 = vadd.f32 %v12605_v35, %v11823_v58 }
 0x71f   : > { %v6256_v34 = vadd.f32 %v6170_v38, %v6096_v24 }
 0x720   : > { %9331 = vlog2.f32 %v6251_v63  ;;  %7401 = vst.msk [vmem:[%s12535_s24 + $0x8] sm:$0xff] %vm7399_vm7, %v6344_v0 }
 0x721   : > { %9333 = vlog2.f32 %v6254_v61  ;;  %v6164_v48 = vpop.permute.xlu1 %6163  ;;  %7434 = vst.msk [vmem:[%s12535_s24 + $0x8] sm:$0xff] %vm7432_vm8, %v12506_v20  ;;  %v6097_v20 = vadd.f32 1.0, %v12384_v41 }
 0x722   : > { %v9324_v25 = vpop.eup %9323  ;;  %v6253_v42 = vadd.f32 %v6164_v48, %v6093_v21 }
 0x723   : > { %v9326_v15 = vpop.eup %9325  ;;  %v6280_v45 = vmul.f32 0.6931472, %v9324_v25  ;;  %v6174_v23 = vpop.permute.xlu0 %6173 }
 0x724   : > { %v6286_v6 = vmul.f32 0.6931472, %v9326_v15  ;;  %9335 = vlog2.f32 %v6253_v42  ;;  %v6258_v61 = vadd.f32 %v6174_v23, %v6098_v59 }
 0x725   : > { %v6343_v19 = vsub.f32 %v5959_v43, %v6280_v45  ;;  %9337 = vlog2.f32 %v6256_v34  ;;  %v6168_v44 = vpop.permute.xlu1 %6167 }
 0x726   : > { %v9328_v18 = vpop.eup %9327  ;;  %v6346_v22 = vsub.f32 %v5962_v37, %v6286_v6  ;;  %v6255_v60 = vadd.f32 %v6168_v44, %v6095_v26  ;;  %v5965_v6 = vadd.f32 %v12621_v1, %v11805_v3  ;;  %v6104_v3 = vadd.f32 1.0, %v12420_v55 }
 0x727   : > { %v9330_v63 = vpop.eup %9329  ;;  %v6284_v11 = vmul.f32 0.6931472, %v9328_v18  ;;  %7400 = vst.msk [vmem:[%s12535_s24] sm:$0xff] %vm7399_vm7, %v6343_v19  ;;  %v6178_v48 = vpop.permute.xlu0 %6177  ;;  %v5970_v55 = vadd.f32 %v12627_v2, %v11842_v4 }
 0x728   : > { %v6290_v29 = vmul.f32 0.6931472, %v9330_v63  ;;  %9339 = vlog2.f32 %v6255_v60  ;;  %7433 = vst.msk [vmem:[%s12535_s24] sm:$0xff] %vm7432_vm8, %v12520_v39  ;;  %v5963_v39 = vadd.f32 %v12613_v12, %v11811_v33  ;;  %v6260_v38 = vadd.f32 %v6178_v48, %v6100_v40 }
 0x729   : > { %7403 = vst.msk [vmem:[%s12535_s24 + $0x18] sm:$0xff] %vm7399_vm7, %v6346_v22  ;;  %v6345_v57 = vsub.f32 %v5961_v54, %v6284_v11  ;;  %9341 = vlog2.f32 %v6258_v61  ;;  %v6172_v21 = vpop.permute.xlu1 %6171  ;;  %v6102_v33 = vadd.f32 1.0, %v12401_v36  ;;  %v5968_v36 = vadd.f32 %v12623_v8, %v11850_v50 }
 0x72a   : > { %7436 = vst.msk [vmem:[%s12535_s24 + $0x18] sm:$0xff] %vm7432_vm8, %v12524_v28  ;;  %v9332_v58 = vpop.eup %9331  ;;  %v6348_v24 = vsub.f32 %v5964_v5, %v6290_v29  ;;  %v6257_v41 = vadd.f32 %v6172_v21, %v6097_v20  ;;  %v6099_v28 = vadd.f32 1.0, %v12398_v51  ;;  %v5967_v60 = vadd.f32 %v12625_v10, %v11835_v14 }
 0x72b   : > { %v9334_v25 = vpop.eup %9333  ;;  %v6288_v0 = vmul.f32 0.6931472, %v9332_v58  ;;  %7402 = vst.msk [vmem:[%s12535_s24 + $0x10] sm:$0xff] %vm7399_vm7, %v6345_v57  ;;  %v6182_v34 = vpop.permute.xlu0 %6181  ;;  %v6106_v14 = vadd.f32 1.0, %v12438_v7  ;;  %v5969_v57 = vadd.f32 %v12629_v49, %v11829_v9  ;;  %v5972_v7 = vadd.f32 %v12631_v56, %v11874_v16 }
 0x72c   : > { %v6294_v42 = vmul.f32 0.6931472, %v9334_v25  ;;  %9343 = vlog2.f32 %v6257_v41  ;;  %7405 = vst.msk [vmem:[%s12535_s24 + $0x28] sm:$0xff] %vm7399_vm7, %v6348_v24  ;;  %v6262_v26 = vadd.f32 %v6182_v34, %v6102_v33  ;;  %v6108_v9 = vadd.f32 1.0, %v12456_v32  ;;  %v13182_v32 = vld [vmem:[#allocation35_spill] sm:$0xff]  ;;  %v13184_v33 = vld [vmem:[#allocation25_spill] sm:$0xff] }
 0x72d   : > { %7435 = vst.msk [vmem:[%s12535_s24 + $0x10] sm:$0xff] %vm7432_vm8, %v12601_v62  ;;  %v6347_v15 = vsub.f32 %v5963_v39, %v6288_v0  ;;  %9345 = vlog2.f32 %v6260_v38  ;;  %v6176_v43 = vpop.permute.xlu1 %6175  ;;  %7438 = vst.msk [vmem:[%s12535_s24 + $0x28] sm:$0xff] %vm7432_vm8, %v12605_v35  ;;  %v6101_v35 = vadd.f32 1.0, %v12411_v17  ;;  %v5971_v39 = vadd.f32 %v12633_v52, %v11862_v47 }
 0x72e   : > { %v9336_v53 = vpop.eup %9335  ;;  %v6350_v45 = vsub.f32 %v5966_v31, %v6294_v42  ;;  %v6259_v51 = vadd.f32 %v6176_v43, %v6099_v28  ;;  %v5974_v31 = vadd.f32 %v13182_v32, %v11866_v27  ;;  %v13183_v28 = vld [vmem:[#allocation24_spill] sm:$0xff]  ;;  %v6110_v43 = vadd.f32 1.0, %v13184_v33 }
 0x72f   : > { %v9338_v37 = vpop.eup %9337  ;;  %v6292_v62 = vmul.f32 0.6931472, %v9336_v53  ;;  %7404 = vst.msk [vmem:[%s12535_s24 + $0x20] sm:$0xff] %vm7399_vm7, %v6347_v15  ;;  %v6186_v22 = vpop.permute.xlu0 %6185  ;;  %v6107_v15 = vadd.f32 1.0, %v13183_v28 }
 0x730   : > { %v6298_v19 = vmul.f32 0.6931472, %v9338_v37  ;;  %9347 = vlog2.f32 %v6259_v51  ;;  %7407 = vst.msk [vmem:[%s12535_s24 + $0x38] sm:$0xff] %vm7399_vm7, %v6350_v45  ;;  %v6264_v63 = vadd.f32 %v6186_v22, %v6104_v3 }
 0x731   : > { %7437 = vst.msk [vmem:[%s12535_s24 + $0x20] sm:$0xff] %vm7432_vm8, %v12613_v12  ;;  %v6349_v59 = vsub.f32 %v5965_v6, %v6292_v62  ;;  %9349 = vlog2.f32 %v6262_v26  ;;  %v6180_v44 = vpop.permute.xlu1 %6179  ;;  %7440 = vst.msk [vmem:[%s12535_s24 + $0x38] sm:$0xff] %vm7432_vm8, %v12617_v46  ;;  %v6103_v46 = vadd.f32 1.0, %v12434_v13  ;;  %v13185_v6 = vld [vmem:[#allocation7_spill] sm:$0xff] }
 0x732   : > { %v9340_v50 = vpop.eup %9339  ;;  %v6352_v18 = vsub.f32 %v5968_v36, %v6298_v19  ;;  %v6261_v17 = vadd.f32 %v6180_v44, %v6101_v35  ;;  %v13187_v35 = vld [vmem:[#allocation11_spill] sm:$0xff] }
 0x733   : > { %v9342_v23 = vpop.eup %9341  ;;  %v6296_v12 = vmul.f32 0.6931472, %v9340_v50  ;;  %7406 = vst.msk [vmem:[%s12535_s24 + $0x30] sm:$0xff] %vm7399_vm7, %v6349_v59  ;;  %v6190_v29 = vpop.permute.xlu0 %6189  ;;  %v13188_v59 = vld [vmem:[#allocation37_spill] sm:$0xff]  ;;  %v13189_v50 = vld [vmem:[#allocation26_spill] sm:$0xff] }
 0x734   : > { %v6302_v54 = vmul.f32 0.6931472, %v9342_v23  ;;  %9351 = vlog2.f32 %v6261_v17  ;;  %7409 = vst.msk [vmem:[%s12535_s24 + $0x48] sm:$0xff] %vm7399_vm7, %v6352_v18  ;;  %v6266_v40 = vadd.f32 %v6190_v29, %v6106_v14  ;;  %v5976_v3 = vadd.f32 %v13188_v59, %v13187_v35  ;;  %v13190_v17 = vld [vmem:[#allocation27_spill] sm:$0xff] }
 0x735   : > { %7439 = vst.msk [vmem:[%s12535_s24 + $0x30] sm:$0xff] %vm7432_vm8, %v12621_v1  ;;  %v6351_v11 = vsub.f32 %v5967_v60, %v6296_v12  ;;  %9353 = vlog2.f32 %v6264_v63  ;;  %v6184_v61 = vpop.permute.xlu1 %6183  ;;  %7442 = vst.msk [vmem:[%s12535_s24 + $0x48] sm:$0xff] %vm7432_vm8, %v12623_v8  ;;  %v6105_v8 = vadd.f32 1.0, %v12453_v30  ;;  %v6109_v18 = vadd.f32 1.0, %v13189_v50  ;;  %v13194_v29 = vld [vmem:[#allocation39_spill] sm:$0xff] }
 0x736   : > { %v9344_v4 = vpop.eup %9343  ;;  %v6354_v5 = vsub.f32 %v5970_v55, %v6302_v54  ;;  %v6263_v13 = vadd.f32 %v6184_v61, %v6103_v46  ;;  %v6112_v23 = vadd.f32 1.0, %v13190_v17 }
 0x737   : > { %v9346_v20 = vpop.eup %9345  ;;  %v6300_v1 = vmul.f32 0.6931472, %v9344_v4  ;;  %7408 = vst.msk [vmem:[%s12535_s24 + $0x40] sm:$0xff] %vm7399_vm7, %v6351_v11  ;;  %v6194_v41 = vpop.permute.xlu0 %6193  ;;  %v13191_v11 = vld [vmem:[#allocation9_spill] sm:$0xff] }
 0x738   : > { %v6306_v21 = vmul.f32 0.6931472, %v9346_v20  ;;  %9355 = vlog2.f32 %v6263_v13  ;;  %7411 = vst.msk [vmem:[%s12535_s24 + $0x58] sm:$0xff] %vm7399_vm7, %v6354_v5  ;;  %v13193_v5 = vld [vmem:[#allocation10_spill] sm:$0xff] }
 0x739   : > { %7441 = vst.msk [vmem:[%s12535_s24 + $0x40] sm:$0xff] %vm7432_vm8, %v12625_v10  ;;  %v6353_v58 = vsub.f32 %v5969_v57, %v6300_v1  ;;  %9357 = vlog2.f32 %v6266_v40  ;;  %v6188_v24 = vpop.permute.xlu1 %6187  ;;  %7444 = vst.msk [vmem:[%s12535_s24 + $0x58] sm:$0xff] %vm7432_vm8, %v12627_v2  ;;  %v6268_v10 = vadd.f32 %v6194_v41, %v6108_v9  ;;  %v5978_v13 = vadd.f32 %v13194_v29, %v13193_v5  ;;  %v13195_v57 = vld [vmem:[#allocation28_spill] sm:$0xff]  ;;  %v13212_v5 = vld [vmem:[#allocation45_spill] sm:$0xff] }
 0x73a   : > { %v9348_v48 = vpop.eup %9347  ;;  %v6356_v16 = vsub.f32 %v5972_v7, %v6306_v21  ;;  %v6265_v30 = vadd.f32 %v6188_v24, %v6105_v8  ;;  %v6111_v1 = vadd.f32 1.0, %v13195_v57  ;;  %v13196_v7 = vld [vmem:[#allocation29_spill] sm:$0xff]  ;;  %v13197_v41 = vld [vmem:[#allocation8_spill] sm:$0xff]  ;;  %v13213_v57 = vld [vmem:[#allocation34_spill] sm:$0xff] }
 0x73b   : > { %v9350_v25 = vpop.eup %9349  ;;  %v6304_v0 = vmul.f32 0.6931472, %v9348_v48  ;;  %v8985_v38 = vpop.f32.mrb[224].mxu1  ;;  %7410 = vst.msk [vmem:[%s12535_s24 + $0x50] sm:$0xff] %vm7399_vm7, %v6353_v58  ;;  %v6114_v21 = vadd.f32 1.0, %v13196_v7 }
 0x73c   : > { %v6310_v2 = vmul.f32 0.6931472, %v9350_v25  ;;  %9359 = vlog2.f32 %v6265_v30  ;;  %v7208_v42 = vpop.f32.mrb[225].mxu1  ;;  %7499 = vrot.lane.b32.xlu0 %v8985_v38, %s9460_s29  ;;  %7413 = vst.msk [vmem:[%s12535_s24 + $0x68] sm:$0xff] %vm7399_vm7, %v6356_v16  ;;  %v6198_v34 = vpop.permute.xlu0 %6197  ;;  %v13198_v30 = vld [vmem:[#allocation40_spill] sm:$0xff]  ;;  %v13200_v38 = vld [vmem:[#allocation41_spill] sm:$0xff] }
 0x73d   : > { %7443 = vst.msk [vmem:[%s12535_s24 + $0x50] sm:$0xff] %vm7432_vm8, %v12629_v49  ;;  %v6355_v47 = vsub.f32 %v5971_v39, %v6304_v0  ;;  %9361 = vlog2.f32 %v6268_v10  ;;  %7497 = vrot.lane.b32.xlu1 %v7208_v42, %s9460_s29  ;;  %v6192_v27 = vpop.permute.xlu1 %6191  ;;  %7446 = vst.msk [vmem:[%s12535_s24 + $0x68] sm:$0xff] %vm7432_vm8, %v12631_v56  ;;  %v13186_v49 = vld [vmem:[#allocation36_spill] sm:$0xff]  ;;  %v6270_v36 = vadd.f32 %v6198_v34, %v6110_v43  ;;  %v13199_v10 = vld [vmem:[#allocation15_spill] sm:$0xff] }
 0x73e   : > { %v9352_v53 = vpop.eup %9351  ;;  %v6358_v45 = vsub.f32 %v5974_v31, %v6310_v2  ;;  %v6267_v51 = vadd.f32 %v6192_v27, %v6107_v15  ;;  %v5973_v62 = vadd.f32 %v13186_v49, %v13185_v6  ;;  %v5977_v25 = vadd.f32 %v13198_v30, %v13197_v41  ;;  %v13201_v2 = vld [vmem:[#allocation30_spill] sm:$0xff]  ;;  %v13202_v15 = vld [vmem:[#allocation31_spill] sm:$0xff] }
 0x73f   : > { %v9354_v37 = vpop.eup %9353  ;;  %v6308_v26 = vmul.f32 0.6931472, %v9352_v53  ;;  %v8988_v19 = vpop.f32.mrb[226].mxu1  ;;  %7412 = vst.msk [vmem:[%s12535_s24 + $0x60] sm:$0xff] %vm7399_vm7, %v6355_v47  ;;  %v6113_v42 = vadd.f32 1.0, %v13201_v2  ;;  %v6118_v47 = vadd.f32 1.0, %v13202_v15 }
 0x740   : > { %v6314_v56 = vmul.f32 0.6931472, %v9354_v37  ;;  %9363 = vlog2.f32 %v6267_v51  ;;  %v7218_v44 = vpop.f32.mrb[227].mxu1  ;;  %7503 = vrot.lane.b32.xlu0 %v8988_v19, %s9460_s29  ;;  %7415 = vst.msk [vmem:[%s12535_s24 + $0x78] sm:$0xff] %vm7399_vm7, %v6358_v45  ;;  %v6202_v55 = vpop.permute.xlu0 %6201  ;;  %v13203_v51 = vld [vmem:[#allocation13_spill] sm:$0xff]  ;;  %v13204_v37 = vld [vmem:[#allocation42_spill] sm:$0xff] }
 0x741   : > { %7445 = vst.msk [vmem:[%s12535_s24 + $0x60] sm:$0xff] %vm7432_vm8, %v12633_v52  ;;  %v6357_v22 = vsub.f32 %v5973_v62, %v6308_v26  ;;  %9365 = vlog2.f32 %v6270_v36  ;;  %7501 = vrot.lane.b32.xlu1 %v7218_v44, %s9460_s29  ;;  %v6196_v60 = vpop.permute.xlu1 %6195  ;;  %7448 = vst.msk [vmem:[%s12535_s24 + $0x78] sm:$0xff] %vm7432_vm8, %v13182_v32  ;;  %v13192_v52 = vld [vmem:[#allocation38_spill] sm:$0xff]  ;;  %v6272_v4 = vadd.f32 %v6202_v55, %v6112_v23  ;;  %v13206_v19 = vld [vmem:[#allocation43_spill] sm:$0xff] }
 0x742   : > { %v9356_v12 = vpop.eup %9355  ;;  %v6360_v63 = vsub.f32 %v5976_v3, %v6314_v56  ;;  %v6269_v54 = vadd.f32 %v6196_v60, %v6109_v18  ;;  %v5975_v14 = vadd.f32 %v13192_v52, %v13191_v11  ;;  %v5980_v32 = vadd.f32 %v13200_v38, %v13199_v10  ;;  %v13205_v36 = vld [vmem:[#allocation14_spill] sm:$0xff]  ;;  %v13207_v56 = vld [vmem:[#allocation32_spill] sm:$0xff]  ;;  %v13208_v18 = vld [vmem:[#allocation33_spill] sm:$0xff] }
 0x743   : > { %v9358_v46 = vpop.eup %9357  ;;  %v6312_v61 = vmul.f32 0.6931472, %v9356_v12  ;;  %7414 = vst.msk [vmem:[%s12535_s24 + $0x70] sm:$0xff] %vm7399_vm7, %v6357_v22  ;;  %v5979_v6 = vadd.f32 %v13204_v37, %v13203_v51  ;;  %v5982_v35 = vadd.f32 %v13206_v19, %v13205_v36  ;;  %v6115_v44 = vadd.f32 1.0, %v13207_v56  ;;  %v13218_v2 = vld [vmem:[#allocation16_spill] sm:$0xff]  ;;  %v13224_v36 = vld [vmem:[#allocation23_spill] sm:$0xff] }
 0x744   : > { %v6318_v20 = vmul.f32 0.6931472, %v9358_v46  ;;  %9367 = vlog2.f32 %v6269_v54  ;;  %7417 = vst.msk [vmem:[%s12535_s24 + $0x88] sm:$0xff] %vm7399_vm7, %v6360_v63  ;;  %v6206_v24 = vpop.permute.xlu0 %6205  ;;  %v6116_v22 = vadd.f32 1.0, %v13208_v18  ;;  %v13209_v54 = vld [vmem:[#allocation12_spill] sm:$0xff] }
 0x745   : > { %7447 = vst.msk [vmem:[%s12535_s24 + $0x70] sm:$0xff] %vm7432_vm8, %v13186_v49  ;;  %v6359_v40 = vsub.f32 %v5975_v14, %v6312_v61  ;;  %9369 = vlog2.f32 %v6272_v4  ;;  %v6200_v8 = vpop.permute.xlu1 %6199  ;;  %7450 = vst.msk [vmem:[%s12535_s24 + $0x88] sm:$0xff] %vm7432_vm8, %v13188_v59  ;;  %v6274_v0 = vadd.f32 %v6206_v24, %v6114_v21  ;;  %v13210_v46 = vld [vmem:[#allocation44_spill] sm:$0xff]  ;;  %v13211_v4 = vld [vmem:[#allocation19_spill] sm:$0xff] }
 0x746   : > { %v9360_v58 = vpop.eup %9359  ;;  %v6362_v9 = vsub.f32 %v5978_v13, %v6318_v20  ;;  %v6271_v48 = vadd.f32 %v6200_v8, %v6111_v1  ;;  %v5981_v11 = vadd.f32 %v13210_v46, %v13209_v54  ;;  %v6117_v1 = vadd.f32 1.0, %v13213_v57  ;;  %v13214_v24 = vld [vmem:[#allocation17_spill] sm:$0xff]  ;;  %v13226_v18 = vld [vmem:[#allocation20_spill] sm:$0xff] }
 0x747   : > { %v9362_v16 = vpop.eup %9361  ;;  %v6316_v39 = vmul.f32 0.6931472, %v9360_v58  ;;  %7416 = vst.msk [vmem:[%s12535_s24 + $0x80] sm:$0xff] %vm7399_vm7, %v6359_v40 }
 0x748   : > { %v6322_v31 = vmul.f32 0.6931472, %v9362_v16  ;;  %9371 = vlog2.f32 %v6271_v48  ;;  %7419 = vst.msk [vmem:[%s12535_s24 + $0x98] sm:$0xff] %vm7399_vm7, %v6362_v9  ;;  %v6214_v53 = vpop.permute.xlu0 %6213  ;;  %v13215_v48 = vld [vmem:[#allocation46_spill] sm:$0xff] }
 0x749   : > { %7449 = vst.msk [vmem:[%s12535_s24 + $0x80] sm:$0xff] %vm7432_vm8, %v13192_v52  ;;  %v6361_v28 = vsub.f32 %v5977_v25, %v6316_v39  ;;  %9373 = vlog2.f32 %v6274_v0  ;;  %v6204_v33 = vpop.permute.xlu1 %6203  ;;  %7452 = vst.msk [vmem:[%s12535_s24 + $0x98] sm:$0xff] %vm7432_vm8, %v13194_v29  ;;  %v6278_v62 = vadd.f32 %v6214_v53, %v6118_v47  ;;  %v5984_v29 = vadd.f32 %v13212_v5, %v13211_v4  ;;  %v13217_v25 = vld [vmem:[#allocation47_spill] sm:$0xff]  ;;  %v13220_v47 = vld [vmem:[#allocation22_spill] sm:$0xff] }
 0x74a   : > { %v9364_v43 = vpop.eup %9363  ;;  %v6364_v27 = vsub.f32 %v5980_v32, %v6322_v31  ;;  %v6273_v45 = vadd.f32 %v6204_v33, %v6113_v42  ;;  %v5983_v16 = vadd.f32 %v13215_v48, %v13214_v24  ;;  %v13219_v42 = vld [vmem:[#allocation48_spill] sm:$0xff]  ;;  %v13221_v33 = vld [vmem:[#allocation51_spill] sm:$0xff] }
 0x74b   : > { %v9366_v34 = vpop.eup %9365  ;;  %v6320_v49 = vmul.f32 0.6931472, %v9364_v43  ;;  %v8991_v26 = vpop.f32.mrb[228].mxu1  ;;  %7418 = vst.msk [vmem:[%s12535_s24 + $0x90] sm:$0xff] %vm7399_vm7, %v6361_v28  ;;  %v5985_v28 = vadd.f32 %v13219_v42, %v13218_v2  ;;  %v5990_v43 = vadd.f32 %v13221_v33, %v13220_v47 }
 0x74c   : > { %v6326_v59 = vmul.f32 0.6931472, %v9366_v34  ;;  %9375 = vlog2.f32 %v6273_v45  ;;  %v7228_v3 = vpop.f32.mrb[229].mxu1  ;;  %7507 = vrot.lane.b32.xlu0 %v8991_v26, %s9460_s29  ;;  %7421 = vst.msk [vmem:[%s12535_s24 + $0xa8] sm:$0xff] %vm7399_vm7, %v6364_v27  ;;  %v6210_v12 = vpop.permute.xlu0 %6209 }
 0x74d   : > { %7451 = vst.msk [vmem:[%s12535_s24 + $0x90] sm:$0xff] %vm7432_vm8, %v13198_v30  ;;  %v6363_v50 = vsub.f32 %v5979_v6, %v6320_v49  ;;  %9377 = vlog2.f32 %v6278_v62  ;;  %7505 = vrot.lane.b32.xlu1 %v7228_v3, %s9460_s29  ;;  %v6208_v17 = vpop.permute.xlu1 %6207  ;;  %7454 = vst.msk [vmem:[%s12535_s24 + $0xa8] sm:$0xff] %vm7432_vm8, %v13200_v38  ;;  %v6276_v14 = vadd.f32 %v6210_v12, %v6116_v22  ;;  %v13216_v30 = vld [vmem:[#allocation18_spill] sm:$0xff]  ;;  %v13227_v22 = vld [vmem:[#allocation52_spill] sm:$0xff] }
 0x74e   : > { %v9368_v23 = vpop.eup %9367  ;;  %v6366_v60 = vsub.f32 %v5982_v35, %v6326_v59  ;;  %v6275_v63 = vadd.f32 %v6208_v17, %v6115_v44  ;;  %v5986_v39 = vadd.f32 %v13217_v25, %v13216_v30  ;;  %v13223_v6 = vld [vmem:[#allocation50_spill] sm:$0xff]  ;;  %v5989_v17 = vadd.f32 %v13227_v22, %v13226_v18 }
 0x74f   : > { %v9370_v55 = vpop.eup %9369  ;;  %v6324_v52 = vmul.f32 0.6931472, %v9368_v23  ;;  %v8994_v61 = vpop.f32.mrb[230].mxu1  ;;  %7420 = vst.msk [vmem:[%s12535_s24 + $0xa0] sm:$0xff] %vm7399_vm7, %v6363_v50 }
 0x750   : > { %v6330_v13 = vmul.f32 0.6931472, %v9370_v55  ;;  %9379 = vlog2.f32 %v6275_v63  ;;  %v7238_v20 = vpop.f32.mrb[231].mxu1  ;;  %7511 = vrot.lane.b32.xlu0 %v8994_v61, %s9460_s29  ;;  %7423 = vst.msk [vmem:[%s12535_s24 + $0xb8] sm:$0xff] %vm7399_vm7, %v6366_v60 }
 0x751   : > { %7453 = vst.msk [vmem:[%s12535_s24 + $0xa0] sm:$0xff] %vm7432_vm8, %v13204_v37  ;;  %v6365_v40 = vsub.f32 %v5981_v11, %v6324_v52  ;;  %9381 = vlog2.f32 %v6276_v14  ;;  %7509 = vrot.lane.b32.xlu1 %v7238_v20, %s9460_s29  ;;  %v6212_v7 = vpop.permute.xlu1 %6211  ;;  %7456 = vst.msk [vmem:[%s12535_s24 + $0xb8] sm:$0xff] %vm7432_vm8, %v13206_v19  ;;  %v13222_v37 = vld [vmem:[#allocation21_spill] sm:$0xff] }
 0x752   : > { %v9372_v21 = vpop.eup %9371  ;;  %v6368_v8 = vsub.f32 %v5984_v29, %v6330_v13  ;;  %v6277_v58 = vadd.f32 %v6212_v7, %v6117_v1  ;;  %v5987_v49 = vadd.f32 %v13223_v6, %v13222_v37  ;;  %v13225_v19 = vld [vmem:[#allocation49_spill] sm:$0xff] }
 0x753   : > { %v9374_v9 = vpop.eup %9373  ;;  %v6328_v41 = vmul.f32 0.6931472, %v9372_v21  ;;  %7422 = vst.msk [vmem:[%s12535_s24 + $0xb0] sm:$0xff] %vm7399_vm7, %v6365_v40  ;;  %v5988_v35 = vadd.f32 %v13225_v19, %v13224_v36 }
 0x754   : > { %v6334_v0 = vmul.f32 0.6931472, %v9374_v9  ;;  %9383 = vlog2.f32 %v6277_v58  ;;  %7425 = vst.msk [vmem:[%s12535_s24 + $0xc8] sm:$0xff] %vm7399_vm7, %v6368_v8 }
 0x755   : > { %7455 = vst.msk [vmem:[%s12535_s24 + $0xb0] sm:$0xff] %vm7432_vm8, %v13210_v46  ;;  %v6367_v10 = vsub.f32 %v5983_v16, %v6328_v41  ;;  %7458 = vst.msk [vmem:[%s12535_s24 + $0xc8] sm:$0xff] %vm7432_vm8, %v13212_v5 }
 0x756   : > { %v9376_v38 = vpop.eup %9375  ;;  %v6370_v32 = vsub.f32 %v5986_v39, %v6334_v0 }
 0x757   : > { %v9378_v31 = vpop.eup %9377  ;;  %v6332_v15 = vmul.f32 0.6931472, %v9376_v38  ;;  %7424 = vst.msk [vmem:[%s12535_s24 + $0xc0] sm:$0xff] %vm7399_vm7, %v6367_v10 }
 0x758   : > { %v6342_v27 = vmul.f32 0.6931472, %v9378_v31  ;;  %7427 = vst.msk [vmem:[%s12535_s24 + $0xd8] sm:$0xff] %vm7399_vm7, %v6370_v32 }
 0x759   : > { %7457 = vst.msk [vmem:[%s12535_s24 + $0xc0] sm:$0xff] %vm7432_vm8, %v13215_v48  ;;  %v6369_v53 = vsub.f32 %v5985_v28, %v6332_v15  ;;  %7460 = vst.msk [vmem:[%s12535_s24 + $0xd8] sm:$0xff] %vm7432_vm8, %v13217_v25 }
 0x75a   : > { %v9380_v45 = vpop.eup %9379  ;;  %v6374_v34 = vsub.f32 %v5990_v43, %v6342_v27 }
 0x75b   : > { %v9382_v51 = vpop.eup %9381  ;;  %v6336_v62 = vmul.f32 0.6931472, %v9380_v45  ;;  %v8997_v26 = vpop.f32.mrb[232].mxu1  ;;  %7426 = vst.msk [vmem:[%s12535_s24 + $0xd0] sm:$0xff] %vm7399_vm7, %v6369_v53 }
 0x75c   : > { %v6338_v59 = vmul.f32 0.6931472, %v9382_v51  ;;  %v7248_v3 = vpop.f32.mrb[233].mxu1  ;;  %7515 = vrot.lane.b32.xlu0 %v8997_v26, %s9460_s29  ;;  %7431 = vst.msk [vmem:[%s12535_s24 + $0xf8] sm:$0xff] %vm7399_vm7, %v6374_v34 }
 0x75d   : > { %7459 = vst.msk [vmem:[%s12535_s24 + $0xd0] sm:$0xff] %vm7432_vm8, %v13219_v42  ;;  %v6371_v56 = vsub.f32 %v5987_v49, %v6336_v62  ;;  %7513 = vrot.lane.b32.xlu1 %v7248_v3, %s9460_s29  ;;  %7464 = vst.msk [vmem:[%s12535_s24 + $0xf8] sm:$0xff] %vm7432_vm8, %v13221_v33 }
 0x75e   : > { %v9384_v44 = vpop.eup %9383  ;;  %v6372_v50 = vsub.f32 %v5988_v35, %v6338_v59 }
 0x75f   : > { %v6340_v23 = vmul.f32 0.6931472, %v9384_v44  ;;  %v9000_v60 = vpop.f32.mrb[234].mxu1  ;;  %7428 = vst.msk [vmem:[%s12535_s24 + $0xe0] sm:$0xff] %vm7399_vm7, %v6371_v56 }
 0x760   : > { %v7258_v12 = vpop.f32.mrb[235].mxu1  ;;  %7519 = vrot.lane.b32.xlu0 %v9000_v60, %s9460_s29  ;;  %7429 = vst.msk [vmem:[%s12535_s24 + $0xe8] sm:$0xff] %vm7399_vm7, %v6372_v50 }
 0x761   : > { %7461 = vst.msk [vmem:[%s12535_s24 + $0xe0] sm:$0xff] %vm7432_vm8, %v13223_v6  ;;  %v6373_v63 = vsub.f32 %v5989_v17, %v6340_v23  ;;  %7517 = vrot.lane.b32.xlu1 %v7258_v12, %s9460_s29  ;;  %7462 = vst.msk [vmem:[%s12535_s24 + $0xe8] sm:$0xff] %vm7432_vm8, %v13225_v19 }
 0x763   : > { %7430 = vst.msk [vmem:[%s12535_s24 + $0xf0] sm:$0xff] %vm7399_vm7, %v6373_v63 }
 0x764   : > { %7463 = vst.msk [vmem:[%s12535_s24 + $0xf0] sm:$0xff] %vm7432_vm8, %v13227_v22 }
 0x76b   : > { %v9003_v55 = vpop.f32.mrb[236].mxu1 }
 0x76c   : > { %v7268_v54 = vpop.f32.mrb[237].mxu1  ;;  %7523 = vrot.lane.b32.xlu0 %v9003_v55, %s9460_s29 }
 0x76d   : > { %7521 = vrot.lane.b32.xlu1 %v7268_v54, %s9460_s29 }
 0x76f   : > { %v9006_v46 = vpop.f32.mrb[238].mxu1 }
 0x770   : > { %v7278_v11 = vpop.f32.mrb[239].mxu1  ;;  %7527 = vrot.lane.b32.xlu0 %v9006_v46, %s9460_s29 }
 0x771   : > { %7525 = vrot.lane.b32.xlu1 %v7278_v11, %s9460_s29 }
 0x77b   : > { %v9009_v52 = vpop.f32.mrb[240].mxu1 }
 0x77c   : > { %v7288_v14 = vpop.f32.mrb[241].mxu1  ;;  %7531 = vrot.lane.b32.xlu0 %v9009_v52, %s9460_s29 }
 0x77d   : > { %7529 = vrot.lane.b32.xlu1 %v7288_v14, %s9460_s29 }
 0x77f   : > { %v9012_v61 = vpop.f32.mrb[242].mxu1 }
 0x780   : > { %v7298_v4 = vpop.f32.mrb[243].mxu1  ;;  %7535 = vrot.lane.b32.xlu0 %v9012_v61, %s9460_s29 }
 0x781   : > { %7533 = vrot.lane.b32.xlu1 %v7298_v4, %s9460_s29 }
 0x78b   : > { %v9015_v5 = vpop.f32.mrb[244].mxu1 }
 0x78c   : > { %v7308_v29 = vpop.f32.mrb[245].mxu1  ;;  %7539 = vrot.lane.b32.xlu0 %v9015_v5, %s9460_s29 }
 0x78d   : > { %7537 = vrot.lane.b32.xlu1 %v7308_v29, %s9460_s29 }
 0x78f   : > { %v9018_v13 = vpop.f32.mrb[246].mxu1 }
 0x790   : > { %v7318_v20 = vpop.f32.mrb[247].mxu1  ;;  %7543 = vrot.lane.b32.xlu0 %v9018_v13, %s9460_s29 }
 0x791   : > { %7541 = vrot.lane.b32.xlu1 %v7318_v20, %s9460_s29 }
 0x79b   : > { %v9021_v57 = vpop.f32.mrb[248].mxu1 }
 0x79c   : > { %7547 = vrot.lane.b32.xlu0 %v9021_v57, %s9460_s29  ;;  %v7328_v1 = vpop.f32.mrb[249].mxu1 }
 0x79d   : > { %7545 = vrot.lane.b32.xlu1 %v7328_v1, %s9460_s29 }
 0x79f   : > { %v9024_v40 = vpop.f32.mrb[250].mxu1 }
 0x7a0   : > { %v7338_v7 = vpop.f32.mrb[251].mxu1  ;;  %7551 = vrot.lane.b32.xlu0 %v9024_v40, %s9460_s29 }
 0x7a1   : > { %7549 = vrot.lane.b32.xlu1 %v7338_v7, %s9460_s29 }
 0x7a7   : > { %v9027_v21 = vpop.f32.mrb[252].mxu1 }
 0x7a8   : > { %7555 = vrot.lane.b32.xlu0 %v9027_v21, %s9460_s29  ;;  %v7348_v8 = vpop.f32.mrb[253].mxu1 }
 0x7a9   : > { %7553 = vrot.lane.b32.xlu1 %v7348_v8, %s9460_s29 }
 0x7ab   : > { %v9030_v58 = vpop.f32.mrb[254].mxu1 }
 0x7ac   : > { %7559 = vrot.lane.b32.xlu0 %v9030_v58, %s9460_s29  ;;  %v7358_v9 = vpop.f32.mrb[255].mxu1 }
 0x7ad   : > { %7557 = vrot.lane.b32.xlu1 %v7358_v9, %s9460_s29 }
 0x7ae   : > { %v7500_v24 = vpop.permute.xlu0 %7499 }
 0x7af   : > { %7595 = vst.msk [vmem:[%s12535_s24 + $0x8] sm:$0xff] %vm7593_vm9, %v7500_v24  ;;  %v7498_v48 = vpop.permute.xlu1 %7497 }
 0x7b0   : > { %7594 = vst.msk [vmem:[%s12535_s24] sm:$0xff] %vm7593_vm9, %v7498_v48 }
 0x7b2   : > { %v7504_v16 = vpop.permute.xlu0 %7503 }
 0x7b3   : > { %7597 = vst.msk [vmem:[%s12535_s24 + $0x18] sm:$0xff] %vm7593_vm9, %v7504_v16  ;;  %v7502_v41 = vpop.permute.xlu1 %7501 }
 0x7b4   : > { %7596 = vst.msk [vmem:[%s12535_s24 + $0x10] sm:$0xff] %vm7593_vm9, %v7502_v41 }
 0x7be   : > { %v7508_v30 = vpop.permute.xlu0 %7507 }
 0x7bf   : > { %7599 = vst.msk [vmem:[%s12535_s24 + $0x28] sm:$0xff] %vm7593_vm9, %v7508_v30  ;;  %v7506_v25 = vpop.permute.xlu1 %7505 }
 0x7c0   : > { %7598 = vst.msk [vmem:[%s12535_s24 + $0x20] sm:$0xff] %vm7593_vm9, %v7506_v25 }
 0x7c2   : > { %v7512_v39 = vpop.permute.xlu0 %7511 }
 0x7c3   : > { %7601 = vst.msk [vmem:[%s12535_s24 + $0x38] sm:$0xff] %vm7593_vm9, %v7512_v39  ;;  %v7510_v0 = vpop.permute.xlu1 %7509 }
 0x7c4   : > { %7600 = vst.msk [vmem:[%s12535_s24 + $0x30] sm:$0xff] %vm7593_vm9, %v7510_v0 }
 0x7ce   : > { %v7516_v10 = vpop.permute.xlu0 %7515 }
 0x7cf   : > { %7603 = vst.msk [vmem:[%s12535_s24 + $0x48] sm:$0xff] %vm7593_vm9, %v7516_v10  ;;  %v7514_v38 = vpop.permute.xlu1 %7513 }
 0x7d0   : > { %7602 = vst.msk [vmem:[%s12535_s24 + $0x40] sm:$0xff] %vm7593_vm9, %v7514_v38 }
 0x7d2   : > { %v7520_v32 = vpop.permute.xlu0 %7519 }
 0x7d3   : > { %7605 = vst.msk [vmem:[%s12535_s24 + $0x58] sm:$0xff] %vm7593_vm9, %v7520_v32  ;;  %v7518_v31 = vpop.permute.xlu1 %7517 }
 0x7d4   : > { %7604 = vst.msk [vmem:[%s12535_s24 + $0x50] sm:$0xff] %vm7593_vm9, %v7518_v31 }
 0x7de   : > { %v7524_v2 = vpop.permute.xlu0 %7523 }
 0x7df   : > { %7607 = vst.msk [vmem:[%s12535_s24 + $0x68] sm:$0xff] %vm7593_vm9, %v7524_v2  ;;  %v7522_v42 = vpop.permute.xlu1 %7521 }
 0x7e0   : > { %7606 = vst.msk [vmem:[%s12535_s24 + $0x60] sm:$0xff] %vm7593_vm9, %v7522_v42 }
 0x7e2   : > { %v7528_v28 = vpop.permute.xlu0 %7527 }
 0x7e3   : > { %7609 = vst.msk [vmem:[%s12535_s24 + $0x78] sm:$0xff] %vm7593_vm9, %v7528_v28  ;;  %v7526_v15 = vpop.permute.xlu1 %7525 }
 0x7e4   : > { %7608 = vst.msk [vmem:[%s12535_s24 + $0x70] sm:$0xff] %vm7593_vm9, %v7526_v15 }
 0x7ee   : > { %v7532_v47 = vpop.permute.xlu0 %7531 }
 0x7ef   : > { %7611 = vst.msk [vmem:[%s12535_s24 + $0x88] sm:$0xff] %vm7593_vm9, %v7532_v47  ;;  %v7530_v33 = vpop.permute.xlu1 %7529 }
 0x7f0   : > { %7610 = vst.msk [vmem:[%s12535_s24 + $0x80] sm:$0xff] %vm7593_vm9, %v7530_v33 }
 0x7f2   : > { %v7536_v43 = vpop.permute.xlu0 %7535 }
 0x7f3   : > { %7613 = vst.msk [vmem:[%s12535_s24 + $0x98] sm:$0xff] %vm7593_vm9, %v7536_v43  ;;  %v7534_v27 = vpop.permute.xlu1 %7533 }
 0x7f4   : > { %7612 = vst.msk [vmem:[%s12535_s24 + $0x90] sm:$0xff] %vm7593_vm9, %v7534_v27 }
 0x7fe   : > { %v7540_v53 = vpop.permute.xlu0 %7539 }
 0x7ff   : > { %7615 = vst.msk [vmem:[%s12535_s24 + $0xa8] sm:$0xff] %vm7593_vm9, %v7540_v53  ;;  %v7538_v45 = vpop.permute.xlu1 %7537 }
 0x800   : > { %7614 = vst.msk [vmem:[%s12535_s24 + $0xa0] sm:$0xff] %vm7593_vm9, %v7538_v45 }
 0x802   : > { %v7544_v34 = vpop.permute.xlu0 %7543 }
 0x803   : > { %7617 = vst.msk [vmem:[%s12535_s24 + $0xb8] sm:$0xff] %vm7593_vm9, %v7544_v34  ;;  %v7542_v51 = vpop.permute.xlu1 %7541 }
 0x804   : > { %7616 = vst.msk [vmem:[%s12535_s24 + $0xb0] sm:$0xff] %vm7593_vm9, %v7542_v51 }
 0x80e   : > { %v7548_v37 = vpop.permute.xlu0 %7547 }
 0x80f   : > { %7619 = vst.msk [vmem:[%s12535_s24 + $0xc8] sm:$0xff] %vm7593_vm9, %v7548_v37  ;;  %v7546_v6 = vpop.permute.xlu1 %7545 }
 0x810   : > { %7618 = vst.msk [vmem:[%s12535_s24 + $0xc0] sm:$0xff] %vm7593_vm9, %v7546_v6 }
 0x812   : > { %v7552_v49 = vpop.permute.xlu0 %7551 }
 0x813   : > { %7621 = vst.msk [vmem:[%s12535_s24 + $0xd8] sm:$0xff] %vm7593_vm9, %v7552_v49  ;;  %v7550_v62 = vpop.permute.xlu1 %7549 }
 0x814   : > { %7620 = vst.msk [vmem:[%s12535_s24 + $0xd0] sm:$0xff] %vm7593_vm9, %v7550_v62 }
 0x81a   : > { %v7556_v26 = vpop.permute.xlu0 %7555 }
 0x81b   : > { %7623 = vst.msk [vmem:[%s12535_s24 + $0xe8] sm:$0xff] %vm7593_vm9, %v7556_v26  ;;  %v7554_v36 = vpop.permute.xlu1 %7553 }
 0x81c   : > { %7622 = vst.msk [vmem:[%s12535_s24 + $0xe0] sm:$0xff] %vm7593_vm9, %v7554_v36 }
 0x81e   : > { %v7560_v19 = vpop.permute.xlu0 %7559 }
 0x81f   : > { %7625 = vst.msk [vmem:[%s12535_s24 + $0xf8] sm:$0xff] %vm7593_vm9, %v7560_v19  ;;  %v7558_v35 = vpop.permute.xlu1 %7557 }
 0x820   : > { %7624 = vst.msk [vmem:[%s12535_s24 + $0xf0] sm:$0xff] %vm7593_vm9, %v7558_v35 }
 0x821   : > { %9403 = shalt.err (!%p9400_p3)
}
 0x822   : > { %s9404_s21 = scalar_lea.hbm %s13024_s28, 4096  ;;  %s9408_s23 = scalar_lea.hbm %s13084_s9, 8192 }
 0x823   : > { %p9405_p4 = scmp.ne.s32.totalorder %s13024_s28, %s9404_s21  ;;  %p9409_p9 = scmp.lt.u32.totalorder %s13024_s28, %s13084_s9 }
 0x824   : > { %p9410_p10 = scmp.lt.u32.totalorder %s9408_s23, %s9404_s21  ;;  %p9412_p12 = scmp.lt.u32.totalorder %s9404_s21, %s13024_s28 }
 0x825   : > { %p9406_p7 = pnand %p9405_p4, %p9552_p5 }
 0x826   : > { %p9411_p11 = por %p9410_p10, %p9409_p9 }
 0x827   : > { %p9407_p8 = pneg %p9406_p7 }
 0x828   : > { %p9413_p13 = por %p9412_p12, %p9411_p11 }
 0x82a   : > { %p9414_p0 = pnand %p9413_p13, %p9407_p8 }
 0x82c   : > { %9417 = shalt.err (!%p9414_p0)
}
 0x82d   : > { %s9462_s17 = smov 128   ;;  %s9463_s16 = smov 8  }
 0x82e   : > { %9037 = dma.vmem_to_hbm [thread:$0]  (%p9552_p5), %s13026_s25, 4096, %s13024_s28, %s13034_s13, %s9462_s17, %s9462_s17, %s9463_s16  }
 0x82f PF: > { %p9043_p1 = scmp.ge.s32.totalorder %s9452_s12, 2  ;;  %s7655_s14 = sand.u32 1, %s9440_s30  }
 0x830   : > { %s7656_s22 = scalar_lea.sflag [#allocation5], %s7655_s14 }
 0x831   : > { %p9040_p2 = pnand %p9043_p1, %p9556_p6 }
 0x833   : > { %9435 = dma.done.wait (!%p9040_p2), %s7656_s22, 4096  }
 0x834   : > { %9437 = vsyncadd (!%p9040_p2), %s7656_s22, 4294963200  ;;  %p19_p3 = scmp.ge.s32.totalorder %s9539_s15, 4   ;;  %s13228_s30 = smov %s9444_s10 }
 0x835   : > { %s13229_s10 = smov %s9448_s11  ;;  %s13230_s11 = smov %s9550_s18 }
 0x836   : > { %s13231_s12 = smov %s9539_s15  ;;  %21 = sbr.rel (!%p19_p3) target bundleno = 3 (0x3), region = 95 }
 0x83d   :  { %7661 = vsyncpa [#allocation5], 1 }
 0x83e   :  { %7663 = vsyncpa [#allocation5 + $0x1], 1 }

</bundles_post_ra>
